<compile_context>
chip_gen: v5e
topology: v5e:2x2
jax: 0.10.0
libtpu: 0.0.40
codegen_flags: <defaults>
</compile_context>

<pallas_src>
import jax
import jax.numpy as jnp
import numpy as np
from jax.experimental import pallas as pl
from jax.experimental.pallas import tpu as pltpu


def _round_up(x, m):
    return ((x + m - 1) // m) * m


# ----------------------- weight preparation (one-time) ---------------------- #

def _conv_as_gemm(w_hwio, b, in_h, in_w, stride):
    """Unfold a VALID, stride-`stride` conv into a dense GEMM operand.

    Activations are flattened NHWC row-major, i.e. flat index (h*W + w)*C + c.
    Returns (W_unf[in_h*in_w*cin, oh*ow*cout], bias_row[1, oh*ow*cout], oh, ow).
    """
    w = np.asarray(w_hwio, np.float32)
    K, K2, cin, cout = w.shape
    assert K == K2
    oh = (in_h - K) // stride + 1
    ow = (in_w - K) // stride + 1

    khg, kwg, cg, cog, ohg, owg = np.meshgrid(
        np.arange(K), np.arange(K), np.arange(cin), np.arange(cout),
        np.arange(oh), np.arange(ow), indexing="ij")
    rows = ((stride * ohg + khg) * in_w + (stride * owg + kwg)) * cin + cg
    cols = (ohg * ow + owg) * cout + cog

    W = np.zeros((in_h * in_w * cin, oh * ow * cout), np.float32)
    W[rows, cols] = w[khg, kwg, cg, cog]
    b_row = np.tile(np.asarray(b, np.float32), oh * ow).reshape(1, oh * ow * cout)
    return W, b_row, oh, ow


def prepare_fused_weights(params):
    """Build the GEMM-unfolded operands (host-side, one-time; ~10.5 MB f32).

    In a real deployment this is hoisted to model init and done exactly once.
    """
    w1, b1r, oh1, ow1 = _conv_as_gemm(params["w1"], params["b1"], 28, 28, 2)   # 13x13x10
    w2, b2r, oh2, ow2 = _conv_as_gemm(params["w2"], params["b2"], oh1, ow1, 2) # 6x6x20
    w3, b3r, oh3, ow3 = _conv_as_gemm(params["w3"], params["b3"], oh2, ow2, 2) # 3x3x10

    # torch.flatten of NCHW gives order (c, h, w); the kernel's h3 layout is
    # flattened (h, w, c).  Permute the dense weight once so no transpose is
    # needed on the activation path.
    cout3 = 10
    wd_chw = np.asarray(params["wd"], np.float32)[:, 0].reshape(cout3, oh3, ow3)   # (c,h,w)
    wd_row = np.transpose(wd_chw, (1, 2, 0)).reshape(1, oh3 * ow3 * cout3)         # (1, 90)
    bd = np.asarray(params["bd"], np.float32).reshape(1, 1)

    return tuple(jnp.asarray(a) for a in (w1, b1r, w2, b2r, w3, b3r, wd_row, bd))


# ------------------------------ fused kernel -------------------------------- #

def _fused_forward_kernel(x_ref,
                          w1_ref, b1_ref, w2_ref, b2_ref, w3_ref, b3_ref,
                          wd_ref, bd_ref,
                          prob_ref, logit_ref):
    # x block: (tile_b, 784) raw pixels; apply the /255 batch transform (VPU).
    x = x_ref[...] * (1.0 / 255.0)

    # Three batched MXU GEMMs (batch on sublanes, features on lanes).
    h = jnp.maximum(
        jnp.dot(x, w1_ref[...], preferred_element_type=jnp.float32) + b1_ref[...],
        0.0)                                                     # (tile_b, 1690)
    h = jnp.maximum(
        jnp.dot(h, w2_ref[...], preferred_element_type=jnp.float32) + b2_ref[...],
        0.0)                                                     # (tile_b, 720)
    h = jnp.maximum(
        jnp.dot(h, w3_ref[...], preferred_element_type=jnp.float32) + b3_ref[...],
        0.0)                                                     # (tile_b, 90)

    # Dense 90 -> 1 as (1,90) . (tile_b,90)^T so the result is (1, tile_b):
    # batch along lanes -> lane-dense output stores, no relayout/concat.
    logit = jax.lax.dot_general(
        wd_ref[...], h,
        dimension_numbers=(((1,), (1,)), ((), ())),
        preferred_element_type=jnp.float32) + bd_ref[...]        # (1, tile_b)
    prob = jax.nn.sigmoid(logit)

    prob_ref[...] = prob[None]                                   # (1, 1, tile_b)
    logit_ref[...] = logit[None]


# --------------------------------- wrapper ---------------------------------- #

def _choose_tile_b(B):
    # Fill the MXU sublane dimension when the batch allows it, and keep the
    # grid >= 2 steps so v7x megacore can split the batch across TensorCores.
    if B >= 512:
        return 256
    if B >= 32:
        return _round_up(-(-B // 2), 8)      # two grid steps
    return _round_up(max(B, 1), 8)           # tiny batches: one small tile


def mnist_binary_cnn_fused(x_raw, params, *, tile_b=None):
    """Fused forward.  Returns (sigmoid_probs, pre_sigmoid_logits), each (B, 1)."""
    B = x_raw.shape[0]
    x = jnp.asarray(x_raw, jnp.float32).reshape(B, 784)

    if tile_b is None:
        tile_b = _choose_tile_b(B)
    tile_b = _round_up(int(tile_b), 8)       # keep block sublane dim legal

    B_pad = _round_up(B, tile_b)
    if B_pad != B:
        x = jnp.pad(x, ((0, B_pad - B), (0, 0)))   # padded rows sliced off below
    num_tiles = B_pad // tile_b

    ops = prepare_fused_weights(params)      # NOTE: hoist to init in real use

    in_specs = [pl.BlockSpec((tile_b, 784), lambda t: (t, 0))]
    # Weights/biases: full-array blocks, grid-invariant -> stay VMEM resident.
    in_specs += [pl.BlockSpec(a.shape, lambda t: (0, 0)) for a in ops]

    out_spec = pl.BlockSpec((1, 1, tile_b), lambda t: (t, 0, 0))
    out_sds = jax.ShapeDtypeStruct((num_tiles, 1, tile_b), jnp.float32)

    probs3, logits3 = pl.pallas_call(
        _fused_forward_kernel,
        out_shape=(out_sds, out_sds),
        grid=(num_tiles,),
        in_specs=in_specs,
        out_specs=(out_spec, out_spec),
        compiler_params=pltpu.CompilerParams(
            dimension_semantics=("parallel",),
            # ~10.5 MB unfolded f32 weights (x2 if double-buffered) + tiles:
            # exceeds v5e's 16 MiB default scoped VMEM; well under 64 MiB.
            vmem_limit_bytes=48 * 1024 * 1024),
    )(x, *ops)

    probs = probs3.reshape(B_pad, 1)[:B]
    logits = logits3.reshape(B_pad, 1)[:B]
    return probs, logits


def mnist_binary_cnn_forward(x_raw, params, *, tile_b=None):
    """Module-equivalent forward: returns sigmoid probabilities, shape (B, 1)."""
    return mnist_binary_cnn_fused(x_raw, params, tile_b=tile_b)[0]


# -------------------------- deterministic params ---------------------------- #

def init_params(key):
    ks = jax.random.split(key, 8)

    def u(k, shape, fan_in):
        bound = 1.0 / float(np.sqrt(fan_in))
        return jax.random.uniform(k, shape, jnp.float32, -bound, bound)

    return {
        "w1": u(ks[0], (4, 4, 1, 10), 1 * 4 * 4),     # HWIO (torch: (10,1,4,4) OIHW)
        "b1": u(ks[1], (10,), 1 * 4 * 4),
        "w2": u(ks[2], (3, 3, 10, 20), 10 * 3 * 3),
        "b2": u(ks[3], (20,), 10 * 3 * 3),
        "w3": u(ks[4], (2, 2, 20, 10), 20 * 2 * 2),
        "b3": u(ks[5], (10,), 20 * 2 * 2),
        "wd": u(ks[6], (90, 1), 90),                  # torch Linear(90,1).weight.T
        "bd": u(ks[7], (1,), 90),
    }


# ---------------------------- pure-JAX reference ----------------------------- #

def _reference_forward(x_raw, params):
    B = x_raw.shape[0]
    x = (x_raw.astype(jnp.float32) / 255.0).reshape(B, 28, 28, 1)

    def conv(v, w, b, s):
        y = jax.lax.conv_general_dilated(
            v, w, window_strides=(s, s), padding="VALID",
            dimension_numbers=("NHWC", "HWIO", "NHWC"),
            precision=jax.lax.Precision.HIGHEST)
        return jax.nn.relu(y + b)

    h1 = conv(x, params["w1"], params["b1"], 2)
    h2 = conv(h1, params["w2"], params["b2"], 2)
    h3 = conv(h2, params["w3"], params["b3"], 2)
    flat = jnp.transpose(h3, (0, 3, 1, 2)).reshape(B, 90)
    logits = flat @ params["wd"] + params["bd"]
    return jax.nn.sigmoid(logits), logits


if __name__ == "__main__":
    key = jax.random.PRNGKey(0)
    k_x, k_p = jax.random.split(key)
    # MNIST-style input: batch of 2 flattened 28x28 images, pixel values in [0, 255).
    x = jax.random.uniform(k_x, (2, 784), jnp.float32, 0.0, 255.0)
    params = init_params(k_p)

    probs, logits = mnist_binary_cnn_fused(x, params)
    probs = jax.block_until_ready(probs)
    logits = jax.block_until_ready(logits)
    assert probs.shape == (2, 1), probs.shape

    ref_probs, ref_logits = _reference_forward(x, params)
    ref_probs = jax.block_until_ready(ref_probs)
    # Validate pre-sigmoid logits (catches layout / unfolding bugs) and probs.
    np.testing.assert_allclose(np.asarray(logits), np.asarray(ref_logits),
                               rtol=1e-3, atol=1e-3)
    np.testing.assert_allclose(np.asarray(probs), np.asarray(ref_probs),
                               rtol=1e-4, atol=1e-4)

    print("KERNEL_OK")
</pallas_src>

<mosaic_0001>
module attributes {stable_mosaic.version = 11 : i64} {
  func.func @_fused_forward_kernel(%arg0: i32, %arg1: memref<8x784xf32, #tpu.memory_space<vmem>>, %arg2: memref<784x1690xf32, #tpu.memory_space<vmem>>, %arg3: memref<1x1690xf32, #tpu.memory_space<vmem>>, %arg4: memref<1690x720xf32, #tpu.memory_space<vmem>>, %arg5: memref<1x720xf32, #tpu.memory_space<vmem>>, %arg6: memref<720x90xf32, #tpu.memory_space<vmem>>, %arg7: memref<1x90xf32, #tpu.memory_space<vmem>>, %arg8: memref<1x90xf32, #tpu.memory_space<vmem>>, %arg9: memref<1x1xf32, #tpu.memory_space<vmem>>, %arg10: memref<1x1x8xf32, #tpu.memory_space<vmem>>, %arg11: memref<1x1x8xf32, #tpu.memory_space<vmem>>) attributes {dimension_semantics = [#tpu.dimension_semantics<parallel>], iteration_bounds = array<i64: 1>, scalar_prefetch = 0 : i64, scratch_operands = 0 : i64, tpu.core_type = #tpu.core_type<tc>, window_params = [{transform_indices = @transform_0, window_bounds = array<i64: 8, 784>}, {pipeline_mode = #tpu.pipeline_mode<synchronous>, transform_indices = @transform_1, window_bounds = array<i64: 784, 1690>}, {pipeline_mode = #tpu.pipeline_mode<synchronous>, transform_indices = @transform_2, window_bounds = array<i64: 1, 1690>}, {pipeline_mode = #tpu.pipeline_mode<synchronous>, transform_indices = @transform_3, window_bounds = array<i64: 1690, 720>}, {pipeline_mode = #tpu.pipeline_mode<synchronous>, transform_indices = @transform_4, window_bounds = array<i64: 1, 720>}, {pipeline_mode = #tpu.pipeline_mode<synchronous>, transform_indices = @transform_5, window_bounds = array<i64: 720, 90>}, {pipeline_mode = #tpu.pipeline_mode<synchronous>, transform_indices = @transform_6, window_bounds = array<i64: 1, 90>}, {pipeline_mode = #tpu.pipeline_mode<synchronous>, transform_indices = @transform_7, window_bounds = array<i64: 1, 90>}, {pipeline_mode = #tpu.pipeline_mode<synchronous>, transform_indices = @transform_8, window_bounds = array<i64: 1, 1>}, {transform_indices = @transform_9, window_bounds = array<i64: 1, 1, 8>}, {transform_indices = @transform_10, window_bounds = array<i64: 1, 1, 8>}]} {
    %c0 = arith.constant 0 : index
    %c0_0 = arith.constant 0 : index
    %0 = vector.load %arg1[%c0, %c0_0] : memref<8x784xf32, #tpu.memory_space<vmem>>, vector<8x784xf32>
    %cst = arith.constant 0.00392156886 : f32
    %1 = vector.broadcast %cst : f32 to vector<8x784xf32>
    %2 = arith.mulf %0, %1 : vector<8x784xf32>
    %c0_1 = arith.constant 0 : index
    %c0_2 = arith.constant 0 : index
    %3 = vector.load %arg2[%c0_1, %c0_2] : memref<784x1690xf32, #tpu.memory_space<vmem>>, vector<784x1690xf32>
    %cst_3 = arith.constant dense<0.000000e+00> : vector<8x1690xf32>
    %4 = tpu.matmul %2, %3, %cst_3 {dimension_numbers = #tpu.dot_dimension_numbers<[1], [0], [0], [1], [0, 0, 1, 1], [], []>} : vector<8x784xf32>, vector<784x1690xf32>, vector<8x1690xf32> -> vector<8x1690xf32>
    %c0_4 = arith.constant 0 : index
    %c0_5 = arith.constant 0 : index
    %5 = vector.load %arg3[%c0_4, %c0_5] : memref<1x1690xf32, #tpu.memory_space<vmem>>, vector<1x1690xf32>
    %6 = vector.broadcast %5 : vector<1x1690xf32> to vector<8x1690xf32>
    %7 = arith.addf %4, %6 : vector<8x1690xf32>
    %cst_6 = arith.constant 0.000000e+00 : f32
    %8 = vector.broadcast %cst_6 : f32 to vector<8x1690xf32>
    %9 = arith.maximumf %7, %8 : vector<8x1690xf32>
    %c0_7 = arith.constant 0 : index
    %c0_8 = arith.constant 0 : index
    %10 = vector.load %arg4[%c0_7, %c0_8] : memref<1690x720xf32, #tpu.memory_space<vmem>>, vector<1690x720xf32>
    %cst_9 = arith.constant dense<0.000000e+00> : vector<8x720xf32>
    %11 = tpu.matmul %9, %10, %cst_9 {dimension_numbers = #tpu.dot_dimension_numbers<[1], [0], [0], [1], [0, 0, 1, 1], [], []>} : vector<8x1690xf32>, vector<1690x720xf32>, vector<8x720xf32> -> vector<8x720xf32>
    %c0_10 = arith.constant 0 : index
    %c0_11 = arith.constant 0 : index
    %12 = vector.load %arg5[%c0_10, %c0_11] : memref<1x720xf32, #tpu.memory_space<vmem>>, vector<1x720xf32>
    %13 = vector.broadcast %12 : vector<1x720xf32> to vector<8x720xf32>
    %14 = arith.addf %11, %13 : vector<8x720xf32>
    %cst_12 = arith.constant 0.000000e+00 : f32
    %15 = vector.broadcast %cst_12 : f32 to vector<8x720xf32>
    %16 = arith.maximumf %14, %15 : vector<8x720xf32>
    %c0_13 = arith.constant 0 : index
    %c0_14 = arith.constant 0 : index
    %17 = vector.load %arg6[%c0_13, %c0_14] : memref<720x90xf32, #tpu.memory_space<vmem>>, vector<720x90xf32>
    %cst_15 = arith.constant dense<0.000000e+00> : vector<8x90xf32>
    %18 = tpu.matmul %16, %17, %cst_15 {dimension_numbers = #tpu.dot_dimension_numbers<[1], [0], [0], [1], [0, 0, 1, 1], [], []>} : vector<8x720xf32>, vector<720x90xf32>, vector<8x90xf32> -> vector<8x90xf32>
    %c0_16 = arith.constant 0 : index
    %c0_17 = arith.constant 0 : index
    %19 = vector.load %arg7[%c0_16, %c0_17] : memref<1x90xf32, #tpu.memory_space<vmem>>, vector<1x90xf32>
    %20 = vector.broadcast %19 : vector<1x90xf32> to vector<8x90xf32>
    %21 = arith.addf %18, %20 : vector<8x90xf32>
    %cst_18 = arith.constant 0.000000e+00 : f32
    %22 = vector.broadcast %cst_18 : f32 to vector<8x90xf32>
    %23 = arith.maximumf %21, %22 : vector<8x90xf32>
    %c0_19 = arith.constant 0 : index
    %c0_20 = arith.constant 0 : index
    %24 = vector.load %arg8[%c0_19, %c0_20] : memref<1x90xf32, #tpu.memory_space<vmem>>, vector<1x90xf32>
    %cst_21 = arith.constant dense<0.000000e+00> : vector<1x8xf32>
    %25 = tpu.matmul %24, %23, %cst_21 {dimension_numbers = #tpu.dot_dimension_numbers<[1], [1], [0], [0], [0, 0, 1, 0], [], []>} : vector<1x90xf32>, vector<8x90xf32>, vector<1x8xf32> -> vector<1x8xf32>
    %c0_22 = arith.constant 0 : index
    %c0_23 = arith.constant 0 : index
    %26 = vector.load %arg9[%c0_22, %c0_23] : memref<1x1xf32, #tpu.memory_space<vmem>>, vector<1x1xf32>
    %27 = vector.broadcast %26 : vector<1x1xf32> to vector<1x8xf32>
    %28 = arith.addf %25, %27 : vector<1x8xf32>
    %29 = arith.negf %28 : vector<1x8xf32>
    %30 = math.exp %29 : vector<1x8xf32>
    %cst_24 = arith.constant 1.000000e+00 : f32
    %31 = vector.broadcast %cst_24 : f32 to vector<1x8xf32>
    %32 = arith.addf %31, %30 : vector<1x8xf32>
    %33 = arith.divf %31, %32 : vector<1x8xf32>
    %34 = vector.shape_cast %33 : vector<1x8xf32> to vector<1x1x8xf32>
    %c0_25 = arith.constant 0 : index
    %c0_26 = arith.constant 0 : index
    %c0_27 = arith.constant 0 : index
    %35 = vector.load %arg10[%c0_25, %c0_26, %c0_27] : memref<1x1x8xf32, #tpu.memory_space<vmem>>, vector<1x1x8xf32>
    tpu.vector_store %arg10[%c0_25, %c0_26, %c0_27], %34 {strides = array<i32>} : memref<1x1x8xf32, #tpu.memory_space<vmem>>, vector<1x1x8xf32>,
    %36 = vector.shape_cast %28 : vector<1x8xf32> to vector<1x1x8xf32>
    %c0_28 = arith.constant 0 : index
    %c0_29 = arith.constant 0 : index
    %c0_30 = arith.constant 0 : index
    %37 = vector.load %arg11[%c0_28, %c0_29, %c0_30] : memref<1x1x8xf32, #tpu.memory_space<vmem>>, vector<1x1x8xf32>
    tpu.vector_store %arg11[%c0_28, %c0_29, %c0_30], %36 {strides = array<i32>} : memref<1x1x8xf32, #tpu.memory_space<vmem>>, vector<1x1x8xf32>,
    return
  }
  func.func @transform_0(%arg0: i32) -> (i32, i32) {
    %c0_i32 = arith.constant 0 : i32
    %c0_i32_0 = arith.constant 0 : i32
    return %arg0, %c0_i32 : i32, i32
  }
  func.func @transform_1(%arg0: i32) -> (i32, i32) {
    %c0_i32 = arith.constant 0 : i32
    %c0_i32_0 = arith.constant 0 : i32
    %c0_i32_1 = arith.constant 0 : i32
    return %c0_i32, %c0_i32_0 : i32, i32
  }
  func.func @transform_2(%arg0: i32) -> (i32, i32) {
    %c0_i32 = arith.constant 0 : i32
    %c0_i32_0 = arith.constant 0 : i32
    %c0_i32_1 = arith.constant 0 : i32
    return %c0_i32, %c0_i32_0 : i32, i32
  }
  func.func @transform_3(%arg0: i32) -> (i32, i32) {
    %c0_i32 = arith.constant 0 : i32
    %c0_i32_0 = arith.constant 0 : i32
    %c0_i32_1 = arith.constant 0 : i32
    return %c0_i32, %c0_i32_0 : i32, i32
  }
  func.func @transform_4(%arg0: i32) -> (i32, i32) {
    %c0_i32 = arith.constant 0 : i32
    %c0_i32_0 = arith.constant 0 : i32
    %c0_i32_1 = arith.constant 0 : i32
    return %c0_i32, %c0_i32_0 : i32, i32
  }
  func.func @transform_5(%arg0: i32) -> (i32, i32) {
    %c0_i32 = arith.constant 0 : i32
    %c0_i32_0 = arith.constant 0 : i32
    %c0_i32_1 = arith.constant 0 : i32
    return %c0_i32, %c0_i32_0 : i32, i32
  }
  func.func @transform_6(%arg0: i32) -> (i32, i32) {
    %c0_i32 = arith.constant 0 : i32
    %c0_i32_0 = arith.constant 0 : i32
    %c0_i32_1 = arith.constant 0 : i32
    return %c0_i32, %c0_i32_0 : i32, i32
  }
  func.func @transform_7(%arg0: i32) -> (i32, i32) {
    %c0_i32 = arith.constant 0 : i32
    %c0_i32_0 = arith.constant 0 : i32
    %c0_i32_1 = arith.constant 0 : i32
    return %c0_i32, %c0_i32_0 : i32, i32
  }
  func.func @transform_8(%arg0: i32) -> (i32, i32) {
    %c0_i32 = arith.constant 0 : i32
    %c0_i32_0 = arith.constant 0 : i32
    %c0_i32_1 = arith.constant 0 : i32
    return %c0_i32, %c0_i32_0 : i32, i32
  }
  func.func @transform_9(%arg0: i32) -> (i32, i32, i32) {
    %c0_i32 = arith.constant 0 : i32
    %c0_i32_0 = arith.constant 0 : i32
    %c0_i32_1 = arith.constant 0 : i32
    return %arg0, %c0_i32, %c0_i32_0 : i32, i32, i32
  }
  func.func @transform_10(%arg0: i32) -> (i32, i32, i32) {
    %c0_i32 = arith.constant 0 : i32
    %c0_i32_0 = arith.constant 0 : i32
    %c0_i32_1 = arith.constant 0 : i32
    return %arg0, %c0_i32, %c0_i32_0 : i32, i32, i32
  }
}

</mosaic_0001>

<bundles_post_ra>
// kernel: tpu_custom_call.1
= control target key start
LH: loop header
LB: loop body
LE: loop exit
PB: predicated region body
PF: predicated region fallthrough
CT: control target
= control target key end

     0   :  { %s15786_s0 = inlined_call_operand.vmem [shape: f32[8,784], index: 0, kind: input, shape index: {}]   ;;  %s15787_s1 = inlined_call_operand.vmem [shape: f32[784,1690], index: 1, kind: input, shape index: {}]   ;;  %s15788_s2 = inlined_call_operand.vmem [shape: f32[1,1690], index: 2, kind: input, shape index: {}]   ;;  %s15789_s3 = inlined_call_operand.vmem [shape: f32[1690,720], index: 3, kind: input, shape index: {}]   ;;  %s15790_s4 = inlined_call_operand.vmem [shape: f32[1,720], index: 4, kind: input, shape index: {}]   ;;  %s15791_s5 = inlined_call_operand.vmem [shape: f32[720,90], index: 5, kind: input, shape index: {}]   ;;  %s15792_s6 = inlined_call_operand.vmem [shape: f32[1,90], index: 6, kind: input, shape index: {}]   ;;  %s15793_s7 = inlined_call_operand.vmem [shape: f32[1,90], index: 7, kind: input, shape index: {}]   ;;  %s15794_s8 = inlined_call_operand.<no memory space> [shape: f32[1,1], index: 8, kind: input, shape index: {}]   ;;  %s15795_s9 = inlined_call_operand.hbm [shape: f32[1,1,8], index: 9, kind: output, shape index: {0}]   ;;  %s15796_s10 = inlined_call_operand.hbm [shape: f32[1,1,8], index: 10, kind: output, shape index: {1}]  }
   0x1   :  { %v16_v0 = vstv %s15794_s8 }
   0x2   :  { %17 = vst [vmem:[#allocation2] sm:$0x1] %v16_v0 }
   0x3   :  { %18 = vsyncpa [#allocation4], 0  ;;  %v262_v1 = vld [vmem:[%s15787_s1 + $0x690] sm:$0xff]  ;;  %v248_v5 = vld [vmem:[%s15787_s1 + $0x620] sm:$0xff]  ;;  %vm1456_vm0 = vcmask 130048  }
   0x4   :  { %v486_v2 = vld [vmem:[%s15787_s1 + $0xd90] sm:$0xff]  ;;  %1460 = vmatpush.msra.mxu0 %v262_v1  ;;  %v472_v6 = vld [vmem:[%s15787_s1 + $0xd20] sm:$0xff] }
   0x5   :  { %v710_v3 = vld [vmem:[%s15787_s1 + $0x1490] sm:$0xff]  ;;  %1480 = vmatpush.msra.mxu1 %v486_v2  ;;  %v696_v7 = vld [vmem:[%s15787_s1 + $0x1420] sm:$0xff] }
   0x6   :  { %v934_v4 = vld [vmem:[%s15787_s1 + $0x1b90] sm:$0xff]  ;;  %1500 = vmatpush.msra.mxu2 %v710_v3  ;;  %v920_v8 = vld [vmem:[%s15787_s1 + $0x1b20] sm:$0xff]  ;;  %1461 = vmatpush.msra.mxu0 %v248_v5  ;;  %v263_v5 = vld [vmem:[%s15787_s1 + $0x698] sm:$0xff] }
   0x7   :  { %1520 = vmatpush.msra.mxu3 %v934_v4  ;;  %v234_v9 = vld [vmem:[%s15787_s1 + $0x5b0] sm:$0xff]  ;;  %1481 = vmatpush.msra.mxu1 %v472_v6  ;;  %v220_v13 = vld [vmem:[%s15787_s1 + $0x540] sm:$0xff] }
   0x8   :  { %v458_v10 = vld [vmem:[%s15787_s1 + $0xcb0] sm:$0xff]  ;;  %1501 = vmatpush.msra.mxu2 %v696_v7  ;;  %v444_v14 = vld [vmem:[%s15787_s1 + $0xc40] sm:$0xff]  ;;  %1462 = vmatpush.msra.mxu0 %v234_v9  ;;  %v249_v9 = vld [vmem:[%s15787_s1 + $0x628] sm:$0xff] }
   0x9   :  { %v682_v11 = vld [vmem:[%s15787_s1 + $0x13b0] sm:$0xff]  ;;  %1521 = vmatpush.msra.mxu3 %v920_v8  ;;  %1482 = vmatpush.msra.mxu1 %v458_v10  ;;  %v668_v15 = vld [vmem:[%s15787_s1 + $0x1340] sm:$0xff] }
   0xa   :  { %v906_v12 = vld [vmem:[%s15787_s1 + $0x1ab0] sm:$0xff]  ;;  %v892_v16 = vld [vmem:[%s15787_s1 + $0x1a40] sm:$0xff]  ;;  %1502 = vmatpush.msra.mxu2 %v682_v11  ;;  %1463 = vmatpush.msra.mxu0 %v220_v13  ;;  %v487_v13 = vld [vmem:[%s15787_s1 + $0xd98] sm:$0xff] }
   0xb   :  { %1522 = vmatpush.msra.mxu3 %v906_v12  ;;  %v206_v17 = vld [vmem:[%s15787_s1 + $0x4d0] sm:$0xff]  ;;  %1483 = vmatpush.msra.mxu1 %v444_v14  ;;  %v192_v21 = vld [vmem:[%s15787_s1 + $0x460] sm:$0xff] }
   0xc   :  { %v430_v18 = vld [vmem:[%s15787_s1 + $0xbd0] sm:$0xff]  ;;  %1503 = vmatpush.msra.mxu2 %v668_v15  ;;  %v416_v22 = vld [vmem:[%s15787_s1 + $0xb60] sm:$0xff]  ;;  %1464 = vmatpush.msra.mxu0 %v206_v17  ;;  %v41_v15 = vld [vmem:[%s15786_s0 + $0x18] sm:$0xff] }
   0xd   :  { %v654_v19 = vld [vmem:[%s15787_s1 + $0x12d0] sm:$0xff]  ;;  %1523 = vmatpush.msra.mxu3 %v892_v16  ;;  %1484 = vmatpush.msra.mxu1 %v430_v18  ;;  %v640_v23 = vld [vmem:[%s15787_s1 + $0x1260] sm:$0xff]  ;;  %v235_v16 = vld [vmem:[%s15787_s1 + $0x5b8] sm:$0xff] }
   0xe   :  { %v878_v20 = vld [vmem:[%s15787_s1 + $0x19d0] sm:$0xff]  ;;  %v864_v24 = vld [vmem:[%s15787_s1 + $0x1960] sm:$0xff]  ;;  %1504 = vmatpush.msra.mxu2 %v654_v19  ;;  %1465 = vmatpush.msra.mxu0 %v192_v21  ;;  %v473_v18 = vld [vmem:[%s15787_s1 + $0xd28] sm:$0xff] }
   0xf   :  { %1524 = vmatpush.msra.mxu3 %v878_v20  ;;  %v178_v25 = vld [vmem:[%s15787_s1 + $0x3f0] sm:$0xff]  ;;  %1485 = vmatpush.msra.mxu1 %v416_v22  ;;  %v164_v29 = vld [vmem:[%s15787_s1 + $0x380] sm:$0xff]  ;;  %v221_v21 = vld [vmem:[%s15787_s1 + $0x548] sm:$0xff]  ;;  %v7144_v22 = vmul.f32 0.003921569, %v41_v15 }
  0x10   :  { %v402_v26 = vld [vmem:[%s15787_s1 + $0xaf0] sm:$0xff]  ;;  %1505 = vmatpush.msra.mxu2 %v640_v23  ;;  %v388_v30 = vld [vmem:[%s15787_s1 + $0xa80] sm:$0xff]  ;;  %1466 = vmatpush.msra.mxu0 %v178_v25  ;;  %v39_v23 = vld [vmem:[%s15786_s0 + $0x8] sm:$0xff] }
  0x11   :  { %v626_v27 = vld [vmem:[%s15787_s1 + $0x11f0] sm:$0xff]  ;;  %1525 = vmatpush.msra.mxu3 %v864_v24  ;;  %1486 = vmatpush.msra.mxu1 %v402_v26  ;;  %v612_v31 = vld [vmem:[%s15787_s1 + $0x1180] sm:$0xff]  ;;  %v459_v24 = vld [vmem:[%s15787_s1 + $0xcb8] sm:$0xff] }
  0x12   :  { %v850_v28 = vld [vmem:[%s15787_s1 + $0x18f0] sm:$0xff]  ;;  %v836_v32 = vld [vmem:[%s15787_s1 + $0x1880] sm:$0xff]  ;;  %1506 = vmatpush.msra.mxu2 %v626_v27  ;;  %1467 = vmatpush.msra.mxu0 %v164_v29  ;;  %v207_v27 = vld [vmem:[%s15787_s1 + $0x4d8] sm:$0xff]  ;;  %v7165_v29 = vmul.f32 0.003921569, %v39_v23 }
  0x13   :  { %1526 = vmatpush.msra.mxu3 %v850_v28  ;;  %v150_v33 = vld [vmem:[%s15787_s1 + $0x310] sm:$0xff]  ;;  %1487 = vmatpush.msra.mxu1 %v388_v30  ;;  %v136_v37 = vld [vmem:[%s15787_s1 + $0x2a0] sm:$0xff]  ;;  %v445_v28 = vld [vmem:[%s15787_s1 + $0xc48] sm:$0xff] }
  0x14   :  { %v374_v34 = vld [vmem:[%s15787_s1 + $0xa10] sm:$0xff]  ;;  %1507 = vmatpush.msra.mxu2 %v612_v31  ;;  %v360_v38 = vld [vmem:[%s15787_s1 + $0x9a0] sm:$0xff]  ;;  %1468 = vmatpush.msra.mxu0 %v150_v33  ;;  %v431_v33 = vld [vmem:[%s15787_s1 + $0xbd8] sm:$0xff] }
  0x15   :  { %v598_v35 = vld [vmem:[%s15787_s1 + $0x1110] sm:$0xff]  ;;  %1527 = vmatpush.msra.mxu3 %v836_v32  ;;  %1488 = vmatpush.msra.mxu1 %v374_v34  ;;  %v584_v39 = vld [vmem:[%s15787_s1 + $0x10a0] sm:$0xff]  ;;  %v193_v32 = vld [vmem:[%s15787_s1 + $0x468] sm:$0xff] }
  0x16   :  { %v822_v36 = vld [vmem:[%s15787_s1 + $0x1810] sm:$0xff]  ;;  %v808_v40 = vld [vmem:[%s15787_s1 + $0x17a0] sm:$0xff]  ;;  %1508 = vmatpush.msra.mxu2 %v598_v35  ;;  %1469 = vmatpush.msra.mxu0 %v136_v37  ;;  %v417_v37 = vld [vmem:[%s15787_s1 + $0xb68] sm:$0xff] }
  0x17   :  { %1528 = vmatpush.msra.mxu3 %v822_v36  ;;  %v122_v41 = vld [vmem:[%s15787_s1 + $0x230] sm:$0xff]  ;;  %1489 = vmatpush.msra.mxu1 %v360_v38  ;;  %v108_v45 = vld [vmem:[%s15787_s1 + $0x1c0] sm:$0xff]  ;;  %v179_v36 = vld [vmem:[%s15787_s1 + $0x3f8] sm:$0xff] }
  0x18   :  { %v346_v42 = vld [vmem:[%s15787_s1 + $0x930] sm:$0xff]  ;;  %1509 = vmatpush.msra.mxu2 %v584_v39  ;;  %v332_v46 = vld [vmem:[%s15787_s1 + $0x8c0] sm:$0xff]  ;;  %1470 = vmatpush.msra.mxu0 %v122_v41  ;;  %v403_v41 = vld [vmem:[%s15787_s1 + $0xaf8] sm:$0xff] }
  0x19   :  { %v570_v43 = vld [vmem:[%s15787_s1 + $0x1030] sm:$0xff]  ;;  %1529 = vmatpush.msra.mxu3 %v808_v40  ;;  %1490 = vmatpush.msra.mxu1 %v346_v42  ;;  %v556_v47 = vld [vmem:[%s15787_s1 + $0xfc0] sm:$0xff]  ;;  %v165_v40 = vld [vmem:[%s15787_s1 + $0x388] sm:$0xff] }
  0x1a   :  { %v794_v44 = vld [vmem:[%s15787_s1 + $0x1730] sm:$0xff]  ;;  %v780_v48 = vld [vmem:[%s15787_s1 + $0x16c0] sm:$0xff]  ;;  %1510 = vmatpush.msra.mxu2 %v570_v43  ;;  %1471 = vmatpush.msra.mxu0 %v108_v45  ;;  %v389_v45 = vld [vmem:[%s15787_s1 + $0xa88] sm:$0xff] }
  0x1b   :  { %1530 = vmatpush.msra.mxu3 %v794_v44  ;;  %v94_v49 = vld [vmem:[%s15787_s1 + $0x150] sm:$0xff]  ;;  %1491 = vmatpush.msra.mxu1 %v332_v46  ;;  %v80_v53 = vld [vmem:[%s15787_s1 + $0xe0] sm:$0xff]  ;;  %v151_v44 = vld [vmem:[%s15787_s1 + $0x318] sm:$0xff] }
  0x1c   :  { %v318_v50 = vld [vmem:[%s15787_s1 + $0x850] sm:$0xff]  ;;  %1511 = vmatpush.msra.mxu2 %v556_v47  ;;  %v304_v54 = vld [vmem:[%s15787_s1 + $0x7e0] sm:$0xff]  ;;  %1472 = vmatpush.msra.mxu0 %v94_v49  ;;  %v375_v49 = vld [vmem:[%s15787_s1 + $0xa18] sm:$0xff] }
  0x1d   :  { %v542_v51 = vld [vmem:[%s15787_s1 + $0xf50] sm:$0xff]  ;;  %1531 = vmatpush.msra.mxu3 %v780_v48  ;;  %1492 = vmatpush.msra.mxu1 %v318_v50  ;;  %v528_v55 = vld [vmem:[%s15787_s1 + $0xee0] sm:$0xff]  ;;  %v137_v48 = vld [vmem:[%s15787_s1 + $0x2a8] sm:$0xff] }
  0x1e   :  { %v766_v52 = vld [vmem:[%s15787_s1 + $0x1650] sm:$0xff]  ;;  %v752_v56 = vld [vmem:[%s15787_s1 + $0x15e0] sm:$0xff]  ;;  %1512 = vmatpush.msra.mxu2 %v542_v51  ;;  %1473 = vmatpush.msra.mxu0 %v80_v53  ;;  %v361_v53 = vld [vmem:[%s15787_s1 + $0x9a8] sm:$0xff] }
  0x1f   :  { %1532 = vmatpush.msra.mxu3 %v766_v52  ;;  %v66_v57 = vld [vmem:[%s15787_s1 + $0x70] sm:$0xff]  ;;  %1493 = vmatpush.msra.mxu1 %v304_v54  ;;  %v52_v61 = vld [vmem:[%s15787_s1] sm:$0xff]  ;;  %v123_v52 = vld [vmem:[%s15787_s1 + $0x238] sm:$0xff] }
  0x20   :  { %v290_v58 = vld [vmem:[%s15787_s1 + $0x770] sm:$0xff]  ;;  %1513 = vmatpush.msra.mxu2 %v528_v55  ;;  %v276_v62 = vld [vmem:[%s15787_s1 + $0x700] sm:$0xff]  ;;  %1474 = vmatpush.msra.mxu0 %v66_v57  ;;  %v347_v57 = vld [vmem:[%s15787_s1 + $0x938] sm:$0xff] }
  0x21   :  { %v514_v59 = vld [vmem:[%s15787_s1 + $0xe70] sm:$0xff]  ;;  %1533 = vmatpush.msra.mxu3 %v752_v56  ;;  %1494 = vmatpush.msra.mxu1 %v290_v58  ;;  %v500_v63 = vld [vmem:[%s15787_s1 + $0xe00] sm:$0xff]  ;;  %v109_v56 = vld [vmem:[%s15787_s1 + $0x1c8] sm:$0xff] }
  0x22   :  { %v738_v60 = vld [vmem:[%s15787_s1 + $0x1570] sm:$0xff]  ;;  %v724_v0 = vld [vmem:[%s15787_s1 + $0x1500] sm:$0xff]  ;;  %1514 = vmatpush.msra.mxu2 %v514_v59  ;;  %1475 = vmatpush.msra.mxu0 %v52_v61  ;;  %v333_v61 = vld [vmem:[%s15787_s1 + $0x8c8] sm:$0xff] }
  0x23   :  { %1534 = vmatpush.msra.mxu3 %v738_v60  ;;  %v1158_v1 = vld [vmem:[%s15787_s1 + $0x2290] sm:$0xff]  ;;  %1495 = vmatpush.msra.mxu1 %v276_v62  ;;  %v1144_v6 = vld [vmem:[%s15787_s1 + $0x2220] sm:$0xff]  ;;  %v95_v60 = vld [vmem:[%s15787_s1 + $0x158] sm:$0xff] }
  0x24   :  { %v1382_v2 = vld [vmem:[%s15787_s1 + $0x2990] sm:$0xff]  ;;  %1515 = vmatpush.msra.mxu2 %v500_v63  ;;  %v1368_v7 = vld [vmem:[%s15787_s1 + $0x2920] sm:$0xff]  ;;  %1540 = vmatpush.msrb.mxu0 %v1158_v1  ;;  %v81_v1 = vld [vmem:[%s15787_s1 + $0xe8] sm:$0xff] }
  0x25   :  { %v40_v3 = vld [vmem:[%s15786_s0 + $0x10] sm:$0xff]  ;;  %1535 = vmatpush.msra.mxu3 %v724_v0  ;;  %1560 = vmatpush.msrb.mxu1 %v1382_v2  ;;  %v1396_v8 = vld [vmem:[%s15787_s1 + $0x2a00] sm:$0xff]  ;;  %v319_v2 = vld [vmem:[%s15787_s1 + $0x858] sm:$0xff] }
  0x26   :  { %v1410_v4 = vld [vmem:[%s15787_s1 + $0x2a70] sm:$0xff]  ;;  %v7109_v10 = vmul.f32 0.003921569, %v40_v3  ;;  %v38_v12 = vld [vmem:[%s15786_s0] sm:$0xff]  ;;  %1541 = vmatpush.msrb.mxu0 %v1144_v6  ;;  %1536 = vmatmul.f32.vlgmr.msra.gmra.mxu3 %v7144_v22  ;;  %v67_v6 = vld [vmem:[%s15787_s1 + $0x78] sm:$0xff] }
  0x27   :  { %1594 = vmatpush.msrb.mxu2 %v1410_v4  ;;  %1600 = vmatpush.msrb.mxu3 %v263_v5  ;;  %v1130_v11 = vld [vmem:[%s15787_s1 + $0x21b0] sm:$0xff]  ;;  %v1116_v17 = vld [vmem:[%s15787_s1 + $0x2140] sm:$0xff]  ;;  %v7139_v20 = vmul.f32 0.003921569, %v38_v12  ;;  %v291_v15 = vld [vmem:[%s15787_s1 + $0x778] sm:$0xff] }
  0x28   :  { %1561 = vmatpush.msrb.mxu1 %v1368_v7  ;;  %v1354_v14 = vld [vmem:[%s15787_s1 + $0x28b0] sm:$0xff]  ;;  %1516 = vmatmul.f32.vlgmr.msra.gmra.mxu2 %v7109_v10  ;;  %v1340_v19 = vld [vmem:[%s15787_s1 + $0x2840] sm:$0xff] }
  0x29   :  { %1595 = vmatpush.msrb.mxu2 %v1396_v8  ;;  %1601 = vmatpush.msrb.mxu3 %v249_v9  ;;  %v1102_v25 = vld [vmem:[%s15787_s1 + $0x20d0] sm:$0xff]  ;;  %v1088_v30 = vld [vmem:[%s15787_s1 + $0x2060] sm:$0xff]  ;;  %v305_v9 = vld [vmem:[%s15787_s1 + $0x7e8] sm:$0xff] }
  0x2a   :  { %1542 = vmatpush.msrb.mxu0 %v1130_v11  ;;  %1562 = vmatpush.msrb.mxu1 %v1354_v14  ;;  %v1326_v26 = vld [vmem:[%s15787_s1 + $0x27d0] sm:$0xff]  ;;  %v1312_v31 = vld [vmem:[%s15787_s1 + $0x2760] sm:$0xff]  ;;  %v53_v14 = vld [vmem:[%s15787_s1 + $0x8] sm:$0xff] }
  0x2b   :  { %1620 = vmatpush.msra.mxu2 %v487_v13  ;;  %1602 = vmatpush.msrb.mxu3 %v235_v16  ;;  %v1074_v34 = vld [vmem:[%s15787_s1 + $0x1ff0] sm:$0xff]  ;;  %v1060_v38 = vld [vmem:[%s15787_s1 + $0x1f80] sm:$0xff]  ;;  %v43_v13 = vld [vmem:[%s15786_s0 + $0x28] sm:$0xff] }
  0x2c   :  { %1543 = vmatpush.msrb.mxu0 %v1116_v17  ;;  %1563 = vmatpush.msrb.mxu1 %v1340_v19  ;;  %v1298_v35 = vld [vmem:[%s15787_s1 + $0x26f0] sm:$0xff]  ;;  %v1284_v39 = vld [vmem:[%s15787_s1 + $0x2680] sm:$0xff]  ;;  %v711_v16 = vld [vmem:[%s15787_s1 + $0x1498] sm:$0xff] }
  0x2d   :  { %1621 = vmatpush.msra.mxu2 %v473_v18  ;;  %1603 = vmatpush.msrb.mxu3 %v221_v21  ;;  %v1046_v42 = vld [vmem:[%s15787_s1 + $0x1f10] sm:$0xff]  ;;  %v1032_v46 = vld [vmem:[%s15787_s1 + $0x1ea0] sm:$0xff] }
  0x2e   :  { %1476 = vmatmul.f32.vlgmr.msra.gmra.mxu0 %v7139_v20  ;;  %1564 = vmatpush.msrb.mxu1 %v1326_v26  ;;  %v1270_v43 = vld [vmem:[%s15787_s1 + $0x2610] sm:$0xff]  ;;  %v1256_v47 = vld [vmem:[%s15787_s1 + $0x25a0] sm:$0xff] }
  0x2f   :  { %1622 = vmatpush.msra.mxu2 %v459_v24  ;;  %1544 = vmatpush.msrb.mxu0 %v1102_v25  ;;  %v1018_v50 = vld [vmem:[%s15787_s1 + $0x1e30] sm:$0xff]  ;;  %v1004_v54 = vld [vmem:[%s15787_s1 + $0x1dc0] sm:$0xff] }
  0x30   :  { %1604 = vmatpush.msrb.mxu3 %v207_v27  ;;  %1496 = vmatmul.f32.vlgmr.msra.gmra.mxu1 %v7165_v29  ;;  %v1242_v51 = vld [vmem:[%s15787_s1 + $0x2530] sm:$0xff]  ;;  %v1228_v55 = vld [vmem:[%s15787_s1 + $0x24c0] sm:$0xff] }
  0x31   :  { %1623 = vmatpush.msra.mxu2 %v445_v28  ;;  %1545 = vmatpush.msrb.mxu0 %v1088_v30  ;;  %v990_v58 = vld [vmem:[%s15787_s1 + $0x1d50] sm:$0xff]  ;;  %v976_v62 = vld [vmem:[%s15787_s1 + $0x1ce0] sm:$0xff] }
  0x32   :  { %1565 = vmatpush.msrb.mxu1 %v1312_v31  ;;  %1605 = vmatpush.msrb.mxu3 %v193_v32  ;;  %v1214_v59 = vld [vmem:[%s15787_s1 + $0x2450] sm:$0xff]  ;;  %v1200_v0 = vld [vmem:[%s15787_s1 + $0x23e0] sm:$0xff] }
  0x33   :  { %1624 = vmatpush.msra.mxu2 %v431_v33  ;;  %1546 = vmatpush.msrb.mxu0 %v1074_v34  ;;  %v44_v63 = vld [vmem:[%s15786_s0 + $0x30] sm:$0xff]  ;;  %v42_v4 = vld [vmem:[%s15786_s0 + $0x20] sm:$0xff] }
  0x34   :  { %1566 = vmatpush.msrb.mxu1 %v1298_v35  ;;  %1606 = vmatpush.msrb.mxu3 %v179_v36  ;;  %v962_v3 = vld [vmem:[%s15787_s1 + $0x1c70] sm:$0xff]  ;;  %v7292_v7 = vmul.f32 0.003921569, %v44_v63  ;;  %v948_v8 = vld [vmem:[%s15787_s1 + $0x1c00] sm:$0xff]  ;;  %v7303_v12 = vmul.f32 0.003921569, %v42_v4 }
  0x35   :  { %1625 = vmatpush.msra.mxu2 %v417_v37  ;;  %1547 = vmatpush.msrb.mxu0 %v1060_v38  ;;  %v1186_v5 = vld [vmem:[%s15787_s1 + $0x2370] sm:$0xff]  ;;  %v1172_v11 = vld [vmem:[%s15787_s1 + $0x2300] sm:$0xff] }
  0x36   :  { %1567 = vmatpush.msrb.mxu1 %v1284_v39  ;;  %1607 = vmatpush.msrb.mxu3 %v165_v40 }
  0x37   :  { %1626 = vmatpush.msra.mxu2 %v403_v41  ;;  %1548 = vmatpush.msrb.mxu0 %v1046_v42 }
  0x38   :  { %1568 = vmatpush.msrb.mxu1 %v1270_v43  ;;  %1608 = vmatpush.msrb.mxu3 %v151_v44 }
  0x39   :  { %1627 = vmatpush.msra.mxu2 %v389_v45  ;;  %1549 = vmatpush.msrb.mxu0 %v1032_v46 }
  0x3a   :  { %1569 = vmatpush.msrb.mxu1 %v1256_v47  ;;  %1609 = vmatpush.msrb.mxu3 %v137_v48 }
  0x3b   :  { %1628 = vmatpush.msra.mxu2 %v375_v49  ;;  %1550 = vmatpush.msrb.mxu0 %v1018_v50 }
  0x3c   :  { %1570 = vmatpush.msrb.mxu1 %v1242_v51  ;;  %1610 = vmatpush.msrb.mxu3 %v123_v52 }
  0x3d   :  { %1629 = vmatpush.msra.mxu2 %v361_v53  ;;  %1551 = vmatpush.msrb.mxu0 %v1004_v54 }
  0x3e   :  { %1571 = vmatpush.msrb.mxu1 %v1228_v55  ;;  %1611 = vmatpush.msrb.mxu3 %v109_v56 }
  0x3f   :  { %1630 = vmatpush.msra.mxu2 %v347_v57  ;;  %1552 = vmatpush.msrb.mxu0 %v990_v58 }
  0x40   :  { %1572 = vmatpush.msrb.mxu1 %v1214_v59  ;;  %1612 = vmatpush.msrb.mxu3 %v95_v60 }
  0x41   :  { %1631 = vmatpush.msra.mxu2 %v333_v61  ;;  %1553 = vmatpush.msrb.mxu0 %v976_v62 }
  0x42   :  { %1573 = vmatpush.msrb.mxu1 %v1200_v0  ;;  %1613 = vmatpush.msrb.mxu3 %v81_v1 }
  0x43   :  { %1632 = vmatpush.msra.mxu2 %v319_v2  ;;  %1554 = vmatpush.msrb.mxu0 %v962_v3 }
  0x44   :  { %1574 = vmatpush.msrb.mxu1 %v1186_v5  ;;  %1614 = vmatpush.msrb.mxu3 %v67_v6 }
  0x45   :  { %6737 = vmatmul.msk.f32.vlgmr.msrb.gmra.mxu2 %vm1456_vm0, %v7292_v7  ;;  %1555 = vmatpush.msrb.mxu0 %v948_v8 }
  0x46   :  { %19 = vsyncpa [#allocation6], 0  ;;  %1633 = vmatpush.msra.mxu2 %v305_v9  ;;  %1575 = vmatpush.msrb.mxu1 %v1172_v11  ;;  %v935_v17 = vld [vmem:[%s15787_s1 + $0x1b98] sm:$0xff]  ;;  %v7325_v19 = vmul.f32 0.003921569, %v43_v13  ;;  %v277_v21 = vld [vmem:[%s15787_s1 + $0x708] sm:$0xff] }
  0x47   :  { %v1159_v18 = vld [vmem:[%s15787_s1 + $0x2298] sm:$0xff]  ;;  %1615 = vmatpush.msrb.mxu3 %v53_v14  ;;  %1556 = vmatmul.f32.vlgmr.msrb.gmra.mxu0 %v7303_v12  ;;  %v697_v23 = vld [vmem:[%s15787_s1 + $0x1428] sm:$0xff]  ;;  %vm4724_vm1 = vcmask 1041408   ;;  %vm4720_vm2 = vcmask 211968   ;;  %vm6523_vm3 = vcmask 654336   ;;  %vm6656_vm4 = vcmask 736256  }
  0x48   :  { %1634 = vmatpush.msra.mxu2 %v291_v15  ;;  %1640 = vmatpush.msra.mxu0 %v711_v16  ;;  %v921_v24 = vld [vmem:[%s15787_s1 + $0x1b28] sm:$0xff]  ;;  %v1383_v26 = vld [vmem:[%s15787_s1 + $0x2998] sm:$0xff]  ;;  %s6723_s12 = sshll.u32 %s15796_s10, 4  ;;  %vm6702_vm5 = vcmask 57344   ;;  %s6724_s12 = int_to_ptr.hbm [resolvable:$true] %s6723_s12 }
  0x49   :  { %1660 = vmatpush.msra.mxu1 %v935_v17  ;;  %1680 = vmatpush.msra.mxu3 %v1159_v18  ;;  %v1145_v25 = vld [vmem:[%s15787_s1 + $0x2228] sm:$0xff]  ;;  %v683_v27 = vld [vmem:[%s15787_s1 + $0x13b8] sm:$0xff] }
  0x4a   :  { %1576 = vmatmul.f32.vlgmr.msrb.gmra.mxu1 %v7325_v19  ;;  %1635 = vmatpush.msra.mxu2 %v277_v21  ;;  %v907_v28 = vld [vmem:[%s15787_s1 + $0x1ab8] sm:$0xff]  ;;  %v1369_v31 = vld [vmem:[%s15787_s1 + $0x2928] sm:$0xff] }
  0x4b   :  { %1641 = vmatpush.msra.mxu0 %v697_v23  ;;  %1661 = vmatpush.msra.mxu1 %v921_v24  ;;  %v1131_v30 = vld [vmem:[%s15787_s1 + $0x21b8] sm:$0xff]  ;;  %v669_v32 = vld [vmem:[%s15787_s1 + $0x1348] sm:$0xff] }
  0x4c   :  { %1681 = vmatpush.msra.mxu3 %v1145_v25  ;;  %1700 = vmatpush.msrb.mxu2 %v1383_v26  ;;  %v893_v33 = vld [vmem:[%s15787_s1 + $0x1a48] sm:$0xff]  ;;  %v1355_v35 = vld [vmem:[%s15787_s1 + $0x28b8] sm:$0xff] }
  0x4d   :  { %1642 = vmatpush.msra.mxu0 %v683_v27  ;;  %1662 = vmatpush.msra.mxu1 %v907_v28  ;;  %v1117_v34 = vld [vmem:[%s15787_s1 + $0x2148] sm:$0xff]  ;;  %v655_v36 = vld [vmem:[%s15787_s1 + $0x12d8] sm:$0xff]  ;;  %v264_v27 = vld [vmem:[%s15787_s1 + $0x6a0] sm:$0xff] }
  0x4e   :  { %1682 = vmatpush.msra.mxu3 %v1131_v30  ;;  %1701 = vmatpush.msrb.mxu2 %v1369_v31  ;;  %v879_v37 = vld [vmem:[%s15787_s1 + $0x19d8] sm:$0xff]  ;;  %v1341_v39 = vld [vmem:[%s15787_s1 + $0x2848] sm:$0xff]  ;;  %v488_v28 = vld [vmem:[%s15787_s1 + $0xda0] sm:$0xff] }
  0x4f   :  { %1643 = vmatpush.msra.mxu0 %v669_v32  ;;  %1663 = vmatpush.msra.mxu1 %v893_v33  ;;  %v1103_v38 = vld [vmem:[%s15787_s1 + $0x20d8] sm:$0xff]  ;;  %v641_v40 = vld [vmem:[%s15787_s1 + $0x1268] sm:$0xff]  ;;  %v250_v32 = vld [vmem:[%s15787_s1 + $0x630] sm:$0xff] }
  0x50   :  { %1683 = vmatpush.msra.mxu3 %v1117_v34  ;;  %1702 = vmatpush.msrb.mxu2 %v1355_v35  ;;  %v865_v41 = vld [vmem:[%s15787_s1 + $0x1968] sm:$0xff]  ;;  %v1327_v43 = vld [vmem:[%s15787_s1 + $0x27d8] sm:$0xff]  ;;  %v474_v33 = vld [vmem:[%s15787_s1 + $0xd30] sm:$0xff] }
  0x51   :  { %1644 = vmatpush.msra.mxu0 %v655_v36  ;;  %1664 = vmatpush.msra.mxu1 %v879_v37  ;;  %v1089_v42 = vld [vmem:[%s15787_s1 + $0x2068] sm:$0xff]  ;;  %v627_v44 = vld [vmem:[%s15787_s1 + $0x11f8] sm:$0xff]  ;;  %v712_v34 = vld [vmem:[%s15787_s1 + $0x14a0] sm:$0xff] }
  0x52   :  { %1684 = vmatpush.msra.mxu3 %v1103_v38  ;;  %1703 = vmatpush.msrb.mxu2 %v1341_v39  ;;  %v851_v45 = vld [vmem:[%s15787_s1 + $0x18f8] sm:$0xff]  ;;  %v1313_v47 = vld [vmem:[%s15787_s1 + $0x2768] sm:$0xff]  ;;  %v936_v35 = vld [vmem:[%s15787_s1 + $0x1ba0] sm:$0xff] }
  0x53   :  { %1645 = vmatpush.msra.mxu0 %v641_v40  ;;  %1665 = vmatpush.msra.mxu1 %v865_v41  ;;  %v1075_v46 = vld [vmem:[%s15787_s1 + $0x1ff8] sm:$0xff]  ;;  %v613_v48 = vld [vmem:[%s15787_s1 + $0x1188] sm:$0xff]  ;;  %v236_v36 = vld [vmem:[%s15787_s1 + $0x5c0] sm:$0xff] }
  0x54   :  { %1685 = vmatpush.msra.mxu3 %v1089_v42  ;;  %1704 = vmatpush.msrb.mxu2 %v1327_v43  ;;  %v837_v49 = vld [vmem:[%s15787_s1 + $0x1888] sm:$0xff]  ;;  %v1299_v51 = vld [vmem:[%s15787_s1 + $0x26f8] sm:$0xff]  ;;  %v460_v37 = vld [vmem:[%s15787_s1 + $0xcc0] sm:$0xff] }
  0x55   :  { %1646 = vmatpush.msra.mxu0 %v627_v44  ;;  %1666 = vmatpush.msra.mxu1 %v851_v45  ;;  %v1061_v50 = vld [vmem:[%s15787_s1 + $0x1f88] sm:$0xff]  ;;  %v599_v52 = vld [vmem:[%s15787_s1 + $0x1118] sm:$0xff]  ;;  %v698_v38 = vld [vmem:[%s15787_s1 + $0x1430] sm:$0xff] }
  0x56   :  { %1686 = vmatpush.msra.mxu3 %v1075_v46  ;;  %1705 = vmatpush.msrb.mxu2 %v1313_v47  ;;  %v823_v53 = vld [vmem:[%s15787_s1 + $0x1818] sm:$0xff]  ;;  %v1285_v55 = vld [vmem:[%s15787_s1 + $0x2688] sm:$0xff]  ;;  %v922_v39 = vld [vmem:[%s15787_s1 + $0x1b30] sm:$0xff] }
  0x57   :  { %1647 = vmatpush.msra.mxu0 %v613_v48  ;;  %1667 = vmatpush.msra.mxu1 %v837_v49  ;;  %v1047_v54 = vld [vmem:[%s15787_s1 + $0x1f18] sm:$0xff]  ;;  %v585_v56 = vld [vmem:[%s15787_s1 + $0x10a8] sm:$0xff]  ;;  %v222_v40 = vld [vmem:[%s15787_s1 + $0x550] sm:$0xff] }
  0x58   :  { %1687 = vmatpush.msra.mxu3 %v1061_v50  ;;  %1706 = vmatpush.msrb.mxu2 %v1299_v51  ;;  %v809_v57 = vld [vmem:[%s15787_s1 + $0x17a8] sm:$0xff]  ;;  %v1271_v59 = vld [vmem:[%s15787_s1 + $0x2618] sm:$0xff]  ;;  %v446_v41 = vld [vmem:[%s15787_s1 + $0xc50] sm:$0xff] }
  0x59   :  { %1648 = vmatpush.msra.mxu0 %v599_v52  ;;  %1668 = vmatpush.msra.mxu1 %v823_v53  ;;  %v1033_v58 = vld [vmem:[%s15787_s1 + $0x1ea8] sm:$0xff]  ;;  %v571_v60 = vld [vmem:[%s15787_s1 + $0x1038] sm:$0xff]  ;;  %v684_v42 = vld [vmem:[%s15787_s1 + $0x13c0] sm:$0xff] }
  0x5a   :  { %1688 = vmatpush.msra.mxu3 %v1047_v54  ;;  %1707 = vmatpush.msrb.mxu2 %v1285_v55  ;;  %v795_v61 = vld [vmem:[%s15787_s1 + $0x1738] sm:$0xff]  ;;  %v1257_v63 = vld [vmem:[%s15787_s1 + $0x25a8] sm:$0xff]  ;;  %v908_v43 = vld [vmem:[%s15787_s1 + $0x1ac0] sm:$0xff] }
  0x5b   :  { %1649 = vmatpush.msra.mxu0 %v585_v56  ;;  %1669 = vmatpush.msra.mxu1 %v809_v57  ;;  %v1019_v62 = vld [vmem:[%s15787_s1 + $0x1e38] sm:$0xff]  ;;  %v557_v0 = vld [vmem:[%s15787_s1 + $0xfc8] sm:$0xff]  ;;  %v208_v44 = vld [vmem:[%s15787_s1 + $0x4e0] sm:$0xff] }
  0x5c   :  { %1689 = vmatpush.msra.mxu3 %v1033_v58  ;;  %1708 = vmatpush.msrb.mxu2 %v1271_v59  ;;  %v781_v1 = vld [vmem:[%s15787_s1 + $0x16c8] sm:$0xff]  ;;  %v1243_v3 = vld [vmem:[%s15787_s1 + $0x2538] sm:$0xff]  ;;  %v432_v45 = vld [vmem:[%s15787_s1 + $0xbe0] sm:$0xff] }
  0x5d   :  { %1650 = vmatpush.msra.mxu0 %v571_v60  ;;  %1670 = vmatpush.msra.mxu1 %v795_v61  ;;  %v1005_v2 = vld [vmem:[%s15787_s1 + $0x1dc8] sm:$0xff]  ;;  %v543_v4 = vld [vmem:[%s15787_s1 + $0xf58] sm:$0xff]  ;;  %v670_v46 = vld [vmem:[%s15787_s1 + $0x1350] sm:$0xff] }
  0x5e   :  { %1690 = vmatpush.msra.mxu3 %v1019_v62  ;;  %1709 = vmatpush.msrb.mxu2 %v1257_v63  ;;  %v767_v5 = vld [vmem:[%s15787_s1 + $0x1658] sm:$0xff]  ;;  %v1229_v8 = vld [vmem:[%s15787_s1 + $0x24c8] sm:$0xff]  ;;  %v894_v47 = vld [vmem:[%s15787_s1 + $0x1a50] sm:$0xff] }
  0x5f   :  { %1651 = vmatpush.msra.mxu0 %v557_v0  ;;  %1671 = vmatpush.msra.mxu1 %v781_v1  ;;  %v991_v6 = vld [vmem:[%s15787_s1 + $0x1d58] sm:$0xff]  ;;  %v529_v9 = vld [vmem:[%s15787_s1 + $0xee8] sm:$0xff]  ;;  %v194_v48 = vld [vmem:[%s15787_s1 + $0x470] sm:$0xff] }
  0x60   :  { %1691 = vmatpush.msra.mxu3 %v1005_v2  ;;  %1710 = vmatpush.msrb.mxu2 %v1243_v3  ;;  %v753_v11 = vld [vmem:[%s15787_s1 + $0x15e8] sm:$0xff]  ;;  %v1215_v14 = vld [vmem:[%s15787_s1 + $0x2458] sm:$0xff]  ;;  %v418_v49 = vld [vmem:[%s15787_s1 + $0xb70] sm:$0xff] }
  0x61   :  { %1652 = vmatpush.msra.mxu0 %v543_v4  ;;  %1672 = vmatpush.msra.mxu1 %v767_v5  ;;  %v977_v13 = vld [vmem:[%s15787_s1 + $0x1ce8] sm:$0xff]  ;;  %v515_v15 = vld [vmem:[%s15787_s1 + $0xe78] sm:$0xff]  ;;  %v656_v50 = vld [vmem:[%s15787_s1 + $0x12e0] sm:$0xff] }
  0x62   :  { %1692 = vmatpush.msra.mxu3 %v991_v6  ;;  %1711 = vmatpush.msrb.mxu2 %v1229_v8  ;;  %v739_v16 = vld [vmem:[%s15787_s1 + $0x1578] sm:$0xff]  ;;  %v1201_v18 = vld [vmem:[%s15787_s1 + $0x23e8] sm:$0xff]  ;;  %v880_v51 = vld [vmem:[%s15787_s1 + $0x19e0] sm:$0xff] }
  0x63   :  { %1653 = vmatpush.msra.mxu0 %v529_v9  ;;  %1673 = vmatpush.msra.mxu1 %v753_v11  ;;  %v963_v17 = vld [vmem:[%s15787_s1 + $0x1c78] sm:$0xff]  ;;  %v501_v21 = vld [vmem:[%s15787_s1 + $0xe08] sm:$0xff]  ;;  %v404_v52 = vld [vmem:[%s15787_s1 + $0xb00] sm:$0xff] }
  0x64   :  { %1693 = vmatpush.msra.mxu3 %v977_v13  ;;  %1712 = vmatpush.msrb.mxu2 %v1215_v14  ;;  %v725_v23 = vld [vmem:[%s15787_s1 + $0x1508] sm:$0xff]  ;;  %v1187_v25 = vld [vmem:[%s15787_s1 + $0x2378] sm:$0xff]  ;;  %v180_v53 = vld [vmem:[%s15787_s1 + $0x400] sm:$0xff] }
  0x65   :  { %1654 = vmatpush.msra.mxu0 %v515_v15  ;;  %1674 = vmatpush.msra.mxu1 %v739_v16  ;;  %v949_v24 = vld [vmem:[%s15787_s1 + $0x1c08] sm:$0xff]  ;;  %v1411_v26 = vld [vmem:[%s15787_s1 + $0x2a78] sm:$0xff]  ;;  %v642_v54 = vld [vmem:[%s15787_s1 + $0x1270] sm:$0xff] }
  0x66   :  { %1694 = vmatpush.msra.mxu3 %v963_v17  ;;  %1713 = vmatpush.msrb.mxu2 %v1201_v18  ;;  %v1397_v30 = vld [vmem:[%s15787_s1 + $0x2a08] sm:$0xff]  ;;  %v866_v55 = vld [vmem:[%s15787_s1 + $0x1970] sm:$0xff]  ;;  %v628_v58 = vld [vmem:[%s15787_s1 + $0x1200] sm:$0xff] }
  0x67   :  { %1655 = vmatpush.msra.mxu0 %v501_v21  ;;  %1675 = vmatpush.msra.mxu1 %v725_v23  ;;  %v1173_v31 = vld [vmem:[%s15787_s1 + $0x2308] sm:$0xff]  ;;  %v390_v56 = vld [vmem:[%s15787_s1 + $0xa90] sm:$0xff]  ;;  %v852_v59 = vld [vmem:[%s15787_s1 + $0x1900] sm:$0xff] }
  0x68   :  { %1695 = vmatpush.msra.mxu3 %v949_v24  ;;  %1714 = vmatpush.msrb.mxu2 %v1187_v25  ;;  %v166_v57 = vld [vmem:[%s15787_s1 + $0x390] sm:$0xff]  ;;  %v376_v60 = vld [vmem:[%s15787_s1 + $0xa20] sm:$0xff] }
  0x69   :  { %1616 = vmatmul.f32.vlgmr.msrb.gmra.mxu3 %v7139_v20  ;;  %1734 = vmatpush.msrb.mxu0 %v1411_v26  ;;  %v152_v61 = vld [vmem:[%s15787_s1 + $0x320] sm:$0xff]  ;;  %v614_v62 = vld [vmem:[%s15787_s1 + $0x1190] sm:$0xff] }
  0x6a   :  { %1740 = vmatpush.msrb.mxu1 %v264_v27  ;;  %1760 = vmatpush.msrb.mxu3 %v488_v28  ;;  %v838_v63 = vld [vmem:[%s15787_s1 + $0x1890] sm:$0xff]  ;;  %v600_v2 = vld [vmem:[%s15787_s1 + $0x1120] sm:$0xff] }
  0x6b   :  { %1636 = vmatmul.f32.vlgmr.msra.gmra.mxu2 %v7165_v29  ;;  %1735 = vmatpush.msrb.mxu0 %v1397_v30  ;;  %v138_v0 = vld [vmem:[%s15787_s1 + $0x2b0] sm:$0xff]  ;;  %v824_v3 = vld [vmem:[%s15787_s1 + $0x1820] sm:$0xff] }
  0x6c   :  { %1715 = vmatpush.msrb.mxu2 %v1173_v31  ;;  %1741 = vmatpush.msrb.mxu1 %v250_v32  ;;  %v362_v1 = vld [vmem:[%s15787_s1 + $0x9b0] sm:$0xff]  ;;  %v124_v4 = vld [vmem:[%s15787_s1 + $0x240] sm:$0xff] }
  0x6d   :  { %1761 = vmatpush.msrb.mxu3 %v474_v33  ;;  %1656 = vmatmul.f32.vlgmr.msra.gmra.mxu0 %v7109_v10  ;;  %v348_v5 = vld [vmem:[%s15787_s1 + $0x940] sm:$0xff]  ;;  %v586_v6 = vld [vmem:[%s15787_s1 + $0x10b0] sm:$0xff] }
  0x6e   :  { %1780 = vmatpush.msra.mxu0 %v712_v34  ;;  %1800 = vmatpush.msra.mxu2 %v936_v35  ;;  %v810_v8 = vld [vmem:[%s15787_s1 + $0x17b0] sm:$0xff]  ;;  %v572_v13 = vld [vmem:[%s15787_s1 + $0x1040] sm:$0xff] }
  0x6f   :  { %1742 = vmatpush.msrb.mxu1 %v236_v36  ;;  %1762 = vmatpush.msrb.mxu3 %v460_v37  ;;  %v110_v9 = vld [vmem:[%s15787_s1 + $0x1d0] sm:$0xff]  ;;  %v796_v14 = vld [vmem:[%s15787_s1 + $0x1740] sm:$0xff] }
  0x70   :  { %1781 = vmatpush.msra.mxu0 %v698_v38  ;;  %1801 = vmatpush.msra.mxu2 %v922_v39  ;;  %v334_v11 = vld [vmem:[%s15787_s1 + $0x8d0] sm:$0xff]  ;;  %v96_v15 = vld [vmem:[%s15787_s1 + $0x160] sm:$0xff] }
  0x71   :  { %1743 = vmatpush.msrb.mxu1 %v222_v40  ;;  %1763 = vmatpush.msrb.mxu3 %v446_v41  ;;  %v320_v16 = vld [vmem:[%s15787_s1 + $0x860] sm:$0xff]  ;;  %v558_v17 = vld [vmem:[%s15787_s1 + $0xfd0] sm:$0xff] }
  0x72   :  { %1782 = vmatpush.msra.mxu0 %v684_v42  ;;  %1802 = vmatpush.msra.mxu2 %v908_v43  ;;  %v782_v18 = vld [vmem:[%s15787_s1 + $0x16d0] sm:$0xff]  ;;  %v544_v24 = vld [vmem:[%s15787_s1 + $0xf60] sm:$0xff]  ;;  %v265_v42 = vld [vmem:[%s15787_s1 + $0x6a8] sm:$0xff] }
  0x73   :  { %1696 = vmatmul.f32.vlgmr.msra.gmra.mxu3 %v7303_v12  ;;  %1744 = vmatpush.msrb.mxu1 %v208_v44  ;;  %v82_v21 = vld [vmem:[%s15787_s1 + $0xf0] sm:$0xff]  ;;  %v768_v25 = vld [vmem:[%s15787_s1 + $0x1660] sm:$0xff] }
  0x74   :  { %1764 = vmatpush.msrb.mxu3 %v432_v45  ;;  %1783 = vmatpush.msra.mxu0 %v670_v46  ;;  %v306_v23 = vld [vmem:[%s15787_s1 + $0x7f0] sm:$0xff]  ;;  %v68_v26 = vld [vmem:[%s15787_s1 + $0x80] sm:$0xff]  ;;  %v251_v46 = vld [vmem:[%s15787_s1 + $0x638] sm:$0xff] }
  0x75   :  { %1803 = vmatpush.msra.mxu2 %v894_v47  ;;  %1745 = vmatpush.msrb.mxu1 %v194_v48  ;;  %v292_v27 = vld [vmem:[%s15787_s1 + $0x780] sm:$0xff]  ;;  %v530_v28 = vld [vmem:[%s15787_s1 + $0xef0] sm:$0xff] }
  0x76   :  { %1716 = vmatmul.f32.vlgmr.msrb.gmra.mxu2 %v7325_v19  ;;  %1765 = vmatpush.msrb.mxu3 %v418_v49  ;;  %v754_v30 = vld [vmem:[%s15787_s1 + $0x15f0] sm:$0xff]  ;;  %v516_v33 = vld [vmem:[%s15787_s1 + $0xe80] sm:$0xff]  ;;  %v489_v49 = vld [vmem:[%s15787_s1 + $0xda8] sm:$0xff] }
  0x77   :  { %1784 = vmatpush.msra.mxu0 %v656_v50  ;;  %1804 = vmatpush.msra.mxu2 %v880_v51  ;;  %v54_v31 = vld [vmem:[%s15787_s1 + $0x10] sm:$0xff]  ;;  %v740_v34 = vld [vmem:[%s15787_s1 + $0x1580] sm:$0xff]  ;;  %v237_v50 = vld [vmem:[%s15787_s1 + $0x5c8] sm:$0xff] }
  0x78   :  { %1676 = vmatmul.f32.vlgmr.msra.gmra.mxu1 %v7144_v22  ;;  %1766 = vmatpush.msrb.mxu3 %v404_v52  ;;  %v278_v32 = vld [vmem:[%s15787_s1 + $0x710] sm:$0xff]  ;;  %v1160_v35 = vld [vmem:[%s15787_s1 + $0x22a0] sm:$0xff] }
  0x79   :  { %1746 = vmatpush.msrb.mxu1 %v180_v53  ;;  %1785 = vmatpush.msra.mxu0 %v642_v54  ;;  %v1384_v36 = vld [vmem:[%s15787_s1 + $0x29a0] sm:$0xff]  ;;  %v502_v37 = vld [vmem:[%s15787_s1 + $0xe10] sm:$0xff]  ;;  %v475_v53 = vld [vmem:[%s15787_s1 + $0xd38] sm:$0xff] }
  0x7a   :  { %1805 = vmatpush.msra.mxu2 %v866_v55  ;;  %1767 = vmatpush.msrb.mxu3 %v390_v56  ;;  %v726_v38 = vld [vmem:[%s15787_s1 + $0x1510] sm:$0xff]  ;;  %v1412_v41 = vld [vmem:[%s15787_s1 + $0x2a80] sm:$0xff]  ;;  %v223_v55 = vld [vmem:[%s15787_s1 + $0x558] sm:$0xff] }
  0x7b   :  { %1747 = vmatpush.msrb.mxu1 %v166_v57  ;;  %1786 = vmatpush.msra.mxu0 %v628_v58  ;;  %v1146_v39 = vld [vmem:[%s15787_s1 + $0x2230] sm:$0xff]  ;;  %v1132_v43 = vld [vmem:[%s15787_s1 + $0x21c0] sm:$0xff]  ;;  %v461_v57 = vld [vmem:[%s15787_s1 + $0xcc8] sm:$0xff] }
  0x7c   :  { %1806 = vmatpush.msra.mxu2 %v852_v59  ;;  %1768 = vmatpush.msrb.mxu3 %v376_v60  ;;  %v1370_v40 = vld [vmem:[%s15787_s1 + $0x2930] sm:$0xff]  ;;  %v1356_v44 = vld [vmem:[%s15787_s1 + $0x28c0] sm:$0xff]  ;;  %v209_v59 = vld [vmem:[%s15787_s1 + $0x4e8] sm:$0xff] }
  0x7d   :  { %1748 = vmatpush.msrb.mxu1 %v152_v61  ;;  %1787 = vmatpush.msra.mxu0 %v614_v62  ;;  %v1398_v45 = vld [vmem:[%s15787_s1 + $0x2a10] sm:$0xff]  ;;  %v1104_v51 = vld [vmem:[%s15787_s1 + $0x20e0] sm:$0xff]  ;;  %v447_v61 = vld [vmem:[%s15787_s1 + $0xc58] sm:$0xff] }
  0x7e   :  { %1807 = vmatpush.msra.mxu2 %v838_v63  ;;  %6738 = vmatmul.msk.f32.vlgmr.msrb.gmra.mxu0 %vm1456_vm0, %v7292_v7  ;;  %v1118_v47 = vld [vmem:[%s15787_s1 + $0x2150] sm:$0xff]  ;;  %v1328_v52 = vld [vmem:[%s15787_s1 + $0x27e0] sm:$0xff]  ;;  %v195_v63 = vld [vmem:[%s15787_s1 + $0x478] sm:$0xff] }
  0x7f   :  { %1749 = vmatpush.msrb.mxu1 %v138_v0  ;;  %1769 = vmatpush.msrb.mxu3 %v362_v1  ;;  %v1342_v48 = vld [vmem:[%s15787_s1 + $0x2850] sm:$0xff]  ;;  %v1076_v58 = vld [vmem:[%s15787_s1 + $0x2000] sm:$0xff]  ;;  %v433_v1 = vld [vmem:[%s15787_s1 + $0xbe8] sm:$0xff] }
  0x80   :  { %1788 = vmatpush.msra.mxu0 %v600_v2  ;;  %1808 = vmatpush.msra.mxu2 %v824_v3  ;;  %v1090_v54 = vld [vmem:[%s15787_s1 + $0x2070] sm:$0xff]  ;;  %v1300_v60 = vld [vmem:[%s15787_s1 + $0x2700] sm:$0xff]  ;;  %v181_v3 = vld [vmem:[%s15787_s1 + $0x408] sm:$0xff] }
  0x81   :  { %1750 = vmatpush.msrb.mxu1 %v124_v4  ;;  %1770 = vmatpush.msrb.mxu3 %v348_v5  ;;  %v1314_v56 = vld [vmem:[%s15787_s1 + $0x2770] sm:$0xff]  ;;  %v1048_v2 = vld [vmem:[%s15787_s1 + $0x1f20] sm:$0xff]  ;;  %v419_v5 = vld [vmem:[%s15787_s1 + $0xb78] sm:$0xff] }
  0x82   :  { %1789 = vmatpush.msra.mxu0 %v586_v6  ;;  %1809 = vmatpush.msra.mxu2 %v810_v8  ;;  %v1062_v62 = vld [vmem:[%s15787_s1 + $0x1f90] sm:$0xff]  ;;  %v1272_v4 = vld [vmem:[%s15787_s1 + $0x2620] sm:$0xff]  ;;  %v167_v8 = vld [vmem:[%s15787_s1 + $0x398] sm:$0xff] }
  0x83   :  { %1751 = vmatpush.msrb.mxu1 %v110_v9  ;;  %1771 = vmatpush.msrb.mxu3 %v334_v11  ;;  %v1286_v0 = vld [vmem:[%s15787_s1 + $0x2690] sm:$0xff]  ;;  %v405_v11 = vld [vmem:[%s15787_s1 + $0xb08] sm:$0xff] }
  0x84   :  { %1790 = vmatpush.msra.mxu0 %v572_v13  ;;  %1810 = vmatpush.msra.mxu2 %v796_v14  ;;  %v1034_v6 = vld [vmem:[%s15787_s1 + $0x1eb0] sm:$0xff]  ;;  %v1020_v13 = vld [vmem:[%s15787_s1 + $0x1e40] sm:$0xff]  ;;  %v153_v14 = vld [vmem:[%s15787_s1 + $0x328] sm:$0xff] }
  0x85   :  { %1752 = vmatpush.msrb.mxu1 %v96_v15  ;;  %1772 = vmatpush.msrb.mxu3 %v320_v16  ;;  %v1258_v9 = vld [vmem:[%s15787_s1 + $0x25b0] sm:$0xff]  ;;  %v1244_v15 = vld [vmem:[%s15787_s1 + $0x2540] sm:$0xff]  ;;  %v391_v16 = vld [vmem:[%s15787_s1 + $0xa98] sm:$0xff] }
  0x86   :  { %1791 = vmatpush.msra.mxu0 %v558_v17  ;;  %1811 = vmatpush.msra.mxu2 %v782_v18  ;;  %v1006_v17 = vld [vmem:[%s15787_s1 + $0x1dd0] sm:$0xff]  ;;  %v139_v18 = vld [vmem:[%s15787_s1 + $0x2b8] sm:$0xff] }
  0x87   :  { %1753 = vmatpush.msrb.mxu1 %v82_v21  ;;  %1773 = vmatpush.msrb.mxu3 %v306_v23  ;;  %v1230_v21 = vld [vmem:[%s15787_s1 + $0x24d0] sm:$0xff]  ;;  %v377_v23 = vld [vmem:[%s15787_s1 + $0xa28] sm:$0xff] }
  0x88   :  { %1792 = vmatpush.msra.mxu0 %v544_v24  ;;  %1812 = vmatpush.msra.mxu2 %v768_v25  ;;  %v992_v24 = vld [vmem:[%s15787_s1 + $0x1d60] sm:$0xff]  ;;  %v125_v25 = vld [vmem:[%s15787_s1 + $0x248] sm:$0xff] }
  0x89   :  { %1754 = vmatpush.msrb.mxu1 %v68_v26  ;;  %1774 = vmatpush.msrb.mxu3 %v292_v27  ;;  %v1216_v26 = vld [vmem:[%s15787_s1 + $0x2460] sm:$0xff]  ;;  %v363_v27 = vld [vmem:[%s15787_s1 + $0x9b8] sm:$0xff] }
  0x8a   :  { %1793 = vmatpush.msra.mxu0 %v530_v28  ;;  %1813 = vmatpush.msra.mxu2 %v754_v30  ;;  %v978_v28 = vld [vmem:[%s15787_s1 + $0x1cf0] sm:$0xff]  ;;  %v111_v30 = vld [vmem:[%s15787_s1 + $0x1d8] sm:$0xff] }
  0x8b   :  { %1755 = vmatpush.msrb.mxu1 %v54_v31  ;;  %1775 = vmatpush.msrb.mxu3 %v278_v32  ;;  %v1202_v31 = vld [vmem:[%s15787_s1 + $0x23f0] sm:$0xff]  ;;  %v349_v32 = vld [vmem:[%s15787_s1 + $0x948] sm:$0xff] }
  0x8c   :  { %1794 = vmatpush.msra.mxu0 %v516_v33  ;;  %1814 = vmatpush.msra.mxu2 %v740_v34  ;;  %v964_v33 = vld [vmem:[%s15787_s1 + $0x1c80] sm:$0xff]  ;;  %v97_v34 = vld [vmem:[%s15787_s1 + $0x168] sm:$0xff] }
  0x8d   :  { %1820 = vmatpush.msra.mxu1 %v1160_v35  ;;  %1840 = vmatpush.msra.mxu3 %v1384_v36  ;;  %v1188_v35 = vld [vmem:[%s15787_s1 + $0x2380] sm:$0xff]  ;;  %v335_v36 = vld [vmem:[%s15787_s1 + $0x8d8] sm:$0xff] }
  0x8e   :  { %1795 = vmatpush.msra.mxu0 %v502_v37  ;;  %1815 = vmatpush.msra.mxu2 %v726_v38  ;;  %v950_v37 = vld [vmem:[%s15787_s1 + $0x1c10] sm:$0xff]  ;;  %v83_v38 = vld [vmem:[%s15787_s1 + $0xf8] sm:$0xff] }
  0x8f   :  { %1821 = vmatpush.msra.mxu1 %v1146_v39  ;;  %1841 = vmatpush.msra.mxu3 %v1370_v40  ;;  %v1174_v39 = vld [vmem:[%s15787_s1 + $0x2310] sm:$0xff]  ;;  %v321_v40 = vld [vmem:[%s15787_s1 + $0x868] sm:$0xff] }
  0x90   :  { %1874 = vmatpush.msrb.mxu0 %v1412_v41  ;;  %1880 = vmatpush.msrb.mxu2 %v265_v42  ;;  %v69_v41 = vld [vmem:[%s15787_s1 + $0x88] sm:$0xff] }
  0x91   :  { %1822 = vmatpush.msra.mxu1 %v1132_v43  ;;  %1842 = vmatpush.msra.mxu3 %v1356_v44  ;;  %v713_v42 = vld [vmem:[%s15787_s1 + $0x14a8] sm:$0xff]  ;;  %v307_v44 = vld [vmem:[%s15787_s1 + $0x7f8] sm:$0xff] }
  0x92   :  { %1776 = vmatmul.f32.vlgmr.msrb.gmra.mxu3 %v7165_v29  ;;  %1875 = vmatpush.msrb.mxu0 %v1398_v45  ;;  %v937_v43 = vld [vmem:[%s15787_s1 + $0x1ba8] sm:$0xff]  ;;  %v55_v45 = vld [vmem:[%s15787_s1 + $0x18] sm:$0xff] }
  0x93   :  { %1881 = vmatpush.msrb.mxu2 %v251_v46  ;;  %1796 = vmatmul.f32.vlgmr.msra.gmra.mxu0 %v7109_v10  ;;  %v699_v46 = vld [vmem:[%s15787_s1 + $0x1438] sm:$0xff] }
  0x94   :  { %1823 = vmatpush.msra.mxu1 %v1118_v47  ;;  %1843 = vmatpush.msra.mxu3 %v1342_v48  ;;  %v923_v47 = vld [vmem:[%s15787_s1 + $0x1b38] sm:$0xff]  ;;  %v293_v48 = vld [vmem:[%s15787_s1 + $0x788] sm:$0xff] }
  0x95   :  { %1900 = vmatpush.msra.mxu0 %v489_v49  ;;  %1882 = vmatpush.msrb.mxu2 %v237_v50  ;;  %v1161_v49 = vld [vmem:[%s15787_s1 + $0x22a8] sm:$0xff] }
  0x96   :  { %1824 = vmatpush.msra.mxu1 %v1104_v51  ;;  %1844 = vmatpush.msra.mxu3 %v1328_v52  ;;  %v685_v50 = vld [vmem:[%s15787_s1 + $0x13c8] sm:$0xff]  ;;  %v279_v52 = vld [vmem:[%s15787_s1 + $0x718] sm:$0xff] }
  0x97   :  { %1901 = vmatpush.msra.mxu0 %v475_v53  ;;  %1756 = vmatmul.f32.vlgmr.msrb.gmra.mxu1 %v7139_v20  ;;  %v909_v51 = vld [vmem:[%s15787_s1 + $0x1ac8] sm:$0xff]  ;;  %v1147_v53 = vld [vmem:[%s15787_s1 + $0x2238] sm:$0xff] }
  0x98   :  { %1816 = vmatmul.f32.vlgmr.msra.gmra.mxu2 %v7144_v22  ;;  %1825 = vmatpush.msra.mxu1 %v1090_v54  ;;  %v671_v54 = vld [vmem:[%s15787_s1 + $0x1358] sm:$0xff] }
  0x99   :  { %1883 = vmatpush.msrb.mxu2 %v223_v55  ;;  %1845 = vmatpush.msra.mxu3 %v1314_v56  ;;  %v895_v55 = vld [vmem:[%s15787_s1 + $0x1a58] sm:$0xff]  ;;  %v1385_v56 = vld [vmem:[%s15787_s1 + $0x29a8] sm:$0xff] }
  0x9a   :  { %1902 = vmatpush.msra.mxu0 %v461_v57  ;;  %1826 = vmatpush.msra.mxu1 %v1076_v58  ;;  %v1133_v57 = vld [vmem:[%s15787_s1 + $0x21c8] sm:$0xff] }
  0x9b   :  { %1884 = vmatpush.msrb.mxu2 %v209_v59  ;;  %1846 = vmatpush.msra.mxu3 %v1300_v60  ;;  %v657_v58 = vld [vmem:[%s15787_s1 + $0x12e8] sm:$0xff]  ;;  %v1371_v60 = vld [vmem:[%s15787_s1 + $0x2938] sm:$0xff] }
  0x9c   :  { %1903 = vmatpush.msra.mxu0 %v447_v61  ;;  %1827 = vmatpush.msra.mxu1 %v1062_v62  ;;  %v881_v59 = vld [vmem:[%s15787_s1 + $0x19e8] sm:$0xff]  ;;  %v1119_v61 = vld [vmem:[%s15787_s1 + $0x2158] sm:$0xff] }
  0x9d   :  { %1885 = vmatpush.msrb.mxu2 %v195_v63  ;;  %1847 = vmatpush.msra.mxu3 %v1286_v0  ;;  %v643_v62 = vld [vmem:[%s15787_s1 + $0x1278] sm:$0xff]  ;;  %v1357_v0 = vld [vmem:[%s15787_s1 + $0x28c8] sm:$0xff] }
  0x9e   :  { %1904 = vmatpush.msra.mxu0 %v433_v1  ;;  %1828 = vmatpush.msra.mxu1 %v1048_v2  ;;  %v867_v63 = vld [vmem:[%s15787_s1 + $0x1978] sm:$0xff]  ;;  %v1105_v1 = vld [vmem:[%s15787_s1 + $0x20e8] sm:$0xff] }
  0x9f   :  { %1886 = vmatpush.msrb.mxu2 %v181_v3  ;;  %1848 = vmatpush.msra.mxu3 %v1272_v4  ;;  %v629_v2 = vld [vmem:[%s15787_s1 + $0x1208] sm:$0xff]  ;;  %v1343_v4 = vld [vmem:[%s15787_s1 + $0x2858] sm:$0xff] }
  0xa0   :  { %1905 = vmatpush.msra.mxu0 %v419_v5  ;;  %1829 = vmatpush.msra.mxu1 %v1034_v6  ;;  %v853_v3 = vld [vmem:[%s15787_s1 + $0x1908] sm:$0xff]  ;;  %v1091_v5 = vld [vmem:[%s15787_s1 + $0x2078] sm:$0xff] }
  0xa1   :  { %1887 = vmatpush.msrb.mxu2 %v167_v8  ;;  %1849 = vmatpush.msra.mxu3 %v1258_v9  ;;  %v615_v6 = vld [vmem:[%s15787_s1 + $0x1198] sm:$0xff]  ;;  %v1329_v9 = vld [vmem:[%s15787_s1 + $0x27e8] sm:$0xff] }
  0xa2   :  { %1906 = vmatpush.msra.mxu0 %v405_v11  ;;  %1830 = vmatpush.msra.mxu1 %v1020_v13  ;;  %v839_v8 = vld [vmem:[%s15787_s1 + $0x1898] sm:$0xff]  ;;  %v1077_v11 = vld [vmem:[%s15787_s1 + $0x2008] sm:$0xff] }
  0xa3   :  { %1888 = vmatpush.msrb.mxu2 %v153_v14  ;;  %1850 = vmatpush.msra.mxu3 %v1244_v15  ;;  %v601_v13 = vld [vmem:[%s15787_s1 + $0x1128] sm:$0xff]  ;;  %v1315_v15 = vld [vmem:[%s15787_s1 + $0x2778] sm:$0xff] }
  0xa4   :  { %1907 = vmatpush.msra.mxu0 %v391_v16  ;;  %1831 = vmatpush.msra.mxu1 %v1006_v17  ;;  %v825_v14 = vld [vmem:[%s15787_s1 + $0x1828] sm:$0xff]  ;;  %v1063_v16 = vld [vmem:[%s15787_s1 + $0x1f98] sm:$0xff] }
  0xa5   :  { %1889 = vmatpush.msrb.mxu2 %v139_v18  ;;  %1851 = vmatpush.msra.mxu3 %v1230_v21  ;;  %v587_v17 = vld [vmem:[%s15787_s1 + $0x10b8] sm:$0xff]  ;;  %v1301_v21 = vld [vmem:[%s15787_s1 + $0x2708] sm:$0xff] }
  0xa6   :  { %1908 = vmatpush.msra.mxu0 %v377_v23  ;;  %1832 = vmatpush.msra.mxu1 %v992_v24  ;;  %v811_v18 = vld [vmem:[%s15787_s1 + $0x17b8] sm:$0xff]  ;;  %v1049_v23 = vld [vmem:[%s15787_s1 + $0x1f28] sm:$0xff] }
  0xa7   :  { %1890 = vmatpush.msrb.mxu2 %v125_v25  ;;  %1852 = vmatpush.msra.mxu3 %v1216_v26  ;;  %v573_v24 = vld [vmem:[%s15787_s1 + $0x1048] sm:$0xff]  ;;  %v1287_v26 = vld [vmem:[%s15787_s1 + $0x2698] sm:$0xff] }
  0xa8   :  { %1909 = vmatpush.msra.mxu0 %v363_v27  ;;  %1833 = vmatpush.msra.mxu1 %v978_v28  ;;  %v797_v25 = vld [vmem:[%s15787_s1 + $0x1748] sm:$0xff]  ;;  %v1035_v27 = vld [vmem:[%s15787_s1 + $0x1eb8] sm:$0xff] }
  0xa9   :  { %1891 = vmatpush.msrb.mxu2 %v111_v30  ;;  %1853 = vmatpush.msra.mxu3 %v1202_v31  ;;  %v559_v28 = vld [vmem:[%s15787_s1 + $0xfd8] sm:$0xff]  ;;  %v1273_v31 = vld [vmem:[%s15787_s1 + $0x2628] sm:$0xff] }
  0xaa   :  { %1910 = vmatpush.msra.mxu0 %v349_v32  ;;  %1834 = vmatpush.msra.mxu1 %v964_v33  ;;  %v783_v30 = vld [vmem:[%s15787_s1 + $0x16d8] sm:$0xff]  ;;  %v1021_v32 = vld [vmem:[%s15787_s1 + $0x1e48] sm:$0xff] }
  0xab   :  { %1892 = vmatpush.msrb.mxu2 %v97_v34  ;;  %1854 = vmatpush.msra.mxu3 %v1188_v35  ;;  %v545_v33 = vld [vmem:[%s15787_s1 + $0xf68] sm:$0xff]  ;;  %v1259_v35 = vld [vmem:[%s15787_s1 + $0x25b8] sm:$0xff] }
  0xac   :  { %1911 = vmatpush.msra.mxu0 %v335_v36  ;;  %1835 = vmatpush.msra.mxu1 %v950_v37  ;;  %v769_v34 = vld [vmem:[%s15787_s1 + $0x1668] sm:$0xff]  ;;  %v1007_v36 = vld [vmem:[%s15787_s1 + $0x1dd8] sm:$0xff] }
  0xad   :  { %1893 = vmatpush.msrb.mxu2 %v83_v38  ;;  %1855 = vmatpush.msra.mxu3 %v1174_v39  ;;  %v531_v37 = vld [vmem:[%s15787_s1 + $0xef8] sm:$0xff]  ;;  %v1245_v39 = vld [vmem:[%s15787_s1 + $0x2548] sm:$0xff] }
  0xae   :  { %1912 = vmatpush.msra.mxu0 %v321_v40  ;;  %1836 = vmatmul.f32.vlgmr.msra.gmra.mxu1 %v7303_v12  ;;  %v755_v38 = vld [vmem:[%s15787_s1 + $0x15f8] sm:$0xff]  ;;  %v993_v40 = vld [vmem:[%s15787_s1 + $0x1d68] sm:$0xff] }
  0xaf   :  { %1856 = vmatmul.f32.vlgmr.msra.gmra.mxu3 %v7325_v19  ;;  %1894 = vmatpush.msrb.mxu2 %v69_v41  ;;  %v517_v41 = vld [vmem:[%s15787_s1 + $0xe88] sm:$0xff] }
  0xb0   :  { %1920 = vmatpush.msrb.mxu1 %v713_v42  ;;  %1940 = vmatpush.msrb.mxu3 %v937_v43  ;;  %v741_v42 = vld [vmem:[%s15787_s1 + $0x1588] sm:$0xff]  ;;  %v1231_v43 = vld [vmem:[%s15787_s1 + $0x24d8] sm:$0xff] }
  0xb1   :  { %1913 = vmatpush.msra.mxu0 %v307_v44  ;;  %1895 = vmatpush.msrb.mxu2 %v55_v45  ;;  %v979_v44 = vld [vmem:[%s15787_s1 + $0x1cf8] sm:$0xff] }
  0xb2   :  { %1921 = vmatpush.msrb.mxu1 %v699_v46  ;;  %1941 = vmatpush.msrb.mxu3 %v923_v47  ;;  %v503_v45 = vld [vmem:[%s15787_s1 + $0xe18] sm:$0xff]  ;;  %v1217_v47 = vld [vmem:[%s15787_s1 + $0x2468] sm:$0xff] }
  0xb3   :  { %1914 = vmatpush.msra.mxu0 %v293_v48  ;;  %1960 = vmatpush.msra.mxu2 %v1161_v49  ;;  %v727_v46 = vld [vmem:[%s15787_s1 + $0x1518] sm:$0xff]  ;;  %v965_v48 = vld [vmem:[%s15787_s1 + $0x1c88] sm:$0xff] }
  0xb4   :  { %1922 = vmatpush.msrb.mxu1 %v685_v50  ;;  %1942 = vmatpush.msrb.mxu3 %v909_v51  ;;  %v1413_v49 = vld [vmem:[%s15787_s1 + $0x2a88] sm:$0xff]  ;;  %v490_v50 = vld [vmem:[%s15787_s1 + $0xdb0] sm:$0xff]  ;;  %v1203_v51 = vld [vmem:[%s15787_s1 + $0x23f8] sm:$0xff] }
  0xb5   :  { %1915 = vmatpush.msra.mxu0 %v279_v52  ;;  %1961 = vmatpush.msra.mxu2 %v1147_v53  ;;  %v951_v52 = vld [vmem:[%s15787_s1 + $0x1c18] sm:$0xff] }
  0xb6   :  { %6739 = vmatmul.msk.f32.vlgmr.msrb.gmra.mxu0 %vm1456_vm0, %v7292_v7  ;;  %1923 = vmatpush.msrb.mxu1 %v671_v54  ;;  %v1399_v53 = vld [vmem:[%s15787_s1 + $0x2a18] sm:$0xff]  ;;  %v476_v54 = vld [vmem:[%s15787_s1 + $0xd40] sm:$0xff] }
  0xb7   :  { %1943 = vmatpush.msrb.mxu3 %v895_v55  ;;  %1980 = vmatpush.msrb.mxu0 %v1385_v56  ;;  %v1189_v55 = vld [vmem:[%s15787_s1 + $0x2388] sm:$0xff]  ;;  %v266_v56 = vld [vmem:[%s15787_s1 + $0x6b0] sm:$0xff] }
  0xb8   :  { %1962 = vmatpush.msra.mxu2 %v1133_v57  ;;  %1924 = vmatpush.msrb.mxu1 %v657_v58  ;;  %v714_v57 = vld [vmem:[%s15787_s1 + $0x14b0] sm:$0xff] }
  0xb9   :  { %1944 = vmatpush.msrb.mxu3 %v881_v59  ;;  %1981 = vmatpush.msrb.mxu0 %v1371_v60  ;;  %v462_v58 = vld [vmem:[%s15787_s1 + $0xcd0] sm:$0xff]  ;;  %v1175_v59 = vld [vmem:[%s15787_s1 + $0x2318] sm:$0xff]  ;;  %v252_v60 = vld [vmem:[%s15787_s1 + $0x640] sm:$0xff] }
  0xba   :  { %1963 = vmatpush.msra.mxu2 %v1119_v61  ;;  %1925 = vmatpush.msrb.mxu1 %v643_v62  ;;  %v700_v61 = vld [vmem:[%s15787_s1 + $0x1440] sm:$0xff] }
  0xbb   :  { %1945 = vmatpush.msrb.mxu3 %v867_v63  ;;  %1982 = vmatpush.msrb.mxu0 %v1357_v0  ;;  %v448_v62 = vld [vmem:[%s15787_s1 + $0xc60] sm:$0xff]  ;;  %v938_v63 = vld [vmem:[%s15787_s1 + $0x1bb0] sm:$0xff] }
  0xbc   :  { %1964 = vmatpush.msra.mxu2 %v1105_v1  ;;  %1926 = vmatpush.msrb.mxu1 %v629_v2  ;;  %v238_v0 = vld [vmem:[%s15787_s1 + $0x5d0] sm:$0xff] }
  0xbd   :  { %1946 = vmatpush.msrb.mxu3 %v853_v3  ;;  %1983 = vmatpush.msrb.mxu0 %v1343_v4  ;;  %v686_v1 = vld [vmem:[%s15787_s1 + $0x13d0] sm:$0xff]  ;;  %v924_v3 = vld [vmem:[%s15787_s1 + $0x1b40] sm:$0xff] }
  0xbe   :  { %1965 = vmatpush.msra.mxu2 %v1091_v5  ;;  %1927 = vmatpush.msrb.mxu1 %v615_v6  ;;  %v434_v2 = vld [vmem:[%s15787_s1 + $0xbf0] sm:$0xff]  ;;  %v224_v4 = vld [vmem:[%s15787_s1 + $0x560] sm:$0xff] }
  0xbf   :  { %1947 = vmatpush.msrb.mxu3 %v839_v8  ;;  %1984 = vmatpush.msrb.mxu0 %v1329_v9  ;;  %v672_v5 = vld [vmem:[%s15787_s1 + $0x1360] sm:$0xff]  ;;  %v910_v8 = vld [vmem:[%s15787_s1 + $0x1ad0] sm:$0xff] }
  0xc0   :  { %1966 = vmatpush.msra.mxu2 %v1077_v11  ;;  %1928 = vmatpush.msrb.mxu1 %v601_v13  ;;  %v420_v6 = vld [vmem:[%s15787_s1 + $0xb80] sm:$0xff]  ;;  %v210_v9 = vld [vmem:[%s15787_s1 + $0x4f0] sm:$0xff] }
  0xc1   :  { %1948 = vmatpush.msrb.mxu3 %v825_v14  ;;  %1985 = vmatpush.msrb.mxu0 %v1315_v15  ;;  %v658_v11 = vld [vmem:[%s15787_s1 + $0x12f0] sm:$0xff]  ;;  %v896_v14 = vld [vmem:[%s15787_s1 + $0x1a60] sm:$0xff] }
  0xc2   :  { %1967 = vmatpush.msra.mxu2 %v1063_v16  ;;  %1929 = vmatpush.msrb.mxu1 %v587_v17  ;;  %v406_v13 = vld [vmem:[%s15787_s1 + $0xb10] sm:$0xff]  ;;  %v196_v15 = vld [vmem:[%s15787_s1 + $0x480] sm:$0xff] }
  0xc3   :  { %1949 = vmatpush.msrb.mxu3 %v811_v18  ;;  %1986 = vmatpush.msrb.mxu0 %v1301_v21  ;;  %v644_v16 = vld [vmem:[%s15787_s1 + $0x1280] sm:$0xff]  ;;  %v882_v18 = vld [vmem:[%s15787_s1 + $0x19f0] sm:$0xff] }
  0xc4   :  { %1968 = vmatpush.msra.mxu2 %v1049_v23  ;;  %1930 = vmatpush.msrb.mxu1 %v573_v24  ;;  %v392_v17 = vld [vmem:[%s15787_s1 + $0xaa0] sm:$0xff]  ;;  %v182_v21 = vld [vmem:[%s15787_s1 + $0x410] sm:$0xff] }
  0xc5   :  { %1950 = vmatpush.msrb.mxu3 %v797_v25  ;;  %1987 = vmatpush.msrb.mxu0 %v1287_v26  ;;  %v630_v23 = vld [vmem:[%s15787_s1 + $0x1210] sm:$0xff]  ;;  %v868_v25 = vld [vmem:[%s15787_s1 + $0x1980] sm:$0xff] }
  0xc6   :  { %1969 = vmatpush.msra.mxu2 %v1035_v27  ;;  %1931 = vmatpush.msrb.mxu1 %v559_v28  ;;  %v378_v24 = vld [vmem:[%s15787_s1 + $0xa30] sm:$0xff]  ;;  %v168_v26 = vld [vmem:[%s15787_s1 + $0x3a0] sm:$0xff] }
  0xc7   :  { %1951 = vmatpush.msrb.mxu3 %v783_v30  ;;  %1988 = vmatpush.msrb.mxu0 %v1273_v31  ;;  %v616_v27 = vld [vmem:[%s15787_s1 + $0x11a0] sm:$0xff]  ;;  %v854_v30 = vld [vmem:[%s15787_s1 + $0x1910] sm:$0xff] }
  0xc8   :  { %1970 = vmatpush.msra.mxu2 %v1021_v32  ;;  %1932 = vmatpush.msrb.mxu1 %v545_v33  ;;  %v364_v28 = vld [vmem:[%s15787_s1 + $0x9c0] sm:$0xff]  ;;  %v154_v31 = vld [vmem:[%s15787_s1 + $0x330] sm:$0xff] }
  0xc9   :  { %1952 = vmatpush.msrb.mxu3 %v769_v34  ;;  %1989 = vmatpush.msrb.mxu0 %v1259_v35  ;;  %v602_v32 = vld [vmem:[%s15787_s1 + $0x1130] sm:$0xff]  ;;  %v840_v34 = vld [vmem:[%s15787_s1 + $0x18a0] sm:$0xff] }
  0xca   :  { %1971 = vmatpush.msra.mxu2 %v1007_v36  ;;  %1933 = vmatpush.msrb.mxu1 %v531_v37  ;;  %v350_v33 = vld [vmem:[%s15787_s1 + $0x950] sm:$0xff]  ;;  %v140_v35 = vld [vmem:[%s15787_s1 + $0x2c0] sm:$0xff] }
  0xcb   :  { %1953 = vmatpush.msrb.mxu3 %v755_v38  ;;  %1990 = vmatpush.msrb.mxu0 %v1245_v39  ;;  %v588_v36 = vld [vmem:[%s15787_s1 + $0x10c0] sm:$0xff]  ;;  %v826_v38 = vld [vmem:[%s15787_s1 + $0x1830] sm:$0xff] }
  0xcc   :  { %1972 = vmatpush.msra.mxu2 %v993_v40  ;;  %1934 = vmatpush.msrb.mxu1 %v517_v41  ;;  %v336_v37 = vld [vmem:[%s15787_s1 + $0x8e0] sm:$0xff]  ;;  %v126_v39 = vld [vmem:[%s15787_s1 + $0x250] sm:$0xff] }
  0xcd   :  { %1896 = vmatmul.f32.vlgmr.msrb.gmra.mxu2 %v7139_v20  ;;  %1954 = vmatpush.msrb.mxu3 %v741_v42  ;;  %v574_v40 = vld [vmem:[%s15787_s1 + $0x1050] sm:$0xff]  ;;  %v812_v42 = vld [vmem:[%s15787_s1 + $0x17c0] sm:$0xff] }
  0xce   :  { %1991 = vmatpush.msrb.mxu0 %v1231_v43  ;;  %1973 = vmatpush.msra.mxu2 %v979_v44  ;;  %v322_v41 = vld [vmem:[%s15787_s1 + $0x870] sm:$0xff]  ;;  %v112_v43 = vld [vmem:[%s15787_s1 + $0x1e0] sm:$0xff] }
  0xcf   :  { %1935 = vmatpush.msrb.mxu1 %v503_v45  ;;  %1955 = vmatpush.msrb.mxu3 %v727_v46  ;;  %v560_v44 = vld [vmem:[%s15787_s1 + $0xfe0] sm:$0xff]  ;;  %v798_v46 = vld [vmem:[%s15787_s1 + $0x1750] sm:$0xff] }
  0xd0   :  { %1992 = vmatpush.msrb.mxu0 %v1217_v47  ;;  %1974 = vmatpush.msra.mxu2 %v965_v48  ;;  %v308_v45 = vld [vmem:[%s15787_s1 + $0x800] sm:$0xff]  ;;  %v98_v47 = vld [vmem:[%s15787_s1 + $0x170] sm:$0xff] }
  0xd1   :  { %2014 = vmatpush.msra.mxu3 %v1413_v49  ;;  %2040 = vmatpush.msra.mxu1 %v490_v50  ;;  %v546_v48 = vld [vmem:[%s15787_s1 + $0xf70] sm:$0xff]  ;;  %v784_v50 = vld [vmem:[%s15787_s1 + $0x16e0] sm:$0xff] }
  0xd2   :  { %1956 = vmatmul.f32.vlgmr.msrb.gmra.mxu3 %v7144_v22  ;;  %1993 = vmatpush.msrb.mxu0 %v1203_v51  ;;  %v294_v49 = vld [vmem:[%s15787_s1 + $0x790] sm:$0xff]  ;;  %v84_v51 = vld [vmem:[%s15787_s1 + $0x100] sm:$0xff] }
  0xd3   :  { %1975 = vmatpush.msra.mxu2 %v951_v52  ;;  %2015 = vmatpush.msra.mxu3 %v1399_v53  ;;  %v532_v52 = vld [vmem:[%s15787_s1 + $0xf00] sm:$0xff] }
  0xd4   :  { %2041 = vmatpush.msra.mxu1 %v476_v54  ;;  %1994 = vmatpush.msrb.mxu0 %v1189_v55  ;;  %v280_v53 = vld [vmem:[%s15787_s1 + $0x720] sm:$0xff]  ;;  %v770_v54 = vld [vmem:[%s15787_s1 + $0x1670] sm:$0xff] }
  0xd5   :  { %2020 = vmatpush.msrb.mxu3 %v266_v56  ;;  %2060 = vmatpush.msrb.mxu2 %v714_v57  ;;  %v70_v55 = vld [vmem:[%s15787_s1 + $0x90] sm:$0xff] }
  0xd6   :  { %2042 = vmatpush.msra.mxu1 %v462_v58  ;;  %1916 = vmatmul.f32.vlgmr.msra.gmra.mxu0 %v7165_v29  ;;  %v518_v56 = vld [vmem:[%s15787_s1 + $0xe90] sm:$0xff]  ;;  %v756_v58 = vld [vmem:[%s15787_s1 + $0x1600] sm:$0xff] }
  0xd7   :  { %1976 = vmatmul.f32.vlgmr.msra.gmra.mxu2 %v7303_v12  ;;  %1995 = vmatpush.msrb.mxu0 %v1175_v59  ;;  %v1386_v57 = vld [vmem:[%s15787_s1 + $0x29b0] sm:$0xff]  ;;  %v56_v59 = vld [vmem:[%s15787_s1 + $0x20] sm:$0xff] }
  0xd8   :  { %2021 = vmatpush.msrb.mxu3 %v252_v60  ;;  %2061 = vmatpush.msrb.mxu2 %v700_v61  ;;  %v504_v60 = vld [vmem:[%s15787_s1 + $0xe20] sm:$0xff] }
  0xd9   :  { %2043 = vmatpush.msra.mxu1 %v448_v62  ;;  %2080 = vmatpush.msra.mxu0 %v938_v63  ;;  %v1372_v61 = vld [vmem:[%s15787_s1 + $0x2940] sm:$0xff]  ;;  %v742_v62 = vld [vmem:[%s15787_s1 + $0x1590] sm:$0xff] }
  0xda   :  { %1936 = vmatmul.f32.vlgmr.msrb.gmra.mxu1 %v7109_v10  ;;  %2022 = vmatpush.msrb.mxu3 %v238_v0  ;;  %v1162_v63 = vld [vmem:[%s15787_s1 + $0x22b0] sm:$0xff] }
  0xdb   :  { %2062 = vmatpush.msrb.mxu2 %v686_v1  ;;  %2044 = vmatpush.msra.mxu1 %v434_v2  ;;  %v1414_v0 = vld [vmem:[%s15787_s1 + $0x2a90] sm:$0xff]  ;;  %v728_v2 = vld [vmem:[%s15787_s1 + $0x1520] sm:$0xff] }
  0xdc   :  { %2081 = vmatpush.msra.mxu0 %v924_v3  ;;  %6740 = vmatmul.msk.f32.vlgmr.msra.gmra.mxu3 %vm1456_vm0, %v7292_v7  ;;  %v1358_v1 = vld [vmem:[%s15787_s1 + $0x28d0] sm:$0xff]  ;;  %v1148_v3 = vld [vmem:[%s15787_s1 + $0x2240] sm:$0xff] }
  0xdd   :  { %2023 = vmatpush.msrb.mxu3 %v224_v4  ;;  %2063 = vmatpush.msrb.mxu2 %v672_v5  ;;  %v1400_v4 = vld [vmem:[%s15787_s1 + $0x2a20] sm:$0xff] }
  0xde   :  { %2045 = vmatpush.msra.mxu1 %v420_v6  ;;  %2082 = vmatpush.msra.mxu0 %v910_v8  ;;  %v1344_v5 = vld [vmem:[%s15787_s1 + $0x2860] sm:$0xff]  ;;  %v267_v6 = vld [vmem:[%s15787_s1 + $0x6b8] sm:$0xff] }
  0xdf   :  { %2024 = vmatpush.msrb.mxu3 %v210_v9  ;;  %2064 = vmatpush.msrb.mxu2 %v658_v11  ;;  %v491_v8 = vld [vmem:[%s15787_s1 + $0xdb8] sm:$0xff]  ;;  %v1134_v9 = vld [vmem:[%s15787_s1 + $0x21d0] sm:$0xff] }
  0xe0   :  { %2046 = vmatpush.msra.mxu1 %v406_v13  ;;  %2083 = vmatpush.msra.mxu0 %v896_v14  ;;  %v1330_v11 = vld [vmem:[%s15787_s1 + $0x27f0] sm:$0xff]  ;;  %v253_v13 = vld [vmem:[%s15787_s1 + $0x648] sm:$0xff] }
  0xe1   :  { %1996 = vmatmul.f32.vlgmr.msrb.gmra.mxu0 %v7325_v19  ;;  %2025 = vmatpush.msrb.mxu3 %v196_v15  ;;  %v477_v14 = vld [vmem:[%s15787_s1 + $0xd48] sm:$0xff]  ;;  %v1120_v15 = vld [vmem:[%s15787_s1 + $0x2160] sm:$0xff] }
  0xe2   :  { %2065 = vmatpush.msrb.mxu2 %v644_v16  ;;  %2047 = vmatpush.msra.mxu1 %v392_v17  ;;  %v1316_v16 = vld [vmem:[%s15787_s1 + $0x2780] sm:$0xff]  ;;  %v239_v17 = vld [vmem:[%s15787_s1 + $0x5d8] sm:$0xff] }
  0xe3   :  { %2084 = vmatpush.msra.mxu0 %v882_v18  ;;  %2026 = vmatpush.msrb.mxu3 %v182_v21  ;;  %v463_v18 = vld [vmem:[%s15787_s1 + $0xcd8] sm:$0xff]  ;;  %v1106_v21 = vld [vmem:[%s15787_s1 + $0x20f0] sm:$0xff] }
  0xe4   :  { %2066 = vmatpush.msrb.mxu2 %v630_v23  ;;  %2048 = vmatpush.msra.mxu1 %v378_v24  ;;  %v1302_v23 = vld [vmem:[%s15787_s1 + $0x2710] sm:$0xff]  ;;  %v225_v24 = vld [vmem:[%s15787_s1 + $0x568] sm:$0xff] }
  0xe5   :  { %2085 = vmatpush.msra.mxu0 %v868_v25  ;;  %2027 = vmatpush.msrb.mxu3 %v168_v26  ;;  %v449_v25 = vld [vmem:[%s15787_s1 + $0xc68] sm:$0xff]  ;;  %v1092_v26 = vld [vmem:[%s15787_s1 + $0x2080] sm:$0xff] }
  0xe6   :  { %2067 = vmatpush.msrb.mxu2 %v616_v27  ;;  %2049 = vmatpush.msra.mxu1 %v364_v28  ;;  %v1288_v27 = vld [vmem:[%s15787_s1 + $0x26a0] sm:$0xff]  ;;  %v211_v28 = vld [vmem:[%s15787_s1 + $0x4f8] sm:$0xff] }
  0xe7   :  { %2086 = vmatpush.msra.mxu0 %v854_v30  ;;  %2028 = vmatpush.msrb.mxu3 %v154_v31  ;;  %v435_v30 = vld [vmem:[%s15787_s1 + $0xbf8] sm:$0xff]  ;;  %v1078_v31 = vld [vmem:[%s15787_s1 + $0x2010] sm:$0xff] }
  0xe8   :  { %2068 = vmatpush.msrb.mxu2 %v602_v32  ;;  %2050 = vmatpush.msra.mxu1 %v350_v33  ;;  %v1274_v32 = vld [vmem:[%s15787_s1 + $0x2630] sm:$0xff]  ;;  %v197_v33 = vld [vmem:[%s15787_s1 + $0x488] sm:$0xff] }
  0xe9   :  { %2087 = vmatpush.msra.mxu0 %v840_v34  ;;  %2029 = vmatpush.msrb.mxu3 %v140_v35  ;;  %v421_v34 = vld [vmem:[%s15787_s1 + $0xb88] sm:$0xff]  ;;  %v1064_v35 = vld [vmem:[%s15787_s1 + $0x1fa0] sm:$0xff] }
  0xea   :  { %2069 = vmatpush.msrb.mxu2 %v588_v36  ;;  %2051 = vmatpush.msra.mxu1 %v336_v37  ;;  %v1260_v36 = vld [vmem:[%s15787_s1 + $0x25c0] sm:$0xff]  ;;  %v183_v37 = vld [vmem:[%s15787_s1 + $0x418] sm:$0xff] }
  0xeb   :  { %2088 = vmatpush.msra.mxu0 %v826_v38  ;;  %2030 = vmatpush.msrb.mxu3 %v126_v39  ;;  %v407_v38 = vld [vmem:[%s15787_s1 + $0xb18] sm:$0xff]  ;;  %v1050_v39 = vld [vmem:[%s15787_s1 + $0x1f30] sm:$0xff] }
  0xec   :  { %2070 = vmatpush.msrb.mxu2 %v574_v40  ;;  %2052 = vmatpush.msra.mxu1 %v322_v41  ;;  %v1246_v40 = vld [vmem:[%s15787_s1 + $0x2550] sm:$0xff]  ;;  %v169_v41 = vld [vmem:[%s15787_s1 + $0x3a8] sm:$0xff] }
  0xed   :  { %2089 = vmatpush.msra.mxu0 %v812_v42  ;;  %2031 = vmatpush.msrb.mxu3 %v112_v43  ;;  %v393_v42 = vld [vmem:[%s15787_s1 + $0xaa8] sm:$0xff]  ;;  %v1036_v43 = vld [vmem:[%s15787_s1 + $0x1ec0] sm:$0xff] }
  0xee   :  { %2071 = vmatpush.msrb.mxu2 %v560_v44  ;;  %2053 = vmatpush.msra.mxu1 %v308_v45  ;;  %v1232_v44 = vld [vmem:[%s15787_s1 + $0x24e0] sm:$0xff]  ;;  %v155_v45 = vld [vmem:[%s15787_s1 + $0x338] sm:$0xff] }
  0xef   :  { %2090 = vmatpush.msra.mxu0 %v798_v46  ;;  %2032 = vmatpush.msrb.mxu3 %v98_v47  ;;  %v379_v46 = vld [vmem:[%s15787_s1 + $0xa38] sm:$0xff]  ;;  %v1022_v47 = vld [vmem:[%s15787_s1 + $0x1e50] sm:$0xff] }
  0xf0   :  { %2072 = vmatpush.msrb.mxu2 %v546_v48  ;;  %2054 = vmatpush.msra.mxu1 %v294_v49  ;;  %v1218_v48 = vld [vmem:[%s15787_s1 + $0x2470] sm:$0xff]  ;;  %v141_v49 = vld [vmem:[%s15787_s1 + $0x2c8] sm:$0xff] }
  0xf1   :  { %2091 = vmatpush.msra.mxu0 %v784_v50  ;;  %2033 = vmatpush.msrb.mxu3 %v84_v51  ;;  %v365_v50 = vld [vmem:[%s15787_s1 + $0x9c8] sm:$0xff]  ;;  %v1008_v51 = vld [vmem:[%s15787_s1 + $0x1de0] sm:$0xff] }
  0xf2   :  { %2073 = vmatpush.msrb.mxu2 %v532_v52  ;;  %2055 = vmatpush.msra.mxu1 %v280_v53  ;;  %v1204_v52 = vld [vmem:[%s15787_s1 + $0x2400] sm:$0xff]  ;;  %v127_v53 = vld [vmem:[%s15787_s1 + $0x258] sm:$0xff] }
  0xf3   :  { %2092 = vmatpush.msra.mxu0 %v770_v54  ;;  %2034 = vmatpush.msrb.mxu3 %v70_v55  ;;  %v351_v54 = vld [vmem:[%s15787_s1 + $0x958] sm:$0xff]  ;;  %v994_v55 = vld [vmem:[%s15787_s1 + $0x1d70] sm:$0xff] }
  0xf4   :  { %2074 = vmatpush.msrb.mxu2 %v518_v56  ;;  %2120 = vmatpush.msrb.mxu1 %v1386_v57  ;;  %v1190_v56 = vld [vmem:[%s15787_s1 + $0x2390] sm:$0xff]  ;;  %v113_v57 = vld [vmem:[%s15787_s1 + $0x1e8] sm:$0xff] }
  0xf5   :  { %2093 = vmatpush.msra.mxu0 %v756_v58  ;;  %2035 = vmatpush.msrb.mxu3 %v56_v59  ;;  %v337_v58 = vld [vmem:[%s15787_s1 + $0x8e8] sm:$0xff]  ;;  %v980_v59 = vld [vmem:[%s15787_s1 + $0x1d00] sm:$0xff] }
  0xf6   :  { %2075 = vmatpush.msrb.mxu2 %v504_v60  ;;  %2121 = vmatpush.msrb.mxu1 %v1372_v61  ;;  %v1176_v60 = vld [vmem:[%s15787_s1 + $0x2320] sm:$0xff]  ;;  %v99_v61 = vld [vmem:[%s15787_s1 + $0x178] sm:$0xff] }
  0xf7   :  { %2094 = vmatpush.msra.mxu0 %v742_v62  ;;  %2100 = vmatpush.msra.mxu3 %v1162_v63  ;;  %v323_v62 = vld [vmem:[%s15787_s1 + $0x878] sm:$0xff]  ;;  %v966_v63 = vld [vmem:[%s15787_s1 + $0x1c90] sm:$0xff] }
  0xf8   :  { %2154 = vmatpush.msra.mxu2 %v1414_v0  ;;  %2122 = vmatpush.msrb.mxu1 %v1358_v1  ;;  %v939_v0 = vld [vmem:[%s15787_s1 + $0x1bb8] sm:$0xff]  ;;  %v85_v1 = vld [vmem:[%s15787_s1 + $0x108] sm:$0xff] }
  0xf9   :  { %2036 = vmatmul.f32.vlgmr.msrb.gmra.mxu3 %v7139_v20  ;;  %2095 = vmatpush.msra.mxu0 %v728_v2  ;;  %v309_v2 = vld [vmem:[%s15787_s1 + $0x808] sm:$0xff] }
  0xfa   :  { %2101 = vmatpush.msra.mxu3 %v1148_v3  ;;  %2155 = vmatpush.msra.mxu2 %v1400_v4  ;;  %v952_v3 = vld [vmem:[%s15787_s1 + $0x1c20] sm:$0xff]  ;;  %v925_v4 = vld [vmem:[%s15787_s1 + $0x1b48] sm:$0xff] }
  0xfb   :  { %2076 = vmatmul.f32.vlgmr.msrb.gmra.mxu2 %v7109_v10  ;;  %2123 = vmatpush.msrb.mxu1 %v1344_v5  ;;  %v71_v5 = vld [vmem:[%s15787_s1 + $0x98] sm:$0xff] }
  0xfc   :  { %2160 = vmatpush.msrb.mxu0 %v267_v6  ;;  %2180 = vmatpush.msrb.mxu2 %v491_v8  ;;  %v295_v6 = vld [vmem:[%s15787_s1 + $0x798] sm:$0xff] }
  0xfd   :  { %2102 = vmatpush.msra.mxu3 %v1134_v9  ;;  %2124 = vmatpush.msrb.mxu1 %v1330_v11  ;;  %v715_v8 = vld [vmem:[%s15787_s1 + $0x14b8] sm:$0xff]  ;;  %v57_v11 = vld [vmem:[%s15787_s1 + $0x28] sm:$0xff] }
  0xfe   :  { %2161 = vmatpush.msrb.mxu0 %v253_v13  ;;  %2181 = vmatpush.msrb.mxu2 %v477_v14  ;;  %v911_v9 = vld [vmem:[%s15787_s1 + $0x1ad8] sm:$0xff]  ;;  %v281_v13 = vld [vmem:[%s15787_s1 + $0x728] sm:$0xff] }
  0xff   :  { %2103 = vmatpush.msra.mxu3 %v1120_v15  ;;  %2125 = vmatpush.msrb.mxu1 %v1316_v16  ;;  %v701_v14 = vld [vmem:[%s15787_s1 + $0x1448] sm:$0xff]  ;;  %v1163_v16 = vld [vmem:[%s15787_s1 + $0x22b8] sm:$0xff] }
 0x100   :  { %2162 = vmatpush.msrb.mxu0 %v239_v17  ;;  %2182 = vmatpush.msrb.mxu2 %v463_v18  ;;  %v897_v15 = vld [vmem:[%s15787_s1 + $0x1a68] sm:$0xff]  ;;  %v1387_v17 = vld [vmem:[%s15787_s1 + $0x29b8] sm:$0xff] }
 0x101   :  { %2104 = vmatpush.msra.mxu3 %v1106_v21  ;;  %2126 = vmatpush.msrb.mxu1 %v1302_v23  ;;  %v687_v18 = vld [vmem:[%s15787_s1 + $0x13d8] sm:$0xff]  ;;  %v1149_v23 = vld [vmem:[%s15787_s1 + $0x2248] sm:$0xff] }
 0x102   :  { %2163 = vmatpush.msrb.mxu0 %v225_v24  ;;  %2183 = vmatpush.msrb.mxu2 %v449_v25  ;;  %v883_v21 = vld [vmem:[%s15787_s1 + $0x19f8] sm:$0xff]  ;;  %v1373_v24 = vld [vmem:[%s15787_s1 + $0x2948] sm:$0xff] }
 0x103   :  { %2056 = vmatmul.f32.vlgmr.msra.gmra.mxu1 %v7165_v29  ;;  %2105 = vmatpush.msra.mxu3 %v1092_v26  ;;  %v673_v25 = vld [vmem:[%s15787_s1 + $0x1368] sm:$0xff] }
 0x104   :  { %2127 = vmatpush.msrb.mxu1 %v1288_v27  ;;  %2164 = vmatpush.msrb.mxu0 %v211_v28  ;;  %v869_v26 = vld [vmem:[%s15787_s1 + $0x1988] sm:$0xff]  ;;  %v1135_v27 = vld [vmem:[%s15787_s1 + $0x21d8] sm:$0xff] }
 0x105   :  { %2184 = vmatpush.msrb.mxu2 %v435_v30  ;;  %2106 = vmatpush.msra.mxu3 %v1078_v31  ;;  %v1359_v28 = vld [vmem:[%s15787_s1 + $0x28d8] sm:$0xff] }
 0x106   :  { %2128 = vmatpush.msrb.mxu1 %v1274_v32  ;;  %2165 = vmatpush.msrb.mxu0 %v197_v33  ;;  %v659_v30 = vld [vmem:[%s15787_s1 + $0x12f8] sm:$0xff]  ;;  %v1121_v32 = vld [vmem:[%s15787_s1 + $0x2168] sm:$0xff] }
 0x107   :  { %2185 = vmatpush.msrb.mxu2 %v421_v34  ;;  %2096 = vmatmul.f32.vlgmr.msra.gmra.mxu0 %v7144_v22  ;;  %v855_v31 = vld [vmem:[%s15787_s1 + $0x1918] sm:$0xff]  ;;  %v1345_v33 = vld [vmem:[%s15787_s1 + $0x2868] sm:$0xff] }
 0x108   :  { %2107 = vmatpush.msra.mxu3 %v1064_v35  ;;  %2129 = vmatpush.msrb.mxu1 %v1260_v36  ;;  %v645_v34 = vld [vmem:[%s15787_s1 + $0x1288] sm:$0xff]  ;;  %v1107_v36 = vld [vmem:[%s15787_s1 + $0x20f8] sm:$0xff] }
 0x109   :  { %2166 = vmatpush.msrb.mxu0 %v183_v37  ;;  %2186 = vmatpush.msrb.mxu2 %v407_v38  ;;  %v841_v35 = vld [vmem:[%s15787_s1 + $0x18a8] sm:$0xff]  ;;  %v1331_v37 = vld [vmem:[%s15787_s1 + $0x27f8] sm:$0xff] }
 0x10a   :  { %2108 = vmatpush.msra.mxu3 %v1050_v39  ;;  %2130 = vmatpush.msrb.mxu1 %v1246_v40  ;;  %v631_v38 = vld [vmem:[%s15787_s1 + $0x1218] sm:$0xff]  ;;  %v1093_v40 = vld [vmem:[%s15787_s1 + $0x2088] sm:$0xff] }
 0x10b   :  { %2167 = vmatpush.msrb.mxu0 %v169_v41  ;;  %2187 = vmatpush.msrb.mxu2 %v393_v42  ;;  %v827_v39 = vld [vmem:[%s15787_s1 + $0x1838] sm:$0xff]  ;;  %v1317_v41 = vld [vmem:[%s15787_s1 + $0x2788] sm:$0xff] }
 0x10c   :  { %2109 = vmatpush.msra.mxu3 %v1036_v43  ;;  %2131 = vmatpush.msrb.mxu1 %v1232_v44  ;;  %v617_v42 = vld [vmem:[%s15787_s1 + $0x11a8] sm:$0xff]  ;;  %v1079_v44 = vld [vmem:[%s15787_s1 + $0x2018] sm:$0xff] }
 0x10d   :  { %2168 = vmatpush.msrb.mxu0 %v155_v45  ;;  %2188 = vmatpush.msrb.mxu2 %v379_v46  ;;  %v813_v43 = vld [vmem:[%s15787_s1 + $0x17c8] sm:$0xff]  ;;  %v1303_v45 = vld [vmem:[%s15787_s1 + $0x2718] sm:$0xff] }
 0x10e   :  { %2110 = vmatpush.msra.mxu3 %v1022_v47  ;;  %2132 = vmatpush.msrb.mxu1 %v1218_v48  ;;  %v603_v46 = vld [vmem:[%s15787_s1 + $0x1138] sm:$0xff]  ;;  %v1065_v48 = vld [vmem:[%s15787_s1 + $0x1fa8] sm:$0xff] }
 0x10f   :  { %2169 = vmatpush.msrb.mxu0 %v141_v49  ;;  %2189 = vmatpush.msrb.mxu2 %v365_v50  ;;  %v799_v47 = vld [vmem:[%s15787_s1 + $0x1758] sm:$0xff]  ;;  %v1289_v49 = vld [vmem:[%s15787_s1 + $0x26a8] sm:$0xff] }
 0x110   :  { %2111 = vmatpush.msra.mxu3 %v1008_v51  ;;  %2133 = vmatpush.msrb.mxu1 %v1204_v52  ;;  %v589_v50 = vld [vmem:[%s15787_s1 + $0x10c8] sm:$0xff]  ;;  %v1051_v52 = vld [vmem:[%s15787_s1 + $0x1f38] sm:$0xff] }
 0x111   :  { %2170 = vmatpush.msrb.mxu0 %v127_v53  ;;  %2190 = vmatpush.msrb.mxu2 %v351_v54  ;;  %v785_v51 = vld [vmem:[%s15787_s1 + $0x16e8] sm:$0xff]  ;;  %v1275_v53 = vld [vmem:[%s15787_s1 + $0x2638] sm:$0xff] }
 0x112   :  { %2112 = vmatpush.msra.mxu3 %v994_v55  ;;  %2134 = vmatpush.msrb.mxu1 %v1190_v56  ;;  %v575_v54 = vld [vmem:[%s15787_s1 + $0x1058] sm:$0xff]  ;;  %v1037_v56 = vld [vmem:[%s15787_s1 + $0x1ec8] sm:$0xff] }
 0x113   :  { %2171 = vmatpush.msrb.mxu0 %v113_v57  ;;  %2191 = vmatpush.msrb.mxu2 %v337_v58  ;;  %v771_v55 = vld [vmem:[%s15787_s1 + $0x1678] sm:$0xff]  ;;  %v1261_v57 = vld [vmem:[%s15787_s1 + $0x25c8] sm:$0xff] }
 0x114   :  { %2113 = vmatpush.msra.mxu3 %v980_v59  ;;  %2135 = vmatpush.msrb.mxu1 %v1176_v60  ;;  %v561_v58 = vld [vmem:[%s15787_s1 + $0xfe8] sm:$0xff]  ;;  %v1023_v60 = vld [vmem:[%s15787_s1 + $0x1e58] sm:$0xff] }
 0x115   :  { %2172 = vmatpush.msrb.mxu0 %v99_v61  ;;  %2192 = vmatpush.msrb.mxu2 %v323_v62  ;;  %v757_v59 = vld [vmem:[%s15787_s1 + $0x1608] sm:$0xff]  ;;  %v1247_v61 = vld [vmem:[%s15787_s1 + $0x2558] sm:$0xff] }
 0x116   :  { %2114 = vmatpush.msra.mxu3 %v966_v63  ;;  %2220 = vmatpush.msra.mxu1 %v939_v0  ;;  %v547_v62 = vld [vmem:[%s15787_s1 + $0xf78] sm:$0xff]  ;;  %v1009_v0 = vld [vmem:[%s15787_s1 + $0x1de8] sm:$0xff] }
 0x117   :  { %2173 = vmatpush.msrb.mxu0 %v85_v1  ;;  %2193 = vmatpush.msrb.mxu2 %v309_v2  ;;  %v743_v63 = vld [vmem:[%s15787_s1 + $0x1598] sm:$0xff]  ;;  %v1233_v1 = vld [vmem:[%s15787_s1 + $0x24e8] sm:$0xff] }
 0x118   :  { %2115 = vmatpush.msra.mxu3 %v952_v3  ;;  %2221 = vmatpush.msra.mxu1 %v925_v4  ;;  %v533_v2 = vld [vmem:[%s15787_s1 + $0xf08] sm:$0xff]  ;;  %v995_v4 = vld [vmem:[%s15787_s1 + $0x1d78] sm:$0xff] }
 0x119   :  { %2116 = vmatmul.f32.vlgmr.msra.gmra.mxu3 %v7303_v12  ;;  %2174 = vmatpush.msrb.mxu0 %v71_v5  ;;  %v729_v3 = vld [vmem:[%s15787_s1 + $0x1528] sm:$0xff]  ;;  %v1219_v5 = vld [vmem:[%s15787_s1 + $0x2478] sm:$0xff] }
 0x11a   :  { %2194 = vmatpush.msrb.mxu2 %v295_v6  ;;  %2200 = vmatpush.msrb.mxu3 %v715_v8  ;;  %v519_v6 = vld [vmem:[%s15787_s1 + $0xe98] sm:$0xff]  ;;  %v268_v8 = vld [vmem:[%s15787_s1 + $0x6c0] sm:$0xff] }
 0x11b   :  { %2222 = vmatpush.msra.mxu1 %v911_v9  ;;  %2175 = vmatpush.msrb.mxu0 %v57_v11  ;;  %v981_v9 = vld [vmem:[%s15787_s1 + $0x1d08] sm:$0xff] }
 0x11c   :  { %2195 = vmatpush.msrb.mxu2 %v281_v13  ;;  %2201 = vmatpush.msrb.mxu3 %v701_v14  ;;  %v1205_v11 = vld [vmem:[%s15787_s1 + $0x2408] sm:$0xff]  ;;  %v254_v14 = vld [vmem:[%s15787_s1 + $0x650] sm:$0xff] }
 0x11d   :  { %6741 = vmatmul.msk.f32.vlgmr.msra.gmra.mxu2 %vm1456_vm0, %v7292_v7  ;;  %2223 = vmatpush.msra.mxu1 %v897_v15  ;;  %v505_v13 = vld [vmem:[%s15787_s1 + $0xe28] sm:$0xff]  ;;  %v967_v15 = vld [vmem:[%s15787_s1 + $0x1c98] sm:$0xff] }
 0x11e   :  { %2240 = vmatpush.msra.mxu0 %v1163_v16  ;;  %2260 = vmatpush.msra.mxu2 %v1387_v17  ;;  %v1191_v16 = vld [vmem:[%s15787_s1 + $0x2398] sm:$0xff] }
 0x11f   :  { %2202 = vmatpush.msrb.mxu3 %v687_v18  ;;  %2224 = vmatpush.msra.mxu1 %v883_v21  ;;  %v1415_v17 = vld [vmem:[%s15787_s1 + $0x2a98] sm:$0xff]  ;;  %v240_v18 = vld [vmem:[%s15787_s1 + $0x5e0] sm:$0xff]  ;;  %v953_v21 = vld [vmem:[%s15787_s1 + $0x1c28] sm:$0xff] }
 0x120   :  { %2241 = vmatpush.msra.mxu0 %v1149_v23  ;;  %2261 = vmatpush.msra.mxu2 %v1373_v24  ;;  %v1177_v23 = vld [vmem:[%s15787_s1 + $0x2328] sm:$0xff] }
 0x121   :  { %2203 = vmatpush.msrb.mxu3 %v673_v25  ;;  %2225 = vmatpush.msra.mxu1 %v869_v26  ;;  %v1401_v24 = vld [vmem:[%s15787_s1 + $0x2a28] sm:$0xff]  ;;  %v226_v25 = vld [vmem:[%s15787_s1 + $0x570] sm:$0xff]  ;;  %v492_v26 = vld [vmem:[%s15787_s1 + $0xdc0] sm:$0xff] }
 0x122   :  { %2242 = vmatpush.msra.mxu0 %v1135_v27  ;;  %2262 = vmatpush.msra.mxu2 %v1359_v28  ;;  %v716_v27 = vld [vmem:[%s15787_s1 + $0x14c0] sm:$0xff] }
 0x123   :  { %2136 = vmatmul.f32.vlgmr.msrb.gmra.mxu1 %v7325_v19  ;;  %2204 = vmatpush.msrb.mxu3 %v659_v30  ;;  %v940_v28 = vld [vmem:[%s15787_s1 + $0x1bc0] sm:$0xff] }
 0x124   :  { %2226 = vmatpush.msra.mxu1 %v855_v31  ;;  %2243 = vmatpush.msra.mxu0 %v1121_v32  ;;  %v212_v30 = vld [vmem:[%s15787_s1 + $0x500] sm:$0xff]  ;;  %v478_v31 = vld [vmem:[%s15787_s1 + $0xd50] sm:$0xff] }
 0x125   :  { %2263 = vmatpush.msra.mxu2 %v1345_v33  ;;  %2205 = vmatpush.msrb.mxu3 %v645_v34  ;;  %v702_v32 = vld [vmem:[%s15787_s1 + $0x1450] sm:$0xff] }
 0x126   :  { %2227 = vmatpush.msra.mxu1 %v841_v35  ;;  %2244 = vmatpush.msra.mxu0 %v1107_v36  ;;  %v926_v33 = vld [vmem:[%s15787_s1 + $0x1b50] sm:$0xff]  ;;  %v464_v35 = vld [vmem:[%s15787_s1 + $0xce0] sm:$0xff] }
 0x127   :  { %2264 = vmatpush.msra.mxu2 %v1331_v37  ;;  %2206 = vmatpush.msrb.mxu3 %v631_v38  ;;  %v198_v34 = vld [vmem:[%s15787_s1 + $0x490] sm:$0xff]  ;;  %v688_v36 = vld [vmem:[%s15787_s1 + $0x13e0] sm:$0xff] }
 0x128   :  { %2228 = vmatpush.msra.mxu1 %v827_v39  ;;  %2245 = vmatpush.msra.mxu0 %v1093_v40  ;;  %v912_v37 = vld [vmem:[%s15787_s1 + $0x1ae0] sm:$0xff]  ;;  %v450_v39 = vld [vmem:[%s15787_s1 + $0xc70] sm:$0xff] }
 0x129   :  { %2265 = vmatpush.msra.mxu2 %v1317_v41  ;;  %2207 = vmatpush.msrb.mxu3 %v617_v42  ;;  %v184_v38 = vld [vmem:[%s15787_s1 + $0x420] sm:$0xff]  ;;  %v674_v40 = vld [vmem:[%s15787_s1 + $0x1370] sm:$0xff] }
 0x12a   :  { %2229 = vmatpush.msra.mxu1 %v813_v43  ;;  %2246 = vmatpush.msra.mxu0 %v1079_v44  ;;  %v898_v41 = vld [vmem:[%s15787_s1 + $0x1a70] sm:$0xff]  ;;  %v436_v43 = vld [vmem:[%s15787_s1 + $0xc00] sm:$0xff] }
 0x12b   :  { %2266 = vmatpush.msra.mxu2 %v1303_v45  ;;  %2208 = vmatpush.msrb.mxu3 %v603_v46  ;;  %v170_v42 = vld [vmem:[%s15787_s1 + $0x3b0] sm:$0xff]  ;;  %v660_v44 = vld [vmem:[%s15787_s1 + $0x1300] sm:$0xff] }
 0x12c   :  { %2230 = vmatpush.msra.mxu1 %v799_v47  ;;  %2247 = vmatpush.msra.mxu0 %v1065_v48  ;;  %v884_v45 = vld [vmem:[%s15787_s1 + $0x1a00] sm:$0xff]  ;;  %v422_v47 = vld [vmem:[%s15787_s1 + $0xb90] sm:$0xff] }
 0x12d   :  { %2267 = vmatpush.msra.mxu2 %v1289_v49  ;;  %2209 = vmatpush.msrb.mxu3 %v589_v50  ;;  %v156_v46 = vld [vmem:[%s15787_s1 + $0x340] sm:$0xff]  ;;  %v646_v48 = vld [vmem:[%s15787_s1 + $0x1290] sm:$0xff] }
 0x12e   :  { %2231 = vmatpush.msra.mxu1 %v785_v51  ;;  %2248 = vmatpush.msra.mxu0 %v1051_v52  ;;  %v870_v49 = vld [vmem:[%s15787_s1 + $0x1990] sm:$0xff]  ;;  %v408_v51 = vld [vmem:[%s15787_s1 + $0xb20] sm:$0xff] }
 0x12f   :  { %2268 = vmatpush.msra.mxu2 %v1275_v53  ;;  %2210 = vmatpush.msrb.mxu3 %v575_v54  ;;  %v142_v50 = vld [vmem:[%s15787_s1 + $0x2d0] sm:$0xff]  ;;  %v632_v52 = vld [vmem:[%s15787_s1 + $0x1220] sm:$0xff] }
 0x130   :  { %2232 = vmatpush.msra.mxu1 %v771_v55  ;;  %2249 = vmatpush.msra.mxu0 %v1037_v56  ;;  %v856_v53 = vld [vmem:[%s15787_s1 + $0x1920] sm:$0xff]  ;;  %v394_v55 = vld [vmem:[%s15787_s1 + $0xab0] sm:$0xff] }
 0x131   :  { %2269 = vmatpush.msra.mxu2 %v1261_v57  ;;  %2211 = vmatpush.msrb.mxu3 %v561_v58  ;;  %v128_v54 = vld [vmem:[%s15787_s1 + $0x260] sm:$0xff]  ;;  %v618_v56 = vld [vmem:[%s15787_s1 + $0x11b0] sm:$0xff] }
 0x132   :  { %2233 = vmatpush.msra.mxu1 %v757_v59  ;;  %2250 = vmatpush.msra.mxu0 %v1023_v60  ;;  %v842_v57 = vld [vmem:[%s15787_s1 + $0x18b0] sm:$0xff]  ;;  %v380_v59 = vld [vmem:[%s15787_s1 + $0xa40] sm:$0xff] }
 0x133   :  { %2270 = vmatpush.msra.mxu2 %v1247_v61  ;;  %2212 = vmatpush.msrb.mxu3 %v547_v62  ;;  %v114_v58 = vld [vmem:[%s15787_s1 + $0x1f0] sm:$0xff]  ;;  %v604_v60 = vld [vmem:[%s15787_s1 + $0x1140] sm:$0xff] }
 0x134   :  { %2234 = vmatpush.msra.mxu1 %v743_v63  ;;  %2251 = vmatpush.msra.mxu0 %v1009_v0  ;;  %v828_v61 = vld [vmem:[%s15787_s1 + $0x1840] sm:$0xff]  ;;  %v366_v63 = vld [vmem:[%s15787_s1 + $0x9d0] sm:$0xff] }
 0x135   :  { %2271 = vmatpush.msra.mxu2 %v1233_v1  ;;  %2213 = vmatpush.msrb.mxu3 %v533_v2  ;;  %v100_v62 = vld [vmem:[%s15787_s1 + $0x180] sm:$0xff]  ;;  %v590_v0 = vld [vmem:[%s15787_s1 + $0x10d0] sm:$0xff] }
 0x136   :  { %2235 = vmatpush.msra.mxu1 %v729_v3  ;;  %2252 = vmatpush.msra.mxu0 %v995_v4  ;;  %v814_v1 = vld [vmem:[%s15787_s1 + $0x17d0] sm:$0xff]  ;;  %v352_v3 = vld [vmem:[%s15787_s1 + $0x960] sm:$0xff] }
 0x137   :  { %2272 = vmatpush.msra.mxu2 %v1219_v5  ;;  %2214 = vmatpush.msrb.mxu3 %v519_v6  ;;  %v86_v2 = vld [vmem:[%s15787_s1 + $0x110] sm:$0xff]  ;;  %v576_v4 = vld [vmem:[%s15787_s1 + $0x1060] sm:$0xff] }
 0x138   :  { %2300 = vmatpush.msrb.mxu1 %v268_v8  ;;  %2253 = vmatpush.msra.mxu0 %v981_v9  ;;  %v800_v5 = vld [vmem:[%s15787_s1 + $0x1760] sm:$0xff]  ;;  %v338_v8 = vld [vmem:[%s15787_s1 + $0x8f0] sm:$0xff] }
 0x139   :  { %2273 = vmatpush.msra.mxu2 %v1205_v11  ;;  %2215 = vmatpush.msrb.mxu3 %v505_v13  ;;  %v72_v6 = vld [vmem:[%s15787_s1 + $0xa0] sm:$0xff]  ;;  %v562_v9 = vld [vmem:[%s15787_s1 + $0xff0] sm:$0xff] }
 0x13a   :  { %2301 = vmatpush.msrb.mxu1 %v254_v14  ;;  %2254 = vmatpush.msra.mxu0 %v967_v15  ;;  %v786_v11 = vld [vmem:[%s15787_s1 + $0x16f0] sm:$0xff]  ;;  %v324_v14 = vld [vmem:[%s15787_s1 + $0x880] sm:$0xff] }
 0x13b   :  { %2274 = vmatpush.msra.mxu2 %v1191_v16  ;;  %2294 = vmatpush.msra.mxu3 %v1415_v17  ;;  %v58_v13 = vld [vmem:[%s15787_s1 + $0x30] sm:$0xff]  ;;  %v548_v15 = vld [vmem:[%s15787_s1 + $0xf80] sm:$0xff] }
 0x13c   :  { %2196 = vmatmul.f32.vlgmr.msrb.gmra.mxu2 %v7165_v29  ;;  %2302 = vmatpush.msrb.mxu1 %v240_v18  ;;  %v772_v16 = vld [vmem:[%s15787_s1 + $0x1680] sm:$0xff]  ;;  %v310_v18 = vld [vmem:[%s15787_s1 + $0x810] sm:$0xff] }
 0x13d   :  { %2255 = vmatpush.msra.mxu0 %v953_v21  ;;  %2275 = vmatpush.msra.mxu2 %v1177_v23  ;;  %v1164_v17 = vld [vmem:[%s15787_s1 + $0x22c0] sm:$0xff]  ;;  %v534_v21 = vld [vmem:[%s15787_s1 + $0xf10] sm:$0xff] }
 0x13e   :  { %2295 = vmatpush.msra.mxu3 %v1401_v24  ;;  %2176 = vmatmul.f32.vlgmr.msrb.gmra.mxu0 %v7139_v20  ;;  %v758_v23 = vld [vmem:[%s15787_s1 + $0x1610] sm:$0xff] }
 0x13f   :  { %2216 = vmatmul.f32.vlgmr.msrb.gmra.mxu3 %v7109_v10  ;;  %2303 = vmatpush.msrb.mxu1 %v226_v25  ;;  %v1150_v24 = vld [vmem:[%s15787_s1 + $0x2250] sm:$0xff]  ;;  %v296_v25 = vld [vmem:[%s15787_s1 + $0x7a0] sm:$0xff] }
 0x140   :  { %2320 = vmatpush.msrb.mxu3 %v492_v26  ;;  %2340 = vmatpush.msrb.mxu0 %v716_v27  ;;  %v520_v26 = vld [vmem:[%s15787_s1 + $0xea0] sm:$0xff] }
 0x141   :  { %2360 = vmatpush.msrb.mxu2 %v940_v28  ;;  %2304 = vmatpush.msrb.mxu1 %v212_v30  ;;  %v744_v27 = vld [vmem:[%s15787_s1 + $0x15a0] sm:$0xff]  ;;  %v282_v30 = vld [vmem:[%s15787_s1 + $0x730] sm:$0xff] }
 0x142   :  { %2321 = vmatpush.msrb.mxu3 %v478_v31  ;;  %2341 = vmatpush.msrb.mxu0 %v702_v32  ;;  %v1136_v28 = vld [vmem:[%s15787_s1 + $0x21e0] sm:$0xff]  ;;  %v506_v31 = vld [vmem:[%s15787_s1 + $0xe30] sm:$0xff] }
 0x143   :  { %2361 = vmatpush.msrb.mxu2 %v926_v33  ;;  %2305 = vmatpush.msrb.mxu1 %v198_v34  ;;  %v730_v32 = vld [vmem:[%s15787_s1 + $0x1530] sm:$0xff]  ;;  %v1388_v34 = vld [vmem:[%s15787_s1 + $0x29c0] sm:$0xff] }
 0x144   :  { %2322 = vmatpush.msrb.mxu3 %v464_v35  ;;  %2342 = vmatpush.msrb.mxu0 %v688_v36  ;;  %v1122_v33 = vld [vmem:[%s15787_s1 + $0x2170] sm:$0xff]  ;;  %v1416_v35 = vld [vmem:[%s15787_s1 + $0x2aa0] sm:$0xff]  ;;  %v269_v36 = vld [vmem:[%s15787_s1 + $0x6c8] sm:$0xff] }
 0x145   :  { %2362 = vmatpush.msrb.mxu2 %v912_v37  ;;  %2306 = vmatpush.msrb.mxu1 %v184_v38  ;;  %v1108_v37 = vld [vmem:[%s15787_s1 + $0x2100] sm:$0xff]  ;;  %v1374_v38 = vld [vmem:[%s15787_s1 + $0x2950] sm:$0xff] }
 0x146   :  { %2276 = vmatmul.f32.vlgmr.msra.gmra.mxu2 %v7325_v19  ;;  %2323 = vmatpush.msrb.mxu3 %v450_v39  ;;  %v1402_v39 = vld [vmem:[%s15787_s1 + $0x2a30] sm:$0xff] }
 0x147   :  { %2343 = vmatpush.msrb.mxu0 %v674_v40  ;;  %2363 = vmatpush.msrb.mxu2 %v898_v41  ;;  %v255_v40 = vld [vmem:[%s15787_s1 + $0x658] sm:$0xff]  ;;  %v1094_v41 = vld [vmem:[%s15787_s1 + $0x2090] sm:$0xff] }
 0x148   :  { %2236 = vmatmul.f32.vlgmr.msra.gmra.mxu1 %v7144_v22  ;;  %6742 = vmatmul.msk.f32.vlgmr.msra.gmra.mxu3 %vm1456_vm0, %v7292_v7 }
 0x149   :  { %2307 = vmatpush.msrb.mxu1 %v170_v42  ;;  %2324 = vmatpush.msrb.mxu3 %v436_v43  ;;  %v493_v42 = vld [vmem:[%s15787_s1 + $0xdc8] sm:$0xff]  ;;  %v1360_v43 = vld [vmem:[%s15787_s1 + $0x28e0] sm:$0xff] }
 0x14a   :  { %2344 = vmatpush.msrb.mxu0 %v660_v44  ;;  %2364 = vmatpush.msrb.mxu2 %v884_v45  ;;  %v241_v44 = vld [vmem:[%s15787_s1 + $0x5e8] sm:$0xff]  ;;  %v479_v45 = vld [vmem:[%s15787_s1 + $0xd58] sm:$0xff] }
 0x14b   :  { %2256 = vmatmul.f32.vlgmr.msra.gmra.mxu0 %v7303_v12  ;;  %2308 = vmatpush.msrb.mxu1 %v156_v46  ;;  %v1080_v46 = vld [vmem:[%s15787_s1 + $0x2020] sm:$0xff] }
 0x14c   :  { %2325 = vmatpush.msrb.mxu3 %v422_v47  ;;  %2345 = vmatpush.msrb.mxu0 %v646_v48  ;;  %v1346_v47 = vld [vmem:[%s15787_s1 + $0x2870] sm:$0xff]  ;;  %v227_v48 = vld [vmem:[%s15787_s1 + $0x578] sm:$0xff] }
 0x14d   :  { %2365 = vmatpush.msrb.mxu2 %v870_v49  ;;  %2309 = vmatpush.msrb.mxu1 %v142_v50  ;;  %v465_v49 = vld [vmem:[%s15787_s1 + $0xce8] sm:$0xff]  ;;  %v1066_v50 = vld [vmem:[%s15787_s1 + $0x1fb0] sm:$0xff] }
 0x14e   :  { %2326 = vmatpush.msrb.mxu3 %v408_v51  ;;  %2346 = vmatpush.msrb.mxu0 %v632_v52  ;;  %v1332_v51 = vld [vmem:[%s15787_s1 + $0x2800] sm:$0xff]  ;;  %v213_v52 = vld [vmem:[%s15787_s1 + $0x508] sm:$0xff] }
 0x14f   :  { %2366 = vmatpush.msrb.mxu2 %v856_v53  ;;  %2310 = vmatpush.msrb.mxu1 %v128_v54  ;;  %v451_v53 = vld [vmem:[%s15787_s1 + $0xc78] sm:$0xff]  ;;  %v1052_v54 = vld [vmem:[%s15787_s1 + $0x1f40] sm:$0xff] }
 0x150   :  { %2327 = vmatpush.msrb.mxu3 %v394_v55  ;;  %2347 = vmatpush.msrb.mxu0 %v618_v56  ;;  %v1318_v55 = vld [vmem:[%s15787_s1 + $0x2790] sm:$0xff]  ;;  %v199_v56 = vld [vmem:[%s15787_s1 + $0x498] sm:$0xff] }
 0x151   :  { %2367 = vmatpush.msrb.mxu2 %v842_v57  ;;  %2311 = vmatpush.msrb.mxu1 %v114_v58  ;;  %v437_v57 = vld [vmem:[%s15787_s1 + $0xc08] sm:$0xff]  ;;  %v1038_v58 = vld [vmem:[%s15787_s1 + $0x1ed0] sm:$0xff] }
 0x152   :  { %2328 = vmatpush.msrb.mxu3 %v380_v59  ;;  %2348 = vmatpush.msrb.mxu0 %v604_v60  ;;  %v1304_v59 = vld [vmem:[%s15787_s1 + $0x2720] sm:$0xff]  ;;  %v185_v60 = vld [vmem:[%s15787_s1 + $0x428] sm:$0xff] }
 0x153   :  { %2368 = vmatpush.msrb.mxu2 %v828_v61  ;;  %2312 = vmatpush.msrb.mxu1 %v100_v62  ;;  %v423_v61 = vld [vmem:[%s15787_s1 + $0xb98] sm:$0xff]  ;;  %v1024_v62 = vld [vmem:[%s15787_s1 + $0x1e60] sm:$0xff] }
 0x154   :  { %2329 = vmatpush.msrb.mxu3 %v366_v63  ;;  %2349 = vmatpush.msrb.mxu0 %v590_v0  ;;  %v1290_v63 = vld [vmem:[%s15787_s1 + $0x26b0] sm:$0xff]  ;;  %v171_v0 = vld [vmem:[%s15787_s1 + $0x3b8] sm:$0xff] }
 0x155   :  { %2369 = vmatpush.msrb.mxu2 %v814_v1  ;;  %2313 = vmatpush.msrb.mxu1 %v86_v2  ;;  %v409_v1 = vld [vmem:[%s15787_s1 + $0xb28] sm:$0xff]  ;;  %v1010_v2 = vld [vmem:[%s15787_s1 + $0x1df0] sm:$0xff] }
 0x156   :  { %2330 = vmatpush.msrb.mxu3 %v352_v3  ;;  %2350 = vmatpush.msrb.mxu0 %v576_v4  ;;  %v1276_v3 = vld [vmem:[%s15787_s1 + $0x2640] sm:$0xff]  ;;  %v157_v4 = vld [vmem:[%s15787_s1 + $0x348] sm:$0xff] }
 0x157   :  { %2370 = vmatpush.msrb.mxu2 %v800_v5  ;;  %2314 = vmatpush.msrb.mxu1 %v72_v6  ;;  %v395_v5 = vld [vmem:[%s15787_s1 + $0xab8] sm:$0xff]  ;;  %v996_v6 = vld [vmem:[%s15787_s1 + $0x1d80] sm:$0xff] }
 0x158   :  { %2331 = vmatpush.msrb.mxu3 %v338_v8  ;;  %2351 = vmatpush.msrb.mxu0 %v562_v9  ;;  %v1262_v8 = vld [vmem:[%s15787_s1 + $0x25d0] sm:$0xff]  ;;  %v143_v9 = vld [vmem:[%s15787_s1 + $0x2d8] sm:$0xff] }
 0x159   :  { %2371 = vmatpush.msrb.mxu2 %v786_v11  ;;  %2315 = vmatpush.msrb.mxu1 %v58_v13  ;;  %v381_v11 = vld [vmem:[%s15787_s1 + $0xa48] sm:$0xff]  ;;  %v982_v13 = vld [vmem:[%s15787_s1 + $0x1d10] sm:$0xff] }
 0x15a   :  { %2332 = vmatpush.msrb.mxu3 %v324_v14  ;;  %2352 = vmatpush.msrb.mxu0 %v548_v15  ;;  %v1248_v14 = vld [vmem:[%s15787_s1 + $0x2560] sm:$0xff]  ;;  %v129_v15 = vld [vmem:[%s15787_s1 + $0x268] sm:$0xff] }
 0x15b   :  { %2372 = vmatpush.msrb.mxu2 %v772_v16  ;;  %2380 = vmatpush.msra.mxu1 %v1164_v17  ;;  %v367_v16 = vld [vmem:[%s15787_s1 + $0x9d8] sm:$0xff]  ;;  %v968_v17 = vld [vmem:[%s15787_s1 + $0x1ca0] sm:$0xff] }
 0x15c   :  { %2333 = vmatpush.msrb.mxu3 %v310_v18  ;;  %2353 = vmatpush.msrb.mxu0 %v534_v21  ;;  %v1234_v18 = vld [vmem:[%s15787_s1 + $0x24f0] sm:$0xff]  ;;  %v115_v21 = vld [vmem:[%s15787_s1 + $0x1f8] sm:$0xff] }
 0x15d   :  { %2373 = vmatpush.msrb.mxu2 %v758_v23  ;;  %2381 = vmatpush.msra.mxu1 %v1150_v24  ;;  %v353_v23 = vld [vmem:[%s15787_s1 + $0x968] sm:$0xff]  ;;  %v954_v24 = vld [vmem:[%s15787_s1 + $0x1c30] sm:$0xff] }
 0x15e   :  { %2334 = vmatpush.msrb.mxu3 %v296_v25  ;;  %2354 = vmatpush.msrb.mxu0 %v520_v26  ;;  %v1220_v25 = vld [vmem:[%s15787_s1 + $0x2480] sm:$0xff]  ;;  %v101_v26 = vld [vmem:[%s15787_s1 + $0x188] sm:$0xff] }
 0x15f   :  { %2374 = vmatpush.msrb.mxu2 %v744_v27  ;;  %2382 = vmatpush.msra.mxu1 %v1136_v28  ;;  %v339_v27 = vld [vmem:[%s15787_s1 + $0x8f8] sm:$0xff]  ;;  %v717_v28 = vld [vmem:[%s15787_s1 + $0x14c8] sm:$0xff] }
 0x160   :  { %2335 = vmatpush.msrb.mxu3 %v282_v30  ;;  %2355 = vmatpush.msrb.mxu0 %v506_v31  ;;  %v1206_v30 = vld [vmem:[%s15787_s1 + $0x2410] sm:$0xff]  ;;  %v87_v31 = vld [vmem:[%s15787_s1 + $0x118] sm:$0xff] }
 0x161   :  { %2375 = vmatpush.msrb.mxu2 %v730_v32  ;;  %2383 = vmatpush.msra.mxu1 %v1122_v33  ;;  %v325_v32 = vld [vmem:[%s15787_s1 + $0x888] sm:$0xff]  ;;  %v703_v33 = vld [vmem:[%s15787_s1 + $0x1458] sm:$0xff] }
 0x162   :  { %2400 = vmatpush.msra.mxu3 %v1388_v34  ;;  %2434 = vmatpush.msra.mxu0 %v1416_v35  ;;  %v1192_v34 = vld [vmem:[%s15787_s1 + $0x23a0] sm:$0xff]  ;;  %v73_v35 = vld [vmem:[%s15787_s1 + $0xa8] sm:$0xff] }
 0x163   :  { %2440 = vmatpush.msra.mxu2 %v269_v36  ;;  %2336 = vmatmul.f32.vlgmr.msrb.gmra.mxu3 %v7165_v29  ;;  %v311_v36 = vld [vmem:[%s15787_s1 + $0x818] sm:$0xff] }
 0x164   :  { %2384 = vmatpush.msra.mxu1 %v1108_v37  ;;  %2401 = vmatpush.msra.mxu3 %v1374_v38  ;;  %v689_v37 = vld [vmem:[%s15787_s1 + $0x13e8] sm:$0xff]  ;;  %v1178_v38 = vld [vmem:[%s15787_s1 + $0x2330] sm:$0xff] }
 0x165   :  { %2435 = vmatpush.msra.mxu0 %v1402_v39  ;;  %2441 = vmatpush.msra.mxu2 %v255_v40  ;;  %v59_v39 = vld [vmem:[%s15787_s1 + $0x38] sm:$0xff]  ;;  %v297_v40 = vld [vmem:[%s15787_s1 + $0x7a8] sm:$0xff] }
 0x166   :  { %2356 = vmatmul.f32.vlgmr.msrb.gmra.mxu0 %v7109_v10  ;;  %2385 = vmatpush.msra.mxu1 %v1094_v41  ;;  %v675_v41 = vld [vmem:[%s15787_s1 + $0x1378] sm:$0xff] }
 0x167   :  { %2460 = vmatpush.msrb.mxu0 %v493_v42  ;;  %2402 = vmatpush.msra.mxu3 %v1360_v43  ;;  %v941_v42 = vld [vmem:[%s15787_s1 + $0x1bc8] sm:$0xff] }
 0x168   :  { %2442 = vmatpush.msra.mxu2 %v241_v44  ;;  %2316 = vmatmul.f32.vlgmr.msrb.gmra.mxu1 %v7139_v20  ;;  %v1165_v43 = vld [vmem:[%s15787_s1 + $0x22c8] sm:$0xff]  ;;  %v283_v44 = vld [vmem:[%s15787_s1 + $0x738] sm:$0xff] }
 0x169   :  { %2461 = vmatpush.msrb.mxu0 %v479_v45  ;;  %2376 = vmatmul.f32.vlgmr.msrb.gmra.mxu2 %v7144_v22  ;;  %v661_v45 = vld [vmem:[%s15787_s1 + $0x1308] sm:$0xff] }
 0x16a   :  { %2386 = vmatpush.msra.mxu1 %v1080_v46  ;;  %2403 = vmatpush.msra.mxu3 %v1346_v47  ;;  %v927_v46 = vld [vmem:[%s15787_s1 + $0x1b58] sm:$0xff] }
 0x16b   :  { %2443 = vmatpush.msra.mxu2 %v227_v48  ;;  %2462 = vmatpush.msrb.mxu0 %v465_v49  ;;  %v1151_v47 = vld [vmem:[%s15787_s1 + $0x2258] sm:$0xff]  ;;  %v1389_v48 = vld [vmem:[%s15787_s1 + $0x29c8] sm:$0xff] }
 0x16c   :  { %2387 = vmatpush.msra.mxu1 %v1066_v50  ;;  %2404 = vmatpush.msra.mxu3 %v1332_v51  ;;  %v647_v49 = vld [vmem:[%s15787_s1 + $0x1298] sm:$0xff]  ;;  %v913_v50 = vld [vmem:[%s15787_s1 + $0x1ae8] sm:$0xff] }
 0x16d   :  { %2444 = vmatpush.msra.mxu2 %v213_v52  ;;  %2463 = vmatpush.msrb.mxu0 %v451_v53  ;;  %v1137_v51 = vld [vmem:[%s15787_s1 + $0x21e8] sm:$0xff]  ;;  %v1375_v52 = vld [vmem:[%s15787_s1 + $0x2958] sm:$0xff] }
 0x16e   :  { %2388 = vmatpush.msra.mxu1 %v1052_v54  ;;  %2405 = vmatpush.msra.mxu3 %v1318_v55  ;;  %v633_v53 = vld [vmem:[%s15787_s1 + $0x1228] sm:$0xff]  ;;  %v899_v54 = vld [vmem:[%s15787_s1 + $0x1a78] sm:$0xff] }
 0x16f   :  { %2445 = vmatpush.msra.mxu2 %v199_v56  ;;  %2464 = vmatpush.msrb.mxu0 %v437_v57  ;;  %v1123_v55 = vld [vmem:[%s15787_s1 + $0x2178] sm:$0xff]  ;;  %v1361_v56 = vld [vmem:[%s15787_s1 + $0x28e8] sm:$0xff] }
 0x170   :  { %2389 = vmatpush.msra.mxu1 %v1038_v58  ;;  %2406 = vmatpush.msra.mxu3 %v1304_v59  ;;  %v619_v57 = vld [vmem:[%s15787_s1 + $0x11b8] sm:$0xff]  ;;  %v885_v58 = vld [vmem:[%s15787_s1 + $0x1a08] sm:$0xff] }
 0x171   :  { %2446 = vmatpush.msra.mxu2 %v185_v60  ;;  %2465 = vmatpush.msrb.mxu0 %v423_v61  ;;  %v1109_v59 = vld [vmem:[%s15787_s1 + $0x2108] sm:$0xff]  ;;  %v1347_v60 = vld [vmem:[%s15787_s1 + $0x2878] sm:$0xff] }
 0x172   :  { %2390 = vmatpush.msra.mxu1 %v1024_v62  ;;  %2407 = vmatpush.msra.mxu3 %v1290_v63  ;;  %v605_v61 = vld [vmem:[%s15787_s1 + $0x1148] sm:$0xff]  ;;  %v871_v62 = vld [vmem:[%s15787_s1 + $0x1998] sm:$0xff] }
 0x173   :  { %2447 = vmatpush.msra.mxu2 %v171_v0  ;;  %2466 = vmatpush.msrb.mxu0 %v409_v1  ;;  %v1095_v63 = vld [vmem:[%s15787_s1 + $0x2098] sm:$0xff]  ;;  %v1333_v0 = vld [vmem:[%s15787_s1 + $0x2808] sm:$0xff] }
 0x174   :  { %2391 = vmatpush.msra.mxu1 %v1010_v2  ;;  %2408 = vmatpush.msra.mxu3 %v1276_v3  ;;  %v591_v1 = vld [vmem:[%s15787_s1 + $0x10d8] sm:$0xff]  ;;  %v857_v2 = vld [vmem:[%s15787_s1 + $0x1928] sm:$0xff] }
 0x175   :  { %2448 = vmatpush.msra.mxu2 %v157_v4  ;;  %2467 = vmatpush.msrb.mxu0 %v395_v5  ;;  %v1081_v3 = vld [vmem:[%s15787_s1 + $0x2028] sm:$0xff]  ;;  %v1319_v4 = vld [vmem:[%s15787_s1 + $0x2798] sm:$0xff] }
 0x176   :  { %2392 = vmatpush.msra.mxu1 %v996_v6  ;;  %2409 = vmatpush.msra.mxu3 %v1262_v8  ;;  %v577_v5 = vld [vmem:[%s15787_s1 + $0x1068] sm:$0xff]  ;;  %v843_v6 = vld [vmem:[%s15787_s1 + $0x18b8] sm:$0xff] }
 0x177   :  { %2449 = vmatpush.msra.mxu2 %v143_v9  ;;  %2468 = vmatpush.msrb.mxu0 %v381_v11  ;;  %v1067_v8 = vld [vmem:[%s15787_s1 + $0x1fb8] sm:$0xff]  ;;  %v1305_v9 = vld [vmem:[%s15787_s1 + $0x2728] sm:$0xff] }
 0x178   :  { %2393 = vmatpush.msra.mxu1 %v982_v13  ;;  %2410 = vmatpush.msra.mxu3 %v1248_v14  ;;  %v563_v11 = vld [vmem:[%s15787_s1 + $0xff8] sm:$0xff]  ;;  %v829_v13 = vld [vmem:[%s15787_s1 + $0x1848] sm:$0xff] }
 0x179   :  { %2450 = vmatpush.msra.mxu2 %v129_v15  ;;  %2469 = vmatpush.msrb.mxu0 %v367_v16  ;;  %v1053_v14 = vld [vmem:[%s15787_s1 + $0x1f48] sm:$0xff]  ;;  %v1291_v15 = vld [vmem:[%s15787_s1 + $0x26b8] sm:$0xff] }
 0x17a   :  { %2394 = vmatpush.msra.mxu1 %v968_v17  ;;  %2411 = vmatpush.msra.mxu3 %v1234_v18  ;;  %v549_v16 = vld [vmem:[%s15787_s1 + $0xf88] sm:$0xff]  ;;  %v815_v17 = vld [vmem:[%s15787_s1 + $0x17d8] sm:$0xff] }
 0x17b   :  { %2451 = vmatpush.msra.mxu2 %v115_v21  ;;  %2470 = vmatpush.msrb.mxu0 %v353_v23  ;;  %v1039_v18 = vld [vmem:[%s15787_s1 + $0x1ed8] sm:$0xff]  ;;  %v1277_v21 = vld [vmem:[%s15787_s1 + $0x2648] sm:$0xff] }
 0x17c   :  { %2395 = vmatpush.msra.mxu1 %v954_v24  ;;  %2412 = vmatpush.msra.mxu3 %v1220_v25  ;;  %v535_v23 = vld [vmem:[%s15787_s1 + $0xf18] sm:$0xff]  ;;  %v801_v24 = vld [vmem:[%s15787_s1 + $0x1768] sm:$0xff] }
 0x17d   :  { %2452 = vmatpush.msra.mxu2 %v101_v26  ;;  %2396 = vmatmul.f32.vlgmr.msra.gmra.mxu1 %v7303_v12  ;;  %v1025_v25 = vld [vmem:[%s15787_s1 + $0x1e68] sm:$0xff]  ;;  %v1263_v26 = vld [vmem:[%s15787_s1 + $0x25d8] sm:$0xff] }
 0x17e   :  { %2471 = vmatpush.msrb.mxu0 %v339_v27  ;;  %2480 = vmatpush.msrb.mxu1 %v717_v28  ;;  %v521_v27 = vld [vmem:[%s15787_s1 + $0xea8] sm:$0xff]  ;;  %v787_v28 = vld [vmem:[%s15787_s1 + $0x16f8] sm:$0xff] }
 0x17f   :  { %2413 = vmatpush.msra.mxu3 %v1206_v30  ;;  %2453 = vmatpush.msra.mxu2 %v87_v31  ;;  %v1011_v30 = vld [vmem:[%s15787_s1 + $0x1df8] sm:$0xff]  ;;  %v1249_v31 = vld [vmem:[%s15787_s1 + $0x2568] sm:$0xff] }
 0x180   :  { %2472 = vmatpush.msrb.mxu0 %v325_v32  ;;  %2481 = vmatpush.msrb.mxu1 %v703_v33  ;;  %v507_v32 = vld [vmem:[%s15787_s1 + $0xe38] sm:$0xff]  ;;  %v773_v33 = vld [vmem:[%s15787_s1 + $0x1688] sm:$0xff] }
 0x181   :  { %2414 = vmatpush.msra.mxu3 %v1192_v34  ;;  %2454 = vmatpush.msra.mxu2 %v73_v35  ;;  %v997_v34 = vld [vmem:[%s15787_s1 + $0x1d88] sm:$0xff]  ;;  %v1235_v35 = vld [vmem:[%s15787_s1 + $0x24f8] sm:$0xff] }
 0x182   :  { %2473 = vmatpush.msrb.mxu0 %v311_v36  ;;  %2482 = vmatpush.msrb.mxu1 %v689_v37  ;;  %v1417_v36 = vld [vmem:[%s15787_s1 + $0x2aa8] sm:$0xff]  ;;  %v759_v37 = vld [vmem:[%s15787_s1 + $0x1618] sm:$0xff] }
 0x183   :  { %2415 = vmatpush.msra.mxu3 %v1178_v38  ;;  %2455 = vmatpush.msra.mxu2 %v59_v39  ;;  %v983_v38 = vld [vmem:[%s15787_s1 + $0x1d18] sm:$0xff]  ;;  %v1221_v39 = vld [vmem:[%s15787_s1 + $0x2488] sm:$0xff] }
 0x184   :  { %2416 = vmatmul.f32.vlgmr.msra.gmra.mxu3 %v7325_v19  ;;  %2474 = vmatpush.msrb.mxu0 %v297_v40  ;;  %v1403_v40 = vld [vmem:[%s15787_s1 + $0x2a38] sm:$0xff] }
 0x185   :  { %2483 = vmatpush.msrb.mxu1 %v675_v41  ;;  %2500 = vmatpush.msrb.mxu3 %v941_v42  ;;  %v745_v41 = vld [vmem:[%s15787_s1 + $0x15a8] sm:$0xff] }
 0x186   :  { %2520 = vmatpush.msrb.mxu2 %v1165_v43  ;;  %2475 = vmatpush.msrb.mxu0 %v283_v44  ;;  %v969_v42 = vld [vmem:[%s15787_s1 + $0x1ca8] sm:$0xff]  ;;  %v494_v43 = vld [vmem:[%s15787_s1 + $0xdd0] sm:$0xff]  ;;  %v1207_v44 = vld [vmem:[%s15787_s1 + $0x2418] sm:$0xff] }
 0x187   :  { %2484 = vmatpush.msrb.mxu1 %v661_v45  ;;  %2501 = vmatpush.msrb.mxu3 %v927_v46  ;;  %v731_v45 = vld [vmem:[%s15787_s1 + $0x1538] sm:$0xff] }
 0x188   :  { %2521 = vmatpush.msrb.mxu2 %v1151_v47  ;;  %6743 = vmatmul.msk.f32.vlgmr.msra.gmra.mxu0 %vm1456_vm0, %v7292_v7  ;;  %v955_v46 = vld [vmem:[%s15787_s1 + $0x1c38] sm:$0xff]  ;;  %v480_v47 = vld [vmem:[%s15787_s1 + $0xd60] sm:$0xff] }
 0x189   :  { %2540 = vmatpush.msra.mxu0 %v1389_v48  ;;  %2485 = vmatpush.msrb.mxu1 %v647_v49  ;;  %v1193_v48 = vld [vmem:[%s15787_s1 + $0x23a8] sm:$0xff]  ;;  %v270_v49 = vld [vmem:[%s15787_s1 + $0x6d0] sm:$0xff] }
 0x18a   :  { %2502 = vmatpush.msrb.mxu3 %v913_v50  ;;  %2522 = vmatpush.msrb.mxu2 %v1137_v51  ;;  %v718_v50 = vld [vmem:[%s15787_s1 + $0x14d0] sm:$0xff] }
 0x18b   :  { %2541 = vmatpush.msra.mxu0 %v1375_v52  ;;  %2486 = vmatpush.msrb.mxu1 %v633_v53  ;;  %v466_v51 = vld [vmem:[%s15787_s1 + $0xcf0] sm:$0xff]  ;;  %v1179_v52 = vld [vmem:[%s15787_s1 + $0x2338] sm:$0xff]  ;;  %v256_v53 = vld [vmem:[%s15787_s1 + $0x660] sm:$0xff] }
 0x18c   :  { %2503 = vmatpush.msrb.mxu3 %v899_v54  ;;  %2523 = vmatpush.msrb.mxu2 %v1123_v55  ;;  %v704_v54 = vld [vmem:[%s15787_s1 + $0x1460] sm:$0xff] }
 0x18d   :  { %2542 = vmatpush.msra.mxu0 %v1361_v56  ;;  %2487 = vmatpush.msrb.mxu1 %v619_v57  ;;  %v452_v55 = vld [vmem:[%s15787_s1 + $0xc80] sm:$0xff]  ;;  %v942_v56 = vld [vmem:[%s15787_s1 + $0x1bd0] sm:$0xff] }
 0x18e   :  { %2504 = vmatpush.msrb.mxu3 %v885_v58  ;;  %2524 = vmatpush.msrb.mxu2 %v1109_v59  ;;  %v242_v57 = vld [vmem:[%s15787_s1 + $0x5f0] sm:$0xff] }
 0x18f   :  { %2543 = vmatpush.msra.mxu0 %v1347_v60  ;;  %2488 = vmatpush.msrb.mxu1 %v605_v61  ;;  %v690_v58 = vld [vmem:[%s15787_s1 + $0x13f0] sm:$0xff]  ;;  %v928_v60 = vld [vmem:[%s15787_s1 + $0x1b60] sm:$0xff] }
 0x190   :  { %2505 = vmatpush.msrb.mxu3 %v871_v62  ;;  %2525 = vmatpush.msrb.mxu2 %v1095_v63  ;;  %v438_v59 = vld [vmem:[%s15787_s1 + $0xc10] sm:$0xff]  ;;  %v228_v61 = vld [vmem:[%s15787_s1 + $0x580] sm:$0xff] }
 0x191   :  { %2544 = vmatpush.msra.mxu0 %v1333_v0  ;;  %2489 = vmatpush.msrb.mxu1 %v591_v1  ;;  %v676_v62 = vld [vmem:[%s15787_s1 + $0x1380] sm:$0xff]  ;;  %v914_v0 = vld [vmem:[%s15787_s1 + $0x1af0] sm:$0xff] }
 0x192   :  { %2506 = vmatpush.msrb.mxu3 %v857_v2  ;;  %2526 = vmatpush.msrb.mxu2 %v1081_v3  ;;  %v424_v63 = vld [vmem:[%s15787_s1 + $0xba0] sm:$0xff]  ;;  %v214_v1 = vld [vmem:[%s15787_s1 + $0x510] sm:$0xff] }
 0x193   :  { %2545 = vmatpush.msra.mxu0 %v1319_v4  ;;  %2490 = vmatpush.msrb.mxu1 %v577_v5  ;;  %v662_v2 = vld [vmem:[%s15787_s1 + $0x1310] sm:$0xff]  ;;  %v900_v4 = vld [vmem:[%s15787_s1 + $0x1a80] sm:$0xff] }
 0x194   :  { %2507 = vmatpush.msrb.mxu3 %v843_v6  ;;  %2527 = vmatpush.msrb.mxu2 %v1067_v8  ;;  %v410_v3 = vld [vmem:[%s15787_s1 + $0xb30] sm:$0xff]  ;;  %v200_v5 = vld [vmem:[%s15787_s1 + $0x4a0] sm:$0xff] }
 0x195   :  { %2546 = vmatpush.msra.mxu0 %v1305_v9  ;;  %2491 = vmatpush.msrb.mxu1 %v563_v11  ;;  %v648_v6 = vld [vmem:[%s15787_s1 + $0x12a0] sm:$0xff]  ;;  %v886_v9 = vld [vmem:[%s15787_s1 + $0x1a10] sm:$0xff] }
 0x196   :  { %2508 = vmatpush.msrb.mxu3 %v829_v13  ;;  %2528 = vmatpush.msrb.mxu2 %v1053_v14  ;;  %v396_v8 = vld [vmem:[%s15787_s1 + $0xac0] sm:$0xff]  ;;  %v186_v11 = vld [vmem:[%s15787_s1 + $0x430] sm:$0xff] }
 0x197   :  { %2547 = vmatpush.msra.mxu0 %v1291_v15  ;;  %2492 = vmatpush.msrb.mxu1 %v549_v16  ;;  %v634_v13 = vld [vmem:[%s15787_s1 + $0x1230] sm:$0xff]  ;;  %v872_v15 = vld [vmem:[%s15787_s1 + $0x19a0] sm:$0xff] }
 0x198   :  { %2509 = vmatpush.msrb.mxu3 %v815_v17  ;;  %2529 = vmatpush.msrb.mxu2 %v1039_v18  ;;  %v382_v14 = vld [vmem:[%s15787_s1 + $0xa50] sm:$0xff]  ;;  %v172_v16 = vld [vmem:[%s15787_s1 + $0x3c0] sm:$0xff] }
 0x199   :  { %2548 = vmatpush.msra.mxu0 %v1277_v21  ;;  %2493 = vmatpush.msrb.mxu1 %v535_v23  ;;  %v620_v17 = vld [vmem:[%s15787_s1 + $0x11c0] sm:$0xff]  ;;  %v858_v21 = vld [vmem:[%s15787_s1 + $0x1930] sm:$0xff] }
 0x19a   :  { %2510 = vmatpush.msrb.mxu3 %v801_v24  ;;  %2530 = vmatpush.msrb.mxu2 %v1025_v25  ;;  %v368_v18 = vld [vmem:[%s15787_s1 + $0x9e0] sm:$0xff]  ;;  %v158_v23 = vld [vmem:[%s15787_s1 + $0x350] sm:$0xff] }
 0x19b   :  { %2549 = vmatpush.msra.mxu0 %v1263_v26  ;;  %2494 = vmatpush.msrb.mxu1 %v521_v27  ;;  %v606_v24 = vld [vmem:[%s15787_s1 + $0x1150] sm:$0xff]  ;;  %v844_v26 = vld [vmem:[%s15787_s1 + $0x18c0] sm:$0xff] }
 0x19c   :  { %2511 = vmatpush.msrb.mxu3 %v787_v28  ;;  %2531 = vmatpush.msrb.mxu2 %v1011_v30  ;;  %v354_v25 = vld [vmem:[%s15787_s1 + $0x970] sm:$0xff]  ;;  %v144_v27 = vld [vmem:[%s15787_s1 + $0x2e0] sm:$0xff] }
 0x19d   :  { %2550 = vmatpush.msra.mxu0 %v1249_v31  ;;  %2495 = vmatpush.msrb.mxu1 %v507_v32  ;;  %v592_v28 = vld [vmem:[%s15787_s1 + $0x10e0] sm:$0xff]  ;;  %v830_v31 = vld [vmem:[%s15787_s1 + $0x1850] sm:$0xff] }
 0x19e   :  { %2512 = vmatpush.msrb.mxu3 %v773_v33  ;;  %2532 = vmatpush.msrb.mxu2 %v997_v34  ;;  %v340_v30 = vld [vmem:[%s15787_s1 + $0x900] sm:$0xff]  ;;  %v130_v32 = vld [vmem:[%s15787_s1 + $0x270] sm:$0xff] }
 0x19f   :  { %2551 = vmatpush.msra.mxu0 %v1235_v35  ;;  %2574 = vmatpush.msra.mxu1 %v1417_v36  ;;  %v578_v33 = vld [vmem:[%s15787_s1 + $0x1070] sm:$0xff]  ;;  %v816_v35 = vld [vmem:[%s15787_s1 + $0x17e0] sm:$0xff] }
 0x1a0   :  { %2513 = vmatpush.msrb.mxu3 %v759_v37  ;;  %2533 = vmatpush.msrb.mxu2 %v983_v38  ;;  %v326_v34 = vld [vmem:[%s15787_s1 + $0x890] sm:$0xff]  ;;  %v116_v36 = vld [vmem:[%s15787_s1 + $0x200] sm:$0xff] }
 0x1a1   :  { %2552 = vmatpush.msra.mxu0 %v1221_v39  ;;  %2575 = vmatpush.msra.mxu1 %v1403_v40  ;;  %v564_v37 = vld [vmem:[%s15787_s1 + $0x1000] sm:$0xff]  ;;  %v802_v39 = vld [vmem:[%s15787_s1 + $0x1770] sm:$0xff] }
 0x1a2   :  { %2496 = vmatmul.f32.vlgmr.msrb.gmra.mxu1 %v7109_v10  ;;  %2514 = vmatpush.msrb.mxu3 %v745_v41  ;;  %v312_v38 = vld [vmem:[%s15787_s1 + $0x820] sm:$0xff]  ;;  %v102_v40 = vld [vmem:[%s15787_s1 + $0x190] sm:$0xff] }
 0x1a3   :  { %2534 = vmatpush.msrb.mxu2 %v969_v42  ;;  %2600 = vmatpush.msrb.mxu1 %v494_v43  ;;  %v550_v41 = vld [vmem:[%s15787_s1 + $0xf90] sm:$0xff]  ;;  %v788_v43 = vld [vmem:[%s15787_s1 + $0x1700] sm:$0xff] }
 0x1a4   :  { %2456 = vmatmul.f32.vlgmr.msra.gmra.mxu2 %v7139_v20  ;;  %2553 = vmatpush.msra.mxu0 %v1207_v44  ;;  %v298_v42 = vld [vmem:[%s15787_s1 + $0x7b0] sm:$0xff]  ;;  %v88_v44 = vld [vmem:[%s15787_s1 + $0x120] sm:$0xff] }
 0x1a5   :  { %2515 = vmatpush.msrb.mxu3 %v731_v45  ;;  %2535 = vmatpush.msrb.mxu2 %v955_v46  ;;  %v536_v45 = vld [vmem:[%s15787_s1 + $0xf20] sm:$0xff] }
 0x1a6   :  { %2601 = vmatpush.msrb.mxu1 %v480_v47  ;;  %2554 = vmatpush.msra.mxu0 %v1193_v48  ;;  %v284_v46 = vld [vmem:[%s15787_s1 + $0x740] sm:$0xff]  ;;  %v774_v47 = vld [vmem:[%s15787_s1 + $0x1690] sm:$0xff] }
 0x1a7   :  { %2580 = vmatpush.msra.mxu3 %v270_v49  ;;  %2620 = vmatpush.msra.mxu2 %v718_v50  ;;  %v74_v48 = vld [vmem:[%s15787_s1 + $0xb0] sm:$0xff] }
 0x1a8   :  { %2602 = vmatpush.msrb.mxu1 %v466_v51  ;;  %2555 = vmatpush.msra.mxu0 %v1179_v52  ;;  %v522_v49 = vld [vmem:[%s15787_s1 + $0xeb0] sm:$0xff]  ;;  %v760_v51 = vld [vmem:[%s15787_s1 + $0x1620] sm:$0xff] }
 0x1a9   :  { %2581 = vmatpush.msra.mxu3 %v256_v53  ;;  %2621 = vmatpush.msra.mxu2 %v704_v54  ;;  %v1390_v50 = vld [vmem:[%s15787_s1 + $0x29d0] sm:$0xff]  ;;  %v60_v52 = vld [vmem:[%s15787_s1 + $0x40] sm:$0xff] }
 0x1aa   :  { %2476 = vmatmul.f32.vlgmr.msrb.gmra.mxu0 %v7165_v29  ;;  %2603 = vmatpush.msrb.mxu1 %v452_v55  ;;  %v508_v53 = vld [vmem:[%s15787_s1 + $0xe40] sm:$0xff]  ;;  %v746_v55 = vld [vmem:[%s15787_s1 + $0x15b0] sm:$0xff] }
 0x1ab   :  { %2640 = vmatpush.msrb.mxu0 %v942_v56  ;;  %2516 = vmatmul.f32.vlgmr.msrb.gmra.mxu3 %v7144_v22  ;;  %v1376_v54 = vld [vmem:[%s15787_s1 + $0x2960] sm:$0xff]  ;;  %v1166_v56 = vld [vmem:[%s15787_s1 + $0x22d0] sm:$0xff] }
 0x1ac   :  { %2582 = vmatpush.msra.mxu3 %v242_v57  ;;  %2622 = vmatpush.msra.mxu2 %v690_v58  ;;  %v1418_v57 = vld [vmem:[%s15787_s1 + $0x2ab0] sm:$0xff] }
 0x1ad   :  { %2604 = vmatpush.msrb.mxu1 %v438_v59  ;;  %2641 = vmatpush.msrb.mxu0 %v928_v60  ;;  %v1362_v58 = vld [vmem:[%s15787_s1 + $0x28f0] sm:$0xff]  ;;  %v732_v59 = vld [vmem:[%s15787_s1 + $0x1540] sm:$0xff] }
 0x1ae   :  { %2536 = vmatmul.f32.vlgmr.msrb.gmra.mxu2 %v7303_v12  ;;  %2583 = vmatpush.msra.mxu3 %v228_v61  ;;  %v1152_v60 = vld [vmem:[%s15787_s1 + $0x2260] sm:$0xff] }
 0x1af   :  { %2623 = vmatpush.msra.mxu2 %v676_v62  ;;  %2605 = vmatpush.msrb.mxu1 %v424_v63  ;;  %v1404_v61 = vld [vmem:[%s15787_s1 + $0x2a40] sm:$0xff]  ;;  %v271_v63 = vld [vmem:[%s15787_s1 + $0x6d8] sm:$0xff] }
 0x1b0   :  { %2642 = vmatpush.msrb.mxu0 %v914_v0  ;;  %2584 = vmatpush.msra.mxu3 %v214_v1  ;;  %v1348_v62 = vld [vmem:[%s15787_s1 + $0x2880] sm:$0xff]  ;;  %v495_v0 = vld [vmem:[%s15787_s1 + $0xdd8] sm:$0xff]  ;;  %v1138_v1 = vld [vmem:[%s15787_s1 + $0x21f0] sm:$0xff] }
 0x1b1   :  { %2624 = vmatpush.msra.mxu2 %v662_v2  ;;  %2606 = vmatpush.msrb.mxu1 %v410_v3  ;;  %v1334_v2 = vld [vmem:[%s15787_s1 + $0x2810] sm:$0xff]  ;;  %v257_v3 = vld [vmem:[%s15787_s1 + $0x668] sm:$0xff] }
 0x1b2   :  { %2643 = vmatpush.msrb.mxu0 %v900_v4  ;;  %2585 = vmatpush.msra.mxu3 %v200_v5  ;;  %v481_v4 = vld [vmem:[%s15787_s1 + $0xd68] sm:$0xff]  ;;  %v1124_v5 = vld [vmem:[%s15787_s1 + $0x2180] sm:$0xff] }
 0x1b3   :  { %2625 = vmatpush.msra.mxu2 %v648_v6  ;;  %2607 = vmatpush.msrb.mxu1 %v396_v8  ;;  %v1320_v6 = vld [vmem:[%s15787_s1 + $0x27a0] sm:$0xff]  ;;  %v243_v8 = vld [vmem:[%s15787_s1 + $0x5f8] sm:$0xff] }
 0x1b4   :  { %2644 = vmatpush.msrb.mxu0 %v886_v9  ;;  %2586 = vmatpush.msra.mxu3 %v186_v11  ;;  %v467_v9 = vld [vmem:[%s15787_s1 + $0xcf8] sm:$0xff]  ;;  %v1110_v11 = vld [vmem:[%s15787_s1 + $0x2110] sm:$0xff] }
 0x1b5   :  { %2626 = vmatpush.msra.mxu2 %v634_v13  ;;  %2608 = vmatpush.msrb.mxu1 %v382_v14  ;;  %v1306_v13 = vld [vmem:[%s15787_s1 + $0x2730] sm:$0xff]  ;;  %v229_v14 = vld [vmem:[%s15787_s1 + $0x588] sm:$0xff] }
 0x1b6   :  { %2645 = vmatpush.msrb.mxu0 %v872_v15  ;;  %2587 = vmatpush.msra.mxu3 %v172_v16  ;;  %v453_v15 = vld [vmem:[%s15787_s1 + $0xc88] sm:$0xff]  ;;  %v1096_v16 = vld [vmem:[%s15787_s1 + $0x20a0] sm:$0xff] }
 0x1b7   :  { %2556 = vmatmul.f32.vlgmr.msra.gmra.mxu0 %v7325_v19  ;;  %2627 = vmatpush.msra.mxu2 %v620_v17  ;;  %v1292_v17 = vld [vmem:[%s15787_s1 + $0x26c0] sm:$0xff] }
 0x1b8   :  { %2609 = vmatpush.msrb.mxu1 %v368_v18  ;;  %2646 = vmatpush.msrb.mxu0 %v858_v21  ;;  %v215_v18 = vld [vmem:[%s15787_s1 + $0x518] sm:$0xff] }
 0x1b9   :  { %6744 = vmatmul.msk.f32.vlgmr.msra.gmra.mxu1 %vm1456_vm0, %v7292_v7  ;;  %2588 = vmatpush.msra.mxu3 %v158_v23  ;;  %v439_v21 = vld [vmem:[%s15787_s1 + $0xc18] sm:$0xff]  ;;  %v1082_v23 = vld [vmem:[%s15787_s1 + $0x2030] sm:$0xff] }
 0x1ba   :  { %2628 = vmatpush.msra.mxu2 %v606_v24  ;;  %2610 = vmatpush.msrb.mxu1 %v354_v25  ;;  %v1278_v24 = vld [vmem:[%s15787_s1 + $0x2650] sm:$0xff]  ;;  %v201_v25 = vld [vmem:[%s15787_s1 + $0x4a8] sm:$0xff] }
 0x1bb   :  { %2647 = vmatpush.msrb.mxu0 %v844_v26  ;;  %2589 = vmatpush.msra.mxu3 %v144_v27  ;;  %v425_v26 = vld [vmem:[%s15787_s1 + $0xba8] sm:$0xff]  ;;  %v1068_v27 = vld [vmem:[%s15787_s1 + $0x1fc0] sm:$0xff] }
 0x1bc   :  { %2629 = vmatpush.msra.mxu2 %v592_v28  ;;  %2611 = vmatpush.msrb.mxu1 %v340_v30  ;;  %v1264_v28 = vld [vmem:[%s15787_s1 + $0x25e0] sm:$0xff]  ;;  %v187_v30 = vld [vmem:[%s15787_s1 + $0x438] sm:$0xff] }
 0x1bd   :  { %2648 = vmatpush.msrb.mxu0 %v830_v31  ;;  %2590 = vmatpush.msra.mxu3 %v130_v32  ;;  %v411_v31 = vld [vmem:[%s15787_s1 + $0xb38] sm:$0xff]  ;;  %v1054_v32 = vld [vmem:[%s15787_s1 + $0x1f50] sm:$0xff] }
 0x1be   :  { %2630 = vmatpush.msra.mxu2 %v578_v33  ;;  %2612 = vmatpush.msrb.mxu1 %v326_v34  ;;  %v1250_v33 = vld [vmem:[%s15787_s1 + $0x2570] sm:$0xff]  ;;  %v173_v34 = vld [vmem:[%s15787_s1 + $0x3c8] sm:$0xff] }
 0x1bf   :  { %2649 = vmatpush.msrb.mxu0 %v816_v35  ;;  %2591 = vmatpush.msra.mxu3 %v116_v36  ;;  %v397_v35 = vld [vmem:[%s15787_s1 + $0xac8] sm:$0xff]  ;;  %v1040_v36 = vld [vmem:[%s15787_s1 + $0x1ee0] sm:$0xff] }
 0x1c0   :  { %2631 = vmatpush.msra.mxu2 %v564_v37  ;;  %2613 = vmatpush.msrb.mxu1 %v312_v38  ;;  %v1236_v37 = vld [vmem:[%s15787_s1 + $0x2500] sm:$0xff]  ;;  %v159_v38 = vld [vmem:[%s15787_s1 + $0x358] sm:$0xff] }
 0x1c1   :  { %2650 = vmatpush.msrb.mxu0 %v802_v39  ;;  %2592 = vmatpush.msra.mxu3 %v102_v40  ;;  %v383_v39 = vld [vmem:[%s15787_s1 + $0xa58] sm:$0xff]  ;;  %v1026_v40 = vld [vmem:[%s15787_s1 + $0x1e70] sm:$0xff] }
 0x1c2   :  { %2632 = vmatpush.msra.mxu2 %v550_v41  ;;  %2614 = vmatpush.msrb.mxu1 %v298_v42  ;;  %v1222_v41 = vld [vmem:[%s15787_s1 + $0x2490] sm:$0xff]  ;;  %v145_v42 = vld [vmem:[%s15787_s1 + $0x2e8] sm:$0xff] }
 0x1c3   :  { %2651 = vmatpush.msrb.mxu0 %v788_v43  ;;  %2593 = vmatpush.msra.mxu3 %v88_v44  ;;  %v369_v43 = vld [vmem:[%s15787_s1 + $0x9e8] sm:$0xff]  ;;  %v1012_v44 = vld [vmem:[%s15787_s1 + $0x1e00] sm:$0xff] }
 0x1c4   :  { %2633 = vmatpush.msra.mxu2 %v536_v45  ;;  %2615 = vmatpush.msrb.mxu1 %v284_v46  ;;  %v1208_v45 = vld [vmem:[%s15787_s1 + $0x2420] sm:$0xff]  ;;  %v131_v46 = vld [vmem:[%s15787_s1 + $0x278] sm:$0xff] }
 0x1c5   :  { %2652 = vmatpush.msrb.mxu0 %v774_v47  ;;  %2594 = vmatpush.msra.mxu3 %v74_v48  ;;  %v355_v47 = vld [vmem:[%s15787_s1 + $0x978] sm:$0xff]  ;;  %v998_v48 = vld [vmem:[%s15787_s1 + $0x1d90] sm:$0xff] }
 0x1c6   :  { %2634 = vmatpush.msra.mxu2 %v522_v49  ;;  %2680 = vmatpush.msra.mxu1 %v1390_v50  ;;  %v1194_v49 = vld [vmem:[%s15787_s1 + $0x23b0] sm:$0xff]  ;;  %v117_v50 = vld [vmem:[%s15787_s1 + $0x208] sm:$0xff] }
 0x1c7   :  { %2653 = vmatpush.msrb.mxu0 %v760_v51  ;;  %2595 = vmatpush.msra.mxu3 %v60_v52  ;;  %v341_v51 = vld [vmem:[%s15787_s1 + $0x908] sm:$0xff]  ;;  %v984_v52 = vld [vmem:[%s15787_s1 + $0x1d20] sm:$0xff] }
 0x1c8   :  { %2635 = vmatpush.msra.mxu2 %v508_v53  ;;  %2681 = vmatpush.msra.mxu1 %v1376_v54  ;;  %v1180_v53 = vld [vmem:[%s15787_s1 + $0x2340] sm:$0xff]  ;;  %v103_v54 = vld [vmem:[%s15787_s1 + $0x198] sm:$0xff] }
 0x1c9   :  { %2654 = vmatpush.msrb.mxu0 %v746_v55  ;;  %2660 = vmatpush.msrb.mxu3 %v1166_v56  ;;  %v327_v55 = vld [vmem:[%s15787_s1 + $0x898] sm:$0xff]  ;;  %v970_v56 = vld [vmem:[%s15787_s1 + $0x1cb0] sm:$0xff] }
 0x1ca   :  { %2714 = vmatpush.msrb.mxu2 %v1418_v57  ;;  %2682 = vmatpush.msra.mxu1 %v1362_v58  ;;  %v943_v57 = vld [vmem:[%s15787_s1 + $0x1bd8] sm:$0xff]  ;;  %v89_v58 = vld [vmem:[%s15787_s1 + $0x128] sm:$0xff] }
 0x1cb   :  { %2596 = vmatmul.f32.vlgmr.msra.gmra.mxu3 %v7139_v20  ;;  %2655 = vmatpush.msrb.mxu0 %v732_v59  ;;  %v313_v59 = vld [vmem:[%s15787_s1 + $0x828] sm:$0xff] }
 0x1cc   :  { %2661 = vmatpush.msrb.mxu3 %v1152_v60  ;;  %2715 = vmatpush.msrb.mxu2 %v1404_v61  ;;  %v956_v60 = vld [vmem:[%s15787_s1 + $0x1c40] sm:$0xff]  ;;  %v929_v61 = vld [vmem:[%s15787_s1 + $0x1b68] sm:$0xff] }
 0x1cd   :  { %2636 = vmatmul.f32.vlgmr.msra.gmra.mxu2 %v7109_v10  ;;  %2683 = vmatpush.msra.mxu1 %v1348_v62  ;;  %v75_v62 = vld [vmem:[%s15787_s1 + $0xb8] sm:$0xff] }
 0x1ce   :  { %2720 = vmatpush.msra.mxu0 %v271_v63  ;;  %2740 = vmatpush.msra.mxu2 %v495_v0  ;;  %v299_v63 = vld [vmem:[%s15787_s1 + $0x7b8] sm:$0xff] }
 0x1cf   :  { %2662 = vmatpush.msrb.mxu3 %v1138_v1  ;;  %2684 = vmatpush.msra.mxu1 %v1334_v2  ;;  %v719_v0 = vld [vmem:[%s15787_s1 + $0x14d8] sm:$0xff]  ;;  %v61_v2 = vld [vmem:[%s15787_s1 + $0x48] sm:$0xff] }
 0x1d0   :  { %2721 = vmatpush.msra.mxu0 %v257_v3  ;;  %2741 = vmatpush.msra.mxu2 %v481_v4  ;;  %v915_v1 = vld [vmem:[%s15787_s1 + $0x1af8] sm:$0xff]  ;;  %v285_v3 = vld [vmem:[%s15787_s1 + $0x748] sm:$0xff] }
 0x1d1   :  { %2663 = vmatpush.msrb.mxu3 %v1124_v5  ;;  %2685 = vmatpush.msra.mxu1 %v1320_v6  ;;  %v705_v4 = vld [vmem:[%s15787_s1 + $0x1468] sm:$0xff]  ;;  %v1167_v6 = vld [vmem:[%s15787_s1 + $0x22d8] sm:$0xff] }
 0x1d2   :  { %2722 = vmatpush.msra.mxu0 %v243_v8  ;;  %2742 = vmatpush.msra.mxu2 %v467_v9  ;;  %v901_v5 = vld [vmem:[%s15787_s1 + $0x1a88] sm:$0xff]  ;;  %v1391_v8 = vld [vmem:[%s15787_s1 + $0x29d8] sm:$0xff] }
 0x1d3   :  { %2664 = vmatpush.msrb.mxu3 %v1110_v11  ;;  %2686 = vmatpush.msra.mxu1 %v1306_v13  ;;  %v691_v9 = vld [vmem:[%s15787_s1 + $0x13f8] sm:$0xff]  ;;  %v1153_v13 = vld [vmem:[%s15787_s1 + $0x2268] sm:$0xff] }
 0x1d4   :  { %2723 = vmatpush.msra.mxu0 %v229_v14  ;;  %2743 = vmatpush.msra.mxu2 %v453_v15  ;;  %v887_v11 = vld [vmem:[%s15787_s1 + $0x1a18] sm:$0xff]  ;;  %v1377_v14 = vld [vmem:[%s15787_s1 + $0x2968] sm:$0xff] }
 0x1d5   :  { %2616 = vmatmul.f32.vlgmr.msrb.gmra.mxu1 %v7165_v29  ;;  %2665 = vmatpush.msrb.mxu3 %v1096_v16  ;;  %v677_v15 = vld [vmem:[%s15787_s1 + $0x1388] sm:$0xff] }
 0x1d6   :  { %2687 = vmatpush.msra.mxu1 %v1292_v17  ;;  %2724 = vmatpush.msra.mxu0 %v215_v18  ;;  %v873_v16 = vld [vmem:[%s15787_s1 + $0x19a8] sm:$0xff]  ;;  %v1139_v17 = vld [vmem:[%s15787_s1 + $0x21f8] sm:$0xff] }
 0x1d7   :  { %2744 = vmatpush.msra.mxu2 %v439_v21  ;;  %2666 = vmatpush.msrb.mxu3 %v1082_v23  ;;  %v1363_v18 = vld [vmem:[%s15787_s1 + $0x28f8] sm:$0xff] }
 0x1d8   :  { %2688 = vmatpush.msra.mxu1 %v1278_v24  ;;  %2725 = vmatpush.msra.mxu0 %v201_v25  ;;  %v663_v21 = vld [vmem:[%s15787_s1 + $0x1318] sm:$0xff]  ;;  %v1125_v24 = vld [vmem:[%s15787_s1 + $0x2188] sm:$0xff] }
 0x1d9   :  { %2745 = vmatpush.msra.mxu2 %v425_v26  ;;  %2656 = vmatmul.f32.vlgmr.msrb.gmra.mxu0 %v7144_v22  ;;  %v859_v23 = vld [vmem:[%s15787_s1 + $0x1938] sm:$0xff]  ;;  %v1349_v25 = vld [vmem:[%s15787_s1 + $0x2888] sm:$0xff] }
 0x1da   :  { %2667 = vmatpush.msrb.mxu3 %v1068_v27  ;;  %2689 = vmatpush.msra.mxu1 %v1264_v28  ;;  %v649_v26 = vld [vmem:[%s15787_s1 + $0x12a8] sm:$0xff]  ;;  %v1111_v28 = vld [vmem:[%s15787_s1 + $0x2118] sm:$0xff] }
 0x1db   :  { %2726 = vmatpush.msra.mxu0 %v187_v30  ;;  %2746 = vmatpush.msra.mxu2 %v411_v31  ;;  %v845_v27 = vld [vmem:[%s15787_s1 + $0x18c8] sm:$0xff]  ;;  %v1335_v30 = vld [vmem:[%s15787_s1 + $0x2818] sm:$0xff] }
 0x1dc   :  { %2668 = vmatpush.msrb.mxu3 %v1054_v32  ;;  %2690 = vmatpush.msra.mxu1 %v1250_v33  ;;  %v635_v31 = vld [vmem:[%s15787_s1 + $0x1238] sm:$0xff]  ;;  %v1097_v33 = vld [vmem:[%s15787_s1 + $0x20a8] sm:$0xff] }
 0x1dd   :  { %2727 = vmatpush.msra.mxu0 %v173_v34  ;;  %2747 = vmatpush.msra.mxu2 %v397_v35  ;;  %v831_v32 = vld [vmem:[%s15787_s1 + $0x1858] sm:$0xff]  ;;  %v1321_v34 = vld [vmem:[%s15787_s1 + $0x27a8] sm:$0xff] }
 0x1de   :  { %2669 = vmatpush.msrb.mxu3 %v1040_v36  ;;  %2691 = vmatpush.msra.mxu1 %v1236_v37  ;;  %v621_v35 = vld [vmem:[%s15787_s1 + $0x11c8] sm:$0xff]  ;;  %v1083_v37 = vld [vmem:[%s15787_s1 + $0x2038] sm:$0xff] }
 0x1df   :  { %2728 = vmatpush.msra.mxu0 %v159_v38  ;;  %2748 = vmatpush.msra.mxu2 %v383_v39  ;;  %v817_v36 = vld [vmem:[%s15787_s1 + $0x17e8] sm:$0xff]  ;;  %v1307_v38 = vld [vmem:[%s15787_s1 + $0x2738] sm:$0xff] }
 0x1e0   :  { %2670 = vmatpush.msrb.mxu3 %v1026_v40  ;;  %2692 = vmatpush.msra.mxu1 %v1222_v41  ;;  %v607_v39 = vld [vmem:[%s15787_s1 + $0x1158] sm:$0xff]  ;;  %v1069_v41 = vld [vmem:[%s15787_s1 + $0x1fc8] sm:$0xff] }
 0x1e1   :  { %2729 = vmatpush.msra.mxu0 %v145_v42  ;;  %2749 = vmatpush.msra.mxu2 %v369_v43  ;;  %v803_v40 = vld [vmem:[%s15787_s1 + $0x1778] sm:$0xff]  ;;  %v1293_v42 = vld [vmem:[%s15787_s1 + $0x26c8] sm:$0xff] }
 0x1e2   :  { %2671 = vmatpush.msrb.mxu3 %v1012_v44  ;;  %2693 = vmatpush.msra.mxu1 %v1208_v45  ;;  %v593_v43 = vld [vmem:[%s15787_s1 + $0x10e8] sm:$0xff]  ;;  %v1055_v45 = vld [vmem:[%s15787_s1 + $0x1f58] sm:$0xff] }
 0x1e3   :  { %2730 = vmatpush.msra.mxu0 %v131_v46  ;;  %2750 = vmatpush.msra.mxu2 %v355_v47  ;;  %v789_v44 = vld [vmem:[%s15787_s1 + $0x1708] sm:$0xff]  ;;  %v1279_v46 = vld [vmem:[%s15787_s1 + $0x2658] sm:$0xff] }
 0x1e4   :  { %2672 = vmatpush.msrb.mxu3 %v998_v48  ;;  %2694 = vmatpush.msra.mxu1 %v1194_v49  ;;  %v579_v47 = vld [vmem:[%s15787_s1 + $0x1078] sm:$0xff]  ;;  %v1041_v49 = vld [vmem:[%s15787_s1 + $0x1ee8] sm:$0xff] }
 0x1e5   :  { %2731 = vmatpush.msra.mxu0 %v117_v50  ;;  %2751 = vmatpush.msra.mxu2 %v341_v51  ;;  %v775_v48 = vld [vmem:[%s15787_s1 + $0x1698] sm:$0xff]  ;;  %v1265_v50 = vld [vmem:[%s15787_s1 + $0x25e8] sm:$0xff] }
 0x1e6   :  { %2673 = vmatpush.msrb.mxu3 %v984_v52  ;;  %2695 = vmatpush.msra.mxu1 %v1180_v53  ;;  %v565_v51 = vld [vmem:[%s15787_s1 + $0x1008] sm:$0xff]  ;;  %v1027_v53 = vld [vmem:[%s15787_s1 + $0x1e78] sm:$0xff] }
 0x1e7   :  { %2732 = vmatpush.msra.mxu0 %v103_v54  ;;  %2752 = vmatpush.msra.mxu2 %v327_v55  ;;  %v761_v52 = vld [vmem:[%s15787_s1 + $0x1628] sm:$0xff]  ;;  %v1251_v54 = vld [vmem:[%s15787_s1 + $0x2578] sm:$0xff] }
 0x1e8   :  { %2674 = vmatpush.msrb.mxu3 %v970_v56  ;;  %2780 = vmatpush.msrb.mxu1 %v943_v57  ;;  %v551_v55 = vld [vmem:[%s15787_s1 + $0xf98] sm:$0xff]  ;;  %v1013_v57 = vld [vmem:[%s15787_s1 + $0x1e08] sm:$0xff] }
 0x1e9   :  { %2733 = vmatpush.msra.mxu0 %v89_v58  ;;  %2753 = vmatpush.msra.mxu2 %v313_v59  ;;  %v747_v56 = vld [vmem:[%s15787_s1 + $0x15b8] sm:$0xff]  ;;  %v1237_v58 = vld [vmem:[%s15787_s1 + $0x2508] sm:$0xff] }
 0x1ea   :  { %2675 = vmatpush.msrb.mxu3 %v956_v60  ;;  %2781 = vmatpush.msrb.mxu1 %v929_v61  ;;  %v537_v59 = vld [vmem:[%s15787_s1 + $0xf28] sm:$0xff]  ;;  %v999_v61 = vld [vmem:[%s15787_s1 + $0x1d98] sm:$0xff] }
 0x1eb   :  { %2676 = vmatmul.f32.vlgmr.msrb.gmra.mxu3 %v7303_v12  ;;  %2734 = vmatpush.msra.mxu0 %v75_v62  ;;  %v733_v60 = vld [vmem:[%s15787_s1 + $0x1548] sm:$0xff]  ;;  %v1223_v62 = vld [vmem:[%s15787_s1 + $0x2498] sm:$0xff] }
 0x1ec   :  { %2754 = vmatpush.msra.mxu2 %v299_v63  ;;  %2760 = vmatpush.msra.mxu3 %v719_v0  ;;  %v523_v63 = vld [vmem:[%s15787_s1 + $0xeb8] sm:$0xff]  ;;  %v272_v0 = vld [vmem:[%s15787_s1 + $0x6e0] sm:$0xff] }
 0x1ed   :  { %2782 = vmatpush.msrb.mxu1 %v915_v1  ;;  %2735 = vmatpush.msra.mxu0 %v61_v2  ;;  %v985_v1 = vld [vmem:[%s15787_s1 + $0x1d28] sm:$0xff] }
 0x1ee   :  { %2755 = vmatpush.msra.mxu2 %v285_v3  ;;  %2761 = vmatpush.msra.mxu3 %v705_v4  ;;  %v1209_v2 = vld [vmem:[%s15787_s1 + $0x2428] sm:$0xff]  ;;  %v258_v4 = vld [vmem:[%s15787_s1 + $0x670] sm:$0xff] }
 0x1ef   :  { %6745 = vmatmul.msk.f32.vlgmr.msrb.gmra.mxu2 %vm1456_vm0, %v7292_v7  ;;  %2783 = vmatpush.msrb.mxu1 %v901_v5  ;;  %v509_v3 = vld [vmem:[%s15787_s1 + $0xe48] sm:$0xff]  ;;  %v971_v5 = vld [vmem:[%s15787_s1 + $0x1cb8] sm:$0xff] }
 0x1f0   :  { %2800 = vmatpush.msrb.mxu0 %v1167_v6  ;;  %2820 = vmatpush.msrb.mxu2 %v1391_v8  ;;  %v1195_v6 = vld [vmem:[%s15787_s1 + $0x23b8] sm:$0xff] }
 0x1f1   :  { %2762 = vmatpush.msra.mxu3 %v691_v9  ;;  %2784 = vmatpush.msrb.mxu1 %v887_v11  ;;  %v1419_v8 = vld [vmem:[%s15787_s1 + $0x2ab8] sm:$0xff]  ;;  %v244_v9 = vld [vmem:[%s15787_s1 + $0x600] sm:$0xff]  ;;  %v957_v11 = vld [vmem:[%s15787_s1 + $0x1c48] sm:$0xff] }
 0x1f2   :  { %2801 = vmatpush.msrb.mxu0 %v1153_v13  ;;  %2821 = vmatpush.msrb.mxu2 %v1377_v14  ;;  %v1181_v13 = vld [vmem:[%s15787_s1 + $0x2348] sm:$0xff] }
 0x1f3   :  { %2763 = vmatpush.msra.mxu3 %v677_v15  ;;  %2785 = vmatpush.msrb.mxu1 %v873_v16  ;;  %v1405_v14 = vld [vmem:[%s15787_s1 + $0x2a48] sm:$0xff]  ;;  %v230_v15 = vld [vmem:[%s15787_s1 + $0x590] sm:$0xff]  ;;  %v496_v16 = vld [vmem:[%s15787_s1 + $0xde0] sm:$0xff] }
 0x1f4   :  { %2802 = vmatpush.msrb.mxu0 %v1139_v17  ;;  %2822 = vmatpush.msrb.mxu2 %v1363_v18  ;;  %v720_v17 = vld [vmem:[%s15787_s1 + $0x14e0] sm:$0xff] }
 0x1f5   :  { %2696 = vmatmul.f32.vlgmr.msra.gmra.mxu1 %v7325_v19  ;;  %2764 = vmatpush.msra.mxu3 %v663_v21  ;;  %v944_v18 = vld [vmem:[%s15787_s1 + $0x1be0] sm:$0xff] }
 0x1f6   :  { %2786 = vmatpush.msrb.mxu1 %v859_v23  ;;  %2803 = vmatpush.msrb.mxu0 %v1125_v24  ;;  %v216_v21 = vld [vmem:[%s15787_s1 + $0x520] sm:$0xff]  ;;  %v482_v23 = vld [vmem:[%s15787_s1 + $0xd70] sm:$0xff] }
 0x1f7   :  { %2823 = vmatpush.msrb.mxu2 %v1349_v25  ;;  %2765 = vmatpush.msra.mxu3 %v649_v26  ;;  %v706_v24 = vld [vmem:[%s15787_s1 + $0x1470] sm:$0xff] }
 0x1f8   :  { %2787 = vmatpush.msrb.mxu1 %v845_v27  ;;  %2804 = vmatpush.msrb.mxu0 %v1111_v28  ;;  %v930_v25 = vld [vmem:[%s15787_s1 + $0x1b70] sm:$0xff]  ;;  %v468_v27 = vld [vmem:[%s15787_s1 + $0xd00] sm:$0xff] }
 0x1f9   :  { %2824 = vmatpush.msrb.mxu2 %v1335_v30  ;;  %2766 = vmatpush.msra.mxu3 %v635_v31  ;;  %v202_v26 = vld [vmem:[%s15787_s1 + $0x4b0] sm:$0xff]  ;;  %v692_v28 = vld [vmem:[%s15787_s1 + $0x1400] sm:$0xff] }
 0x1fa   :  { %2788 = vmatpush.msrb.mxu1 %v831_v32  ;;  %2805 = vmatpush.msrb.mxu0 %v1097_v33  ;;  %v916_v30 = vld [vmem:[%s15787_s1 + $0x1b00] sm:$0xff]  ;;  %v454_v32 = vld [vmem:[%s15787_s1 + $0xc90] sm:$0xff] }
 0x1fb   :  { %2825 = vmatpush.msrb.mxu2 %v1321_v34  ;;  %2767 = vmatpush.msra.mxu3 %v621_v35  ;;  %v188_v31 = vld [vmem:[%s15787_s1 + $0x440] sm:$0xff]  ;;  %v678_v33 = vld [vmem:[%s15787_s1 + $0x1390] sm:$0xff] }
 0x1fc   :  { %2789 = vmatpush.msrb.mxu1 %v817_v36  ;;  %2806 = vmatpush.msrb.mxu0 %v1083_v37  ;;  %v902_v34 = vld [vmem:[%s15787_s1 + $0x1a90] sm:$0xff]  ;;  %v440_v36 = vld [vmem:[%s15787_s1 + $0xc20] sm:$0xff] }
 0x1fd   :  { %2826 = vmatpush.msrb.mxu2 %v1307_v38  ;;  %2768 = vmatpush.msra.mxu3 %v607_v39  ;;  %v174_v35 = vld [vmem:[%s15787_s1 + $0x3d0] sm:$0xff]  ;;  %v664_v37 = vld [vmem:[%s15787_s1 + $0x1320] sm:$0xff] }
 0x1fe   :  { %2790 = vmatpush.msrb.mxu1 %v803_v40  ;;  %2807 = vmatpush.msrb.mxu0 %v1069_v41  ;;  %v888_v38 = vld [vmem:[%s15787_s1 + $0x1a20] sm:$0xff]  ;;  %v426_v40 = vld [vmem:[%s15787_s1 + $0xbb0] sm:$0xff] }
 0x1ff   :  { %2827 = vmatpush.msrb.mxu2 %v1293_v42  ;;  %2769 = vmatpush.msra.mxu3 %v593_v43  ;;  %v160_v39 = vld [vmem:[%s15787_s1 + $0x360] sm:$0xff]  ;;  %v650_v41 = vld [vmem:[%s15787_s1 + $0x12b0] sm:$0xff] }
 0x200   :  { %2791 = vmatpush.msrb.mxu1 %v789_v44  ;;  %2808 = vmatpush.msrb.mxu0 %v1055_v45  ;;  %v874_v42 = vld [vmem:[%s15787_s1 + $0x19b0] sm:$0xff]  ;;  %v412_v44 = vld [vmem:[%s15787_s1 + $0xb40] sm:$0xff] }
 0x201   :  { %2828 = vmatpush.msrb.mxu2 %v1279_v46  ;;  %2770 = vmatpush.msra.mxu3 %v579_v47  ;;  %v146_v43 = vld [vmem:[%s15787_s1 + $0x2f0] sm:$0xff]  ;;  %v636_v45 = vld [vmem:[%s15787_s1 + $0x1240] sm:$0xff] }
 0x202   :  { %2792 = vmatpush.msrb.mxu1 %v775_v48  ;;  %2809 = vmatpush.msrb.mxu0 %v1041_v49  ;;  %v860_v46 = vld [vmem:[%s15787_s1 + $0x1940] sm:$0xff]  ;;  %v398_v48 = vld [vmem:[%s15787_s1 + $0xad0] sm:$0xff] }
 0x203   :  { %2829 = vmatpush.msrb.mxu2 %v1265_v50  ;;  %2771 = vmatpush.msra.mxu3 %v565_v51  ;;  %v132_v47 = vld [vmem:[%s15787_s1 + $0x280] sm:$0xff]  ;;  %v622_v49 = vld [vmem:[%s15787_s1 + $0x11d0] sm:$0xff] }
 0x204   :  { %2793 = vmatpush.msrb.mxu1 %v761_v52  ;;  %2810 = vmatpush.msrb.mxu0 %v1027_v53  ;;  %v846_v50 = vld [vmem:[%s15787_s1 + $0x18d0] sm:$0xff]  ;;  %v384_v52 = vld [vmem:[%s15787_s1 + $0xa60] sm:$0xff] }
 0x205   :  { %2830 = vmatpush.msrb.mxu2 %v1251_v54  ;;  %2772 = vmatpush.msra.mxu3 %v551_v55  ;;  %v118_v51 = vld [vmem:[%s15787_s1 + $0x210] sm:$0xff]  ;;  %v608_v53 = vld [vmem:[%s15787_s1 + $0x1160] sm:$0xff] }
 0x206   :  { %2794 = vmatpush.msrb.mxu1 %v747_v56  ;;  %2811 = vmatpush.msrb.mxu0 %v1013_v57  ;;  %v832_v54 = vld [vmem:[%s15787_s1 + $0x1860] sm:$0xff]  ;;  %v370_v56 = vld [vmem:[%s15787_s1 + $0x9f0] sm:$0xff] }
 0x207   :  { %2831 = vmatpush.msrb.mxu2 %v1237_v58  ;;  %2773 = vmatpush.msra.mxu3 %v537_v59  ;;  %v104_v55 = vld [vmem:[%s15787_s1 + $0x1a0] sm:$0xff]  ;;  %v594_v57 = vld [vmem:[%s15787_s1 + $0x10f0] sm:$0xff] }
 0x208   :  { %2795 = vmatpush.msrb.mxu1 %v733_v60  ;;  %2812 = vmatpush.msrb.mxu0 %v999_v61  ;;  %v818_v58 = vld [vmem:[%s15787_s1 + $0x17f0] sm:$0xff]  ;;  %v356_v60 = vld [vmem:[%s15787_s1 + $0x980] sm:$0xff] }
 0x209   :  { %2832 = vmatpush.msrb.mxu2 %v1223_v62  ;;  %2774 = vmatpush.msra.mxu3 %v523_v63  ;;  %v90_v59 = vld [vmem:[%s15787_s1 + $0x130] sm:$0xff]  ;;  %v580_v61 = vld [vmem:[%s15787_s1 + $0x1080] sm:$0xff] }
 0x20a   :  { %2860 = vmatpush.msra.mxu1 %v272_v0  ;;  %2813 = vmatpush.msrb.mxu0 %v985_v1  ;;  %v804_v62 = vld [vmem:[%s15787_s1 + $0x1780] sm:$0xff]  ;;  %v342_v0 = vld [vmem:[%s15787_s1 + $0x910] sm:$0xff] }
 0x20b   :  { %2833 = vmatpush.msrb.mxu2 %v1209_v2  ;;  %2775 = vmatpush.msra.mxu3 %v509_v3  ;;  %v76_v63 = vld [vmem:[%s15787_s1 + $0xc0] sm:$0xff]  ;;  %v566_v1 = vld [vmem:[%s15787_s1 + $0x1010] sm:$0xff] }
 0x20c   :  { %2861 = vmatpush.msra.mxu1 %v258_v4  ;;  %2814 = vmatpush.msrb.mxu0 %v971_v5  ;;  %v790_v2 = vld [vmem:[%s15787_s1 + $0x1710] sm:$0xff]  ;;  %v328_v4 = vld [vmem:[%s15787_s1 + $0x8a0] sm:$0xff] }
 0x20d   :  { %2834 = vmatpush.msrb.mxu2 %v1195_v6  ;;  %2854 = vmatpush.msrb.mxu3 %v1419_v8  ;;  %v62_v3 = vld [vmem:[%s15787_s1 + $0x50] sm:$0xff]  ;;  %v552_v5 = vld [vmem:[%s15787_s1 + $0xfa0] sm:$0xff] }
 0x20e   :  { %2756 = vmatmul.f32.vlgmr.msra.gmra.mxu2 %v7165_v29  ;;  %2862 = vmatpush.msra.mxu1 %v244_v9  ;;  %v776_v6 = vld [vmem:[%s15787_s1 + $0x16a0] sm:$0xff]  ;;  %v314_v9 = vld [vmem:[%s15787_s1 + $0x830] sm:$0xff] }
 0x20f   :  { %2815 = vmatpush.msrb.mxu0 %v957_v11  ;;  %2835 = vmatpush.msrb.mxu2 %v1181_v13  ;;  %v1168_v8 = vld [vmem:[%s15787_s1 + $0x22e0] sm:$0xff]  ;;  %v538_v11 = vld [vmem:[%s15787_s1 + $0xf30] sm:$0xff] }
 0x210   :  { %2855 = vmatpush.msrb.mxu3 %v1405_v14  ;;  %2736 = vmatmul.f32.vlgmr.msra.gmra.mxu0 %v7139_v20  ;;  %v762_v13 = vld [vmem:[%s15787_s1 + $0x1630] sm:$0xff] }
 0x211   :  { %2776 = vmatmul.f32.vlgmr.msra.gmra.mxu3 %v7109_v10  ;;  %2863 = vmatpush.msra.mxu1 %v230_v15  ;;  %v1154_v14 = vld [vmem:[%s15787_s1 + $0x2270] sm:$0xff]  ;;  %v300_v15 = vld [vmem:[%s15787_s1 + $0x7c0] sm:$0xff] }
 0x212   :  { %2880 = vmatpush.msra.mxu3 %v496_v16  ;;  %2900 = vmatpush.msra.mxu0 %v720_v17  ;;  %v524_v16 = vld [vmem:[%s15787_s1 + $0xec0] sm:$0xff] }
 0x213   :  { %2920 = vmatpush.msra.mxu2 %v944_v18  ;;  %2864 = vmatpush.msra.mxu1 %v216_v21  ;;  %v748_v17 = vld [vmem:[%s15787_s1 + $0x15c0] sm:$0xff]  ;;  %v286_v21 = vld [vmem:[%s15787_s1 + $0x750] sm:$0xff] }
 0x214   :  { %2881 = vmatpush.msra.mxu3 %v482_v23  ;;  %2901 = vmatpush.msra.mxu0 %v706_v24  ;;  %v1140_v18 = vld [vmem:[%s15787_s1 + $0x2200] sm:$0xff]  ;;  %v510_v23 = vld [vmem:[%s15787_s1 + $0xe50] sm:$0xff] }
 0x215   :  { %2921 = vmatpush.msra.mxu2 %v930_v25  ;;  %2865 = vmatpush.msra.mxu1 %v202_v26  ;;  %v734_v24 = vld [vmem:[%s15787_s1 + $0x1550] sm:$0xff]  ;;  %v1392_v26 = vld [vmem:[%s15787_s1 + $0x29e0] sm:$0xff] }
 0x216   :  { %2882 = vmatpush.msra.mxu3 %v468_v27  ;;  %2902 = vmatpush.msra.mxu0 %v692_v28  ;;  %v1126_v25 = vld [vmem:[%s15787_s1 + $0x2190] sm:$0xff]  ;;  %v1420_v27 = vld [vmem:[%s15787_s1 + $0x2ac0] sm:$0xff]  ;;  %v273_v28 = vld [vmem:[%s15787_s1 + $0x6e8] sm:$0xff] }
 0x217   :  { %2922 = vmatpush.msra.mxu2 %v916_v30  ;;  %2866 = vmatpush.msra.mxu1 %v188_v31  ;;  %v1112_v30 = vld [vmem:[%s15787_s1 + $0x2120] sm:$0xff]  ;;  %v1378_v31 = vld [vmem:[%s15787_s1 + $0x2970] sm:$0xff] }
 0x218   :  { %2836 = vmatmul.f32.vlgmr.msrb.gmra.mxu2 %v7325_v19  ;;  %2883 = vmatpush.msra.mxu3 %v454_v32  ;;  %v1406_v32 = vld [vmem:[%s15787_s1 + $0x2a50] sm:$0xff] }
 0x219   :  { %2903 = vmatpush.msra.mxu0 %v678_v33  ;;  %2923 = vmatpush.msra.mxu2 %v902_v34  ;;  %v259_v33 = vld [vmem:[%s15787_s1 + $0x678] sm:$0xff]  ;;  %v1098_v34 = vld [vmem:[%s15787_s1 + $0x20b0] sm:$0xff] }
 0x21a   :  { %2796 = vmatmul.f32.vlgmr.msrb.gmra.mxu1 %v7144_v22  ;;  %6746 = vmatmul.msk.f32.vlgmr.msrb.gmra.mxu3 %vm1456_vm0, %v7292_v7 }
 0x21b   :  { %2867 = vmatpush.msra.mxu1 %v174_v35  ;;  %2884 = vmatpush.msra.mxu3 %v440_v36  ;;  %v497_v35 = vld [vmem:[%s15787_s1 + $0xde8] sm:$0xff]  ;;  %v1364_v36 = vld [vmem:[%s15787_s1 + $0x2900] sm:$0xff] }
 0x21c   :  { %2904 = vmatpush.msra.mxu0 %v664_v37  ;;  %2924 = vmatpush.msra.mxu2 %v888_v38  ;;  %v245_v37 = vld [vmem:[%s15787_s1 + $0x608] sm:$0xff]  ;;  %v483_v38 = vld [vmem:[%s15787_s1 + $0xd78] sm:$0xff] }
 0x21d   :  { %2816 = vmatmul.f32.vlgmr.msrb.gmra.mxu0 %v7303_v12  ;;  %2868 = vmatpush.msra.mxu1 %v160_v39  ;;  %v1084_v39 = vld [vmem:[%s15787_s1 + $0x2040] sm:$0xff] }
 0x21e   :  { %2885 = vmatpush.msra.mxu3 %v426_v40  ;;  %2905 = vmatpush.msra.mxu0 %v650_v41  ;;  %v1350_v40 = vld [vmem:[%s15787_s1 + $0x2890] sm:$0xff]  ;;  %v231_v41 = vld [vmem:[%s15787_s1 + $0x598] sm:$0xff] }
 0x21f   :  { %2925 = vmatpush.msra.mxu2 %v874_v42  ;;  %2869 = vmatpush.msra.mxu1 %v146_v43  ;;  %v469_v42 = vld [vmem:[%s15787_s1 + $0xd08] sm:$0xff]  ;;  %v1070_v43 = vld [vmem:[%s15787_s1 + $0x1fd0] sm:$0xff] }
 0x220   :  { %2886 = vmatpush.msra.mxu3 %v412_v44  ;;  %2906 = vmatpush.msra.mxu0 %v636_v45  ;;  %v1336_v44 = vld [vmem:[%s15787_s1 + $0x2820] sm:$0xff]  ;;  %v217_v45 = vld [vmem:[%s15787_s1 + $0x528] sm:$0xff] }
 0x221   :  { %2926 = vmatpush.msra.mxu2 %v860_v46  ;;  %2870 = vmatpush.msra.mxu1 %v132_v47  ;;  %v455_v46 = vld [vmem:[%s15787_s1 + $0xc98] sm:$0xff]  ;;  %v1056_v47 = vld [vmem:[%s15787_s1 + $0x1f60] sm:$0xff] }
 0x222   :  { %2887 = vmatpush.msra.mxu3 %v398_v48  ;;  %2907 = vmatpush.msra.mxu0 %v622_v49  ;;  %v1322_v48 = vld [vmem:[%s15787_s1 + $0x27b0] sm:$0xff]  ;;  %v203_v49 = vld [vmem:[%s15787_s1 + $0x4b8] sm:$0xff] }
 0x223   :  { %2927 = vmatpush.msra.mxu2 %v846_v50  ;;  %2871 = vmatpush.msra.mxu1 %v118_v51  ;;  %v441_v50 = vld [vmem:[%s15787_s1 + $0xc28] sm:$0xff]  ;;  %v1042_v51 = vld [vmem:[%s15787_s1 + $0x1ef0] sm:$0xff] }
 0x224   :  { %2888 = vmatpush.msra.mxu3 %v384_v52  ;;  %2908 = vmatpush.msra.mxu0 %v608_v53  ;;  %v1308_v52 = vld [vmem:[%s15787_s1 + $0x2740] sm:$0xff]  ;;  %v189_v53 = vld [vmem:[%s15787_s1 + $0x448] sm:$0xff] }
 0x225   :  { %2928 = vmatpush.msra.mxu2 %v832_v54  ;;  %2872 = vmatpush.msra.mxu1 %v104_v55  ;;  %v427_v54 = vld [vmem:[%s15787_s1 + $0xbb8] sm:$0xff]  ;;  %v1028_v55 = vld [vmem:[%s15787_s1 + $0x1e80] sm:$0xff] }
 0x226   :  { %2889 = vmatpush.msra.mxu3 %v370_v56  ;;  %2909 = vmatpush.msra.mxu0 %v594_v57  ;;  %v1294_v56 = vld [vmem:[%s15787_s1 + $0x26d0] sm:$0xff]  ;;  %v175_v57 = vld [vmem:[%s15787_s1 + $0x3d8] sm:$0xff] }
 0x227   :  { %2929 = vmatpush.msra.mxu2 %v818_v58  ;;  %2873 = vmatpush.msra.mxu1 %v90_v59  ;;  %v413_v58 = vld [vmem:[%s15787_s1 + $0xb48] sm:$0xff]  ;;  %v1014_v59 = vld [vmem:[%s15787_s1 + $0x1e10] sm:$0xff] }
 0x228   :  { %2890 = vmatpush.msra.mxu3 %v356_v60  ;;  %2910 = vmatpush.msra.mxu0 %v580_v61  ;;  %v1280_v60 = vld [vmem:[%s15787_s1 + $0x2660] sm:$0xff]  ;;  %v161_v61 = vld [vmem:[%s15787_s1 + $0x368] sm:$0xff] }
 0x229   :  { %2930 = vmatpush.msra.mxu2 %v804_v62  ;;  %2874 = vmatpush.msra.mxu1 %v76_v63  ;;  %v399_v62 = vld [vmem:[%s15787_s1 + $0xad8] sm:$0xff]  ;;  %v1000_v63 = vld [vmem:[%s15787_s1 + $0x1da0] sm:$0xff] }
 0x22a   :  { %2891 = vmatpush.msra.mxu3 %v342_v0  ;;  %2911 = vmatpush.msra.mxu0 %v566_v1  ;;  %v1266_v0 = vld [vmem:[%s15787_s1 + $0x25f0] sm:$0xff]  ;;  %v147_v1 = vld [vmem:[%s15787_s1 + $0x2f8] sm:$0xff] }
 0x22b   :  { %2931 = vmatpush.msra.mxu2 %v790_v2  ;;  %2875 = vmatpush.msra.mxu1 %v62_v3  ;;  %v385_v2 = vld [vmem:[%s15787_s1 + $0xa68] sm:$0xff]  ;;  %v986_v3 = vld [vmem:[%s15787_s1 + $0x1d30] sm:$0xff] }
 0x22c   :  { %2892 = vmatpush.msra.mxu3 %v328_v4  ;;  %2912 = vmatpush.msra.mxu0 %v552_v5  ;;  %v1252_v4 = vld [vmem:[%s15787_s1 + $0x2580] sm:$0xff]  ;;  %v133_v5 = vld [vmem:[%s15787_s1 + $0x288] sm:$0xff] }
 0x22d   :  { %2932 = vmatpush.msra.mxu2 %v776_v6  ;;  %2940 = vmatpush.msrb.mxu1 %v1168_v8  ;;  %v371_v6 = vld [vmem:[%s15787_s1 + $0x9f8] sm:$0xff]  ;;  %v972_v8 = vld [vmem:[%s15787_s1 + $0x1cc0] sm:$0xff] }
 0x22e   :  { %2893 = vmatpush.msra.mxu3 %v314_v9  ;;  %2913 = vmatpush.msra.mxu0 %v538_v11  ;;  %v1238_v9 = vld [vmem:[%s15787_s1 + $0x2510] sm:$0xff]  ;;  %v119_v11 = vld [vmem:[%s15787_s1 + $0x218] sm:$0xff] }
 0x22f   :  { %2933 = vmatpush.msra.mxu2 %v762_v13  ;;  %2941 = vmatpush.msrb.mxu1 %v1154_v14  ;;  %v357_v13 = vld [vmem:[%s15787_s1 + $0x988] sm:$0xff]  ;;  %v958_v14 = vld [vmem:[%s15787_s1 + $0x1c50] sm:$0xff] }
 0x230   :  { %2894 = vmatpush.msra.mxu3 %v300_v15  ;;  %2914 = vmatpush.msra.mxu0 %v524_v16  ;;  %v1224_v15 = vld [vmem:[%s15787_s1 + $0x24a0] sm:$0xff]  ;;  %v105_v16 = vld [vmem:[%s15787_s1 + $0x1a8] sm:$0xff] }
 0x231   :  { %2934 = vmatpush.msra.mxu2 %v748_v17  ;;  %2942 = vmatpush.msrb.mxu1 %v1140_v18  ;;  %v343_v17 = vld [vmem:[%s15787_s1 + $0x918] sm:$0xff]  ;;  %v721_v18 = vld [vmem:[%s15787_s1 + $0x14e8] sm:$0xff] }
 0x232   :  { %2895 = vmatpush.msra.mxu3 %v286_v21  ;;  %2915 = vmatpush.msra.mxu0 %v510_v23  ;;  %v1210_v21 = vld [vmem:[%s15787_s1 + $0x2430] sm:$0xff]  ;;  %v91_v23 = vld [vmem:[%s15787_s1 + $0x138] sm:$0xff] }
 0x233   :  { %2935 = vmatpush.msra.mxu2 %v734_v24  ;;  %2943 = vmatpush.msrb.mxu1 %v1126_v25  ;;  %v329_v24 = vld [vmem:[%s15787_s1 + $0x8a8] sm:$0xff]  ;;  %v707_v25 = vld [vmem:[%s15787_s1 + $0x1478] sm:$0xff] }
 0x234   :  { %2960 = vmatpush.msrb.mxu3 %v1392_v26  ;;  %2994 = vmatpush.msrb.mxu0 %v1420_v27  ;;  %v1196_v26 = vld [vmem:[%s15787_s1 + $0x23c0] sm:$0xff]  ;;  %v77_v27 = vld [vmem:[%s15787_s1 + $0xc8] sm:$0xff] }
 0x235   :  { %3000 = vmatpush.msrb.mxu2 %v273_v28  ;;  %2896 = vmatmul.f32.vlgmr.msra.gmra.mxu3 %v7165_v29  ;;  %v315_v28 = vld [vmem:[%s15787_s1 + $0x838] sm:$0xff] }
 0x236   :  { %2944 = vmatpush.msrb.mxu1 %v1112_v30  ;;  %2961 = vmatpush.msrb.mxu3 %v1378_v31  ;;  %v693_v30 = vld [vmem:[%s15787_s1 + $0x1408] sm:$0xff]  ;;  %v1182_v31 = vld [vmem:[%s15787_s1 + $0x2350] sm:$0xff] }
 0x237   :  { %2995 = vmatpush.msrb.mxu0 %v1406_v32  ;;  %3001 = vmatpush.msrb.mxu2 %v259_v33  ;;  %v63_v32 = vld [vmem:[%s15787_s1 + $0x58] sm:$0xff]  ;;  %v301_v33 = vld [vmem:[%s15787_s1 + $0x7c8] sm:$0xff] }
 0x238   :  { %2916 = vmatmul.f32.vlgmr.msra.gmra.mxu0 %v7109_v10  ;;  %2945 = vmatpush.msrb.mxu1 %v1098_v34  ;;  %v679_v34 = vld [vmem:[%s15787_s1 + $0x1398] sm:$0xff] }
 0x239   :  { %3020 = vmatpush.msra.mxu0 %v497_v35  ;;  %2962 = vmatpush.msrb.mxu3 %v1364_v36  ;;  %v945_v35 = vld [vmem:[%s15787_s1 + $0x1be8] sm:$0xff] }
 0x23a   :  { %3002 = vmatpush.msrb.mxu2 %v245_v37  ;;  %2876 = vmatmul.f32.vlgmr.msra.gmra.mxu1 %v7139_v20  ;;  %v1169_v36 = vld [vmem:[%s15787_s1 + $0x22e8] sm:$0xff]  ;;  %v287_v37 = vld [vmem:[%s15787_s1 + $0x758] sm:$0xff] }
 0x23b   :  { %3021 = vmatpush.msra.mxu0 %v483_v38  ;;  %2936 = vmatmul.f32.vlgmr.msra.gmra.mxu2 %v7144_v22  ;;  %v665_v38 = vld [vmem:[%s15787_s1 + $0x1328] sm:$0xff] }
 0x23c   :  { %2946 = vmatpush.msrb.mxu1 %v1084_v39  ;;  %2963 = vmatpush.msrb.mxu3 %v1350_v40  ;;  %v931_v39 = vld [vmem:[%s15787_s1 + $0x1b78] sm:$0xff] }
 0x23d   :  { %3003 = vmatpush.msrb.mxu2 %v231_v41  ;;  %3022 = vmatpush.msra.mxu0 %v469_v42  ;;  %v1155_v40 = vld [vmem:[%s15787_s1 + $0x2278] sm:$0xff]  ;;  %v1393_v41 = vld [vmem:[%s15787_s1 + $0x29e8] sm:$0xff] }
 0x23e   :  { %2947 = vmatpush.msrb.mxu1 %v1070_v43  ;;  %2964 = vmatpush.msrb.mxu3 %v1336_v44  ;;  %v651_v42 = vld [vmem:[%s15787_s1 + $0x12b8] sm:$0xff]  ;;  %v917_v43 = vld [vmem:[%s15787_s1 + $0x1b08] sm:$0xff] }
 0x23f   :  { %3004 = vmatpush.msrb.mxu2 %v217_v45  ;;  %3023 = vmatpush.msra.mxu0 %v455_v46  ;;  %v1141_v44 = vld [vmem:[%s15787_s1 + $0x2208] sm:$0xff]  ;;  %v1379_v45 = vld [vmem:[%s15787_s1 + $0x2978] sm:$0xff] }
 0x240   :  { %2948 = vmatpush.msrb.mxu1 %v1056_v47  ;;  %2965 = vmatpush.msrb.mxu3 %v1322_v48  ;;  %v637_v46 = vld [vmem:[%s15787_s1 + $0x1248] sm:$0xff]  ;;  %v903_v47 = vld [vmem:[%s15787_s1 + $0x1a98] sm:$0xff] }
 0x241   :  { %3005 = vmatpush.msrb.mxu2 %v203_v49  ;;  %3024 = vmatpush.msra.mxu0 %v441_v50  ;;  %v1127_v48 = vld [vmem:[%s15787_s1 + $0x2198] sm:$0xff]  ;;  %v1365_v49 = vld [vmem:[%s15787_s1 + $0x2908] sm:$0xff] }
 0x242   :  { %2949 = vmatpush.msrb.mxu1 %v1042_v51  ;;  %2966 = vmatpush.msrb.mxu3 %v1308_v52  ;;  %v623_v50 = vld [vmem:[%s15787_s1 + $0x11d8] sm:$0xff]  ;;  %v889_v51 = vld [vmem:[%s15787_s1 + $0x1a28] sm:$0xff] }
 0x243   :  { %3006 = vmatpush.msrb.mxu2 %v189_v53  ;;  %3025 = vmatpush.msra.mxu0 %v427_v54  ;;  %v1113_v52 = vld [vmem:[%s15787_s1 + $0x2128] sm:$0xff]  ;;  %v1351_v53 = vld [vmem:[%s15787_s1 + $0x2898] sm:$0xff] }
 0x244   :  { %2950 = vmatpush.msrb.mxu1 %v1028_v55  ;;  %2967 = vmatpush.msrb.mxu3 %v1294_v56  ;;  %v609_v54 = vld [vmem:[%s15787_s1 + $0x1168] sm:$0xff]  ;;  %v875_v55 = vld [vmem:[%s15787_s1 + $0x19b8] sm:$0xff] }
 0x245   :  { %3007 = vmatpush.msrb.mxu2 %v175_v57  ;;  %3026 = vmatpush.msra.mxu0 %v413_v58  ;;  %v1099_v56 = vld [vmem:[%s15787_s1 + $0x20b8] sm:$0xff]  ;;  %v1337_v57 = vld [vmem:[%s15787_s1 + $0x2828] sm:$0xff] }
 0x246   :  { %2951 = vmatpush.msrb.mxu1 %v1014_v59  ;;  %2968 = vmatpush.msrb.mxu3 %v1280_v60  ;;  %v595_v58 = vld [vmem:[%s15787_s1 + $0x10f8] sm:$0xff]  ;;  %v861_v59 = vld [vmem:[%s15787_s1 + $0x1948] sm:$0xff] }
 0x247   :  { %3008 = vmatpush.msrb.mxu2 %v161_v61  ;;  %3027 = vmatpush.msra.mxu0 %v399_v62  ;;  %v1085_v60 = vld [vmem:[%s15787_s1 + $0x2048] sm:$0xff]  ;;  %v1323_v61 = vld [vmem:[%s15787_s1 + $0x27b8] sm:$0xff] }
 0x248   :  { %2952 = vmatpush.msrb.mxu1 %v1000_v63  ;;  %2969 = vmatpush.msrb.mxu3 %v1266_v0  ;;  %v581_v62 = vld [vmem:[%s15787_s1 + $0x1088] sm:$0xff]  ;;  %v847_v63 = vld [vmem:[%s15787_s1 + $0x18d8] sm:$0xff] }
 0x249   :  { %3009 = vmatpush.msrb.mxu2 %v147_v1  ;;  %3028 = vmatpush.msra.mxu0 %v385_v2  ;;  %v1071_v0 = vld [vmem:[%s15787_s1 + $0x1fd8] sm:$0xff]  ;;  %v1309_v1 = vld [vmem:[%s15787_s1 + $0x2748] sm:$0xff] }
 0x24a   :  { %2953 = vmatpush.msrb.mxu1 %v986_v3  ;;  %2970 = vmatpush.msrb.mxu3 %v1252_v4  ;;  %v567_v2 = vld [vmem:[%s15787_s1 + $0x1018] sm:$0xff]  ;;  %v833_v3 = vld [vmem:[%s15787_s1 + $0x1868] sm:$0xff] }
 0x24b   :  { %3010 = vmatpush.msrb.mxu2 %v133_v5  ;;  %3029 = vmatpush.msra.mxu0 %v371_v6  ;;  %v1057_v4 = vld [vmem:[%s15787_s1 + $0x1f68] sm:$0xff]  ;;  %v1295_v5 = vld [vmem:[%s15787_s1 + $0x26d8] sm:$0xff] }
 0x24c   :  { %2954 = vmatpush.msrb.mxu1 %v972_v8  ;;  %2971 = vmatpush.msrb.mxu3 %v1238_v9  ;;  %v553_v6 = vld [vmem:[%s15787_s1 + $0xfa8] sm:$0xff]  ;;  %v819_v8 = vld [vmem:[%s15787_s1 + $0x17f8] sm:$0xff] }
 0x24d   :  { %3011 = vmatpush.msrb.mxu2 %v119_v11  ;;  %3030 = vmatpush.msra.mxu0 %v357_v13  ;;  %v1043_v9 = vld [vmem:[%s15787_s1 + $0x1ef8] sm:$0xff]  ;;  %v1281_v11 = vld [vmem:[%s15787_s1 + $0x2668] sm:$0xff] }
 0x24e   :  { %2955 = vmatpush.msrb.mxu1 %v958_v14  ;;  %2972 = vmatpush.msrb.mxu3 %v1224_v15  ;;  %v539_v13 = vld [vmem:[%s15787_s1 + $0xf38] sm:$0xff]  ;;  %v805_v14 = vld [vmem:[%s15787_s1 + $0x1788] sm:$0xff] }
 0x24f   :  { %3012 = vmatpush.msrb.mxu2 %v105_v16  ;;  %2956 = vmatmul.f32.vlgmr.msrb.gmra.mxu1 %v7303_v12  ;;  %v1029_v15 = vld [vmem:[%s15787_s1 + $0x1e88] sm:$0xff]  ;;  %v1267_v16 = vld [vmem:[%s15787_s1 + $0x25f8] sm:$0xff] }
 0x250   :  { %3031 = vmatpush.msra.mxu0 %v343_v17  ;;  %3040 = vmatpush.msra.mxu1 %v721_v18  ;;  %v525_v17 = vld [vmem:[%s15787_s1 + $0xec8] sm:$0xff]  ;;  %v791_v18 = vld [vmem:[%s15787_s1 + $0x1718] sm:$0xff] }
 0x251   :  { %2973 = vmatpush.msrb.mxu3 %v1210_v21  ;;  %3013 = vmatpush.msrb.mxu2 %v91_v23  ;;  %v1015_v21 = vld [vmem:[%s15787_s1 + $0x1e18] sm:$0xff]  ;;  %v1253_v23 = vld [vmem:[%s15787_s1 + $0x2588] sm:$0xff] }
 0x252   :  { %3032 = vmatpush.msra.mxu0 %v329_v24  ;;  %3041 = vmatpush.msra.mxu1 %v707_v25  ;;  %v511_v24 = vld [vmem:[%s15787_s1 + $0xe58] sm:$0xff]  ;;  %v777_v25 = vld [vmem:[%s15787_s1 + $0x16a8] sm:$0xff] }
 0x253   :  { %2974 = vmatpush.msrb.mxu3 %v1196_v26  ;;  %3014 = vmatpush.msrb.mxu2 %v77_v27  ;;  %v1001_v26 = vld [vmem:[%s15787_s1 + $0x1da8] sm:$0xff]  ;;  %v1239_v27 = vld [vmem:[%s15787_s1 + $0x2518] sm:$0xff] }
 0x254   :  { %3033 = vmatpush.msra.mxu0 %v315_v28  ;;  %3042 = vmatpush.msra.mxu1 %v693_v30  ;;  %v1421_v28 = vld [vmem:[%s15787_s1 + $0x2ac8] sm:$0xff]  ;;  %v763_v30 = vld [vmem:[%s15787_s1 + $0x1638] sm:$0xff] }
 0x255   :  { %2975 = vmatpush.msrb.mxu3 %v1182_v31  ;;  %3015 = vmatpush.msrb.mxu2 %v63_v32  ;;  %v987_v31 = vld [vmem:[%s15787_s1 + $0x1d38] sm:$0xff]  ;;  %v1225_v32 = vld [vmem:[%s15787_s1 + $0x24a8] sm:$0xff] }
 0x256   :  { %2976 = vmatmul.f32.vlgmr.msrb.gmra.mxu3 %v7325_v19  ;;  %3034 = vmatpush.msra.mxu0 %v301_v33  ;;  %v1407_v33 = vld [vmem:[%s15787_s1 + $0x2a58] sm:$0xff] }
 0x257   :  { %3043 = vmatpush.msra.mxu1 %v679_v34  ;;  %3060 = vmatpush.msra.mxu3 %v945_v35  ;;  %v749_v34 = vld [vmem:[%s15787_s1 + $0x15c8] sm:$0xff] }
 0x258   :  { %3080 = vmatpush.msra.mxu2 %v1169_v36  ;;  %3035 = vmatpush.msra.mxu0 %v287_v37  ;;  %v973_v35 = vld [vmem:[%s15787_s1 + $0x1cc8] sm:$0xff]  ;;  %v498_v36 = vld [vmem:[%s15787_s1 + $0xdf0] sm:$0xff]  ;;  %v1211_v37 = vld [vmem:[%s15787_s1 + $0x2438] sm:$0xff] }
 0x259   :  { %3044 = vmatpush.msra.mxu1 %v665_v38  ;;  %3061 = vmatpush.msra.mxu3 %v931_v39  ;;  %v735_v38 = vld [vmem:[%s15787_s1 + $0x1558] sm:$0xff] }
 0x25a   :  { %3081 = vmatpush.msra.mxu2 %v1155_v40  ;;  %6747 = vmatmul.msk.f32.vlgmr.msrb.gmra.mxu0 %vm1456_vm0, %v7292_v7  ;;  %v959_v39 = vld [vmem:[%s15787_s1 + $0x1c58] sm:$0xff]  ;;  %v484_v40 = vld [vmem:[%s15787_s1 + $0xd80] sm:$0xff] }
 0x25b   :  { %3100 = vmatpush.msrb.mxu0 %v1393_v41  ;;  %3045 = vmatpush.msra.mxu1 %v651_v42  ;;  %v1197_v41 = vld [vmem:[%s15787_s1 + $0x23c8] sm:$0xff]  ;;  %v274_v42 = vld [vmem:[%s15787_s1 + $0x6f0] sm:$0xff] }
 0x25c   :  { %3062 = vmatpush.msra.mxu3 %v917_v43  ;;  %3082 = vmatpush.msra.mxu2 %v1141_v44  ;;  %v722_v43 = vld [vmem:[%s15787_s1 + $0x14f0] sm:$0xff] }
 0x25d   :  { %3101 = vmatpush.msrb.mxu0 %v1379_v45  ;;  %3046 = vmatpush.msra.mxu1 %v637_v46  ;;  %v470_v44 = vld [vmem:[%s15787_s1 + $0xd10] sm:$0xff]  ;;  %v1183_v45 = vld [vmem:[%s15787_s1 + $0x2358] sm:$0xff]  ;;  %v260_v46 = vld [vmem:[%s15787_s1 + $0x680] sm:$0xff] }
 0x25e   :  { %3063 = vmatpush.msra.mxu3 %v903_v47  ;;  %3083 = vmatpush.msra.mxu2 %v1127_v48  ;;  %v708_v47 = vld [vmem:[%s15787_s1 + $0x1480] sm:$0xff] }
 0x25f   :  { %3102 = vmatpush.msrb.mxu0 %v1365_v49  ;;  %3047 = vmatpush.msra.mxu1 %v623_v50  ;;  %v456_v48 = vld [vmem:[%s15787_s1 + $0xca0] sm:$0xff]  ;;  %v946_v49 = vld [vmem:[%s15787_s1 + $0x1bf0] sm:$0xff] }
 0x260   :  { %3064 = vmatpush.msra.mxu3 %v889_v51  ;;  %3084 = vmatpush.msra.mxu2 %v1113_v52  ;;  %v246_v50 = vld [vmem:[%s15787_s1 + $0x610] sm:$0xff] }
 0x261   :  { %3103 = vmatpush.msrb.mxu0 %v1351_v53  ;;  %3048 = vmatpush.msra.mxu1 %v609_v54  ;;  %v694_v51 = vld [vmem:[%s15787_s1 + $0x1410] sm:$0xff]  ;;  %v932_v53 = vld [vmem:[%s15787_s1 + $0x1b80] sm:$0xff] }
 0x262   :  { %3065 = vmatpush.msra.mxu3 %v875_v55  ;;  %3085 = vmatpush.msra.mxu2 %v1099_v56  ;;  %v442_v52 = vld [vmem:[%s15787_s1 + $0xc30] sm:$0xff]  ;;  %v232_v54 = vld [vmem:[%s15787_s1 + $0x5a0] sm:$0xff] }
 0x263   :  { %3104 = vmatpush.msrb.mxu0 %v1337_v57  ;;  %3049 = vmatpush.msra.mxu1 %v595_v58  ;;  %v680_v55 = vld [vmem:[%s15787_s1 + $0x13a0] sm:$0xff]  ;;  %v918_v57 = vld [vmem:[%s15787_s1 + $0x1b10] sm:$0xff] }
 0x264   :  { %3066 = vmatpush.msra.mxu3 %v861_v59  ;;  %3086 = vmatpush.msra.mxu2 %v1085_v60  ;;  %v428_v56 = vld [vmem:[%s15787_s1 + $0xbc0] sm:$0xff]  ;;  %v218_v58 = vld [vmem:[%s15787_s1 + $0x530] sm:$0xff] }
 0x265   :  { %3105 = vmatpush.msrb.mxu0 %v1323_v61  ;;  %3050 = vmatpush.msra.mxu1 %v581_v62  ;;  %v666_v59 = vld [vmem:[%s15787_s1 + $0x1330] sm:$0xff]  ;;  %v904_v61 = vld [vmem:[%s15787_s1 + $0x1aa0] sm:$0xff] }
 0x266   :  { %3067 = vmatpush.msra.mxu3 %v847_v63  ;;  %3087 = vmatpush.msra.mxu2 %v1071_v0  ;;  %v414_v60 = vld [vmem:[%s15787_s1 + $0xb50] sm:$0xff]  ;;  %v204_v62 = vld [vmem:[%s15787_s1 + $0x4c0] sm:$0xff] }
 0x267   :  { %3106 = vmatpush.msrb.mxu0 %v1309_v1  ;;  %3051 = vmatpush.msra.mxu1 %v567_v2  ;;  %v652_v63 = vld [vmem:[%s15787_s1 + $0x12c0] sm:$0xff]  ;;  %v890_v1 = vld [vmem:[%s15787_s1 + $0x1a30] sm:$0xff] }
 0x268   :  { %3068 = vmatpush.msra.mxu3 %v833_v3  ;;  %3088 = vmatpush.msra.mxu2 %v1057_v4  ;;  %v400_v0 = vld [vmem:[%s15787_s1 + $0xae0] sm:$0xff]  ;;  %v190_v2 = vld [vmem:[%s15787_s1 + $0x450] sm:$0xff]  ;;  %v10624_v3 = vpop.f32.mrf.mxu0 }
 0x269   :  { %3107 = vmatpush.msrb.mxu0 %v1295_v5  ;;  %3052 = vmatpush.msra.mxu1 %v553_v6  ;;  %v638_v4 = vld [vmem:[%s15787_s1 + $0x1250] sm:$0xff]  ;;  %v876_v6 = vld [vmem:[%s15787_s1 + $0x19c0] sm:$0xff] }
 0x26a   :  { %3069 = vmatpush.msra.mxu3 %v819_v8  ;;  %3089 = vmatpush.msra.mxu2 %v1043_v9  ;;  %v386_v5 = vld [vmem:[%s15787_s1 + $0xa70] sm:$0xff]  ;;  %v176_v8 = vld [vmem:[%s15787_s1 + $0x3e0] sm:$0xff] }
 0x26b   :  { %3108 = vmatpush.msrb.mxu0 %v1281_v11  ;;  %3053 = vmatpush.msra.mxu1 %v539_v13  ;;  %v624_v9 = vld [vmem:[%s15787_s1 + $0x11e0] sm:$0xff]  ;;  %v862_v13 = vld [vmem:[%s15787_s1 + $0x1950] sm:$0xff] }
 0x26c   :  { %3070 = vmatpush.msra.mxu3 %v805_v14  ;;  %3090 = vmatpush.msra.mxu2 %v1029_v15  ;;  %v372_v11 = vld [vmem:[%s15787_s1 + $0xa00] sm:$0xff]  ;;  %v10647_v14 = vpop.f32.mrf.mxu2  ;;  %v162_v15 = vld [vmem:[%s15787_s1 + $0x370] sm:$0xff] }
 0x26d   :  { %3109 = vmatpush.msrb.mxu0 %v1267_v16  ;;  %3054 = vmatpush.msra.mxu1 %v525_v17  ;;  %v610_v16 = vld [vmem:[%s15787_s1 + $0x1170] sm:$0xff] }
 0x26e   :  { %3071 = vmatpush.msra.mxu3 %v791_v18  ;;  %3091 = vmatpush.msra.mxu2 %v1015_v21  ;;  %v358_v17 = vld [vmem:[%s15787_s1 + $0x990] sm:$0xff]  ;;  %v848_v18 = vld [vmem:[%s15787_s1 + $0x18e0] sm:$0xff] }
 0x26f   :  { %3110 = vmatpush.msrb.mxu0 %v1253_v23  ;;  %3055 = vmatpush.msra.mxu1 %v511_v24  ;;  %v148_v21 = vld [vmem:[%s15787_s1 + $0x300] sm:$0xff] }
 0x270   :  { %3072 = vmatpush.msra.mxu3 %v777_v25  ;;  %3092 = vmatpush.msra.mxu2 %v1001_v26  ;;  %v596_v23 = vld [vmem:[%s15787_s1 + $0x1100] sm:$0xff]  ;;  %v10673_v25 = vpop.f32.mrf.mxu0  ;;  %v834_v26 = vld [vmem:[%s15787_s1 + $0x1870] sm:$0xff] }
 0x271   :  { %3111 = vmatpush.msrb.mxu0 %v1239_v27  ;;  %3134 = vmatpush.msrb.mxu1 %v1421_v28  ;;  %v344_v24 = vld [vmem:[%s15787_s1 + $0x920] sm:$0xff]  ;;  %v134_v27 = vld [vmem:[%s15787_s1 + $0x290] sm:$0xff] }
 0x272   :  { %3073 = vmatpush.msra.mxu3 %v763_v30  ;;  %3093 = vmatpush.msra.mxu2 %v987_v31  ;;  %v582_v28 = vld [vmem:[%s15787_s1 + $0x1090] sm:$0xff]  ;;  %v10687_v31 = vpop.f32.mrf.mxu3 }
 0x273   :  { %3112 = vmatpush.msrb.mxu0 %v1225_v32  ;;  %3135 = vmatpush.msrb.mxu1 %v1407_v33  ;;  %v330_v30 = vld [vmem:[%s15787_s1 + $0x8b0] sm:$0xff]  ;;  %v820_v32 = vld [vmem:[%s15787_s1 + $0x1800] sm:$0xff] }
 0x274   :  { %3056 = vmatmul.f32.vlgmr.msra.gmra.mxu1 %v7109_v10  ;;  %3074 = vmatpush.msra.mxu3 %v749_v34  ;;  %v120_v33 = vld [vmem:[%s15787_s1 + $0x220] sm:$0xff] }
 0x275   :  { %3094 = vmatpush.msra.mxu2 %v973_v35  ;;  %3160 = vmatpush.msra.mxu1 %v498_v36  ;;  %v568_v34 = vld [vmem:[%s15787_s1 + $0x1020] sm:$0xff]  ;;  %v10701_v36 = vpop.f32.mrf.mxu2 }
 0x276   :  { %3016 = vmatmul.f32.vlgmr.msrb.gmra.mxu2 %v7139_v20  ;;  %3113 = vmatpush.msrb.mxu0 %v1211_v37  ;;  %v316_v35 = vld [vmem:[%s15787_s1 + $0x840] sm:$0xff]  ;;  %v806_v37 = vld [vmem:[%s15787_s1 + $0x1790] sm:$0xff] }
 0x277   :  { %3075 = vmatpush.msra.mxu3 %v735_v38  ;;  %3095 = vmatpush.msra.mxu2 %v959_v39  ;;  %v106_v38 = vld [vmem:[%s15787_s1 + $0x1b0] sm:$0xff] }
 0x278   :  { %3161 = vmatpush.msra.mxu1 %v484_v40  ;;  %3114 = vmatpush.msrb.mxu0 %v1197_v41  ;;  %v554_v39 = vld [vmem:[%s15787_s1 + $0xfb0] sm:$0xff]  ;;  %v792_v41 = vld [vmem:[%s15787_s1 + $0x1720] sm:$0xff] }
 0x279   :  { %3140 = vmatpush.msrb.mxu3 %v274_v42  ;;  %3180 = vmatpush.msrb.mxu2 %v722_v43  ;;  %v302_v40 = vld [vmem:[%s15787_s1 + $0x7d0] sm:$0xff]  ;;  %v92_v42 = vld [vmem:[%s15787_s1 + $0x140] sm:$0xff] }
 0x27a   :  { %3162 = vmatpush.msra.mxu1 %v470_v44  ;;  %3115 = vmatpush.msrb.mxu0 %v1183_v45  ;;  %v540_v43 = vld [vmem:[%s15787_s1 + $0xf40] sm:$0xff]  ;;  %v10727_v45 = vpop.f32.mrf.mxu0 }
 0x27b   :  { %3141 = vmatpush.msrb.mxu3 %v260_v46  ;;  %3181 = vmatpush.msrb.mxu2 %v708_v47  ;;  %v288_v44 = vld [vmem:[%s15787_s1 + $0x760] sm:$0xff]  ;;  %v778_v46 = vld [vmem:[%s15787_s1 + $0x16b0] sm:$0xff] }
 0x27c   :  { %3036 = vmatmul.f32.vlgmr.msra.gmra.mxu0 %v7165_v29  ;;  %3163 = vmatpush.msra.mxu1 %v456_v48  ;;  %v78_v47 = vld [vmem:[%s15787_s1 + $0xd0] sm:$0xff] }
 0x27d   :  { %3200 = vmatpush.msra.mxu0 %v946_v49  ;;  %3076 = vmatmul.f32.vlgmr.msra.gmra.mxu3 %v7144_v22  ;;  %v526_v48 = vld [vmem:[%s15787_s1 + $0xed0] sm:$0xff] }
 0x27e   :  { %3142 = vmatpush.msrb.mxu3 %v246_v50  ;;  %3182 = vmatpush.msrb.mxu2 %v694_v51  ;;  %v1394_v49 = vld [vmem:[%s15787_s1 + $0x29f0] sm:$0xff]  ;;  %v10741_v50 = vpop.f32.mrf.mxu3  ;;  %v764_v51 = vld [vmem:[%s15787_s1 + $0x1640] sm:$0xff] }
 0x27f   :  { %3164 = vmatpush.msra.mxu1 %v442_v52  ;;  %3201 = vmatpush.msra.mxu0 %v932_v53  ;;  %v64_v52 = vld [vmem:[%s15787_s1 + $0x60] sm:$0xff] }
 0x280   :  { %3096 = vmatmul.f32.vlgmr.msra.gmra.mxu2 %v7303_v12  ;;  %3143 = vmatpush.msrb.mxu3 %v232_v54  ;;  %v512_v53 = vld [vmem:[%s15787_s1 + $0xe60] sm:$0xff] }
 0x281   :  { %3183 = vmatpush.msrb.mxu2 %v680_v55  ;;  %3165 = vmatpush.msra.mxu1 %v428_v56  ;;  %v1380_v54 = vld [vmem:[%s15787_s1 + $0x2980] sm:$0xff]  ;;  %v10755_v55 = vpop.f32.mrf.mxu2  ;;  %v750_v56 = vld [vmem:[%s15787_s1 + $0x15d0] sm:$0xff] }
 0x282   :  { %3202 = vmatpush.msra.mxu0 %v918_v57  ;;  %3144 = vmatpush.msrb.mxu3 %v218_v58  ;;  %v1170_v57 = vld [vmem:[%s15787_s1 + $0x22f0] sm:$0xff] }
 0x283   :  { %3184 = vmatpush.msrb.mxu2 %v666_v59  ;;  %3166 = vmatpush.msra.mxu1 %v414_v60  ;;  %v1422_v58 = vld [vmem:[%s15787_s1 + $0x2ad0] sm:$0xff]  ;;  %v736_v60 = vld [vmem:[%s15787_s1 + $0x1560] sm:$0xff] }
 0x284   :  { %3203 = vmatpush.msra.mxu0 %v904_v61  ;;  %3145 = vmatpush.msrb.mxu3 %v204_v62  ;;  %v1366_v59 = vld [vmem:[%s15787_s1 + $0x2910] sm:$0xff]  ;;  %v1156_v61 = vld [vmem:[%s15787_s1 + $0x2280] sm:$0xff] }
 0x285   :  { %3185 = vmatpush.msrb.mxu2 %v652_v63  ;;  %3167 = vmatpush.msra.mxu1 %v400_v0  ;;  %v1408_v62 = vld [vmem:[%s15787_s1 + $0x2a60] sm:$0xff]  ;;  %v275_v0 = vld [vmem:[%s15787_s1 + $0x6f8] sm:$0xff] }
 0x286   :  { %3204 = vmatpush.msra.mxu0 %v890_v1  ;;  %3146 = vmatpush.msrb.mxu3 %v190_v2  ;;  %v1352_v63 = vld [vmem:[%s15787_s1 + $0x28a0] sm:$0xff]  ;;  %v499_v1 = vld [vmem:[%s15787_s1 + $0xdf8] sm:$0xff]  ;;  %v10788_v2 = vpop.f32.mrf.mxu0 }
 0x287   :  { %3186 = vmatpush.msrb.mxu2 %v638_v4  ;;  %3168 = vmatpush.msra.mxu1 %v386_v5  ;;  %v1142_v4 = vld [vmem:[%s15787_s1 + $0x2210] sm:$0xff] }
 0x288   :  { %3205 = vmatpush.msra.mxu0 %v876_v6  ;;  %3147 = vmatpush.msrb.mxu3 %v176_v8  ;;  %v1338_v5 = vld [vmem:[%s15787_s1 + $0x2830] sm:$0xff]  ;;  %v261_v6 = vld [vmem:[%s15787_s1 + $0x688] sm:$0xff] }
 0x289   :  { %3116 = vmatmul.f32.vlgmr.msrb.gmra.mxu0 %v7325_v19  ;;  %3187 = vmatpush.msrb.mxu2 %v624_v9  ;;  %v485_v8 = vld [vmem:[%s15787_s1 + $0xd88] sm:$0xff]  ;;  %v10803_v9 = vpop.f32.mrf.mxu1 }
 0x28a   :  { %3169 = vmatpush.msra.mxu1 %v372_v11  ;;  %3206 = vmatpush.msra.mxu0 %v862_v13  ;;  %v10805_v11 = vpop.f32.mrf.mxu3  ;;  %v1128_v13 = vld [vmem:[%s15787_s1 + $0x21a0] sm:$0xff] }
 0x28b   :  { %6748 = vmatmul.msk.f32.vlgmr.msrb.gmra.mxu1 %vm1456_vm0, %v7292_v7  ;;  %3148 = vmatpush.msrb.mxu3 %v162_v15  ;;  %v1324_v15 = vld [vmem:[%s15787_s1 + $0x27c0] sm:$0xff] }
 0x28c   :  { %3188 = vmatpush.msrb.mxu2 %v610_v16  ;;  %3170 = vmatpush.msra.mxu1 %v358_v17  ;;  %v247_v16 = vld [vmem:[%s15787_s1 + $0x618] sm:$0xff] }
 0x28d   :  { %3207 = vmatpush.msra.mxu0 %v848_v18  ;;  %3149 = vmatpush.msrb.mxu3 %v148_v21  ;;  %v471_v17 = vld [vmem:[%s15787_s1 + $0xd18] sm:$0xff]  ;;  %v10819_v18 = vpop.f32.mrf.mxu2  ;;  %v1114_v21 = vld [vmem:[%s15787_s1 + $0x2130] sm:$0xff] }
 0x28e   :  { %3189 = vmatpush.msrb.mxu2 %v596_v23  ;;  %3171 = vmatpush.msra.mxu1 %v344_v24  ;;  %v1310_v23 = vld [vmem:[%s15787_s1 + $0x2750] sm:$0xff]  ;;  %v233_v24 = vld [vmem:[%s15787_s1 + $0x5a8] sm:$0xff] }
 0x28f   :  { %3208 = vmatpush.msra.mxu0 %v834_v26  ;;  %3150 = vmatpush.msrb.mxu3 %v134_v27  ;;  %v457_v26 = vld [vmem:[%s15787_s1 + $0xca8] sm:$0xff]  ;;  %v1100_v27 = vld [vmem:[%s15787_s1 + $0x20c0] sm:$0xff] }
 0x290   :  { %3190 = vmatpush.msrb.mxu2 %v582_v28  ;;  %3172 = vmatpush.msra.mxu1 %v330_v30  ;;  %v1296_v28 = vld [vmem:[%s15787_s1 + $0x26e0] sm:$0xff]  ;;  %v219_v30 = vld [vmem:[%s15787_s1 + $0x538] sm:$0xff] }
 0x291   :  { %3209 = vmatpush.msra.mxu0 %v820_v32  ;;  %3151 = vmatpush.msrb.mxu3 %v120_v33  ;;  %v10842_v32 = vpop.f32.mrf.mxu0  ;;  %v443_v33 = vld [vmem:[%s15787_s1 + $0xc38] sm:$0xff] }
 0x292   :  { %3191 = vmatpush.msrb.mxu2 %v568_v34  ;;  %3173 = vmatpush.msra.mxu1 %v316_v35  ;;  %v1086_v34 = vld [vmem:[%s15787_s1 + $0x2050] sm:$0xff] }
 0x293   :  { %3210 = vmatpush.msra.mxu0 %v806_v37  ;;  %3152 = vmatpush.msrb.mxu3 %v106_v38  ;;  %v1282_v35 = vld [vmem:[%s15787_s1 + $0x2670] sm:$0xff]  ;;  %v205_v37 = vld [vmem:[%s15787_s1 + $0x4c8] sm:$0xff]  ;;  %v10857_v38 = vpop.f32.mrf.mxu1 }
 0x294   :  { %3192 = vmatpush.msrb.mxu2 %v554_v39  ;;  %3174 = vmatpush.msra.mxu1 %v302_v40  ;;  %v10859_v39 = vpop.f32.mrf.mxu3  ;;  %v429_v40 = vld [vmem:[%s15787_s1 + $0xbc8] sm:$0xff] }
 0x295   :  { %3211 = vmatpush.msra.mxu0 %v792_v41  ;;  %3153 = vmatpush.msrb.mxu3 %v92_v42  ;;  %v1072_v41 = vld [vmem:[%s15787_s1 + $0x1fe0] sm:$0xff] }
 0x296   :  { %3193 = vmatpush.msrb.mxu2 %v540_v43  ;;  %3175 = vmatpush.msra.mxu1 %v288_v44  ;;  %v1268_v42 = vld [vmem:[%s15787_s1 + $0x2600] sm:$0xff]  ;;  %v10870_v43 = vpop.f32.mrf.mxu2  ;;  %v191_v44 = vld [vmem:[%s15787_s1 + $0x458] sm:$0xff] }
 0x297   :  { %3212 = vmatpush.msra.mxu0 %v778_v46  ;;  %3154 = vmatpush.msrb.mxu3 %v78_v47  ;;  %v415_v46 = vld [vmem:[%s15787_s1 + $0xb58] sm:$0xff]  ;;  %v1058_v47 = vld [vmem:[%s15787_s1 + $0x1f70] sm:$0xff] }
 0x298   :  { %3194 = vmatpush.msrb.mxu2 %v526_v48  ;;  %3240 = vmatpush.msrb.mxu1 %v1394_v49  ;;  %v1254_v48 = vld [vmem:[%s15787_s1 + $0x2590] sm:$0xff]  ;;  %v177_v49 = vld [vmem:[%s15787_s1 + $0x3e8] sm:$0xff] }
 0x299   :  { %3213 = vmatpush.msra.mxu0 %v764_v51  ;;  %3155 = vmatpush.msrb.mxu3 %v64_v52  ;;  %v401_v51 = vld [vmem:[%s15787_s1 + $0xae8] sm:$0xff]  ;;  %v1044_v52 = vld [vmem:[%s15787_s1 + $0x1f00] sm:$0xff] }
 0x29a   :  { %3195 = vmatpush.msrb.mxu2 %v512_v53  ;;  %3241 = vmatpush.msrb.mxu1 %v1380_v54  ;;  %v1240_v53 = vld [vmem:[%s15787_s1 + $0x2520] sm:$0xff]  ;;  %v10897_v54 = vpop.f32.mrf.mxu0 }
 0x29b   :  { %3214 = vmatpush.msra.mxu0 %v750_v56  ;;  %3220 = vmatpush.msra.mxu3 %v1170_v57  ;;  %v163_v56 = vld [vmem:[%s15787_s1 + $0x378] sm:$0xff] }
 0x29c   :  { %3274 = vmatpush.msra.mxu2 %v1422_v58  ;;  %3242 = vmatpush.msrb.mxu1 %v1366_v59  ;;  %v387_v57 = vld [vmem:[%s15787_s1 + $0xa78] sm:$0xff]  ;;  %v1030_v58 = vld [vmem:[%s15787_s1 + $0x1e90] sm:$0xff] }
 0x29d   :  { %3156 = vmatmul.f32.vlgmr.msrb.gmra.mxu3 %v7139_v20  ;;  %3215 = vmatpush.msra.mxu0 %v736_v60  ;;  %v1226_v59 = vld [vmem:[%s15787_s1 + $0x24b0] sm:$0xff]  ;;  %v10911_v60 = vpop.f32.mrf.mxu1 }
 0x29e   :  { %3221 = vmatpush.msra.mxu3 %v1156_v61  ;;  %3275 = vmatpush.msra.mxu2 %v1408_v62  ;;  %v10913_v61 = vpop.f32.mrf.mxu3  ;;  %v149_v62 = vld [vmem:[%s15787_s1 + $0x308] sm:$0xff] }
 0x29f   :  { %3196 = vmatmul.f32.vlgmr.msrb.gmra.mxu2 %v7109_v10  ;;  %3243 = vmatpush.msrb.mxu1 %v1352_v63  ;;  %v373_v63 = vld [vmem:[%s15787_s1 + $0xa08] sm:$0xff] }
 0x2a0   :  { %3280 = vmatpush.msrb.mxu0 %v275_v0  ;;  %3300 = vmatpush.msrb.mxu2 %v499_v1  ;;  %v1016_v0 = vld [vmem:[%s15787_s1 + $0x1e20] sm:$0xff] }
 0x2a1   :  { %3222 = vmatpush.msra.mxu3 %v1142_v4  ;;  %3244 = vmatpush.msrb.mxu1 %v1338_v5  ;;  %v1212_v1 = vld [vmem:[%s15787_s1 + $0x2440] sm:$0xff]  ;;  %v10927_v4 = vpop.f32.mrf.mxu2  ;;  %v135_v5 = vld [vmem:[%s15787_s1 + $0x298] sm:$0xff] }
 0x2a2   :  { %3281 = vmatpush.msrb.mxu0 %v261_v6  ;;  %3301 = vmatpush.msrb.mxu2 %v485_v8  ;;  %v359_v6 = vld [vmem:[%s15787_s1 + $0x998] sm:$0xff]  ;;  %v1002_v8 = vld [vmem:[%s15787_s1 + $0x1db0] sm:$0xff] }
 0x2a3   :  { %3223 = vmatpush.msra.mxu3 %v1128_v13  ;;  %3245 = vmatpush.msrb.mxu1 %v1324_v15  ;;  %v1198_v13 = vld [vmem:[%s15787_s1 + $0x23d0] sm:$0xff]  ;;  %v121_v15 = vld [vmem:[%s15787_s1 + $0x228] sm:$0xff] }
 0x2a4   :  { %3282 = vmatpush.msrb.mxu0 %v247_v16  ;;  %3302 = vmatpush.msrb.mxu2 %v471_v17  ;;  %v345_v16 = vld [vmem:[%s15787_s1 + $0x928] sm:$0xff]  ;;  %v988_v17 = vld [vmem:[%s15787_s1 + $0x1d40] sm:$0xff] }
 0x2a5   :  { %3224 = vmatpush.msra.mxu3 %v1114_v21  ;;  %3246 = vmatpush.msrb.mxu1 %v1310_v23  ;;  %v1184_v21 = vld [vmem:[%s15787_s1 + $0x2360] sm:$0xff]  ;;  %v10953_v23 = vpop.f32.mrf.mxu0 }
 0x2a6   :  { %3283 = vmatpush.msrb.mxu0 %v233_v24  ;;  %3303 = vmatpush.msrb.mxu2 %v457_v26  ;;  %v107_v24 = vld [vmem:[%s15787_s1 + $0x1b8] sm:$0xff] }
 0x2a7   :  { %3176 = vmatmul.f32.vlgmr.msra.gmra.mxu1 %v7165_v29  ;;  %3225 = vmatpush.msra.mxu3 %v1100_v27  ;;  %v331_v26 = vld [vmem:[%s15787_s1 + $0x8b8] sm:$0xff]  ;;  %v974_v27 = vld [vmem:[%s15787_s1 + $0x1cd0] sm:$0xff] }
 0x2a8   :  { %3247 = vmatpush.msrb.mxu1 %v1296_v28  ;;  %3284 = vmatpush.msrb.mxu0 %v219_v30  ;;  %v947_v28 = vld [vmem:[%s15787_s1 + $0x1bf8] sm:$0xff]  ;;  %v10967_v30 = vpop.f32.mrf.mxu1 }
 0x2a9   :  { %3304 = vmatpush.msrb.mxu2 %v443_v33  ;;  %3226 = vmatpush.msra.mxu3 %v1086_v34  ;;  %v10969_v33 = vpop.f32.mrf.mxu3  ;;  %v93_v34 = vld [vmem:[%s15787_s1 + $0x148] sm:$0xff] }
 0x2aa   :  { %3248 = vmatpush.msrb.mxu1 %v1282_v35  ;;  %3285 = vmatpush.msrb.mxu0 %v205_v37  ;;  %v317_v35 = vld [vmem:[%s15787_s1 + $0x848] sm:$0xff]  ;;  %v960_v37 = vld [vmem:[%s15787_s1 + $0x1c60] sm:$0xff] }
 0x2ab   :  { %3305 = vmatpush.msrb.mxu2 %v429_v40  ;;  %3216 = vmatmul.f32.vlgmr.msra.gmra.mxu0 %v7144_v22  ;;  %v933_v40 = vld [vmem:[%s15787_s1 + $0x1b88] sm:$0xff] }
 0x2ac   :  { %3227 = vmatpush.msra.mxu3 %v1072_v41  ;;  %3249 = vmatpush.msrb.mxu1 %v1268_v42  ;;  %v79_v41 = vld [vmem:[%s15787_s1 + $0xd8] sm:$0xff] }
 0x2ad   :  { %3286 = vmatpush.msrb.mxu0 %v191_v44  ;;  %3306 = vmatpush.msrb.mxu2 %v415_v46  ;;  %v303_v42 = vld [vmem:[%s15787_s1 + $0x7d8] sm:$0xff]  ;;  %v10992_v46 = vpop.f32.mrf.mxu2 }
 0x2ae   :  { %3228 = vmatpush.msra.mxu3 %v1058_v47  ;;  %3250 = vmatpush.msrb.mxu1 %v1254_v48  ;;  %v723_v44 = vld [vmem:[%s15787_s1 + $0x14f8] sm:$0xff]  ;;  %v65_v48 = vld [vmem:[%s15787_s1 + $0x68] sm:$0xff] }
 0x2af   :  { %3287 = vmatpush.msrb.mxu0 %v177_v49  ;;  %3307 = vmatpush.msrb.mxu2 %v401_v51  ;;  %v919_v47 = vld [vmem:[%s15787_s1 + $0x1b18] sm:$0xff]  ;;  %v289_v49 = vld [vmem:[%s15787_s1 + $0x768] sm:$0xff] }
 0x2b0   :  { %3229 = vmatpush.msra.mxu3 %v1044_v52  ;;  %3251 = vmatpush.msrb.mxu1 %v1240_v53  ;;  %v709_v51 = vld [vmem:[%s15787_s1 + $0x1488] sm:$0xff]  ;;  %v1171_v53 = vld [vmem:[%s15787_s1 + $0x22f8] sm:$0xff] }
 0x2b1   :  { %3288 = vmatpush.msrb.mxu0 %v163_v56  ;;  %3308 = vmatpush.msrb.mxu2 %v387_v57  ;;  %v905_v52 = vld [vmem:[%s15787_s1 + $0x1aa8] sm:$0xff]  ;;  %v1395_v56 = vld [vmem:[%s15787_s1 + $0x29f8] sm:$0xff]  ;;  %v11016_v57 = vpop.f32.mrf.mxu1 }
 0x2b2   :  { %3230 = vmatpush.msra.mxu3 %v1030_v58  ;;  %3252 = vmatpush.msrb.mxu1 %v1226_v59  ;;  %v11018_v58 = vpop.f32.mrf.mxu0  ;;  %v695_v59 = vld [vmem:[%s15787_s1 + $0x1418] sm:$0xff] }
 0x2b3   :  { %3289 = vmatpush.msrb.mxu0 %v149_v62  ;;  %3309 = vmatpush.msrb.mxu2 %v373_v63  ;;  %v891_v62 = vld [vmem:[%s15787_s1 + $0x1a38] sm:$0xff]  ;;  %v1157_v63 = vld [vmem:[%s15787_s1 + $0x2288] sm:$0xff] }
 0x2b4   :  { %3231 = vmatpush.msra.mxu3 %v1016_v0  ;;  %3253 = vmatpush.msrb.mxu1 %v1212_v1  ;;  %v1381_v0 = vld [vmem:[%s15787_s1 + $0x2988] sm:$0xff]  ;;  %v11034_v1 = vpop.f32.mrf.mxu3 }
 0x2b5   :  { %3290 = vmatpush.msrb.mxu0 %v135_v5  ;;  %3310 = vmatpush.msrb.mxu2 %v359_v6  ;;  %v681_v5 = vld [vmem:[%s15787_s1 + $0x13a8] sm:$0xff] }
 0x2b6   :  { %3232 = vmatpush.msra.mxu3 %v1002_v8  ;;  %3254 = vmatpush.msrb.mxu1 %v1198_v13  ;;  %v877_v6 = vld [vmem:[%s15787_s1 + $0x19c8] sm:$0xff]  ;;  %v1143_v8 = vld [vmem:[%s15787_s1 + $0x2218] sm:$0xff] }
 0x2b7   :  { %3291 = vmatpush.msrb.mxu0 %v121_v15  ;;  %3311 = vmatpush.msrb.mxu2 %v345_v16  ;;  %v1367_v13 = vld [vmem:[%s15787_s1 + $0x2918] sm:$0xff]  ;;  %v11048_v15 = vpop.f32.mrf.mxu2 }
 0x2b8   :  { %3233 = vmatpush.msra.mxu3 %v988_v17  ;;  %3255 = vmatpush.msrb.mxu1 %v1184_v21  ;;  %v667_v16 = vld [vmem:[%s15787_s1 + $0x1338] sm:$0xff]  ;;  %v1129_v21 = vld [vmem:[%s15787_s1 + $0x21a8] sm:$0xff] }
 0x2b9   :  { %3292 = vmatpush.msrb.mxu0 %v107_v24  ;;  %3312 = vmatpush.msrb.mxu2 %v331_v26  ;;  %v863_v17 = vld [vmem:[%s15787_s1 + $0x1958] sm:$0xff]  ;;  %v1353_v24 = vld [vmem:[%s15787_s1 + $0x28a8] sm:$0xff] }
 0x2ba   :  { %3234 = vmatpush.msra.mxu3 %v974_v27  ;;  %3340 = vmatpush.msra.mxu1 %v947_v28  ;;  %v653_v26 = vld [vmem:[%s15787_s1 + $0x12c8] sm:$0xff]  ;;  %v1115_v28 = vld [vmem:[%s15787_s1 + $0x2138] sm:$0xff] }
 0x2bb   :  { %3293 = vmatpush.msrb.mxu0 %v93_v34  ;;  %3313 = vmatpush.msrb.mxu2 %v317_v35  ;;  %v849_v27 = vld [vmem:[%s15787_s1 + $0x18e8] sm:$0xff]  ;;  %v11072_v34 = vpop.f32.mrf.mxu1  ;;  %v11074_v35 = vpop.f32.mrf.mxu0 }
 0x2bc   :  { %3235 = vmatpush.msra.mxu3 %v960_v37  ;;  %3341 = vmatpush.msra.mxu1 %v933_v40  ;;  %v1339_v37 = vld [vmem:[%s15787_s1 + $0x2838] sm:$0xff] }
 0x2bd   :  { %3236 = vmatmul.f32.vlgmr.msra.gmra.mxu3 %v7303_v12  ;;  %3294 = vmatpush.msrb.mxu0 %v79_v41  ;;  %v639_v40 = vld [vmem:[%s15787_s1 + $0x1258] sm:$0xff] }
 0x2be   :  { %3314 = vmatpush.msrb.mxu2 %v303_v42  ;;  %3320 = vmatpush.msrb.mxu3 %v723_v44  ;;  %v835_v41 = vld [vmem:[%s15787_s1 + $0x1878] sm:$0xff]  ;;  %v1101_v42 = vld [vmem:[%s15787_s1 + $0x20c8] sm:$0xff]  ;;  %v11088_v44 = vpop.f32.mrf.mxu3 }
 0x2bf   :  { %3342 = vmatpush.msra.mxu1 %v919_v47  ;;  %3295 = vmatpush.msrb.mxu0 %v65_v48  ;;  %v1325_v47 = vld [vmem:[%s15787_s1 + $0x27c8] sm:$0xff] }
 0x2c0   :  { %3315 = vmatpush.msrb.mxu2 %v289_v49  ;;  %3321 = vmatpush.msrb.mxu3 %v709_v51  ;;  %v625_v48 = vld [vmem:[%s15787_s1 + $0x11e8] sm:$0xff]  ;;  %v1087_v51 = vld [vmem:[%s15787_s1 + $0x2058] sm:$0xff] }
 0x2c1   :  { %6749 = vmatmul.msk.f32.vlgmr.msra.gmra.mxu2 %vm1456_vm0, %v7292_v7  ;;  %3343 = vmatpush.msra.mxu1 %v905_v52  ;;  %v821_v49 = vld [vmem:[%s15787_s1 + $0x1808] sm:$0xff]  ;;  %v11102_v52 = vpop.f32.mrf.mxu2 }
 0x2c2   :  { %3360 = vmatpush.msra.mxu0 %v1171_v53  ;;  %3380 = vmatpush.msra.mxu2 %v1395_v56  ;;  %v1311_v53 = vld [vmem:[%s15787_s1 + $0x2758] sm:$0xff] }
 0x2c3   :  { %3322 = vmatpush.msrb.mxu3 %v695_v59  ;;  %3344 = vmatpush.msra.mxu1 %v891_v62  ;;  %v611_v56 = vld [vmem:[%s15787_s1 + $0x1178] sm:$0xff]  ;;  %v1073_v62 = vld [vmem:[%s15787_s1 + $0x1fe8] sm:$0xff] }
 0x2c4   :  { %3361 = vmatpush.msra.mxu0 %v1157_v63  ;;  %3381 = vmatpush.msra.mxu2 %v1381_v0  ;;  %v807_v59 = vld [vmem:[%s15787_s1 + $0x1798] sm:$0xff]  ;;  %v1297_v63 = vld [vmem:[%s15787_s1 + $0x26e8] sm:$0xff] }
 0x2c5   :  { %3323 = vmatpush.msrb.mxu3 %v681_v5  ;;  %3345 = vmatpush.msra.mxu1 %v877_v6  ;;  %v597_v0 = vld [vmem:[%s15787_s1 + $0x1108] sm:$0xff]  ;;  %v1059_v6 = vld [vmem:[%s15787_s1 + $0x1f78] sm:$0xff] }
 0x2c6   :  { %3362 = vmatpush.msra.mxu0 %v1143_v8  ;;  %3382 = vmatpush.msra.mxu2 %v1367_v13  ;;  %v793_v5 = vld [vmem:[%s15787_s1 + $0x1728] sm:$0xff]  ;;  %v11128_v8 = vpop.f32.mrf.mxu1  ;;  %v11130_v13 = vpop.f32.mrf.mxu0 }
 0x2c7   :  { %3256 = vmatmul.f32.vlgmr.msrb.gmra.mxu1 %v7325_v19  ;;  %3324 = vmatpush.msrb.mxu3 %v667_v16  ;;  %v1283_v16 = vld [vmem:[%s15787_s1 + $0x2678] sm:$0xff] }
 0x2c8   :  { %3346 = vmatpush.msra.mxu1 %v863_v17  ;;  %3363 = vmatpush.msra.mxu0 %v1129_v21  ;;  %v583_v17 = vld [vmem:[%s15787_s1 + $0x1098] sm:$0xff] }
 0x2c9   :  { %3383 = vmatpush.msra.mxu2 %v1353_v24  ;;  %3325 = vmatpush.msrb.mxu3 %v653_v26  ;;  %v779_v21 = vld [vmem:[%s15787_s1 + $0x16b8] sm:$0xff]  ;;  %v1045_v24 = vld [vmem:[%s15787_s1 + $0x1f08] sm:$0xff]  ;;  %v11144_v26 = vpop.f32.mrf.mxu3 }
 0x2ca   :  { %3347 = vmatpush.msra.mxu1 %v849_v27  ;;  %3364 = vmatpush.msra.mxu0 %v1115_v28  ;;  %v1269_v27 = vld [vmem:[%s15787_s1 + $0x2608] sm:$0xff] }
 0x2cb   :  { %3384 = vmatpush.msra.mxu2 %v1339_v37  ;;  %3326 = vmatpush.msrb.mxu3 %v639_v40  ;;  %v569_v28 = vld [vmem:[%s15787_s1 + $0x1028] sm:$0xff]  ;;  %v1031_v40 = vld [vmem:[%s15787_s1 + $0x1e98] sm:$0xff] }
 0x2cc   :  { %3348 = vmatpush.msra.mxu1 %v835_v41  ;;  %3365 = vmatpush.msra.mxu0 %v1101_v42  ;;  %v765_v37 = vld [vmem:[%s15787_s1 + $0x1648] sm:$0xff]  ;;  %v11158_v41 = vpop.f32.mrf.mxu2  ;;  %v1255_v42 = vld [vmem:[%s15787_s1 + $0x2598] sm:$0xff] }
 0x2cd   :  { %3385 = vmatpush.msra.mxu2 %v1325_v47  ;;  %3327 = vmatpush.msrb.mxu3 %v625_v48  ;;  %v555_v47 = vld [vmem:[%s15787_s1 + $0xfb8] sm:$0xff] }
 0x2ce   :  { %3349 = vmatpush.msra.mxu1 %v821_v49  ;;  %3366 = vmatpush.msra.mxu0 %v1087_v51  ;;  %v751_v48 = vld [vmem:[%s15787_s1 + $0x15d8] sm:$0xff]  ;;  %v1017_v49 = vld [vmem:[%s15787_s1 + $0x1e28] sm:$0xff] }
 0x2cf   :  { %3386 = vmatpush.msra.mxu2 %v1311_v53  ;;  %3328 = vmatpush.msrb.mxu3 %v611_v56  ;;  %v1241_v51 = vld [vmem:[%s15787_s1 + $0x2528] sm:$0xff] }
 0x2d0   :  { %3350 = vmatpush.msra.mxu1 %v807_v59  ;;  %3367 = vmatpush.msra.mxu0 %v1073_v62  ;;  %v541_v53 = vld [vmem:[%s15787_s1 + $0xf48] sm:$0xff]  ;;  %v1003_v59 = vld [vmem:[%s15787_s1 + $0x1db8] sm:$0xff]  ;;  %v11184_v62 = vpop.f32.mrf.mxu1 }
 0x2d1   :  { %3387 = vmatpush.msra.mxu2 %v1297_v63  ;;  %3329 = vmatpush.msrb.mxu3 %v597_v0  ;;  %v737_v56 = vld [vmem:[%s15787_s1 + $0x1568] sm:$0xff]  ;;  %v1227_v63 = vld [vmem:[%s15787_s1 + $0x24b8] sm:$0xff] }
 0x2d2   :  { %3351 = vmatpush.msra.mxu1 %v793_v5  ;;  %3368 = vmatpush.msra.mxu0 %v1059_v6  ;;  %v527_v0 = vld [vmem:[%s15787_s1 + $0xed8] sm:$0xff]  ;;  %v3524_v5 = vld [vmem:[%s15789_s3 + $0x2d0] sm:$0xff]  ;;  %v11195_v6 = vpop.f32.mrf.mxu3 }
 0x2d3   :  { %3388 = vmatpush.msra.mxu2 %v1283_v16  ;;  %3330 = vmatpush.msrb.mxu3 %v583_v17  ;;  %v11197_v16 = vpop.f32.mrf.mxu0  ;;  %v989_v17 = vld [vmem:[%s15787_s1 + $0x1d48] sm:$0xff] }
 0x2d4   :  { %3352 = vmatpush.msra.mxu1 %v779_v21  ;;  %3369 = vmatpush.msra.mxu0 %v1045_v24  ;;  %v1213_v21 = vld [vmem:[%s15787_s1 + $0x2448] sm:$0xff] }
 0x2d5   :  { %3389 = vmatpush.msra.mxu2 %v1269_v27  ;;  %3331 = vmatpush.msrb.mxu3 %v569_v28  ;;  %v513_v24 = vld [vmem:[%s15787_s1 + $0xe68] sm:$0xff]  ;;  %v3518_v27 = vld [vmem:[%s15789_s3 + $0x2a0] sm:$0xff] }
 0x2d6   :  { %3353 = vmatpush.msra.mxu1 %v765_v37  ;;  %3370 = vmatpush.msra.mxu0 %v1031_v40  ;;  %v11214_v28 = vld [vmem:[%s15788_s2] sm:$0xff]  ;;  %v975_v37 = vld [vmem:[%s15787_s1 + $0x1cd8] sm:$0xff] }
 0x2d7   :  { %3390 = vmatpush.msra.mxu2 %v1255_v42  ;;  %3332 = vmatpush.msrb.mxu3 %v555_v47  ;;  %v1199_v40 = vld [vmem:[%s15787_s1 + $0x23d8] sm:$0xff]  ;;  %v11226_v47 = vpop.f32.mrf.mxu2 }
 0x2d8   :  { %3354 = vmatpush.msra.mxu1 %v751_v48  ;;  %3371 = vmatpush.msra.mxu0 %v1017_v49  ;;  %v1423_v42 = vld [vmem:[%s15787_s1 + $0x2ad8] sm:$0xff]  ;;  %v1428_v48 = vperm.slane %v11214_v28, 0  ;;  %v961_v49 = vld [vmem:[%s15787_s1 + $0x1c68] sm:$0xff] }
 0x2d9   :  { %3391 = vmatpush.msra.mxu2 %v1241_v51  ;;  %3333 = vmatpush.msrb.mxu3 %v541_v53  ;;  %v1185_v51 = vld [vmem:[%s15787_s1 + $0x2368] sm:$0xff]  ;;  %v11239_v53 = vpop.f32.mrf.mxu1 }
 0x2da   :  { %3355 = vmatpush.msra.mxu1 %v737_v56  ;;  %3372 = vmatpush.msra.mxu0 %v1003_v59  ;;  %v1409_v56 = vld [vmem:[%s15787_s1 + $0x2a68] sm:$0xff]  ;;  %v3620_v59 = vld [vmem:[%s15789_s3 + $0x5d0] sm:$0xff] }
 0x2db   :  { %3392 = vmatpush.msra.mxu2 %v1227_v63  ;;  %3334 = vmatpush.msrb.mxu3 %v527_v0  ;;  %v3716_v63 = vld [vmem:[%s15789_s3 + $0x8d0] sm:$0xff]  ;;  %v11254_v0 = vpop.f32.mrf.mxu0 }
 0x2dc   :  { %4743 = vmatpush.msrb.mxu1 %v3524_v5  ;;  %3316 = vmatmul.f32.vlgmr.msrb.gmra.mxu2 %v7165_v29  ;;  %v3512_v29 = vld [vmem:[%s15789_s3 + $0x270] sm:$0xff] }
 0x2dd   :  { %3373 = vmatpush.msra.mxu0 %v989_v17  ;;  %3393 = vmatpush.msra.mxu2 %v1213_v21  ;;  %v3812_v5 = vld [vmem:[%s15789_s3 + $0xbd0] sm:$0xff]  ;;  %v1478_v17 = vadd.f32 %v10624_v3, %v1428_v48  ;;  %v3614_v21 = vld [vmem:[%s15789_s3 + $0x5a0] sm:$0xff] }
 0x2de   :  { %3335 = vmatpush.msrb.mxu3 %v513_v24  ;;  %4744 = vmatpush.msrb.mxu1 %v3518_v27  ;;  %v3710_v24 = vld [vmem:[%s15789_s3 + $0x8a0] sm:$0xff]  ;;  %v1429_v27 = vperm.slane %v11214_v28, 1 }
 0x2df   :  { %3336 = vmatmul.f32.vlgmr.msrb.gmra.mxu3 %v7109_v10  ;;  %3374 = vmatpush.msra.mxu0 %v975_v37  ;;  %v3506_v10 = vld [vmem:[%s15789_s3 + $0x240] sm:$0xff]  ;;  %v11270_v37 = vpop.f32.mrf.mxu3  ;;  %v11282_v48 = vpop.f32.mrf.mxu2 }
 0x2e0   :  { %3394 = vmatpush.msra.mxu2 %v1199_v40  ;;  %3414 = vmatpush.msra.mxu3 %v1423_v42  ;;  %v3806_v3 = vld [vmem:[%s15789_s3 + $0xba0] sm:$0xff]  ;;  %v1431_v42 = vperm.slane %v11214_v28, 3 }
 0x2e1   :  { %4745 = vmatpush.msrb.mxu1 %v3512_v29  ;;  %3296 = vmatmul.f32.vlgmr.msrb.gmra.mxu0 %v7139_v20  ;;  %v3500_v20 = vld [vmem:[%s15789_s3 + $0x210] sm:$0xff]  ;;  %v3494_v40 = vld [vmem:[%s15789_s3 + $0x1e0] sm:$0xff] }
 0x2e2   :  { %3375 = vmatpush.msra.mxu0 %v961_v49  ;;  %3395 = vmatpush.msra.mxu2 %v1185_v51  ;;  %v3608_v29 = vld [vmem:[%s15789_s3 + $0x570] sm:$0xff] }
 0x2e3   :  { %3415 = vmatpush.msra.mxu3 %v1409_v56  ;;  %4746 = vmatpush.msrb.mxu1 %v3506_v10  ;;  %v3704_v49 = vld [vmem:[%s15789_s3 + $0x870] sm:$0xff]  ;;  %v1498_v56 = vadd.f32 %v10803_v9, %v1478_v17  ;;  %v1618_v10 = vadd.f32 %v10741_v50, %v1429_v27  ;;  %v1898_v9 = vadd.f32 %v10927_v4, %v1431_v42  ;;  %v3698_v50 = vld [vmem:[%s15789_s3 + $0x840] sm:$0xff]  ;;  %v11309_v17 = vpop.f32.mrf.mxu0 }
 0x2e4   :  { %4783 = vmatpush.msrb.mxu0 %v3716_v63  ;;  %4803 = vmatpush.msrb.mxu2 %v3812_v5  ;;  %v3800_v51 = vld [vmem:[%s15789_s3 + $0xb70] sm:$0xff]  ;;  %v11293_v63 = vpop.f32.mrf.mxu1  ;;  %v3482_v4 = vld [vmem:[%s15789_s3 + $0x180] sm:$0xff] }
 0x2e5   :  { %4763 = vmatpush.msrb.mxu3 %v3620_v59  ;;  %4747 = vmatpush.msrb.mxu1 %v3500_v20  ;;  %v1430_v59 = vperm.slane %v11214_v28, 2  ;;  %v3488_v5 = vld [vmem:[%s15789_s3 + $0x1b0] sm:$0xff]  ;;  %v3602_v20 = vld [vmem:[%s15789_s3 + $0x540] sm:$0xff]  ;;  %v1918_v42 = vadd.f32 %v10953_v23, %v1898_v9 }
 0x2e6   :  { %4784 = vmatpush.msrb.mxu0 %v3710_v24  ;;  %4804 = vmatpush.msrb.mxu2 %v3806_v3  ;;  %v3596_v24 = vld [vmem:[%s15789_s3 + $0x510] sm:$0xff] }
 0x2e7   :  { %4764 = vmatpush.msrb.mxu3 %v3614_v21  ;;  %4748 = vmatpush.msrb.mxu1 %v3494_v40  ;;  %v1518_v21 = vadd.f32 %v10647_v14, %v1498_v56  ;;  %v3692_v27 = vld [vmem:[%s15789_s3 + $0x810] sm:$0xff]  ;;  %v11326_v3 = vpop.f32.mrf.mxu3 }
 0x2e8   :  { %3396 = vmatmul.f32.vlgmr.msra.gmra.mxu2 %v7325_v19  ;;  %4785 = vmatpush.msrb.mxu0 %v3704_v49  ;;  %v3794_v19 = vld [vmem:[%s15789_s3 + $0xb40] sm:$0xff]  ;;  %v3788_v14 = vld [vmem:[%s15789_s3 + $0xb10] sm:$0xff] }
 0x2e9   :  { %4765 = vmatpush.msrb.mxu3 %v3608_v29  ;;  %4805 = vmatpush.msrb.mxu2 %v3800_v51  ;;  %v3476_v40 = vld [vmem:[%s15789_s3 + $0x150] sm:$0xff]  ;;  %v11342_v29 = vpop.f32.mrf.mxu2  ;;  %v3782_v49 = vld [vmem:[%s15789_s3 + $0xae0] sm:$0xff]  ;;  %v1538_v23 = vadd.f32 %v10687_v31, %v1518_v21 }
 0x2ea   :  { %3356 = vmatmul.f32.vlgmr.msra.gmra.mxu1 %v7144_v22  ;;  %6750 = vmatmul.msk.f32.vlgmr.msra.gmra.mxu3 %vm1456_vm0, %v7292_v7  ;;  %v1638_v22 = vadd.f32 %v10755_v55, %v1618_v10  ;;  %v1758_v7 = vadd.f32 %v10967_v30, %v1430_v59  ;;  %v3590_v55 = vld [vmem:[%s15789_s3 + $0x4e0] sm:$0xff]  ;;  %v3584_v51 = vld [vmem:[%s15789_s3 + $0x4b0] sm:$0xff] }
 0x2eb   :  { %4749 = vmatpush.msrb.mxu1 %v3488_v5  ;;  %4766 = vmatpush.msrb.mxu3 %v3602_v20  ;;  %v3686_v30 = vld [vmem:[%s15789_s3 + $0x7e0] sm:$0xff]  ;;  %v3680_v56 = vld [vmem:[%s15789_s3 + $0x7b0] sm:$0xff]  ;;  %v1558_v9 = vadd.f32 %v10673_v25, %v1538_v23 }
 0x2ec   :  { %4786 = vmatpush.msrb.mxu0 %v3698_v50  ;;  %4806 = vmatpush.msrb.mxu2 %v3794_v19  ;;  %v1658_v10 = vadd.f32 %v10727_v45, %v1638_v22  ;;  %v1778_v59 = vadd.f32 %v10859_v39, %v1758_v7  ;;  %v11359_v5 = vpop.f32.mrf.mxu1  ;;  %v3776_v31 = vld [vmem:[%s15789_s3 + $0xab0] sm:$0xff]  ;;  %v1938_v50 = vadd.f32 %v11072_v34, %v1918_v42  ;;  %v3578_v45 = vld [vmem:[%s15789_s3 + $0x480] sm:$0xff]  ;;  %v11375_v19 = vpop.f32.mrf.mxu0 }
 0x2ed   :  { %3376 = vmatmul.f32.vlgmr.msra.gmra.mxu0 %v7303_v12  ;;  %4750 = vmatpush.msrb.mxu1 %v3482_v4  ;;  %v3470_v12 = vld [vmem:[%s15789_s3 + $0x120] sm:$0xff]  ;;  %v3464_v20 = vld [vmem:[%s15789_s3 + $0xf0] sm:$0xff] }
 0x2ee   :  { %4767 = vmatpush.msrb.mxu3 %v3596_v24  ;;  %4787 = vmatpush.msrb.mxu0 %v3692_v27  ;;  %v3674_v39 = vld [vmem:[%s15789_s3 + $0x780] sm:$0xff]  ;;  %v3572_v4 = vld [vmem:[%s15789_s3 + $0x450] sm:$0xff]  ;;  %v1678_v24 = vadd.f32 %v10911_v60, %v1658_v10  ;;  %v1798_v27 = vadd.f32 %v10842_v32, %v1778_v59  ;;  %v1958_v42 = vadd.f32 %v10969_v33, %v1938_v50 }
 0x2ef   :  { %4807 = vmatpush.msrb.mxu2 %v3788_v14  ;;  %4751 = vmatpush.msrb.mxu1 %v3476_v40  ;;  %v3770_v25 = vld [vmem:[%s15789_s3 + $0xa80] sm:$0xff]  ;;  %v3668_v21 = vld [vmem:[%s15789_s3 + $0x750] sm:$0xff]  ;;  %v11391_v22 = vpop.f32.mrf.mxu3  ;;  %v1578_v40 = vadd.f32 %v10857_v38, %v1558_v9 }
 0x2f0   :  { %4768 = vmatpush.msrb.mxu3 %v3590_v55  ;;  %4788 = vmatpush.msrb.mxu0 %v3686_v30  ;;  %v3458_v34 = vld [vmem:[%s15789_s3 + $0xc0] sm:$0xff]  ;;  %v3764_v7 = vld [vmem:[%s15789_s3 + $0xa50] sm:$0xff] }
 0x2f1   :  { %4808 = vmatpush.msrb.mxu2 %v3782_v49  ;;  %4752 = vmatpush.msrb.mxu1 %v3470_v12  ;;  %v3452_v14 = vld [vmem:[%s15789_s3 + $0x90] sm:$0xff]  ;;  %v3566_v32 = vld [vmem:[%s15789_s3 + $0x420] sm:$0xff]  ;;  %v1698_v49 = vadd.f32 %v10805_v11, %v1678_v24  ;;  %v1818_v12 = vadd.f32 %v10870_v43, %v1798_v27  ;;  %v1598_v59 = vadd.f32 %v10701_v36, %v1578_v40 }
 0x2f2   :  { %4769 = vmatpush.msrb.mxu3 %v3584_v51  ;;  %4789 = vmatpush.msrb.mxu0 %v3680_v56  ;;  %v3662_v60 = vld [vmem:[%s15789_s3 + $0x720] sm:$0xff]  ;;  %v3560_v33 = vld [vmem:[%s15789_s3 + $0x3f0] sm:$0xff]  ;;  %v11423_v51 = vpop.f32.mrf.mxu2  ;;  %v1978_v11 = vadd.f32 %v10992_v46, %v1958_v42 }
 0x2f3   :  { %4809 = vmatpush.msrb.mxu2 %v3776_v31  ;;  %4753 = vmatpush.msrb.mxu1 %v3464_v20  ;;  %v3758_v55 = vld [vmem:[%s15789_s3 + $0xa20] sm:$0xff]  ;;  %v3656_v30 = vld [vmem:[%s15789_s3 + $0x6f0] sm:$0xff]  ;;  %v1838_v20 = vadd.f32 %v11016_v57, %v1818_v12  ;;  %v1718_v50 = vadd.f32 %v10819_v18, %v1698_v49 }
 0x2f4   :  { %4770 = vmatpush.msrb.mxu3 %v3578_v45  ;;  %4790 = vmatpush.msrb.mxu0 %v3674_v39  ;;  %v3446_v38 = vld [vmem:[%s15789_s3 + $0x60] sm:$0xff]  ;;  %v11421_v23 = vpop.f32.mrf.mxu1  ;;  %v3752_v56 = vld [vmem:[%s15789_s3 + $0x9f0] sm:$0xff] }
 0x2f5   :  { %4810 = vmatpush.msrb.mxu2 %v3770_v25  ;;  %4754 = vmatpush.msrb.mxu1 %v3458_v34  ;;  %v3440_v10 = vld [vmem:[%s15789_s3 + $0x30] sm:$0xff]  ;;  %v3554_v43 = vld [vmem:[%s15789_s3 + $0x3c0] sm:$0xff]  ;;  %v1858_v45 = vadd.f32 %v10913_v61, %v1838_v20  ;;  %v11456_v25 = vpop.f32.mrf.mxu0 }
 0x2f6   :  { %4771 = vmatpush.msrb.mxu3 %v3572_v4  ;;  %4791 = vmatpush.msrb.mxu0 %v3668_v21  ;;  %v3650_v31 = vld [vmem:[%s15789_s3 + $0x6c0] sm:$0xff]  ;;  %v3548_v9 = vld [vmem:[%s15789_s3 + $0x390] sm:$0xff]  ;;  %v11461_v4 = vmax.f32 %v1598_v59, 0.0  ;;  %v1998_v21 = vadd.f32 %v11018_v58, %v1978_v11 }
 0x2f7   :  { %4811 = vmatpush.msrb.mxu2 %v3764_v7  ;;  %4755 = vmatpush.msrb.mxu1 %v3452_v14  ;;  %v3746_v36 = vld [vmem:[%s15789_s3 + $0x9c0] sm:$0xff]  ;;  %v3644_v57 = vld [vmem:[%s15789_s3 + $0x690] sm:$0xff]  ;;  %v11454_v39 = vpop.f32.mrf.mxu3  ;;  %v1738_v14 = vadd.f32 %v10788_v2, %v1718_v50  ;;  %v1878_v40 = vadd.f32 %v10897_v54, %v1858_v45 }
 0x2f8   :  { %4772 = vmatpush.msrb.mxu3 %v3566_v32  ;;  %4792 = vmatpush.msrb.mxu0 %v3662_v60  ;;  %v3434_v46 = vld [vmem:[%s15789_s3] sm:$0xff]  ;;  %v3740_v34 = vld [vmem:[%s15789_s3 + $0x990] sm:$0xff] }
 0x2f9   :  { %4812 = vmatpush.msrb.mxu2 %v3758_v55  ;;  %4756 = vmatpush.msrb.mxu1 %v3446_v38  ;;  %v3908_v18 = vld [vmem:[%s15789_s3 + $0xed0] sm:$0xff]  ;;  %v3542_v61 = vld [vmem:[%s15789_s3 + $0x360] sm:$0xff]  ;;  %v2018_v55 = vadd.f32 %v11034_v1, %v1998_v21  ;;  %v1432_v38 = vperm.slane %v11214_v28, 4  ;;  %v11509_v49 = vmax.f32 %v1738_v14, 0.0  ;;  %v11511_v12 = vmax.f32 %v1878_v40, 0.0 }
 0x2fa   :  { %4773 = vmatpush.msrb.mxu3 %v3560_v33  ;;  %4793 = vmatpush.msrb.mxu0 %v3656_v30  ;;  %v3638_v24 = vld [vmem:[%s15789_s3 + $0x660] sm:$0xff]  ;;  %v3536_v7 = vld [vmem:[%s15789_s3 + $0x330] sm:$0xff]  ;;  %v11485_v42 = vpop.f32.mrf.mxu2 }
 0x2fb   :  { %4813 = vmatpush.msrb.mxu2 %v3752_v56  ;;  %4757 = vmatpush.msrb.mxu1 %v3440_v10  ;;  %v3734_v58 = vld [vmem:[%s15789_s3 + $0x960] sm:$0xff]  ;;  %v3632_v32 = vld [vmem:[%s15789_s3 + $0x630] sm:$0xff]  ;;  %v11520_v11 = vmax.f32 %v2018_v55, 0.0 }
 0x2fc   :  { %4774 = vmatpush.msrb.mxu3 %v3554_v43  ;;  %4794 = vmatpush.msrb.mxu0 %v3650_v31  ;;  %v3902_v27 = vld [vmem:[%s15789_s3 + $0xea0] sm:$0xff]  ;;  %v3728_v60 = vld [vmem:[%s15789_s3 + $0x930] sm:$0xff]  ;;  %v11501_v33 = vpop.f32.mrf.mxu1  ;;  %v2038_v43 = vadd.f32 %v11088_v44, %v1432_v38 }
 0x2fd   :  { %4814 = vmatpush.msrb.mxu2 %v3746_v36  ;;  %4758 = vmatpush.msrb.mxu1 %v3434_v46  ;;  %v3896_v2 = vld [vmem:[%s15789_s3 + $0xe70] sm:$0xff]  ;;  %v3530_v54 = vld [vmem:[%s15789_s3 + $0x300] sm:$0xff]  ;;  %v11515_v10 = vpop.f32.mrf.mxu0  ;;  %v1433_v36 = vperm.slane %v11214_v28, 5 }
 0x2fe   :  { %4775 = vmatpush.msrb.mxu3 %v3548_v9  ;;  %4795 = vmatpush.msrb.mxu0 %v3644_v57  ;;  %v3626_v1 = vld [vmem:[%s15789_s3 + $0x600] sm:$0xff]  ;;  %v4004_v31 = vld [vmem:[%s15789_s3 + $0x11d0] sm:$0xff]  ;;  %v1435_v9 = vperm.slane %v11214_v28, 7 }
 0x2ff   :  { %4815 = vmatpush.msrb.mxu2 %v3740_v34  ;;  %4759 = vmatmul.f32.vlgmr.msrb.gmra.mxu1 %v11461_v4  ;;  %v3722_v30 = vld [vmem:[%s15789_s3 + $0x900] sm:$0xff]  ;;  %v11513_v56 = vpop.f32.mrf.mxu3  ;;  %v4100_v20 = vld [vmem:[%s15789_s3 + $0x14d0] sm:$0xff] }
 0x300   :  { %4823 = vmatpush.msra.mxu1 %v3908_v18  ;;  %4776 = vmatpush.msrb.mxu3 %v3542_v61  ;;  %v3890_v59 = vld [vmem:[%s15789_s3 + $0xe40] sm:$0xff]  ;;  %v4196_v44 = vld [vmem:[%s15789_s3 + $0x17d0] sm:$0xff]  ;;  %v2058_v18 = vadd.f32 %v11128_v8, %v2038_v43  ;;  %v2458_v40 = vadd.f32 %v11342_v29, %v1435_v9 }
 0x301   :  { %4796 = vmatpush.msrb.mxu0 %v3638_v24  ;;  %4816 = vmatpush.msrb.mxu2 %v3734_v58  ;;  %v3884_v46 = vld [vmem:[%s15789_s3 + $0xe10] sm:$0xff]  ;;  %v3998_v57 = vld [vmem:[%s15789_s3 + $0x11a0] sm:$0xff]  ;;  %v2178_v58 = vadd.f32 %v11130_v13, %v1433_v36 }
 0x302   :  { %4824 = vmatpush.msra.mxu1 %v3902_v27  ;;  %4777 = vmatpush.msrb.mxu3 %v3536_v7  ;;  %v4094_v50 = vld [vmem:[%s15789_s3 + $0x14a0] sm:$0xff]  ;;  %v11546_v45 = vpop.f32.mrf.mxu2  ;;  %v3992_v61 = vld [vmem:[%s15789_s3 + $0x1170] sm:$0xff]  ;;  %v1434_v27 = vperm.slane %v11214_v28, 6  ;;  %v2078_v38 = vadd.f32 %v11048_v15, %v2058_v18  ;;  %v2478_v43 = vadd.f32 %v11375_v19, %v2458_v40 }
 0x303   :  { %4797 = vmatpush.msrb.mxu0 %v3632_v32  ;;  %4817 = vmatpush.msrb.mxu2 %v3728_v60  ;;  %v4190_v34 = vld [vmem:[%s15789_s3 + $0x17a0] sm:$0xff]  ;;  %v4088_v24 = vld [vmem:[%s15789_s3 + $0x1470] sm:$0xff] }
 0x304   :  { %4825 = vmatpush.msra.mxu1 %v3896_v2  ;;  %4778 = vmatpush.msrb.mxu3 %v3530_v54  ;;  %v3878_v21 = vld [vmem:[%s15789_s3 + $0xde0] sm:$0xff]  ;;  %v11563_v7 = vpop.f32.mrf.mxu1  ;;  %v4184_v8 = vld [vmem:[%s15789_s3 + $0x1770] sm:$0xff]  ;;  %v2098_v36 = vadd.f32 %v11074_v35, %v2078_v38  ;;  %v2498_v18 = vadd.f32 %v11421_v23, %v2478_v43 }
 0x305   :  { %4798 = vmatpush.msrb.mxu0 %v3626_v1  ;;  %4818 = vmatpush.msrb.mxu2 %v3722_v30  ;;  %v3872_v14 = vld [vmem:[%s15789_s3 + $0xdb0] sm:$0xff]  ;;  %v3986_v13 = vld [vmem:[%s15789_s3 + $0x1140] sm:$0xff]  ;;  %v11580_v60 = vpop.f32.mrf.mxu0  ;;  %v2198_v1 = vadd.f32 %v11158_v41, %v2178_v58  ;;  %v2318_v30 = vadd.f32 %v11293_v63, %v1434_v27 }
 0x306   :  { %4779 = vmatmul.f32.vlgmr.msrb.gmra.mxu3 %v11509_v49  ;;  %4799 = vmatmul.f32.vlgmr.msrb.gmra.mxu0 %v11511_v12  ;;  %v4082_v28 = vld [vmem:[%s15789_s3 + $0x1440] sm:$0xff]  ;;  %v3980_v2 = vld [vmem:[%s15789_s3 + $0x1110] sm:$0xff] }
 0x307   :  { %4819 = vmatmul.f32.vlgmr.msrb.gmra.mxu2 %v11520_v11  ;;  %4826 = vmatpush.msra.mxu1 %v3890_v59  ;;  %v11578_v32 = vpop.f32.mrf.mxu3  ;;  %v4178_v29 = vld [vmem:[%s15789_s3 + $0x1740] sm:$0xff]  ;;  %v4076_v54 = vld [vmem:[%s15789_s3 + $0x1410] sm:$0xff]  ;;  %v2218_v9 = vadd.f32 %v11195_v6, %v2198_v1 }
 0x308   :  { %4843 = vmatpush.msra.mxu3 %v4004_v31  ;;  %4863 = vmatpush.msra.mxu0 %v4100_v20  ;;  %v3866_v55 = vld [vmem:[%s15789_s3 + $0xd80] sm:$0xff]  ;;  %v4172_v15 = vld [vmem:[%s15789_s3 + $0x1710] sm:$0xff] }
 0x309   :  { %4883 = vmatpush.msra.mxu2 %v4196_v44  ;;  %4827 = vmatpush.msra.mxu1 %v3884_v46  ;;  %v3860_v59 = vld [vmem:[%s15789_s3 + $0xd50] sm:$0xff]  ;;  %v3974_v41 = vld [vmem:[%s15789_s3 + $0x10e0] sm:$0xff]  ;;  %v2238_v27 = vadd.f32 %v11239_v53, %v2218_v9 }
 0x30a   :  { %4844 = vmatpush.msra.mxu3 %v3998_v57  ;;  %4864 = vmatpush.msra.mxu0 %v4094_v50  ;;  %v4070_v63 = vld [vmem:[%s15789_s3 + $0x13e0] sm:$0xff]  ;;  %v11610_v31 = vpop.f32.mrf.mxu2  ;;  %v3968_v44 = vld [vmem:[%s15789_s3 + $0x10b0] sm:$0xff]  ;;  %v2338_v57 = vadd.f32 %v11326_v3, %v2318_v30 }
 0x30b   :  { %4884 = vmatpush.msra.mxu2 %v4190_v34  ;;  %4828 = vmatpush.msra.mxu1 %v3878_v21  ;;  %v4166_v20 = vld [vmem:[%s15789_s3 + $0x16e0] sm:$0xff]  ;;  %v4064_v46 = vld [vmem:[%s15789_s3 + $0x13b0] sm:$0xff]  ;;  %v2118_v21 = vadd.f32 %v11144_v26, %v2098_v36 }
 0x30c   :  { %4845 = vmatpush.msra.mxu3 %v3992_v61  ;;  %4865 = vmatpush.msra.mxu0 %v4088_v24  ;;  %v3854_v19 = vld [vmem:[%s15789_s3 + $0xd20] sm:$0xff]  ;;  %v11627_v50 = vpop.f32.mrf.mxu1  ;;  %v4160_v35 = vld [vmem:[%s15789_s3 + $0x16b0] sm:$0xff] }
 0x30d   :  { %4885 = vmatpush.msra.mxu2 %v4184_v8  ;;  %4829 = vmatpush.msra.mxu1 %v3872_v14  ;;  %v3848_v34 = vld [vmem:[%s15789_s3 + $0xcf0] sm:$0xff]  ;;  %v3962_v6 = vld [vmem:[%s15789_s3 + $0x1080] sm:$0xff]  ;;  %v2358_v8 = vadd.f32 %v11254_v0, %v2338_v57  ;;  %v11659_v14 = vpop.f32.mrf.mxu0 }
 0x30e   :  { %4846 = vmatpush.msra.mxu3 %v3986_v13  ;;  %4866 = vmatpush.msra.mxu0 %v4082_v28  ;;  %v4058_v3 = vld [vmem:[%s15789_s3 + $0x1380] sm:$0xff]  ;;  %v3956_v24 = vld [vmem:[%s15789_s3 + $0x1050] sm:$0xff]  ;;  %v2138_v28 = vadd.f32 %v11184_v62, %v2118_v21 }
 0x30f   :  { %4886 = vmatpush.msra.mxu2 %v4178_v29  ;;  %4830 = vmatpush.msra.mxu1 %v3866_v55  ;;  %v11643_v61 = vpop.f32.mrf.mxu3  ;;  %v4154_v26 = vld [vmem:[%s15789_s3 + $0x1680] sm:$0xff]  ;;  %v4052_v58 = vld [vmem:[%s15789_s3 + $0x1350] sm:$0xff]  ;;  %v2518_v29 = vadd.f32 %v11454_v39, %v2498_v18 }
 0x310   :  { %4847 = vmatpush.msra.mxu3 %v3980_v2  ;;  %4867 = vmatpush.msra.mxu0 %v4076_v54  ;;  %v3842_v23 = vld [vmem:[%s15789_s3 + $0xcc0] sm:$0xff]  ;;  %v4148_v40 = vld [vmem:[%s15789_s3 + $0x1650] sm:$0xff]  ;;  %v2258_v2 = vadd.f32 %v11197_v16, %v2238_v27  ;;  %v2378_v54 = vadd.f32 %v11282_v48, %v2358_v8  ;;  %v2158_v43 = vadd.f32 %v11102_v52, %v2138_v28 }
 0x311   :  { %4887 = vmatpush.msra.mxu2 %v4172_v15  ;;  %4831 = vmatpush.msra.mxu1 %v3860_v59  ;;  %v3836_v13 = vld [vmem:[%s15789_s3 + $0xc90] sm:$0xff]  ;;  %v3950_v53 = vld [vmem:[%s15789_s3 + $0x1020] sm:$0xff]  ;;  %v2538_v16 = vadd.f32 %v11423_v51, %v2518_v29 }
 0x312   :  { %4848 = vmatpush.msra.mxu3 %v3974_v41  ;;  %4868 = vmatpush.msra.mxu0 %v4070_v63  ;;  %v4046_v0 = vld [vmem:[%s15789_s3 + $0x1320] sm:$0xff]  ;;  %v3944_v39 = vld [vmem:[%s15789_s3 + $0xff0] sm:$0xff]  ;;  %v11691_v30 = vpop.f32.mrf.mxu2  ;;  %v2398_v63 = vadd.f32 %v11359_v5, %v2378_v54  ;;  %v11729_v57 = vmax.f32 %v2158_v43, 0.0 }
 0x313   :  { %4888 = vmatpush.msra.mxu2 %v4166_v20  ;;  %4832 = vmatpush.msra.mxu1 %v3854_v19  ;;  %v4142_v55 = vld [vmem:[%s15789_s3 + $0x1620] sm:$0xff]  ;;  %v4040_v38 = vld [vmem:[%s15789_s3 + $0x12f0] sm:$0xff]  ;;  %v2278_v19 = vadd.f32 %v11226_v47, %v2258_v2 }
 0x314   :  { %4849 = vmatpush.msra.mxu3 %v3968_v44  ;;  %4869 = vmatpush.msra.mxu0 %v4064_v46  ;;  %v3830_v62 = vld [vmem:[%s15789_s3 + $0xc60] sm:$0xff]  ;;  %v11689_v1 = vpop.f32.mrf.mxu1  ;;  %v4136_v15 = vld [vmem:[%s15789_s3 + $0x15f0] sm:$0xff]  ;;  %v2418_v36 = vadd.f32 %v11391_v22, %v2398_v63 }
 0x315   :  { %4889 = vmatpush.msra.mxu2 %v4160_v35  ;;  %4833 = vmatpush.msra.mxu1 %v3848_v34  ;;  %v3824_v59 = vld [vmem:[%s15789_s3 + $0xc30] sm:$0xff]  ;;  %v3938_v48 = vld [vmem:[%s15789_s3 + $0xfc0] sm:$0xff]  ;;  %v11724_v46 = vpop.f32.mrf.mxu0  ;;  %v2558_v35 = vadd.f32 %v11456_v25, %v2538_v16  ;;  %v11741_v34 = vld [vmem:[%s15788_s2 + $0x8] sm:$0x3f] }
 0x316   :  { %4850 = vmatpush.msra.mxu3 %v3962_v6  ;;  %4870 = vmatpush.msra.mxu0 %v4058_v3  ;;  %v4034_v41 = vld [vmem:[%s15789_s3 + $0x12c0] sm:$0xff]  ;;  %v3932_v20 = vld [vmem:[%s15789_s3 + $0xf90] sm:$0xff]  ;;  %v2298_v3 = vadd.f32 %v11270_v37, %v2278_v19  ;;  %v1436_v37 = vperm.slane %v11741_v34, 0  ;;  %v1437_v54 = vperm.slane %v11741_v34, 1 }
 0x317   :  { %4890 = vmatpush.msra.mxu2 %v4154_v26  ;;  %4834 = vmatpush.msra.mxu1 %v3842_v23  ;;  %v4130_v52 = vld [vmem:[%s15789_s3 + $0x15c0] sm:$0xff]  ;;  %v4028_v5 = vld [vmem:[%s15789_s3 + $0x1290] sm:$0xff]  ;;  %v11722_v44 = vpop.f32.mrf.mxu3  ;;  %v2438_v26 = vadd.f32 %v11309_v17, %v2418_v36  ;;  %v2578_v8 = vadd.f32 %v11501_v33, %v2558_v35  ;;  %v1438_v36 = vperm.slane %v11741_v34, 2 }
 0x318   :  { %4851 = vmatpush.msra.mxu3 %v3956_v24  ;;  %4871 = vmatpush.msra.mxu0 %v4052_v58  ;;  %v3818_v51 = vld [vmem:[%s15789_s3 + $0xc00] sm:$0xff]  ;;  %v4124_v9 = vld [vmem:[%s15789_s3 + $0x1590] sm:$0xff]  ;;  %v11782_v28 = vmax.f32 %v2298_v3, 0.0  ;;  %v2738_v19 = vadd.f32 %v11580_v60, %v1437_v54 }
 0x319   :  { %4891 = vmatpush.msra.mxu2 %v4148_v40  ;;  %4835 = vmatpush.msra.mxu1 %v3836_v13  ;;  %v4292_v47 = vld [vmem:[%s15789_s3 + $0x1ad0] sm:$0xff]  ;;  %v3926_v22 = vld [vmem:[%s15789_s3 + $0xf60] sm:$0xff]  ;;  %v11784_v29 = vmax.f32 %v2438_v26, 0.0 }
 0x31a   :  { %4852 = vmatpush.msra.mxu3 %v3950_v53  ;;  %4872 = vmatpush.msra.mxu0 %v4046_v0  ;;  %v4022_v25 = vld [vmem:[%s15789_s3 + $0x1260] sm:$0xff]  ;;  %v3920_v6 = vld [vmem:[%s15789_s3 + $0xf30] sm:$0xff]  ;;  %v11760_v24 = vpop.f32.mrf.mxu2 }
 0x31b   :  { %4892 = vmatpush.msra.mxu2 %v4142_v55  ;;  %4836 = vmatpush.msra.mxu1 %v3830_v62  ;;  %v4118_v21 = vld [vmem:[%s15789_s3 + $0x1560] sm:$0xff]  ;;  %v4016_v58 = vld [vmem:[%s15789_s3 + $0x1230] sm:$0xff]  ;;  %v11793_v62 = vmax.f32 %v2578_v8, 0.0 }
 0x31c   :  { %4853 = vmatpush.msra.mxu3 %v3944_v39  ;;  %4873 = vmatpush.msra.mxu0 %v4040_v38  ;;  %v4286_v18 = vld [vmem:[%s15789_s3 + $0x1aa0] sm:$0xff]  ;;  %v11758_v23 = vpop.f32.mrf.mxu1  ;;  %v4112_v27 = vld [vmem:[%s15789_s3 + $0x1530] sm:$0xff]  ;;  %v2598_v39 = vadd.f32 %v11513_v56, %v1436_v37 }
 0x31d   :  { %4893 = vmatpush.msra.mxu2 %v4136_v15  ;;  %4837 = vmatpush.msra.mxu1 %v3824_v59  ;;  %v4280_v17 = vld [vmem:[%s15789_s3 + $0x1a70] sm:$0xff]  ;;  %v3914_v40 = vld [vmem:[%s15789_s3 + $0xf00] sm:$0xff]  ;;  %v11788_v0 = vpop.f32.mrf.mxu0  ;;  %v1439_v59 = vperm.slane %v11741_v34, 3 }
 0x31e   :  { %4854 = vmatpush.msra.mxu3 %v3938_v48  ;;  %4874 = vmatpush.msra.mxu0 %v4034_v41  ;;  %v4010_v13 = vld [vmem:[%s15789_s3 + $0x1200] sm:$0xff]  ;;  %v4388_v38 = vld [vmem:[%s15789_s3 + $0x1dd0] sm:$0xff] }
 0x31f   :  { %4894 = vmatpush.msra.mxu2 %v4130_v52  ;;  %4838 = vmatpush.msra.mxu1 %v3818_v51  ;;  %v4106_v33 = vld [vmem:[%s15789_s3 + $0x1500] sm:$0xff]  ;;  %v11786_v53 = vpop.f32.mrf.mxu3  ;;  %v4484_v2 = vld [vmem:[%s15789_s3 + $0x20d0] sm:$0xff]  ;;  %v2618_v51 = vadd.f32 %v11563_v7, %v2598_v39 }
 0x320   :  { %4855 = vmatpush.msra.mxu3 %v3932_v20  ;;  %4875 = vmatpush.msra.mxu0 %v4028_v5  ;;  %v4274_v55 = vld [vmem:[%s15789_s3 + $0x1a40] sm:$0xff]  ;;  %v4580_v56 = vld [vmem:[%s15789_s3 + $0x23d0] sm:$0xff] }
 0x321   :  { %4895 = vmatpush.msra.mxu2 %v4124_v9  ;;  %4839 = vmatmul.f32.vlgmr.msra.gmra.mxu1 %v11729_v57  ;;  %v4268_v15 = vld [vmem:[%s15789_s3 + $0x1a10] sm:$0xff]  ;;  %v4382_v43 = vld [vmem:[%s15789_s3 + $0x1da0] sm:$0xff] }
 0x322   :  { %4903 = vmatpush.msrb.mxu1 %v4292_v47  ;;  %4856 = vmatpush.msra.mxu3 %v3926_v22  ;;  %v4478_v16 = vld [vmem:[%s15789_s3 + $0x20a0] sm:$0xff]  ;;  %v3017_v41 = vpop.f32.mrf.mxu2  ;;  %v4376_v20 = vld [vmem:[%s15789_s3 + $0x1d70] sm:$0xff] }
 0x323   :  { %4876 = vmatpush.msra.mxu0 %v4022_v25  ;;  %4896 = vmatpush.msra.mxu2 %v4118_v21  ;;  %v4574_v63 = vld [vmem:[%s15789_s3 + $0x23a0] sm:$0xff]  ;;  %v4472_v5 = vld [vmem:[%s15789_s3 + $0x2070] sm:$0xff]  ;;  %v3018_v35 = vadd.f32 %v3017_v41, %v1439_v59 }
 0x324   :  { %4904 = vmatpush.msrb.mxu1 %v4286_v18  ;;  %4857 = vmatpush.msra.mxu3 %v3920_v6  ;;  %v11819_v48 = vpop.f32.mrf.mxu1  ;;  %v4262_v52 = vld [vmem:[%s15789_s3 + $0x19e0] sm:$0xff]  ;;  %v4568_v7 = vld [vmem:[%s15789_s3 + $0x2370] sm:$0xff]  ;;  %v2638_v6 = vadd.f32 %v11485_v42, %v2618_v51 }
 0x325   :  { %4877 = vmatpush.msra.mxu0 %v4016_v58  ;;  %4897 = vmatpush.msra.mxu2 %v4112_v27  ;;  %v4256_v9 = vld [vmem:[%s15789_s3 + $0x19b0] sm:$0xff]  ;;  %v4370_v47 = vld [vmem:[%s15789_s3 + $0x1d40] sm:$0xff]  ;;  %v3037_v25 = vpop.f32.mrf.mxu0  ;;  %v2758_v58 = vadd.f32 %v11610_v31, %v2738_v19  ;;  %v2878_v27 = vadd.f32 %v11758_v23, %v1438_v36 }
 0x326   :  { %4905 = vmatpush.msrb.mxu1 %v4280_v17  ;;  %4858 = vmatpush.msra.mxu3 %v3914_v40  ;;  %v4466_v60 = vld [vmem:[%s15789_s3 + $0x2040] sm:$0xff]  ;;  %v4364_v3 = vld [vmem:[%s15789_s3 + $0x1d10] sm:$0xff]  ;;  %v3038_v37 = vadd.f32 %v3037_v25, %v3018_v35 }
 0x327   :  { %4878 = vmatpush.msra.mxu0 %v4010_v13  ;;  %4898 = vmatpush.msra.mxu2 %v4106_v33  ;;  %v11848_v22 = vpop.f32.mrf.mxu3  ;;  %v4562_v21 = vld [vmem:[%s15789_s3 + $0x2340] sm:$0xff]  ;;  %v4460_v26 = vld [vmem:[%s15789_s3 + $0x2010] sm:$0xff]  ;;  %v2658_v33 = vadd.f32 %v11515_v10, %v2638_v6 }
 0x328   :  { %4859 = vmatmul.f32.vlgmr.msra.gmra.mxu3 %v11782_v28  ;;  %4879 = vmatmul.f32.vlgmr.msra.gmra.mxu0 %v11784_v29  ;;  %v4250_v18 = vld [vmem:[%s15789_s3 + $0x1980] sm:$0xff]  ;;  %v4556_v42 = vld [vmem:[%s15789_s3 + $0x2310] sm:$0xff] }
 0x329   :  { %4899 = vmatmul.f32.vlgmr.msra.gmra.mxu2 %v11793_v62  ;;  %4906 = vmatpush.msrb.mxu1 %v4274_v55  ;;  %v4244_v8 = vld [vmem:[%s15789_s3 + $0x1950] sm:$0xff]  ;;  %v4358_v17 = vld [vmem:[%s15789_s3 + $0x1ce0] sm:$0xff] }
 0x32a   :  { %4923 = vmatpush.msrb.mxu3 %v4388_v38  ;;  %4943 = vmatpush.msrb.mxu0 %v4484_v2  ;;  %v4454_v31 = vld [vmem:[%s15789_s3 + $0x1fe0] sm:$0xff]  ;;  %v4352_v55 = vld [vmem:[%s15789_s3 + $0x1cb0] sm:$0xff]  ;;  %v2778_v38 = vadd.f32 %v11643_v61, %v2758_v58  ;;  %v2898_v2 = vadd.f32 %v11786_v53, %v2878_v27  ;;  %v3097_v36 = vpop.f32.mrf.mxu2 }
 0x32b   :  { %4963 = vmatpush.msrb.mxu2 %v4580_v56  ;;  %4907 = vmatpush.msrb.mxu1 %v4268_v15  ;;  %v4550_v40 = vld [vmem:[%s15789_s3 + $0x22e0] sm:$0xff]  ;;  %v4448_v39 = vld [vmem:[%s15789_s3 + $0x1fb0] sm:$0xff]  ;;  %v2678_v56 = vadd.f32 %v11578_v32, %v2658_v33 }
 0x32c   :  { %4924 = vmatpush.msrb.mxu3 %v4382_v43  ;;  %4944 = vmatpush.msrb.mxu0 %v4478_v16  ;;  %v3057_v23 = vpop.f32.mrf.mxu1  ;;  %v4238_v13 = vld [vmem:[%s15789_s3 + $0x1920] sm:$0xff]  ;;  %v4544_v10 = vld [vmem:[%s15789_s3 + $0x22b0] sm:$0xff] }
 0x32d   :  { %4964 = vmatpush.msrb.mxu2 %v4574_v63  ;;  %4908 = vmatpush.msrb.mxu1 %v4262_v52  ;;  %v4232_v54 = vld [vmem:[%s15789_s3 + $0x18f0] sm:$0xff]  ;;  %v3058_v15 = vadd.f32 %v3057_v23, %v3038_v37  ;;  %v4346_v61 = vld [vmem:[%s15789_s3 + $0x1c80] sm:$0xff]  ;;  %v2798_v63 = vadd.f32 %v11689_v1, %v2778_v38  ;;  %v2918_v52 = vadd.f32 %v11724_v46, %v2898_v2 }
 0x32e   :  { %4925 = vmatpush.msrb.mxu3 %v4376_v20  ;;  %4945 = vmatpush.msrb.mxu0 %v4472_v5  ;;  %v4442_v53 = vld [vmem:[%s15789_s3 + $0x1f80] sm:$0xff]  ;;  %v4340_v16 = vld [vmem:[%s15789_s3 + $0x1c50] sm:$0xff]  ;;  %v2698_v5 = vadd.f32 %v11627_v50, %v2678_v56  ;;  %v1440_v56 = vperm.slane %v11741_v34, 4 }
 0x32f   :  { %4965 = vmatpush.msrb.mxu2 %v4568_v7  ;;  %4909 = vmatpush.msrb.mxu1 %v4256_v9  ;;  %v3077_v59 = vpop.f32.mrf.mxu3  ;;  %v4538_v43 = vld [vmem:[%s15789_s3 + $0x2280] sm:$0xff]  ;;  %v4436_v41 = vld [vmem:[%s15789_s3 + $0x1f50] sm:$0xff] }
 0x330   :  { %4926 = vmatpush.msrb.mxu3 %v4370_v47  ;;  %4946 = vmatpush.msrb.mxu0 %v4466_v60  ;;  %v4226_v32 = vld [vmem:[%s15789_s3 + $0x18c0] sm:$0xff]  ;;  %v4532_v51 = vld [vmem:[%s15789_s3 + $0x2250] sm:$0xff]  ;;  %v3078_v19 = vadd.f32 %v3077_v59, %v3058_v15  ;;  %v2818_v47 = vadd.f32 %v11659_v14, %v2798_v63  ;;  %v2938_v60 = vadd.f32 %v11760_v24, %v2918_v52  ;;  %v3525_v63 = vld [vmem:[%s15789_s3 + $0x2d8] sm:$0xff] }
 0x331   :  { %4966 = vmatpush.msrb.mxu2 %v4562_v21  ;;  %4910 = vmatpush.msrb.mxu1 %v4250_v18  ;;  %v4220_v20 = vld [vmem:[%s15789_s3 + $0x1890] sm:$0xff]  ;;  %v4334_v1 = vld [vmem:[%s15789_s3 + $0x1c20] sm:$0xff]  ;;  %v2718_v18 = vadd.f32 %v11546_v45, %v2698_v5  ;;  %v3621_v52 = vld [vmem:[%s15789_s3 + $0x5d8] sm:$0xff] }
 0x332   :  { %4927 = vmatpush.msrb.mxu3 %v4364_v3  ;;  %4947 = vmatpush.msrb.mxu0 %v4460_v26  ;;  %v4430_v46 = vld [vmem:[%s15789_s3 + $0x1f20] sm:$0xff]  ;;  %v4328_v9 = vld [vmem:[%s15789_s3 + $0x1bf0] sm:$0xff]  ;;  %v3098_v6 = vadd.f32 %v3097_v36, %v3078_v19  ;;  %v2958_v3 = vadd.f32 %v11819_v48, %v2938_v60  ;;  %v3117_v26 = vpop.f32.mrf.mxu0  ;;  %v3519_v19 = vld [vmem:[%s15789_s3 + $0x2a8] sm:$0xff] }
 0x333   :  { %4967 = vmatpush.msrb.mxu2 %v4556_v42  ;;  %4911 = vmatpush.msrb.mxu1 %v4244_v8  ;;  %v4526_v7 = vld [vmem:[%s15789_s3 + $0x2220] sm:$0xff]  ;;  %v4424_v35 = vld [vmem:[%s15789_s3 + $0x1ef0] sm:$0xff]  ;;  %v2838_v42 = vadd.f32 %v11691_v30, %v2818_v47 }
 0x334   :  { %4928 = vmatpush.msrb.mxu3 %v4358_v17  ;;  %4948 = vmatpush.msrb.mxu0 %v4454_v31  ;;  %v4214_v50 = vld [vmem:[%s15789_s3 + $0x1860] sm:$0xff]  ;;  %v4520_v25 = vld [vmem:[%s15789_s3 + $0x21f0] sm:$0xff]  ;;  %v2978_v8 = vadd.f32 %v11848_v22, %v2958_v3  ;;  %v11977_v17 = vmax.f32 %v2718_v18, 0.0  ;;  %v3118_v31 = vadd.f32 %v3117_v26, %v3098_v6  ;;  %v3137_v22 = vpop.f32.mrf.mxu1  ;;  %v3597_v3 = vld [vmem:[%s15789_s3 + $0x518] sm:$0xff] }
 0x335   :  { %4968 = vmatpush.msrb.mxu2 %v4550_v40  ;;  %4912 = vmatpush.msrb.mxu1 %v4238_v13  ;;  %v4208_v21 = vld [vmem:[%s15789_s3 + $0x1830] sm:$0xff]  ;;  %v4322_v14 = vld [vmem:[%s15789_s3 + $0x1bc0] sm:$0xff] }
 0x336   :  { %4929 = vmatpush.msrb.mxu3 %v4352_v55  ;;  %4949 = vmatpush.msrb.mxu0 %v4448_v39  ;;  %v4418_v24 = vld [vmem:[%s15789_s3 + $0x1ec0] sm:$0xff]  ;;  %v4316_v27 = vld [vmem:[%s15789_s3 + $0x1b90] sm:$0xff]  ;;  %v2858_v39 = vadd.f32 %v11722_v44, %v2838_v42  ;;  %v2998_v38 = vadd.f32 %v11788_v0, %v2978_v8 }
 0x337   :  { %4969 = vmatpush.msrb.mxu2 %v4544_v10  ;;  %4913 = vmatpush.msrb.mxu1 %v4232_v54  ;;  %v4514_v45 = vld [vmem:[%s15789_s3 + $0x21c0] sm:$0xff]  ;;  %v4412_v48 = vld [vmem:[%s15789_s3 + $0x1e90] sm:$0xff]  ;;  %v3138_v54 = vadd.f32 %v3137_v22, %v3118_v31  ;;  %v3157_v15 = vpop.f32.mrf.mxu3 }
 0x338   :  { %4930 = vmatpush.msrb.mxu3 %v4346_v61  ;;  %4950 = vmatpush.msrb.mxu0 %v4442_v53  ;;  %v4202_v58 = vld [vmem:[%s15789_s3 + $0x1800] sm:$0xff]  ;;  %v4508_v37 = vld [vmem:[%s15789_s3 + $0x2190] sm:$0xff]  ;;  %v12019_v59 = vmax.f32 %v2858_v39, 0.0  ;;  %v3579_v39 = vld [vmem:[%s15789_s3 + $0x488] sm:$0xff] }
 0x339   :  { %4970 = vmatpush.msrb.mxu2 %v4538_v43  ;;  %4914 = vmatpush.msrb.mxu1 %v4226_v32  ;;  %v4676_v23 = vld [vmem:[%s15789_s3 + $0x26d0] sm:$0xff]  ;;  %v4310_v30 = vld [vmem:[%s15789_s3 + $0x1b60] sm:$0xff]  ;;  %v12021_v43 = vmax.f32 %v2998_v38, 0.0 }
 0x33a   :  { %4931 = vmatpush.msrb.mxu3 %v4340_v16  ;;  %4951 = vmatpush.msrb.mxu0 %v4436_v41  ;;  %v4406_v40 = vld [vmem:[%s15789_s3 + $0x1e60] sm:$0xff]  ;;  %v4304_v55 = vld [vmem:[%s15789_s3 + $0x1b30] sm:$0xff]  ;;  %v12026_v16 = vmax.f32 %v3138_v54, 0.0  ;;  %v3158_v41 = vadd.f32 %v3157_v15, %v1440_v56  ;;  %v3217_v26 = vpop.f32.mrf.mxu0  ;;  %v3477_v54 = vld [vmem:[%s15789_s3 + $0x158] sm:$0xff] }
 0x33b   :  { %4971 = vmatpush.msrb.mxu2 %v4532_v51  ;;  %4915 = vmatpush.msrb.mxu1 %v4220_v20  ;;  %v4502_v13 = vld [vmem:[%s15789_s3 + $0x2160] sm:$0xff]  ;;  %v4400_v2 = vld [vmem:[%s15789_s3 + $0x1e30] sm:$0xff]  ;;  %v3573_v56 = vld [vmem:[%s15789_s3 + $0x458] sm:$0xff] }
 0x33c   :  { %4932 = vmatpush.msrb.mxu3 %v4334_v1  ;;  %4952 = vmatpush.msrb.mxu0 %v4430_v46  ;;  %v4670_v33 = vld [vmem:[%s15789_s3 + $0x26a0] sm:$0xff]  ;;  %v4496_v10 = vld [vmem:[%s15789_s3 + $0x2130] sm:$0xff]  ;;  %v3177_v51 = vpop.f32.mrf.mxu1  ;;  %v3615_v1 = vld [vmem:[%s15789_s3 + $0x5a8] sm:$0xff] }
 0x33d   :  { %4972 = vmatpush.msrb.mxu2 %v4526_v7  ;;  %4916 = vmatpush.msrb.mxu1 %v4214_v50  ;;  %v4664_v44 = vld [vmem:[%s15789_s3 + $0x2670] sm:$0xff]  ;;  %v4298_v0 = vld [vmem:[%s15789_s3 + $0x1b00] sm:$0xff]  ;;  %v3178_v7 = vadd.f32 %v3177_v51, %v3158_v41  ;;  %v3513_v50 = vld [vmem:[%s15789_s3 + $0x278] sm:$0xff] }
 0x33e   :  { %4933 = vmatpush.msrb.mxu3 %v4328_v9  ;;  %4953 = vmatpush.msrb.mxu0 %v4424_v35  ;;  %v4394_v61 = vld [vmem:[%s15789_s3 + $0x1e00] sm:$0xff]  ;;  %v4652_v20 = vld [vmem:[%s15789_s3 + $0x2610] sm:$0xff]  ;;  %v3609_v9 = vld [vmem:[%s15789_s3 + $0x578] sm:$0xff]  ;;  %v3197_v35 = vpop.f32.mrf.mxu2 }
 0x33f   :  { %4973 = vmatpush.msrb.mxu2 %v4520_v25  ;;  %4917 = vmatpush.msrb.mxu1 %v4208_v21  ;;  %v4490_v53 = vld [vmem:[%s15789_s3 + $0x2100] sm:$0xff]  ;;  %v4700_v5 = vld [vmem:[%s15789_s3 + $0x2790] sm:$0x3]  ;;  %v3507_v25 = vld [vmem:[%s15789_s3 + $0x248] sm:$0xff] }
 0x340   :  { %4934 = vmatpush.msrb.mxu3 %v4322_v14  ;;  %4954 = vmatpush.msrb.mxu0 %v4418_v24  ;;  %v4658_v32 = vld [vmem:[%s15789_s3 + $0x2640] sm:$0xff]  ;;  %v4640_v47 = vld [vmem:[%s15789_s3 + $0x25b0] sm:$0xff]  ;;  %v3603_v21 = vld [vmem:[%s15789_s3 + $0x548] sm:$0xff]  ;;  %v3198_v14 = vadd.f32 %v3197_v35, %v3178_v7  ;;  %v3237_v42 = vpop.f32.mrf.mxu3 }
 0x341   :  { %4974 = vmatpush.msrb.mxu2 %v4514_v45  ;;  %4918 = vmatpush.msrb.mxu1 %v4202_v58  ;;  %v4646_v46 = vld [vmem:[%s15789_s3 + $0x25e0] sm:$0xff]  ;;  %v4688_v60 = vld [vmem:[%s15789_s3 + $0x2730] sm:$0xff]  ;;  %v3501_v24 = vld [vmem:[%s15789_s3 + $0x218] sm:$0xff] }
 0x342   :  { %4935 = vmatpush.msrb.mxu3 %v4316_v27  ;;  %4955 = vmatpush.msrb.mxu0 %v4412_v48  ;;  %v4694_v36 = vld [vmem:[%s15789_s3 + $0x2760] sm:$0xff]  ;;  %v4628_v45 = vld [vmem:[%s15789_s3 + $0x2550] sm:$0xff]  ;;  %v3717_v58 = vld [vmem:[%s15789_s3 + $0x8d8] sm:$0xff]  ;;  %v3218_v31 = vadd.f32 %v3217_v26, %v3198_v14 }
 0x343   :  { %4975 = vmatpush.msrb.mxu2 %v4508_v37  ;;  %4919 = vmatmul.f32.vlgmr.msrb.gmra.mxu1 %v11977_v17  ;;  %v4634_v18 = vld [vmem:[%s15789_s3 + $0x2580] sm:$0xff]  ;;  %v3495_v27 = vld [vmem:[%s15789_s3 + $0x1e8] sm:$0xff]  ;;  %v4616_v22 = vld [vmem:[%s15789_s3 + $0x24f0] sm:$0xff] }
 0x344   :  { %4983 = vmatpush.msra.mxu1 %v4676_v23  ;;  %4936 = vmatpush.msrb.mxu3 %v4310_v30  ;;  %v4682_v6 = vld [vmem:[%s15789_s3 + $0x2700] sm:$0xff]  ;;  %v3591_v48 = vld [vmem:[%s15789_s3 + $0x4e8] sm:$0xff]  ;;  %v3489_v23 = vld [vmem:[%s15789_s3 + $0x1b8] sm:$0xff]  ;;  %v3257_v38 = vpop.f32.mrf.mxu1 }
 0x345   :  { %4956 = vmatpush.msrb.mxu0 %v4406_v40  ;;  %4976 = vmatpush.msrb.mxu2 %v4502_v13  ;;  %v4622_v8 = vld [vmem:[%s15789_s3 + $0x2520] sm:$0xff]  ;;  %v3711_v37 = vld [vmem:[%s15789_s3 + $0x8a8] sm:$0xff]  ;;  %v3585_v30 = vld [vmem:[%s15789_s3 + $0x4b8] sm:$0xff]  ;;  %v3238_v13 = vadd.f32 %v3237_v42, %v3218_v31 }
 0x346   :  { %4984 = vmatpush.msra.mxu1 %v4670_v33  ;;  %4937 = vmatpush.msrb.mxu3 %v4304_v55  ;;  %v3705_v40 = vld [vmem:[%s15789_s3 + $0x878] sm:$0xff]  ;;  %v3277_v33 = vpop.f32.mrf.mxu2  ;;  %v3483_v55 = vld [vmem:[%s15789_s3 + $0x188] sm:$0xff]  ;;  %v4598_v41 = vld [vmem:[%s15789_s3 + $0x2460] sm:$0xff] }
 0x347   :  { %4957 = vmatpush.msrb.mxu0 %v4400_v2  ;;  %4977 = vmatpush.msrb.mxu2 %v4496_v10  ;;  %v4610_v2 = vld [vmem:[%s15789_s3 + $0x24c0] sm:$0xff]  ;;  %v3699_v10 = vld [vmem:[%s15789_s3 + $0x848] sm:$0xff]  ;;  %v3258_v15 = vadd.f32 %v3257_v38, %v3238_v13  ;;  %v3561_v51 = vld [vmem:[%s15789_s3 + $0x3f8] sm:$0xff] }
 0x348   :  { %4985 = vmatpush.msra.mxu1 %v4664_v44  ;;  %4938 = vmatpush.msrb.mxu3 %v4298_v0  ;;  %v4604_v44 = vld [vmem:[%s15789_s3 + $0x2490] sm:$0xff]  ;;  %v3693_v0 = vld [vmem:[%s15789_s3 + $0x818] sm:$0xff]  ;;  %v3447_v14 = vld [vmem:[%s15789_s3 + $0x68] sm:$0xff] }
 0x349   :  { %4958 = vmatpush.msrb.mxu0 %v4394_v61  ;;  %4978 = vmatpush.msrb.mxu2 %v4490_v53  ;;  %v3471_v61 = vld [vmem:[%s15789_s3 + $0x128] sm:$0xff]  ;;  %v3453_v35 = vld [vmem:[%s15789_s3 + $0x98] sm:$0xff] }
 0x34a   :  { %4939 = vmatmul.f32.vlgmr.msrb.gmra.mxu3 %v12019_v59  ;;  %4959 = vmatmul.f32.vlgmr.msrb.gmra.mxu0 %v12021_v43  ;;  %v3567_v53 = vld [vmem:[%s15789_s3 + $0x428] sm:$0xff]  ;;  %v3801_v42 = vld [vmem:[%s15789_s3 + $0xb78] sm:$0xff] }
 0x34b   :  { %4979 = vmatmul.f32.vlgmr.msrb.gmra.mxu2 %v12026_v16  ;;  %4986 = vmatpush.msra.mxu1 %v4658_v32  ;;  %v1441_v32 = vperm.slane %v11741_v34, 5  ;;  %v4592_v34 = vld [vmem:[%s15789_s3 + $0x2430] sm:$0xff]  ;;  %v3663_v26 = vld [vmem:[%s15789_s3 + $0x728] sm:$0xff] }
 0x34c   :  { %5023 = vmatpush.msra.mxu0 %v3525_v63  ;;  %5043 = vmatpush.msra.mxu2 %v3621_v52  ;;  %v3687_v63 = vld [vmem:[%s15789_s3 + $0x7e8] sm:$0xff]  ;;  %v3465_v52 = vld [vmem:[%s15789_s3 + $0xf8] sm:$0xff] }
 0x34d   :  { %4987 = vmatpush.msra.mxu1 %v4652_v20  ;;  %6751 = vmatpush.msk.msra.mxu3 %vm4724_vm1, %v4700_v5  ;;  %v3681_v20 = vld [vmem:[%s15789_s3 + $0x7b8] sm:$0xff]  ;;  %v3531_v31 = vld [vmem:[%s15789_s3 + $0x308] sm:$0xff] }
 0x34e   :  { %5024 = vmatpush.msra.mxu0 %v3519_v19  ;;  %5044 = vmatpush.msra.mxu2 %v3615_v1  ;;  %v3278_v19 = vadd.f32 %v3277_v33, %v3258_v15  ;;  %v3459_v1 = vld [vmem:[%s15789_s3 + $0xc8] sm:$0xff]  ;;  %v3789_v33 = vld [vmem:[%s15789_s3 + $0xb18] sm:$0xff] }
 0x34f   :  { %4988 = vmatpush.msra.mxu1 %v4646_v46  ;;  %5016 = vmatpush.msra.mxu3 %v4694_v36  ;;  %v3555_v46 = vld [vmem:[%s15789_s3 + $0x3c8] sm:$0xff]  ;;  %v3897_v15 = vld [vmem:[%s15789_s3 + $0xe78] sm:$0xff] }
 0x350   :  { %5025 = vmatpush.msra.mxu0 %v3513_v50  ;;  %5045 = vmatpush.msra.mxu2 %v3609_v9  ;;  %v4586_v50 = vld [vmem:[%s15789_s3 + $0x2400] sm:$0xff]  ;;  %v3675_v9 = vld [vmem:[%s15789_s3 + $0x788] sm:$0xff] }
 0x351   :  { %4989 = vmatpush.msra.mxu1 %v4640_v47  ;;  %5017 = vmatpush.msra.mxu3 %v4688_v60  ;;  %v3549_v47 = vld [vmem:[%s15789_s3 + $0x398] sm:$0xff] }
 0x352   :  { %5026 = vmatpush.msra.mxu0 %v3507_v25  ;;  %5046 = vmatpush.msra.mxu2 %v3603_v21  ;;  %v3669_v25 = vld [vmem:[%s15789_s3 + $0x758] sm:$0xff] }
 0x353   :  { %4990 = vmatpush.msra.mxu1 %v4634_v18  ;;  %5018 = vmatpush.msra.mxu3 %v4682_v6  ;;  %v12186_v18 = vmax.f32 %v3278_v19, 0.0  ;;  %v3813_v6 = vld [vmem:[%s15789_s3 + $0xbd8] sm:$0xff] }
 0x354   :  { %5027 = vmatpush.msra.mxu0 %v3501_v24  ;;  %5047 = vmatpush.msra.mxu2 %v3597_v3  ;;  %v3543_v24 = vld [vmem:[%s15789_s3 + $0x368] sm:$0xff]  ;;  %v3765_v19 = vld [vmem:[%s15789_s3 + $0xa58] sm:$0xff] }
 0x355   :  { %4991 = vmatpush.msra.mxu1 %v4628_v45  ;;  %5063 = vmatpush.msrb.mxu3 %v3717_v58  ;;  %v3807_v45 = vld [vmem:[%s15789_s3 + $0xba8] sm:$0xff]  ;;  %v3441_v58 = vld [vmem:[%s15789_s3 + $0x38] sm:$0xff] }
 0x356   :  { %5028 = vmatpush.msra.mxu0 %v3495_v27  ;;  %5048 = vmatpush.msra.mxu2 %v3591_v48  ;;  %v3537_v27 = vld [vmem:[%s15789_s3 + $0x338] sm:$0xff] }
 0x357   :  { %4992 = vmatpush.msra.mxu1 %v4622_v8  ;;  %5064 = vmatpush.msrb.mxu3 %v3711_v37  ;;  %v3657_v48 = vld [vmem:[%s15789_s3 + $0x6f8] sm:$0xff]  ;;  %v3435_v8 = vld [vmem:[%s15789_s3 + $0x8] sm:$0xff] }
 0x358   :  { %5029 = vmatpush.msra.mxu0 %v3489_v23  ;;  %5049 = vmatpush.msra.mxu2 %v3585_v30  ;;  %v3795_v30 = vld [vmem:[%s15789_s3 + $0xb48] sm:$0xff] }
 0x359   :  { %4993 = vmatpush.msra.mxu1 %v4616_v22  ;;  %5065 = vmatpush.msrb.mxu3 %v3705_v40  ;;  %v3909_v22 = vld [vmem:[%s15789_s3 + $0xed8] sm:$0xff] }
 0x35a   :  { %5030 = vmatpush.msra.mxu0 %v3483_v55  ;;  %5050 = vmatpush.msra.mxu2 %v3579_v39  ;;  %v4005_v40 = vld [vmem:[%s15789_s3 + $0x11d8] sm:$0xff]  ;;  %v3651_v39 = vld [vmem:[%s15789_s3 + $0x6c8] sm:$0xff] }
 0x35b   :  { %4994 = vmatpush.msra.mxu1 %v4610_v2  ;;  %5066 = vmatpush.msrb.mxu3 %v3699_v10  ;;  %v3903_v2 = vld [vmem:[%s15789_s3 + $0xea8] sm:$0xff] }
 0x35c   :  { %5031 = vmatpush.msra.mxu0 %v3477_v54  ;;  %5051 = vmatpush.msra.mxu2 %v3573_v56  ;;  %v3999_v10 = vld [vmem:[%s15789_s3 + $0x11a8] sm:$0xff] }
 0x35d   :  { %4995 = vmatpush.msra.mxu1 %v4604_v44  ;;  %5067 = vmatpush.msrb.mxu3 %v3693_v0  ;;  %v3783_v54 = vld [vmem:[%s15789_s3 + $0xae8] sm:$0xff]  ;;  %v3645_v44 = vld [vmem:[%s15789_s3 + $0x698] sm:$0xff] }
 0x35e   :  { %5032 = vmatpush.msra.mxu0 %v3471_v61  ;;  %5052 = vmatpush.msra.mxu2 %v3567_v53  ;;  %v3297_v5 = vpop.f32.mrf.mxu0  ;;  %v3993_v61 = vld [vmem:[%s15789_s3 + $0x1178] sm:$0xff] }
 0x35f   :  { %4996 = vmatpush.msra.mxu1 %v4598_v41  ;;  %5068 = vmatpush.msrb.mxu3 %v3687_v63  ;;  %v3298_v36 = vadd.f32 %v3297_v5, %v1441_v32  ;;  %v3317_v7 = vpop.f32.mrf.mxu2  ;;  %v3777_v53 = vld [vmem:[%s15789_s3 + $0xab8] sm:$0xff]  ;;  %v3639_v32 = vld [vmem:[%s15789_s3 + $0x668] sm:$0xff] }
 0x360   :  { %5033 = vmatpush.msra.mxu0 %v3465_v52  ;;  %5053 = vmatpush.msra.mxu2 %v3561_v51  ;;  %v3891_v41 = vld [vmem:[%s15789_s3 + $0xe48] sm:$0xff]  ;;  %v3981_v5 = vld [vmem:[%s15789_s3 + $0x1118] sm:$0xff] }
 0x361   :  { %4997 = vmatpush.msra.mxu1 %v4592_v34  ;;  %5069 = vmatpush.msrb.mxu3 %v3681_v20  ;;  %v3318_v60 = vadd.f32 %v3317_v7, %v3298_v36  ;;  %v3987_v63 = vld [vmem:[%s15789_s3 + $0x1148] sm:$0xff]  ;;  %v3633_v34 = vld [vmem:[%s15789_s3 + $0x638] sm:$0xff] }
 0x362   :  { %5034 = vmatpush.msra.mxu0 %v3459_v1  ;;  %5054 = vmatpush.msra.mxu2 %v3555_v46  ;;  %v3337_v21 = vpop.f32.mrf.mxu3  ;;  %v3771_v51 = vld [vmem:[%s15789_s3 + $0xa88] sm:$0xff]  ;;  %v3885_v20 = vld [vmem:[%s15789_s3 + $0xe18] sm:$0xff] }
 0x363   :  { %4998 = vmatpush.msra.mxu1 %v4586_v50  ;;  %5070 = vmatpush.msrb.mxu3 %v3675_v9  ;;  %v3338_v3 = vadd.f32 %v3337_v21, %v3318_v60  ;;  %v3627_v1 = vld [vmem:[%s15789_s3 + $0x608] sm:$0xff]  ;;  %v3873_v9 = vld [vmem:[%s15789_s3 + $0xdb8] sm:$0xff] }
 0x364   :  { %5035 = vmatpush.msra.mxu0 %v3453_v35  ;;  %5055 = vmatpush.msra.mxu2 %v3549_v47  ;;  %v3879_v46 = vld [vmem:[%s15789_s3 + $0xde8] sm:$0xff]  ;;  %v3969_v35 = vld [vmem:[%s15789_s3 + $0x10b8] sm:$0xff] }
 0x365   :  { %4999 = vmatmul.f32.vlgmr.msra.gmra.mxu1 %v12186_v18  ;;  %5071 = vmatpush.msrb.mxu3 %v3669_v25  ;;  %v3975_v36 = vld [vmem:[%s15789_s3 + $0x10e8] sm:$0xff]  ;;  %v3753_v47 = vld [vmem:[%s15789_s3 + $0x9f8] sm:$0xff] }
 0x366   :  { %5083 = vmatpush.msrb.mxu1 %v3813_v6  ;;  %5036 = vmatpush.msra.mxu0 %v3447_v14  ;;  %v3759_v50 = vld [vmem:[%s15789_s3 + $0xa28] sm:$0xff]  ;;  %v4101_v60 = vld [vmem:[%s15789_s3 + $0x14d8] sm:$0xff] }
 0x367   :  { %5056 = vmatpush.msra.mxu2 %v3543_v24  ;;  %5072 = vmatpush.msrb.mxu3 %v3663_v26  ;;  %v3357_v37 = vpop.f32.mrf.mxu1  ;;  %v3867_v25 = vld [vmem:[%s15789_s3 + $0xd88] sm:$0xff]  ;;  %v3861_v24 = vld [vmem:[%s15789_s3 + $0xd58] sm:$0xff] }
 0x368   :  { %5084 = vmatpush.msrb.mxu1 %v3807_v45  ;;  %5037 = vmatpush.msra.mxu0 %v3441_v58  ;;  %v3358_v23 = vadd.f32 %v3357_v37, %v3338_v3  ;;  %v3963_v21 = vld [vmem:[%s15789_s3 + $0x1088] sm:$0xff]  ;;  %v3957_v3 = vld [vmem:[%s15789_s3 + $0x1058] sm:$0xff] }
 0x369   :  { %5057 = vmatpush.msra.mxu2 %v3537_v27  ;;  %5073 = vmatpush.msrb.mxu3 %v3657_v48  ;;  %v3747_v6 = vld [vmem:[%s15789_s3 + $0x9c8] sm:$0xff]  ;;  %v3741_v26 = vld [vmem:[%s15789_s3 + $0x998] sm:$0xff] }
 0x36a   :  { %5085 = vmatpush.msrb.mxu1 %v3801_v42  ;;  %5038 = vmatpush.msra.mxu0 %v3435_v8  ;;  %v3377_v13 = vpop.f32.mrf.mxu0  ;;  %v4095_v14 = vld [vmem:[%s15789_s3 + $0x14a8] sm:$0xff]  ;;  %v4089_v45 = vld [vmem:[%s15789_s3 + $0x1478] sm:$0xff] }
 0x36b   :  { %5058 = vmatpush.msra.mxu2 %v3531_v31  ;;  %5039 = vmatmul.f32.vlgmr.msra.gmra.mxu0 %v11461_v4  ;;  %v3378_v55 = vadd.f32 %v3377_v13, %v3358_v23  ;;  %v3397_v38 = vpop.f32.mrf.mxu2  ;;  %v3855_v58 = vld [vmem:[%s15789_s3 + $0xd28] sm:$0xff]  ;;  %v3849_v8 = vld [vmem:[%s15789_s3 + $0xcf8] sm:$0xff]  ;;  %v4706_v13 = vld [vmem:[%s15790_s4] sm:$0x3f] }
 0x36c   :  { %5059 = vmatmul.f32.vlgmr.msra.gmra.mxu2 %v11509_v49  ;;  %5086 = vmatpush.msrb.mxu1 %v3795_v30  ;;  %v3951_v27 = vld [vmem:[%s15789_s3 + $0x1028] sm:$0xff]  ;;  %v3945_v37 = vld [vmem:[%s15789_s3 + $0xff8] sm:$0xff] }
 0x36d   :  { %5103 = vmatpush.msrb.mxu0 %v3909_v22  ;;  %5123 = vmatpush.msrb.mxu2 %v4005_v40  ;;  %v3398_v56 = vadd.f32 %v3397_v38, %v3378_v55  ;;  %v3417_v0 = vpop.f32.mrf.mxu3  ;;  %v3735_v48 = vld [vmem:[%s15789_s3 + $0x968] sm:$0xff]  ;;  %v3729_v31 = vld [vmem:[%s15789_s3 + $0x938] sm:$0xff] }
 0x36e   :  { %5087 = vmatpush.msrb.mxu1 %v3789_v33  ;;  %5074 = vmatpush.msrb.mxu3 %v3651_v39  ;;  %v4083_v42 = vld [vmem:[%s15789_s3 + $0x1448] sm:$0xff]  ;;  %v4077_v40 = vld [vmem:[%s15789_s3 + $0x1418] sm:$0xff] }
 0x36f   :  { %5104 = vmatpush.msrb.mxu0 %v3903_v2  ;;  %5124 = vmatpush.msrb.mxu2 %v3999_v10  ;;  %v3418_v52 = vadd.f32 %v3417_v0, %v3398_v56  ;;  %v3843_v23 = vld [vmem:[%s15789_s3 + $0xcc8] sm:$0xff]  ;;  %v3837_v33 = vld [vmem:[%s15789_s3 + $0xc98] sm:$0xff]  ;;  %v4708_v2 = vperm.slane %v4706_v13, 0 }
 0x370   :  { %5088 = vmatpush.msrb.mxu1 %v3783_v54  ;;  %5075 = vmatpush.msrb.mxu3 %v3645_v44  ;;  %v3939_v30 = vld [vmem:[%s15789_s3 + $0xfc8] sm:$0xff]  ;;  %v3933_v55 = vld [vmem:[%s15789_s3 + $0xf98] sm:$0xff] }
 0x371   :  { %5105 = vmatpush.msrb.mxu0 %v3897_v15  ;;  %5125 = vmatpush.msrb.mxu2 %v3993_v61  ;;  %v12293_v7 = vmax.f32 %v3418_v52, 0.0  ;;  %v3723_v22 = vld [vmem:[%s15789_s3 + $0x908] sm:$0xff]  ;;  %v4197_v38 = vld [vmem:[%s15789_s3 + $0x17d8] sm:$0xff] }
 0x372   :  { %5089 = vmatpush.msrb.mxu1 %v3777_v53  ;;  %5076 = vmatpush.msrb.mxu3 %v3639_v32  ;;  %v4071_v39 = vld [vmem:[%s15789_s3 + $0x13e8] sm:$0xff]  ;;  %v4065_v44 = vld [vmem:[%s15789_s3 + $0x13b8] sm:$0xff] }
 0x373   :  { %5106 = vmatpush.msrb.mxu0 %v3891_v41  ;;  %5126 = vmatpush.msrb.mxu2 %v3987_v63  ;;  %v3831_v10 = vld [vmem:[%s15789_s3 + $0xc68] sm:$0xff]  ;;  %v3825_v15 = vld [vmem:[%s15789_s3 + $0xc38] sm:$0xff] }
 0x374   :  { %5090 = vmatpush.msrb.mxu1 %v3771_v51  ;;  %5077 = vmatpush.msrb.mxu3 %v3633_v34  ;;  %v3927_v56 = vld [vmem:[%s15789_s3 + $0xf68] sm:$0xff]  ;;  %v3921_v61 = vld [vmem:[%s15789_s3 + $0xf38] sm:$0xff] }
 0x375   :  { %5107 = vmatpush.msrb.mxu0 %v3885_v20  ;;  %5127 = vmatpush.msrb.mxu2 %v3981_v5  ;;  %v4191_v0 = vld [vmem:[%s15789_s3 + $0x17a8] sm:$0xff]  ;;  %v4185_v41 = vld [vmem:[%s15789_s3 + $0x1778] sm:$0xff] }
 0x376   :  { %5091 = vmatpush.msrb.mxu1 %v3765_v19  ;;  %5078 = vmatpush.msrb.mxu3 %v3627_v1  ;;  %v4059_v53 = vld [vmem:[%s15789_s3 + $0x1388] sm:$0xff]  ;;  %v4293_v5 = vld [vmem:[%s15789_s3 + $0x1ad8] sm:$0xff] }
 0x377   :  { %5108 = vmatpush.msrb.mxu0 %v3879_v46  ;;  %5128 = vmatpush.msrb.mxu2 %v3975_v36  ;;  %v3819_v63 = vld [vmem:[%s15789_s3 + $0xc08] sm:$0xff]  ;;  %v4389_v19 = vld [vmem:[%s15789_s3 + $0x1dd8] sm:$0xff] }
 0x378   :  { %5092 = vmatpush.msrb.mxu1 %v3759_v50  ;;  %6752 = vmatmul.msk.f32.vlgmr.msra.gmra.mxu3 %vm4720_vm2, %v12293_v7  ;;  %v3915_v52 = vld [vmem:[%s15789_s3 + $0xf08] sm:$0xff]  ;;  %v4053_v46 = vld [vmem:[%s15789_s3 + $0x1358] sm:$0xff] }
 0x379   :  { %5109 = vmatpush.msrb.mxu0 %v3873_v9  ;;  %5129 = vmatpush.msrb.mxu2 %v3969_v35  ;;  %v4179_v34 = vld [vmem:[%s15789_s3 + $0x1748] sm:$0xff]  ;;  %v4173_v36 = vld [vmem:[%s15789_s3 + $0x1718] sm:$0xff] }
 0x37a   :  { %5093 = vmatpush.msrb.mxu1 %v3753_v47  ;;  %5143 = vmatpush.msra.mxu3 %v4101_v60  ;;  %v4287_v9 = vld [vmem:[%s15789_s3 + $0x1aa8] sm:$0xff]  ;;  %v4353_v13 = vld [vmem:[%s15789_s3 + $0x1cb8] sm:$0xff] }
 0x37b   :  { %5110 = vmatpush.msrb.mxu0 %v3867_v25  ;;  %5130 = vmatpush.msrb.mxu2 %v3963_v21  ;;  %v4383_v35 = vld [vmem:[%s15789_s3 + $0x1da8] sm:$0xff] }
 0x37c   :  { %5094 = vmatpush.msrb.mxu1 %v3747_v6  ;;  %5144 = vmatpush.msra.mxu3 %v4095_v14  ;;  %v4760_v54 = vpop.f32.mrf.mxu1  ;;  %v4047_v60 = vld [vmem:[%s15789_s3 + $0x1328] sm:$0xff]  ;;  %v4281_v6 = vld [vmem:[%s15789_s3 + $0x1a78] sm:$0xff] }
 0x37d   :  { %5111 = vmatpush.msrb.mxu0 %v3861_v24  ;;  %5131 = vmatpush.msrb.mxu2 %v3957_v3  ;;  %v4761_v32 = vadd.f32 %v4760_v54, %v4708_v2  ;;  %v4167_v25 = vld [vmem:[%s15789_s3 + $0x16e8] sm:$0xff]  ;;  %v4377_v14 = vld [vmem:[%s15789_s3 + $0x1d78] sm:$0xff] }
 0x37e   :  { %5095 = vmatpush.msrb.mxu1 %v3741_v26  ;;  %5145 = vmatpush.msra.mxu3 %v4089_v45  ;;  %v4041_v24 = vld [vmem:[%s15789_s3 + $0x12f8] sm:$0xff]  ;;  %v4275_v26 = vld [vmem:[%s15789_s3 + $0x1a48] sm:$0xff] }
 0x37f   :  { %5112 = vmatpush.msrb.mxu0 %v3855_v58  ;;  %5132 = vmatpush.msrb.mxu2 %v3951_v27  ;;  %v4161_v3 = vld [vmem:[%s15789_s3 + $0x16b8] sm:$0xff]  ;;  %v4371_v45 = vld [vmem:[%s15789_s3 + $0x1d48] sm:$0xff] }
 0x380   :  { %5096 = vmatpush.msrb.mxu1 %v3735_v48  ;;  %5146 = vmatpush.msra.mxu3 %v4083_v42  ;;  %v4035_v58 = vld [vmem:[%s15789_s3 + $0x12c8] sm:$0xff]  ;;  %v4269_v48 = vld [vmem:[%s15789_s3 + $0x1a18] sm:$0xff] }
 0x381   :  { %5113 = vmatpush.msrb.mxu0 %v3849_v8  ;;  %5133 = vmatpush.msrb.mxu2 %v3945_v37  ;;  %v4155_v27 = vld [vmem:[%s15789_s3 + $0x1688] sm:$0xff]  ;;  %v4365_v42 = vld [vmem:[%s15789_s3 + $0x1d18] sm:$0xff] }
 0x382   :  { %5097 = vmatpush.msrb.mxu1 %v3729_v31  ;;  %5079 = vmatmul.f32.vlgmr.msrb.gmra.mxu3 %v11511_v12  ;;  %v4029_v8 = vld [vmem:[%s15789_s3 + $0x1298] sm:$0xff]  ;;  %v4263_v31 = vld [vmem:[%s15789_s3 + $0x19e8] sm:$0xff] }
 0x383   :  { %5114 = vmatpush.msrb.mxu0 %v3843_v23  ;;  %5134 = vmatpush.msrb.mxu2 %v3939_v30  ;;  %v4800_v1 = vpop.f32.mrf.mxu0  ;;  %v4149_v37 = vld [vmem:[%s15789_s3 + $0x1658] sm:$0xff]  ;;  %v4359_v23 = vld [vmem:[%s15789_s3 + $0x1ce8] sm:$0xff] }
 0x384   :  { %5098 = vmatpush.msrb.mxu1 %v3723_v22  ;;  %5147 = vmatpush.msra.mxu3 %v4077_v40  ;;  %v4023_v30 = vld [vmem:[%s15789_s3 + $0x1268] sm:$0xff]  ;;  %v4257_v40 = vld [vmem:[%s15789_s3 + $0x19b8] sm:$0xff] }
 0x385   :  { %5115 = vmatpush.msrb.mxu0 %v3837_v33  ;;  %5135 = vmatpush.msrb.mxu2 %v3933_v55  ;;  %v4143_v22 = vld [vmem:[%s15789_s3 + $0x1628] sm:$0xff]  ;;  %v4017_v33 = vld [vmem:[%s15789_s3 + $0x1238] sm:$0xff] }
 0x386   :  { %5099 = vmatmul.f32.vlgmr.msrb.gmra.mxu1 %v11520_v11  ;;  %5148 = vmatpush.msra.mxu3 %v4071_v39  ;;  %v4137_v55 = vld [vmem:[%s15789_s3 + $0x15f8] sm:$0xff]  ;;  %v4251_v39 = vld [vmem:[%s15789_s3 + $0x1988] sm:$0xff] }
 0x387   :  { %5163 = vmatpush.msra.mxu1 %v4197_v38  ;;  %5116 = vmatpush.msrb.mxu0 %v3831_v10  ;;  %v4347_v38 = vld [vmem:[%s15789_s3 + $0x1c88] sm:$0xff]  ;;  %v4245_v54 = vld [vmem:[%s15789_s3 + $0x1958] sm:$0xff] }
 0x388   :  { %5136 = vmatpush.msrb.mxu2 %v3927_v56  ;;  %5149 = vmatpush.msra.mxu3 %v4065_v44  ;;  %v4011_v2 = vld [vmem:[%s15789_s3 + $0x1208] sm:$0xff]  ;;  %v4341_v56 = vld [vmem:[%s15789_s3 + $0x1c58] sm:$0xff] }
 0x389   :  { %5164 = vmatpush.msra.mxu1 %v4191_v0  ;;  %5117 = vmatpush.msrb.mxu0 %v3825_v15  ;;  %v4780_v51 = vpop.f32.mrf.mxu3  ;;  %v4131_v10 = vld [vmem:[%s15789_s3 + $0x15c8] sm:$0xff]  ;;  %v4125_v44 = vld [vmem:[%s15789_s3 + $0x1598] sm:$0xff] }
 0x38a   :  { %5137 = vmatpush.msrb.mxu2 %v3921_v61  ;;  %5150 = vmatpush.msra.mxu3 %v4059_v53  ;;  %v4781_v20 = vadd.f32 %v4780_v51, %v4761_v32  ;;  %v4820_v47 = vpop.f32.mrf.mxu2  ;;  %v4485_v0 = vld [vmem:[%s15789_s3 + $0x20d8] sm:$0xff]  ;;  %v4239_v15 = vld [vmem:[%s15789_s3 + $0x1928] sm:$0xff] }
 0x38b   :  { %5165 = vmatpush.msra.mxu1 %v4185_v41  ;;  %5118 = vmatpush.msrb.mxu0 %v3819_v63  ;;  %v4335_v61 = vld [vmem:[%s15789_s3 + $0x1c28] sm:$0xff]  ;;  %v4233_v63 = vld [vmem:[%s15789_s3 + $0x18f8] sm:$0xff] }
 0x38c   :  { %5138 = vmatpush.msrb.mxu2 %v3915_v52  ;;  %5119 = vmatmul.f32.vlgmr.msrb.gmra.mxu0 %v11729_v57  ;;  %v4801_v50 = vadd.f32 %v4800_v1, %v4781_v20  ;;  %v4119_v53 = vld [vmem:[%s15789_s3 + $0x1568] sm:$0xff]  ;;  %v4329_v51 = vld [vmem:[%s15789_s3 + $0x1bf8] sm:$0xff] }
 0x38d   :  { %5139 = vmatmul.f32.vlgmr.msrb.gmra.mxu2 %v11782_v28  ;;  %5166 = vmatpush.msra.mxu1 %v4179_v34  ;;  %v4479_v41 = vld [vmem:[%s15789_s3 + $0x20a8] sm:$0xff]  ;;  %v4113_v34 = vld [vmem:[%s15789_s3 + $0x1538] sm:$0xff] }
 0x38e   :  { %5183 = vmatpush.msra.mxu0 %v4293_v5  ;;  %5203 = vmatpush.msra.mxu2 %v4389_v19  ;;  %v12445_v21 = vadd.f32 %v4820_v47, %v4801_v50  ;;  %v4473_v20 = vld [vmem:[%s15789_s3 + $0x2078] sm:$0xff]  ;;  %v4227_v5 = vld [vmem:[%s15789_s3 + $0x18c8] sm:$0xff] }
 0x38f   :  { %5151 = vmatpush.msra.mxu3 %v4053_v46  ;;  %5167 = vmatpush.msra.mxu1 %v4173_v36  ;;  %v4323_v19 = vld [vmem:[%s15789_s3 + $0x1bc8] sm:$0xff]  ;;  %v4221_v36 = vld [vmem:[%s15789_s3 + $0x1898] sm:$0xff] }
 0x390   :  { %5184 = vmatpush.msra.mxu0 %v4287_v9  ;;  %5204 = vmatpush.msra.mxu2 %v4383_v35  ;;  %v4107_v1 = vld [vmem:[%s15789_s3 + $0x1508] sm:$0xff]  ;;  %v4317_v50 = vld [vmem:[%s15789_s3 + $0x1b98] sm:$0xff] }
 0x391   :  { %5152 = vmatpush.msra.mxu3 %v4047_v60  ;;  %5168 = vmatpush.msra.mxu1 %v4167_v25  ;;  %v4467_v46 = vld [vmem:[%s15789_s3 + $0x2048] sm:$0xff]  ;;  %v4461_v9 = vld [vmem:[%s15789_s3 + $0x2018] sm:$0xff] }
 0x392   :  { %5185 = vmatpush.msra.mxu0 %v4281_v6  ;;  %5205 = vmatpush.msra.mxu2 %v4377_v14  ;;  %v4581_v35 = vld [vmem:[%s15789_s3 + $0x23d8] sm:$0xff]  ;;  %v4215_v47 = vld [vmem:[%s15789_s3 + $0x1868] sm:$0xff] }
 0x393   :  { %5153 = vmatpush.msra.mxu3 %v4041_v24  ;;  %5169 = vmatpush.msra.mxu1 %v4161_v3  ;;  %v4311_v60 = vld [vmem:[%s15789_s3 + $0x1b68] sm:$0xff]  ;;  %v4209_v6 = vld [vmem:[%s15789_s3 + $0x1838] sm:$0xff] }
 0x394   :  { %5186 = vmatpush.msra.mxu0 %v4275_v26  ;;  %5206 = vmatpush.msra.mxu2 %v4371_v45  ;;  %v4455_v25 = vld [vmem:[%s15789_s3 + $0x1fe8] sm:$0xff]  ;;  %v4305_v14 = vld [vmem:[%s15789_s3 + $0x1b38] sm:$0xff] }
 0x395   :  { %5154 = vmatpush.msra.mxu3 %v4035_v58  ;;  %5170 = vmatpush.msra.mxu1 %v4155_v27  ;;  %v4449_v24 = vld [vmem:[%s15789_s3 + $0x1fb8] sm:$0xff]  ;;  %v4203_v26 = vld [vmem:[%s15789_s3 + $0x1808] sm:$0xff] }
 0x396   :  { %5187 = vmatpush.msra.mxu0 %v4269_v48  ;;  %5207 = vmatpush.msra.mxu2 %v4365_v42  ;;  %v4569_v3 = vld [vmem:[%s15789_s3 + $0x2378] sm:$0xff]  ;;  %v4299_v45 = vld [vmem:[%s15789_s3 + $0x1b08] sm:$0xff] }
 0x397   :  { %5155 = vmatpush.msra.mxu3 %v4029_v8  ;;  %5171 = vmatpush.msra.mxu1 %v4149_v37  ;;  %v4443_v27 = vld [vmem:[%s15789_s3 + $0x1f88] sm:$0xff]  ;;  %v4677_v8 = vld [vmem:[%s15789_s3 + $0x26d8] sm:$0xff] }
 0x398   :  { %5188 = vmatpush.msra.mxu0 %v4263_v31  ;;  %5208 = vmatpush.msra.mxu2 %v4359_v23  ;;  %v4563_v48 = vld [vmem:[%s15789_s3 + $0x2348] sm:$0xff]  ;;  %v4701_v37 = vld [vmem:[%s15789_s3 + $0x2798] sm:$0x3] }
 0x399   :  { %5156 = vmatpush.msra.mxu3 %v4023_v30  ;;  %5172 = vmatpush.msra.mxu1 %v4143_v22  ;;  %v4437_v23 = vld [vmem:[%s15789_s3 + $0x1f58] sm:$0xff] }
 0x39a   :  { %5189 = vmatpush.msra.mxu0 %v4257_v40  ;;  %5209 = vmatpush.msra.mxu2 %v4353_v13  ;;  %v4557_v30 = vld [vmem:[%s15789_s3 + $0x2318] sm:$0xff]  ;;  %v4671_v40 = vld [vmem:[%s15789_s3 + $0x26a8] sm:$0xff] }
 0x39b   :  { %5157 = vmatpush.msra.mxu3 %v4017_v33  ;;  %5173 = vmatpush.msra.mxu1 %v4137_v55  ;;  %v4695_v13 = vld [vmem:[%s15789_s3 + $0x2768] sm:$0xff] }
 0x39c   :  { %5190 = vmatpush.msra.mxu0 %v4251_v39  ;;  %5210 = vmatpush.msra.mxu2 %v4347_v38  ;;  %v4431_v55 = vld [vmem:[%s15789_s3 + $0x1f28] sm:$0xff] }
 0x39d   :  { %5158 = vmatpush.msra.mxu3 %v4011_v2  ;;  %5174 = vmatpush.msra.mxu1 %v4131_v10  ;;  %v4551_v39 = vld [vmem:[%s15789_s3 + $0x22e8] sm:$0xff]  ;;  %v4665_v2 = vld [vmem:[%s15789_s3 + $0x2678] sm:$0xff] }
 0x39e   :  { %5191 = vmatpush.msra.mxu0 %v4245_v54  ;;  %5211 = vmatpush.msra.mxu2 %v4341_v56  ;;  %v4840_v32 = vpop.f32.mrf.mxu1  ;;  %v4689_v10 = vld [vmem:[%s15789_s3 + $0x2738] sm:$0xff] }
 0x39f   :  { %5159 = vmatmul.f32.vlgmr.msra.gmra.mxu3 %v11784_v29  ;;  %5175 = vmatpush.msra.mxu1 %v4125_v44  ;;  %v4841_v52 = vadd.f32 %v4840_v32, %v12445_v21  ;;  %v4575_v21 = vld [vmem:[%s15789_s3 + $0x23a8] sm:$0xff]  ;;  %v4425_v54 = vld [vmem:[%s15789_s3 + $0x1ef8] sm:$0xff] }
 0x3a0   :  { %5223 = vmatpush.msrb.mxu3 %v4485_v0  ;;  %5192 = vmatpush.msra.mxu0 %v4239_v15  ;;  %v4545_v56 = vld [vmem:[%s15789_s3 + $0x22b8] sm:$0xff]  ;;  %v4659_v44 = vld [vmem:[%s15789_s3 + $0x2648] sm:$0xff]  ;;  %v3622_v15 = vld [vmem:[%s15789_s3 + $0x5e0] sm:$0xff] }
 0x3a1   :  { %5212 = vmatpush.msra.mxu2 %v4335_v61  ;;  %5176 = vmatpush.msra.mxu1 %v4119_v53  ;;  %v4683_v0 = vld [vmem:[%s15789_s3 + $0x2708] sm:$0xff]  ;;  %v4653_v32 = vld [vmem:[%s15789_s3 + $0x2618] sm:$0xff] }
 0x3a2   :  { %5224 = vmatpush.msrb.mxu3 %v4479_v41  ;;  %5193 = vmatpush.msra.mxu0 %v4233_v63  ;;  %v4419_v61 = vld [vmem:[%s15789_s3 + $0x1ec8] sm:$0xff]  ;;  %v4413_v41 = vld [vmem:[%s15789_s3 + $0x1e98] sm:$0xff]  ;;  %v3616_v63 = vld [vmem:[%s15789_s3 + $0x5b0] sm:$0xff] }
 0x3a3   :  { %5213 = vmatpush.msra.mxu2 %v4329_v51  ;;  %5177 = vmatpush.msra.mxu1 %v4113_v34  ;;  %v4539_v53 = vld [vmem:[%s15789_s3 + $0x2288] sm:$0xff] }
 0x3a4   :  { %5225 = vmatpush.msrb.mxu3 %v4473_v20  ;;  %5194 = vmatpush.msra.mxu0 %v4227_v5  ;;  %v4647_v51 = vld [vmem:[%s15789_s3 + $0x25e8] sm:$0xff]  ;;  %v3610_v20 = vld [vmem:[%s15789_s3 + $0x580] sm:$0xff] }
 0x3a5   :  { %5214 = vmatpush.msra.mxu2 %v4323_v19  ;;  %5178 = vmatpush.msra.mxu1 %v4107_v1  ;;  %v4880_v31 = vpop.f32.mrf.mxu0  ;;  %v4407_v34 = vld [vmem:[%s15789_s3 + $0x1e68] sm:$0xff]  ;;  %v4641_v19 = vld [vmem:[%s15789_s3 + $0x25b8] sm:$0xff] }
 0x3a6   :  { %5226 = vmatpush.msrb.mxu3 %v4467_v46  ;;  %5195 = vmatpush.msra.mxu0 %v4221_v36  ;;  %v4527_v5 = vld [vmem:[%s15789_s3 + $0x2228] sm:$0xff]  ;;  %v4401_v1 = vld [vmem:[%s15789_s3 + $0x1e38] sm:$0xff]  ;;  %v3604_v46 = vld [vmem:[%s15789_s3 + $0x550] sm:$0xff] }
 0x3a7   :  { %5215 = vmatpush.msra.mxu2 %v4317_v50  ;;  %5179 = vmatmul.f32.vlgmr.msra.gmra.mxu1 %v11793_v62  ;;  %v4521_v36 = vld [vmem:[%s15789_s3 + $0x21f8] sm:$0xff]  ;;  %v4635_v50 = vld [vmem:[%s15789_s3 + $0x2588] sm:$0xff] }
 0x3a8   :  { %5227 = vmatpush.msrb.mxu3 %v4461_v9  ;;  %5243 = vmatpush.msrb.mxu1 %v4581_v35  ;;  %v4395_v9 = vld [vmem:[%s15789_s3 + $0x1e08] sm:$0xff]  ;;  %v3598_v35 = vld [vmem:[%s15789_s3 + $0x520] sm:$0xff] }
 0x3a9   :  { %5196 = vmatpush.msra.mxu0 %v4215_v47  ;;  %5216 = vmatpush.msra.mxu2 %v4311_v60  ;;  %v4515_v47 = vld [vmem:[%s15789_s3 + $0x21c8] sm:$0xff]  ;;  %v4629_v60 = vld [vmem:[%s15789_s3 + $0x2558] sm:$0xff] }
 0x3aa   :  { %5228 = vmatpush.msrb.mxu3 %v4455_v25  ;;  %5244 = vmatpush.msrb.mxu1 %v4575_v21  ;;  %v3526_v25 = vld [vmem:[%s15789_s3 + $0x2e0] sm:$0xff]  ;;  %v3592_v21 = vld [vmem:[%s15789_s3 + $0x4f0] sm:$0xff] }
 0x3ab   :  { %5197 = vmatpush.msra.mxu0 %v4209_v6  ;;  %5217 = vmatpush.msra.mxu2 %v4305_v14  ;;  %v4860_v58 = vpop.f32.mrf.mxu3  ;;  %v4509_v6 = vld [vmem:[%s15789_s3 + $0x2198] sm:$0xff]  ;;  %v4623_v14 = vld [vmem:[%s15789_s3 + $0x2528] sm:$0xff] }
 0x3ac   :  { %5229 = vmatpush.msrb.mxu3 %v4449_v24  ;;  %5245 = vmatpush.msrb.mxu1 %v4569_v3  ;;  %v4861_v42 = vadd.f32 %v4860_v58, %v4841_v52  ;;  %v4900_v33 = vpop.f32.mrf.mxu2  ;;  %v4533_v52 = vld [vmem:[%s15789_s3 + $0x2258] sm:$0xff]  ;;  %v3520_v3 = vld [vmem:[%s15789_s3 + $0x2b0] sm:$0xff]  ;;  %v4503_v58 = vld [vmem:[%s15789_s3 + $0x2168] sm:$0xff] }
 0x3ad   :  { %5198 = vmatpush.msra.mxu0 %v4203_v26  ;;  %5218 = vmatpush.msra.mxu2 %v4299_v45  ;;  %v3586_v26 = vld [vmem:[%s15789_s3 + $0x4c0] sm:$0xff] }
 0x3ae   :  { %5199 = vmatmul.f32.vlgmr.msra.gmra.mxu0 %v11977_v17  ;;  %5219 = vmatmul.f32.vlgmr.msra.gmra.mxu2 %v12019_v59  ;;  %v4881_v22 = vadd.f32 %v4880_v31, %v4861_v42  ;;  %v3580_v42 = vld [vmem:[%s15789_s3 + $0x490] sm:$0xff] }
 0x3af   :  { %5230 = vmatpush.msrb.mxu3 %v4443_v27  ;;  %5246 = vmatpush.msrb.mxu1 %v4563_v48  ;;  %v4617_v27 = vld [vmem:[%s15789_s3 + $0x24f8] sm:$0xff]  ;;  %v3514_v48 = vld [vmem:[%s15789_s3 + $0x280] sm:$0xff]  ;;  %v3508_v31 = vld [vmem:[%s15789_s3 + $0x250] sm:$0xff] }
 0x3b0   :  { %5263 = vmatpush.msrb.mxu0 %v4677_v8  ;;  %6753 = vmatpush.msk.msrb.mxu2 %vm4724_vm1, %v4701_v37  ;;  %v12645_v38 = vadd.f32 %v4900_v33, %v4881_v22  ;;  %v4497_v8 = vld [vmem:[%s15789_s3 + $0x2138] sm:$0xff]  ;;  %v4611_v37 = vld [vmem:[%s15789_s3 + $0x24c8] sm:$0xff]  ;;  %v3718_v33 = vld [vmem:[%s15789_s3 + $0x8e0] sm:$0xff] }
 0x3b1   :  { %5231 = vmatpush.msrb.mxu3 %v4437_v23  ;;  %5247 = vmatpush.msrb.mxu1 %v4557_v30  ;;  %v3574_v23 = vld [vmem:[%s15789_s3 + $0x460] sm:$0xff]  ;;  %v4491_v30 = vld [vmem:[%s15789_s3 + $0x2108] sm:$0xff]  ;;  %v4605_v22 = vld [vmem:[%s15789_s3 + $0x2498] sm:$0xff] }
 0x3b2   :  { %5264 = vmatpush.msrb.mxu0 %v4671_v40  ;;  %5296 = vmatpush.msrb.mxu2 %v4695_v13  ;;  %v3502_v40 = vld [vmem:[%s15789_s3 + $0x220] sm:$0xff]  ;;  %v3568_v13 = vld [vmem:[%s15789_s3 + $0x430] sm:$0xff] }
 0x3b3   :  { %5232 = vmatpush.msrb.mxu3 %v4431_v55  ;;  %5248 = vmatpush.msrb.mxu1 %v4551_v39  ;;  %v4599_v55 = vld [vmem:[%s15789_s3 + $0x2468] sm:$0xff]  ;;  %v3496_v39 = vld [vmem:[%s15789_s3 + $0x1f0] sm:$0xff] }
 0x3b4   :  { %5265 = vmatpush.msrb.mxu0 %v4665_v2  ;;  %5297 = vmatpush.msrb.mxu2 %v4689_v10  ;;  %v3712_v2 = vld [vmem:[%s15789_s3 + $0x8b0] sm:$0xff]  ;;  %v4593_v10 = vld [vmem:[%s15789_s3 + $0x2438] sm:$0xff] }
 0x3b5   :  { %5233 = vmatpush.msrb.mxu3 %v4425_v54  ;;  %5249 = vmatpush.msrb.mxu1 %v4545_v56  ;;  %v3490_v54 = vld [vmem:[%s15789_s3 + $0x1c0] sm:$0xff]  ;;  %v3556_v56 = vld [vmem:[%s15789_s3 + $0x3d0] sm:$0xff] }
 0x3b6   :  { %5266 = vmatpush.msrb.mxu0 %v4659_v44  ;;  %5298 = vmatpush.msrb.mxu2 %v4683_v0  ;;  %v3706_v44 = vld [vmem:[%s15789_s3 + $0x880] sm:$0xff]  ;;  %v4587_v0 = vld [vmem:[%s15789_s3 + $0x2408] sm:$0xff] }
 0x3b7   :  { %5234 = vmatpush.msrb.mxu3 %v4419_v61  ;;  %5250 = vmatpush.msrb.mxu1 %v4539_v53  ;;  %v3550_v53 = vld [vmem:[%s15789_s3 + $0x3a0] sm:$0xff] }
 0x3b8   :  { %5323 = vmatpush.msra.mxu2 %v3622_v15  ;;  %5267 = vmatpush.msrb.mxu0 %v4653_v32  ;;  %v3484_v15 = vld [vmem:[%s15789_s3 + $0x190] sm:$0xff] }
 0x3b9   :  { %6754 = vmatmul.msk.f32.vlgmr.msrb.gmra.mxu2 %vm4720_vm2, %v12293_v7  ;;  %5235 = vmatpush.msrb.mxu3 %v4413_v41  ;;  %v3700_v41 = vld [vmem:[%s15789_s3 + $0x850] sm:$0xff] }
 0x3ba   :  { %5324 = vmatpush.msra.mxu2 %v3616_v63  ;;  %5251 = vmatpush.msrb.mxu1 %v4533_v52  ;;  %v3814_v63 = vld [vmem:[%s15789_s3 + $0xbe0] sm:$0xff] }
 0x3bb   :  { %5268 = vmatpush.msrb.mxu0 %v4647_v51  ;;  %5236 = vmatpush.msrb.mxu3 %v4407_v34  ;;  %v3478_v51 = vld [vmem:[%s15789_s3 + $0x160] sm:$0xff]  ;;  %v3544_v34 = vld [vmem:[%s15789_s3 + $0x370] sm:$0xff] }
 0x3bc   :  { %5325 = vmatpush.msra.mxu2 %v3610_v20  ;;  %5252 = vmatpush.msrb.mxu1 %v4527_v5  ;;  %v3694_v5 = vld [vmem:[%s15789_s3 + $0x820] sm:$0xff] }
 0x3bd   :  { %5269 = vmatpush.msrb.mxu0 %v4641_v19  ;;  %5237 = vmatpush.msrb.mxu3 %v4401_v1  ;;  %v3808_v19 = vld [vmem:[%s15789_s3 + $0xbb0] sm:$0xff] }
 0x3be   :  { %5326 = vmatpush.msra.mxu2 %v3604_v46  ;;  %5253 = vmatpush.msrb.mxu1 %v4521_v36  ;;  %v3472_v46 = vld [vmem:[%s15789_s3 + $0x130] sm:$0xff]  ;;  %v3538_v36 = vld [vmem:[%s15789_s3 + $0x340] sm:$0xff] }
 0x3bf   :  { %5270 = vmatpush.msrb.mxu0 %v4635_v50  ;;  %5238 = vmatpush.msrb.mxu3 %v4395_v9  ;;  %v3688_v9 = vld [vmem:[%s15789_s3 + $0x7f0] sm:$0xff] }
 0x3c0   :  { %5327 = vmatpush.msra.mxu2 %v3598_v35  ;;  %5254 = vmatpush.msrb.mxu1 %v4515_v47  ;;  %v4920_v24 = vpop.f32.mrf.mxu1  ;;  %v3802_v35 = vld [vmem:[%s15789_s3 + $0xb80] sm:$0xff] }
 0x3c1   :  { %5271 = vmatpush.msrb.mxu0 %v4629_v60  ;;  %5239 = vmatmul.f32.vlgmr.msrb.gmra.mxu3 %v12021_v43  ;;  %v4921_v45 = vadd.f32 %v4920_v24, %v12645_v38  ;;  %v3562_v38 = vld [vmem:[%s15789_s3 + $0x400] sm:$0xff]  ;;  %v3532_v60 = vld [vmem:[%s15789_s3 + $0x310] sm:$0xff] }
 0x3c2   :  { %5303 = vmatpush.msra.mxu3 %v3526_v25  ;;  %5328 = vmatpush.msra.mxu2 %v3592_v21  ;;  %v3466_v47 = vld [vmem:[%s15789_s3 + $0x100] sm:$0xff]  ;;  %v3796_v21 = vld [vmem:[%s15789_s3 + $0xb50] sm:$0xff] }
 0x3c3   :  { %5255 = vmatpush.msrb.mxu1 %v4509_v6  ;;  %5272 = vmatpush.msrb.mxu0 %v4623_v14  ;;  %v3682_v25 = vld [vmem:[%s15789_s3 + $0x7c0] sm:$0xff]  ;;  %v3460_v6 = vld [vmem:[%s15789_s3 + $0xd0] sm:$0xff] }
 0x3c4   :  { %5304 = vmatpush.msra.mxu3 %v3520_v3  ;;  %5329 = vmatpush.msra.mxu2 %v3586_v26  ;;  %v4006_v14 = vld [vmem:[%s15789_s3 + $0x11e0] sm:$0xff]  ;;  %v3676_v24 = vld [vmem:[%s15789_s3 + $0x790] sm:$0xff] }
 0x3c5   :  { %5256 = vmatpush.msrb.mxu1 %v4503_v58  ;;  %5273 = vmatpush.msrb.mxu0 %v4617_v27  ;;  %v3790_v3 = vld [vmem:[%s15789_s3 + $0xb20] sm:$0xff]  ;;  %v3784_v27 = vld [vmem:[%s15789_s3 + $0xaf0] sm:$0xff] }
 0x3c6   :  { %5305 = vmatpush.msra.mxu3 %v3514_v48  ;;  %5330 = vmatpush.msra.mxu2 %v3580_v42  ;;  %v3454_v26 = vld [vmem:[%s15789_s3 + $0xa0] sm:$0xff]  ;;  %v3448_v48 = vld [vmem:[%s15789_s3 + $0x70] sm:$0xff] }
 0x3c7   :  { %5257 = vmatpush.msrb.mxu1 %v4497_v8  ;;  %5274 = vmatpush.msrb.mxu0 %v4611_v37  ;;  %v4960_v52 = vpop.f32.mrf.mxu0  ;;  %v3670_v58 = vld [vmem:[%s15789_s3 + $0x760] sm:$0xff]  ;;  %v3664_v8 = vld [vmem:[%s15789_s3 + $0x730] sm:$0xff] }
 0x3c8   :  { %5306 = vmatpush.msra.mxu3 %v3508_v31  ;;  %5331 = vmatpush.msra.mxu2 %v3574_v23  ;;  %v3994_v42 = vld [vmem:[%s15789_s3 + $0x1180] sm:$0xff]  ;;  %v3988_v23 = vld [vmem:[%s15789_s3 + $0x1150] sm:$0xff] }
 0x3c9   :  { %5258 = vmatpush.msrb.mxu1 %v4491_v30  ;;  %5275 = vmatpush.msrb.mxu0 %v4605_v22  ;;  %v3778_v37 = vld [vmem:[%s15789_s3 + $0xac0] sm:$0xff]  ;;  %v3772_v22 = vld [vmem:[%s15789_s3 + $0xa90] sm:$0xff] }
 0x3ca   :  { %5259 = vmatmul.f32.vlgmr.msrb.gmra.mxu1 %v12026_v16  ;;  %5307 = vmatpush.msra.mxu3 %v3502_v40  ;;  %v3442_v31 = vld [vmem:[%s15789_s3 + $0x40] sm:$0xff]  ;;  %v3436_v40 = vld [vmem:[%s15789_s3 + $0x10] sm:$0xff] }
 0x3cb   :  { %5332 = vmatpush.msra.mxu2 %v3568_v13  ;;  %5343 = vmatpush.msra.mxu1 %v3718_v33  ;;  %v3658_v30 = vld [vmem:[%s15789_s3 + $0x700] sm:$0xff]  ;;  %v3652_v33 = vld [vmem:[%s15789_s3 + $0x6d0] sm:$0xff] }
 0x3cc   :  { %5276 = vmatpush.msrb.mxu0 %v4599_v55  ;;  %5308 = vmatpush.msra.mxu3 %v3496_v39  ;;  %v3982_v13 = vld [vmem:[%s15789_s3 + $0x1120] sm:$0xff] }
 0x3cd   :  { %5333 = vmatpush.msra.mxu2 %v3562_v38  ;;  %5344 = vmatpush.msra.mxu1 %v3712_v2  ;;  %v4940_v61 = vpop.f32.mrf.mxu3  ;;  %v3766_v55 = vld [vmem:[%s15789_s3 + $0xa60] sm:$0xff]  ;;  %v3976_v38 = vld [vmem:[%s15789_s3 + $0x10f0] sm:$0xff] }
 0x3ce   :  { %5277 = vmatpush.msrb.mxu0 %v4593_v10  ;;  %5309 = vmatpush.msra.mxu3 %v3490_v54  ;;  %v4941_v32 = vadd.f32 %v4940_v61, %v4921_v45  ;;  %v4980_v1 = vpop.f32.mrf.mxu2  ;;  %v4000_v45 = vld [vmem:[%s15789_s3 + $0x11b0] sm:$0xff]  ;;  %v3910_v39 = vld [vmem:[%s15789_s3 + $0xee0] sm:$0xff] }
 0x3cf   :  { %5334 = vmatpush.msra.mxu2 %v3556_v56  ;;  %5345 = vmatpush.msra.mxu1 %v3706_v44  ;;  %v3646_v2 = vld [vmem:[%s15789_s3 + $0x6a0] sm:$0xff]  ;;  %v3760_v10 = vld [vmem:[%s15789_s3 + $0xa30] sm:$0xff] }
 0x3d0   :  { %5278 = vmatpush.msrb.mxu0 %v4587_v0  ;;  %5310 = vmatpush.msra.mxu3 %v3484_v15  ;;  %v4961_v20 = vadd.f32 %v4960_v52, %v4941_v32  ;;  %v3904_v56 = vld [vmem:[%s15789_s3 + $0xeb0] sm:$0xff]  ;;  %v3970_v44 = vld [vmem:[%s15789_s3 + $0x10c0] sm:$0xff] }
 0x3d1   :  { %5279 = vmatmul.f32.vlgmr.msrb.gmra.mxu0 %v12186_v18  ;;  %5335 = vmatpush.msra.mxu2 %v3550_v53  ;;  %v3640_v15 = vld [vmem:[%s15789_s3 + $0x670] sm:$0xff]  ;;  %v3754_v61 = vld [vmem:[%s15789_s3 + $0xa00] sm:$0xff] }
 0x3d2   :  { %5346 = vmatpush.msra.mxu1 %v3700_v41  ;;  %5363 = vmatpush.msra.mxu0 %v3814_v63  ;;  %v12845_v50 = vadd.f32 %v4980_v1, %v4961_v20  ;;  %v3898_v53 = vld [vmem:[%s15789_s3 + $0xe80] sm:$0xff]  ;;  %v3964_v32 = vld [vmem:[%s15789_s3 + $0x1090] sm:$0xff] }
 0x3d3   :  { %5311 = vmatpush.msra.mxu3 %v3478_v51  ;;  %5336 = vmatpush.msra.mxu2 %v3544_v34  ;;  %v3634_v41 = vld [vmem:[%s15789_s3 + $0x640] sm:$0xff]  ;;  %v3748_v63 = vld [vmem:[%s15789_s3 + $0x9d0] sm:$0xff] }
 0x3d4   :  { %5347 = vmatpush.msra.mxu1 %v3694_v5  ;;  %5364 = vmatpush.msra.mxu0 %v3808_v19  ;;  %v3892_v52 = vld [vmem:[%s15789_s3 + $0xe50] sm:$0xff]  ;;  %v3958_v51 = vld [vmem:[%s15789_s3 + $0x1060] sm:$0xff] }
 0x3d5   :  { %5312 = vmatpush.msra.mxu3 %v3472_v46  ;;  %5337 = vmatpush.msra.mxu2 %v3538_v36  ;;  %v3628_v34 = vld [vmem:[%s15789_s3 + $0x610] sm:$0xff]  ;;  %v3742_v20 = vld [vmem:[%s15789_s3 + $0x9a0] sm:$0xff] }
 0x3d6   :  { %5348 = vmatpush.msra.mxu1 %v3688_v9  ;;  %5365 = vmatpush.msra.mxu0 %v3802_v35  ;;  %v3886_v5 = vld [vmem:[%s15789_s3 + $0xe20] sm:$0xff]  ;;  %v3952_v19 = vld [vmem:[%s15789_s3 + $0x1030] sm:$0xff] }
 0x3d7   :  { %5313 = vmatpush.msra.mxu3 %v3466_v47  ;;  %5338 = vmatpush.msra.mxu2 %v3532_v60  ;;  %v4102_v1 = vld [vmem:[%s15789_s3 + $0x14e0] sm:$0xff]  ;;  %v3736_v46 = vld [vmem:[%s15789_s3 + $0x970] sm:$0xff] }
 0x3d8   :  { %5349 = vmatpush.msra.mxu1 %v3682_v25  ;;  %5366 = vmatpush.msra.mxu0 %v3796_v21  ;;  %v3880_v36 = vld [vmem:[%s15789_s3 + $0xdf0] sm:$0xff]  ;;  %v3730_v35 = vld [vmem:[%s15789_s3 + $0x940] sm:$0xff] }
 0x3d9   :  { %5339 = vmatmul.f32.vlgmr.msra.gmra.mxu2 %v11509_v49  ;;  %5314 = vmatpush.msra.mxu3 %v3460_v6  ;;  %v4096_v9 = vld [vmem:[%s15789_s3 + $0x14b0] sm:$0xff]  ;;  %v3874_v47 = vld [vmem:[%s15789_s3 + $0xdc0] sm:$0xff] }
 0x3da   :  { %5403 = vmatpush.msrb.mxu2 %v4006_v14  ;;  %5350 = vmatpush.msra.mxu1 %v3676_v24  ;;  %v3940_v60 = vld [vmem:[%s15789_s3 + $0xfd0] sm:$0xff]  ;;  %v4090_v25 = vld [vmem:[%s15789_s3 + $0x1480] sm:$0xff] }
 0x3db   :  { %5367 = vmatpush.msra.mxu0 %v3790_v3  ;;  %5315 = vmatpush.msra.mxu3 %v3454_v26  ;;  %v3724_v21 = vld [vmem:[%s15789_s3 + $0x910] sm:$0xff]  ;;  %v3934_v14 = vld [vmem:[%s15789_s3 + $0xfa0] sm:$0xff] }
 0x3dc   :  { %5404 = vmatpush.msrb.mxu2 %v4000_v45  ;;  %5351 = vmatpush.msra.mxu1 %v3670_v58  ;;  %v3868_v6 = vld [vmem:[%s15789_s3 + $0xd90] sm:$0xff]  ;;  %v4198_v3 = vld [vmem:[%s15789_s3 + $0x17e0] sm:$0xff] }
 0x3dd   :  { %5368 = vmatpush.msra.mxu0 %v3784_v27  ;;  %5316 = vmatpush.msra.mxu3 %v3448_v48  ;;  %v4084_v24 = vld [vmem:[%s15789_s3 + $0x1450] sm:$0xff]  ;;  %v3862_v26 = vld [vmem:[%s15789_s3 + $0xd60] sm:$0xff] }
 0x3de   :  { %5405 = vmatpush.msrb.mxu2 %v3994_v42  ;;  %5352 = vmatpush.msra.mxu1 %v3664_v8  ;;  %v3928_v45 = vld [vmem:[%s15789_s3 + $0xf70] sm:$0xff]  ;;  %v4078_v58 = vld [vmem:[%s15789_s3 + $0x1420] sm:$0xff] }
 0x3df   :  { %5369 = vmatpush.msra.mxu0 %v3778_v37  ;;  %5317 = vmatpush.msra.mxu3 %v3442_v31  ;;  %v4192_v27 = vld [vmem:[%s15789_s3 + $0x17b0] sm:$0xff]  ;;  %v3922_v42 = vld [vmem:[%s15789_s3 + $0xf40] sm:$0xff] }
 0x3e0   :  { %5406 = vmatpush.msrb.mxu2 %v3988_v23  ;;  %5353 = vmatpush.msra.mxu1 %v3658_v30  ;;  %v3856_v48 = vld [vmem:[%s15789_s3 + $0xd30] sm:$0xff]  ;;  %v4186_v37 = vld [vmem:[%s15789_s3 + $0x1780] sm:$0xff] }
 0x3e1   :  { %5370 = vmatpush.msra.mxu0 %v3772_v22  ;;  %5318 = vmatpush.msra.mxu3 %v3436_v40  ;;  %v4072_v8 = vld [vmem:[%s15789_s3 + $0x13f0] sm:$0xff]  ;;  %v3850_v31 = vld [vmem:[%s15789_s3 + $0xd00] sm:$0xff] }
 0x3e2   :  { %5407 = vmatpush.msrb.mxu2 %v3982_v13  ;;  %5354 = vmatpush.msra.mxu1 %v3652_v33  ;;  %v5000_v54 = vpop.f32.mrf.mxu1  ;;  %v3916_v23 = vld [vmem:[%s15789_s3 + $0xf10] sm:$0xff]  ;;  %v4066_v30 = vld [vmem:[%s15789_s3 + $0x13c0] sm:$0xff] }
 0x3e3   :  { %5371 = vmatpush.msra.mxu0 %v3766_v55  ;;  %5319 = vmatmul.f32.vlgmr.msra.gmra.mxu3 %v11461_v4  ;;  %v12946_v0 = vadd.f32 %v5000_v54, %v12845_v50  ;;  %v3946_v50 = vld [vmem:[%s15789_s3 + $0x1000] sm:$0xff]  ;;  %v4180_v22 = vld [vmem:[%s15789_s3 + $0x1750] sm:$0xff] }
 0x3e4   :  { %5383 = vmatpush.msrb.mxu3 %v3910_v39  ;;  %5408 = vmatpush.msrb.mxu2 %v3976_v38  ;;  %v3844_v40 = vld [vmem:[%s15789_s3 + $0xcd0] sm:$0xff]  ;;  %v4390_v13 = vld [vmem:[%s15789_s3 + $0x1de0] sm:$0xff] }
 0x3e5   :  { %5355 = vmatpush.msra.mxu1 %v3646_v2  ;;  %5372 = vmatpush.msra.mxu0 %v3760_v10  ;;  %v4060_v33 = vld [vmem:[%s15789_s3 + $0x1390] sm:$0xff]  ;;  %v4174_v55 = vld [vmem:[%s15789_s3 + $0x1720] sm:$0xff] }
 0x3e6   :  { %5384 = vmatpush.msrb.mxu3 %v3904_v56  ;;  %5409 = vmatpush.msrb.mxu2 %v3970_v44  ;;  %v3838_v39 = vld [vmem:[%s15789_s3 + $0xca0] sm:$0xff]  ;;  %v4384_v38 = vld [vmem:[%s15789_s3 + $0x1db0] sm:$0xff] }
 0x3e7   :  { %5356 = vmatpush.msra.mxu1 %v3640_v15  ;;  %5373 = vmatpush.msra.mxu0 %v3754_v61  ;;  %v4054_v2 = vld [vmem:[%s15789_s3 + $0x1360] sm:$0xff]  ;;  %v4168_v54 = vld [vmem:[%s15789_s3 + $0x16f0] sm:$0xff] }
 0x3e8   :  { %5385 = vmatpush.msrb.mxu3 %v3898_v53  ;;  %5410 = vmatpush.msrb.mxu2 %v3964_v32  ;;  %v3832_v56 = vld [vmem:[%s15789_s3 + $0xc70] sm:$0xff]  ;;  %v4378_v15 = vld [vmem:[%s15789_s3 + $0x1d80] sm:$0xff] }
 0x3e9   :  { %5357 = vmatpush.msra.mxu1 %v3634_v41  ;;  %5374 = vmatpush.msra.mxu0 %v3748_v63  ;;  %v4048_v61 = vld [vmem:[%s15789_s3 + $0x1330] sm:$0xff]  ;;  %v4162_v53 = vld [vmem:[%s15789_s3 + $0x16c0] sm:$0xff] }
 0x3ea   :  { %5386 = vmatpush.msrb.mxu3 %v3892_v52  ;;  %5411 = vmatpush.msrb.mxu2 %v3958_v51  ;;  %v4372_v32 = vld [vmem:[%s15789_s3 + $0x1d50] sm:$0xff]  ;;  %v4042_v41 = vld [vmem:[%s15789_s3 + $0x1300] sm:$0xff] }
 0x3eb   :  { %5358 = vmatpush.msra.mxu1 %v3628_v34  ;;  %5375 = vmatpush.msra.mxu0 %v3742_v20  ;;  %v4156_v63 = vld [vmem:[%s15789_s3 + $0x1690] sm:$0xff]  ;;  %v4366_v51 = vld [vmem:[%s15789_s3 + $0x1d20] sm:$0xff] }
 0x3ec   :  { %5359 = vmatmul.f32.vlgmr.msra.gmra.mxu1 %v11511_v12  ;;  %5387 = vmatpush.msrb.mxu3 %v3886_v5  ;;  %v3820_v52 = vld [vmem:[%s15789_s3 + $0xc10] sm:$0xff]  ;;  %v4150_v20 = vld [vmem:[%s15789_s3 + $0x1660] sm:$0xff] }
 0x3ed   :  { %5412 = vmatpush.msrb.mxu2 %v3952_v19  ;;  %5423 = vmatpush.msrb.mxu1 %v4102_v1  ;;  %v4036_v34 = vld [vmem:[%s15789_s3 + $0x12d0] sm:$0xff]  ;;  %v4294_v5 = vld [vmem:[%s15789_s3 + $0x1ae0] sm:$0xff] }
 0x3ee   :  { %5376 = vmatpush.msra.mxu0 %v3736_v46  ;;  %5388 = vmatpush.msrb.mxu3 %v3880_v36  ;;  %v4360_v19 = vld [vmem:[%s15789_s3 + $0x1cf0] sm:$0xff]  ;;  %v4030_v1 = vld [vmem:[%s15789_s3 + $0x12a0] sm:$0xff] }
 0x3ef   :  { %5413 = vmatpush.msrb.mxu2 %v3946_v50  ;;  %5424 = vmatpush.msrb.mxu1 %v4096_v9  ;;  %v4144_v46 = vld [vmem:[%s15789_s3 + $0x1630] sm:$0xff]  ;;  %v4354_v50 = vld [vmem:[%s15789_s3 + $0x1cc0] sm:$0xff] }
 0x3f0   :  { %5377 = vmatpush.msra.mxu0 %v3730_v35  ;;  %5389 = vmatpush.msrb.mxu3 %v3874_v47  ;;  %v4288_v36 = vld [vmem:[%s15789_s3 + $0x1ab0] sm:$0xff]  ;;  %v4138_v35 = vld [vmem:[%s15789_s3 + $0x1600] sm:$0xff] }
 0x3f1   :  { %5414 = vmatpush.msrb.mxu2 %v3940_v60  ;;  %5425 = vmatpush.msrb.mxu1 %v4090_v25  ;;  %v4024_v9 = vld [vmem:[%s15789_s3 + $0x1270] sm:$0xff]  ;;  %v4282_v47 = vld [vmem:[%s15789_s3 + $0x1a80] sm:$0xff] }
 0x3f2   :  { %5378 = vmatpush.msra.mxu0 %v3724_v21  ;;  %5390 = vmatpush.msrb.mxu3 %v3868_v6  ;;  %v4348_v60 = vld [vmem:[%s15789_s3 + $0x1c90] sm:$0xff]  ;;  %v4018_v25 = vld [vmem:[%s15789_s3 + $0x1240] sm:$0xff] }
 0x3f3   :  { %5379 = vmatmul.f32.vlgmr.msra.gmra.mxu0 %v11520_v11  ;;  %5415 = vmatpush.msrb.mxu2 %v3934_v14  ;;  %v4132_v21 = vld [vmem:[%s15789_s3 + $0x15d0] sm:$0xff]  ;;  %v4342_v14 = vld [vmem:[%s15789_s3 + $0x1c60] sm:$0xff] }
 0x3f4   :  { %5426 = vmatpush.msrb.mxu1 %v4084_v24  ;;  %5443 = vmatpush.msrb.mxu0 %v4198_v3  ;;  %v4276_v6 = vld [vmem:[%s15789_s3 + $0x1a50] sm:$0xff]  ;;  %v4126_v3 = vld [vmem:[%s15789_s3 + $0x15a0] sm:$0xff] }
 0x3f5   :  { %5391 = vmatpush.msrb.mxu3 %v3862_v26  ;;  %5416 = vmatpush.msrb.mxu2 %v3928_v45  ;;  %v4012_v24 = vld [vmem:[%s15789_s3 + $0x1210] sm:$0xff]  ;;  %v4270_v26 = vld [vmem:[%s15789_s3 + $0x1a20] sm:$0xff] }
 0x3f6   :  { %5427 = vmatpush.msrb.mxu1 %v4078_v58  ;;  %5444 = vmatpush.msrb.mxu0 %v4192_v27  ;;  %v4336_v45 = vld [vmem:[%s15789_s3 + $0x1c30] sm:$0xff]  ;;  %v4486_v58 = vld [vmem:[%s15789_s3 + $0x20e0] sm:$0xff] }
 0x3f7   :  { %5392 = vmatpush.msrb.mxu3 %v3856_v48  ;;  %5417 = vmatpush.msrb.mxu2 %v3922_v42  ;;  %v4120_v27 = vld [vmem:[%s15789_s3 + $0x1570] sm:$0xff]  ;;  %v4330_v42 = vld [vmem:[%s15789_s3 + $0x1c00] sm:$0xff] }
 0x3f8   :  { %5428 = vmatpush.msrb.mxu1 %v4072_v8  ;;  %5445 = vmatpush.msrb.mxu0 %v4186_v37  ;;  %v4264_v48 = vld [vmem:[%s15789_s3 + $0x19f0] sm:$0xff]  ;;  %v4114_v37 = vld [vmem:[%s15789_s3 + $0x1540] sm:$0xff] }
 0x3f9   :  { %5393 = vmatpush.msrb.mxu3 %v3850_v31  ;;  %5418 = vmatpush.msrb.mxu2 %v3916_v23  ;;  %v4480_v8 = vld [vmem:[%s15789_s3 + $0x20b0] sm:$0xff]  ;;  %v4258_v31 = vld [vmem:[%s15789_s3 + $0x19c0] sm:$0xff] }
 0x3fa   :  { %5429 = vmatpush.msrb.mxu1 %v4066_v30  ;;  %5446 = vmatpush.msrb.mxu0 %v4180_v22  ;;  %v4324_v23 = vld [vmem:[%s15789_s3 + $0x1bd0] sm:$0xff]  ;;  %v4474_v30 = vld [vmem:[%s15789_s3 + $0x2080] sm:$0xff] }
 0x3fb   :  { %5419 = vmatmul.f32.vlgmr.msrb.gmra.mxu2 %v11782_v28  ;;  %5394 = vmatpush.msrb.mxu3 %v3844_v40  ;;  %v5020_v10 = vpop.f32.mrf.mxu3  ;;  %v4108_v22 = vld [vmem:[%s15789_s3 + $0x1510] sm:$0xff] }
 0x3fc   :  { %5483 = vmatpush.msra.mxu2 %v4390_v13  ;;  %5430 = vmatpush.msrb.mxu1 %v4060_v33  ;;  %v13093_v44 = vadd.f32 %v5020_v10, %v12946_v0  ;;  %v3826_v0 = vld [vmem:[%s15789_s3 + $0xc40] sm:$0xff]  ;;  %v4252_v40 = vld [vmem:[%s15789_s3 + $0x1990] sm:$0xff] }
 0x3fd   :  { %5447 = vmatpush.msrb.mxu0 %v4174_v55  ;;  %5395 = vmatpush.msrb.mxu3 %v3838_v39  ;;  %v4318_v13 = vld [vmem:[%s15789_s3 + $0x1ba0] sm:$0xff]  ;;  %v4468_v33 = vld [vmem:[%s15789_s3 + $0x2050] sm:$0xff] }
 0x3fe   :  { %5484 = vmatpush.msra.mxu2 %v4384_v38  ;;  %5431 = vmatpush.msrb.mxu1 %v4054_v2  ;;  %v4582_v55 = vld [vmem:[%s15789_s3 + $0x23e0] sm:$0xff]  ;;  %v4312_v38 = vld [vmem:[%s15789_s3 + $0x1b70] sm:$0xff] }
 0x3ff   :  { %5448 = vmatpush.msrb.mxu0 %v4168_v54  ;;  %5396 = vmatpush.msrb.mxu3 %v3832_v56  ;;  %v4246_v39 = vld [vmem:[%s15789_s3 + $0x1960] sm:$0xff]  ;;  %v4576_v10 = vld [vmem:[%s15789_s3 + $0x23b0] sm:$0xff] }
 0x400   :  { %5485 = vmatpush.msra.mxu2 %v4378_v15  ;;  %5432 = vmatpush.msrb.mxu1 %v4048_v61  ;;  %v4462_v2 = vld [vmem:[%s15789_s3 + $0x2020] sm:$0xff]  ;;  %v4240_v54 = vld [vmem:[%s15789_s3 + $0x1930] sm:$0xff] }
 0x401   :  { %5449 = vmatpush.msrb.mxu0 %v4162_v53  ;;  %5397 = vmatpush.msrb.mxu3 %v3826_v0  ;;  %v4306_v56 = vld [vmem:[%s15789_s3 + $0x1b40] sm:$0xff]  ;;  %v4456_v15 = vld [vmem:[%s15789_s3 + $0x1ff0] sm:$0xff] }
 0x402   :  { %5486 = vmatpush.msra.mxu2 %v4372_v32  ;;  %5433 = vmatpush.msrb.mxu1 %v4042_v41  ;;  %v4570_v61 = vld [vmem:[%s15789_s3 + $0x2380] sm:$0xff]  ;;  %v4300_v0 = vld [vmem:[%s15789_s3 + $0x1b10] sm:$0xff] }
 0x403   :  { %5450 = vmatpush.msrb.mxu0 %v4156_v63  ;;  %5398 = vmatpush.msrb.mxu3 %v3820_v52  ;;  %v4234_v53 = vld [vmem:[%s15789_s3 + $0x1900] sm:$0xff]  ;;  %v4564_v41 = vld [vmem:[%s15789_s3 + $0x2350] sm:$0xff] }
 0x404   :  { %5487 = vmatpush.msra.mxu2 %v4366_v51  ;;  %5434 = vmatpush.msrb.mxu1 %v4036_v34  ;;  %v4450_v32 = vld [vmem:[%s15789_s3 + $0x1fc0] sm:$0xff]  ;;  %v4228_v63 = vld [vmem:[%s15789_s3 + $0x18d0] sm:$0xff] }
 0x405   :  { %5451 = vmatpush.msrb.mxu0 %v4150_v20  ;;  %5399 = vmatmul.f32.vlgmr.msrb.gmra.mxu3 %v11729_v57  ;;  %v4702_v52 = vld [vmem:[%s15789_s3 + $0x27a0] sm:$0x3]  ;;  %v4444_v51 = vld [vmem:[%s15789_s3 + $0x1f90] sm:$0xff] }
 0x406   :  { %5463 = vmatpush.msra.mxu3 %v4294_v5  ;;  %5488 = vmatpush.msra.mxu2 %v4360_v19  ;;  %v4558_v34 = vld [vmem:[%s15789_s3 + $0x2320] sm:$0xff]  ;;  %v4696_v5 = vld [vmem:[%s15789_s3 + $0x2770] sm:$0xff] }
 0x407   :  { %5435 = vmatpush.msrb.mxu1 %v4030_v1  ;;  %5452 = vmatpush.msrb.mxu0 %v4144_v46  ;;  %v4222_v20 = vld [vmem:[%s15789_s3 + $0x18a0] sm:$0xff]  ;;  %v4552_v1 = vld [vmem:[%s15789_s3 + $0x22f0] sm:$0xff] }
 0x408   :  { %5464 = vmatpush.msra.mxu3 %v4288_v36  ;;  %5489 = vmatpush.msra.mxu2 %v4354_v50  ;;  %v4438_v19 = vld [vmem:[%s15789_s3 + $0x1f60] sm:$0xff]  ;;  %v4216_v46 = vld [vmem:[%s15789_s3 + $0x1870] sm:$0xff] }
 0x409   :  { %5436 = vmatpush.msrb.mxu1 %v4024_v9  ;;  %5453 = vmatpush.msrb.mxu0 %v4138_v35  ;;  %v4690_v36 = vld [vmem:[%s15789_s3 + $0x2740] sm:$0xff]  ;;  %v4432_v50 = vld [vmem:[%s15789_s3 + $0x1f30] sm:$0xff] }
 0x40a   :  { %5465 = vmatpush.msra.mxu3 %v4282_v47  ;;  %5490 = vmatpush.msra.mxu2 %v4348_v60  ;;  %v4546_v9 = vld [vmem:[%s15789_s3 + $0x22c0] sm:$0xff]  ;;  %v4684_v47 = vld [vmem:[%s15789_s3 + $0x2710] sm:$0xff] }
 0x40b   :  { %5437 = vmatpush.msrb.mxu1 %v4018_v25  ;;  %5454 = vmatpush.msrb.mxu0 %v4132_v21  ;;  %v4210_v35 = vld [vmem:[%s15789_s3 + $0x1840] sm:$0xff]  ;;  %v4540_v25 = vld [vmem:[%s15789_s3 + $0x2290] sm:$0xff]  ;;  %v3527_v21 = vld [vmem:[%s15789_s3 + $0x2e8] sm:$0xff] }
 0x40c   :  { %5466 = vmatpush.msra.mxu3 %v4276_v6  ;;  %5491 = vmatpush.msra.mxu2 %v4342_v14  ;;  %v4426_v60 = vld [vmem:[%s15789_s3 + $0x1f00] sm:$0xff]  ;;  %v4204_v6 = vld [vmem:[%s15789_s3 + $0x1810] sm:$0xff] }
 0x40d   :  { %5438 = vmatpush.msrb.mxu1 %v4012_v24  ;;  %5455 = vmatpush.msrb.mxu0 %v4126_v3  ;;  %v4420_v14 = vld [vmem:[%s15789_s3 + $0x1ed0] sm:$0xff]  ;;  %v4534_v24 = vld [vmem:[%s15789_s3 + $0x2260] sm:$0xff]  ;;  %v3521_v3 = vld [vmem:[%s15789_s3 + $0x2b8] sm:$0xff] }
 0x40e   :  { %5439 = vmatmul.f32.vlgmr.msrb.gmra.mxu1 %v11784_v29  ;;  %5467 = vmatpush.msra.mxu3 %v4270_v26  ;;  %v4678_v26 = vld [vmem:[%s15789_s3 + $0x26e0] sm:$0xff] }
 0x40f   :  { %5492 = vmatpush.msra.mxu2 %v4336_v45  ;;  %5503 = vmatpush.msra.mxu1 %v4486_v58  ;;  %v4414_v45 = vld [vmem:[%s15789_s3 + $0x1ea0] sm:$0xff]  ;;  %v4528_v58 = vld [vmem:[%s15789_s3 + $0x2230] sm:$0xff] }
 0x410   :  { %5456 = vmatpush.msrb.mxu0 %v4120_v27  ;;  %5468 = vmatpush.msra.mxu3 %v4264_v48  ;;  %v3515_v27 = vld [vmem:[%s15789_s3 + $0x288] sm:$0xff]  ;;  %v4672_v48 = vld [vmem:[%s15789_s3 + $0x26b0] sm:$0xff] }
 0x411   :  { %5493 = vmatpush.msra.mxu2 %v4330_v42  ;;  %5504 = vmatpush.msra.mxu1 %v4480_v8  ;;  %v4408_v42 = vld [vmem:[%s15789_s3 + $0x1e70] sm:$0xff]  ;;  %v4522_v8 = vld [vmem:[%s15789_s3 + $0x2200] sm:$0xff] }
 0x412   :  { %5457 = vmatpush.msrb.mxu0 %v4114_v37  ;;  %5469 = vmatpush.msra.mxu3 %v4258_v31  ;;  %v3509_v37 = vld [vmem:[%s15789_s3 + $0x258] sm:$0xff]  ;;  %v4666_v31 = vld [vmem:[%s15789_s3 + $0x2680] sm:$0xff] }
 0x413   :  { %5494 = vmatpush.msra.mxu2 %v4324_v23  ;;  %5505 = vmatpush.msra.mxu1 %v4474_v30  ;;  %v4402_v23 = vld [vmem:[%s15789_s3 + $0x1e40] sm:$0xff]  ;;  %v4516_v30 = vld [vmem:[%s15789_s3 + $0x21d0] sm:$0xff] }
 0x414   :  { %5458 = vmatpush.msrb.mxu0 %v4108_v22  ;;  %5470 = vmatpush.msra.mxu3 %v4252_v40  ;;  %v3503_v22 = vld [vmem:[%s15789_s3 + $0x228] sm:$0xff]  ;;  %v4660_v40 = vld [vmem:[%s15789_s3 + $0x2650] sm:$0xff] }
 0x415   :  { %5459 = vmatmul.f32.vlgmr.msrb.gmra.mxu0 %v11793_v62  ;;  %5495 = vmatpush.msra.mxu2 %v4318_v13  ;;  %v4396_v13 = vld [vmem:[%s15789_s3 + $0x1e10] sm:$0xff] }
 0x416   :  { %5506 = vmatpush.msra.mxu1 %v4468_v33  ;;  %5523 = vmatpush.msra.mxu0 %v4582_v55  ;;  %v4510_v33 = vld [vmem:[%s15789_s3 + $0x21a0] sm:$0xff]  ;;  %v3497_v55 = vld [vmem:[%s15789_s3 + $0x1f8] sm:$0xff] }
 0x417   :  { %5471 = vmatpush.msra.mxu3 %v4246_v39  ;;  %5496 = vmatpush.msra.mxu2 %v4312_v38  ;;  %v4654_v39 = vld [vmem:[%s15789_s3 + $0x2620] sm:$0xff]  ;;  %v3623_v38 = vld [vmem:[%s15789_s3 + $0x5e8] sm:$0xff] }
 0x418   :  { %5507 = vmatpush.msra.mxu1 %v4462_v2  ;;  %5524 = vmatpush.msra.mxu0 %v4576_v10  ;;  %v4504_v2 = vld [vmem:[%s15789_s3 + $0x2170] sm:$0xff]  ;;  %v3491_v10 = vld [vmem:[%s15789_s3 + $0x1c8] sm:$0xff] }
 0x419   :  { %5472 = vmatpush.msra.mxu3 %v4240_v54  ;;  %5497 = vmatpush.msra.mxu2 %v4306_v56  ;;  %v4648_v54 = vld [vmem:[%s15789_s3 + $0x25f0] sm:$0xff]  ;;  %v3617_v56 = vld [vmem:[%s15789_s3 + $0x5b8] sm:$0xff] }
 0x41a   :  { %5508 = vmatpush.msra.mxu1 %v4456_v15  ;;  %5525 = vmatpush.msra.mxu0 %v4570_v61  ;;  %v4498_v15 = vld [vmem:[%s15789_s3 + $0x2140] sm:$0xff]  ;;  %v3485_v61 = vld [vmem:[%s15789_s3 + $0x198] sm:$0xff] }
 0x41b   :  { %5473 = vmatpush.msra.mxu3 %v4234_v53  ;;  %5498 = vmatpush.msra.mxu2 %v4300_v0  ;;  %v4642_v53 = vld [vmem:[%s15789_s3 + $0x25c0] sm:$0xff]  ;;  %v3611_v0 = vld [vmem:[%s15789_s3 + $0x588] sm:$0xff] }
 0x41c   :  { %5509 = vmatpush.msra.mxu1 %v4450_v32  ;;  %5526 = vmatpush.msra.mxu0 %v4564_v41  ;;  %v4492_v32 = vld [vmem:[%s15789_s3 + $0x2110] sm:$0xff]  ;;  %v3479_v41 = vld [vmem:[%s15789_s3 + $0x168] sm:$0xff] }
 0x41d   :  { %5499 = vmatmul.f32.vlgmr.msra.gmra.mxu2 %v12019_v59  ;;  %5474 = vmatpush.msra.mxu3 %v4228_v63  ;;  %v4636_v63 = vld [vmem:[%s15789_s3 + $0x2590] sm:$0xff] }
 0x41e   :  { %6755 = vmatpush.msk.msrb.mxu2 %vm4724_vm1, %v4702_v52  ;;  %5510 = vmatpush.msra.mxu1 %v4444_v51  ;;  %v3605_v52 = vld [vmem:[%s15789_s3 + $0x558] sm:$0xff]  ;;  %v3719_v51 = vld [vmem:[%s15789_s3 + $0x8e8] sm:$0xff] }
 0x41f   :  { %5527 = vmatpush.msra.mxu0 %v4558_v34  ;;  %5475 = vmatpush.msra.mxu3 %v4222_v20  ;;  %v3473_v34 = vld [vmem:[%s15789_s3 + $0x138] sm:$0xff]  ;;  %v4630_v20 = vld [vmem:[%s15789_s3 + $0x2560] sm:$0xff] }
 0x420   :  { %5576 = vmatpush.msrb.mxu2 %v4696_v5  ;;  %5511 = vmatpush.msra.mxu1 %v4438_v19  ;;  %v3599_v5 = vld [vmem:[%s15789_s3 + $0x528] sm:$0xff]  ;;  %v3713_v19 = vld [vmem:[%s15789_s3 + $0x8b8] sm:$0xff] }
 0x421   :  { %5528 = vmatpush.msra.mxu0 %v4552_v1  ;;  %5476 = vmatpush.msra.mxu3 %v4216_v46  ;;  %v3467_v1 = vld [vmem:[%s15789_s3 + $0x108] sm:$0xff]  ;;  %v4624_v46 = vld [vmem:[%s15789_s3 + $0x2530] sm:$0xff] }
 0x422   :  { %5577 = vmatpush.msrb.mxu2 %v4690_v36  ;;  %5512 = vmatpush.msra.mxu1 %v4432_v50  ;;  %v3593_v36 = vld [vmem:[%s15789_s3 + $0x4f8] sm:$0xff]  ;;  %v3707_v50 = vld [vmem:[%s15789_s3 + $0x888] sm:$0xff] }
 0x423   :  { %5529 = vmatpush.msra.mxu0 %v4546_v9  ;;  %5477 = vmatpush.msra.mxu3 %v4210_v35  ;;  %v3461_v9 = vld [vmem:[%s15789_s3 + $0xd8] sm:$0xff]  ;;  %v4618_v35 = vld [vmem:[%s15789_s3 + $0x2500] sm:$0xff] }
 0x424   :  { %5578 = vmatpush.msrb.mxu2 %v4684_v47  ;;  %5513 = vmatpush.msra.mxu1 %v4426_v60  ;;  %v3587_v47 = vld [vmem:[%s15789_s3 + $0x4c8] sm:$0xff]  ;;  %v3701_v60 = vld [vmem:[%s15789_s3 + $0x858] sm:$0xff] }
 0x425   :  { %5530 = vmatpush.msra.mxu0 %v4540_v25  ;;  %6756 = vmatmul.msk.f32.vlgmr.msrb.gmra.mxu2 %vm4720_vm2, %v12293_v7  ;;  %v3455_v25 = vld [vmem:[%s15789_s3 + $0xa8] sm:$0xff] }
 0x426   :  { %5583 = vmatpush.msra.mxu2 %v3527_v21  ;;  %5478 = vmatpush.msra.mxu3 %v4204_v6  ;;  %v4612_v21 = vld [vmem:[%s15789_s3 + $0x24d0] sm:$0xff]  ;;  %v3581_v6 = vld [vmem:[%s15789_s3 + $0x498] sm:$0xff] }
 0x427   :  { %5514 = vmatpush.msra.mxu1 %v4420_v14  ;;  %5531 = vmatpush.msra.mxu0 %v4534_v24  ;;  %v3695_v14 = vld [vmem:[%s15789_s3 + $0x828] sm:$0xff]  ;;  %v3449_v24 = vld [vmem:[%s15789_s3 + $0x78] sm:$0xff] }
 0x428   :  { %5584 = vmatpush.msra.mxu2 %v3521_v3  ;;  %5479 = vmatmul.f32.vlgmr.msra.gmra.mxu3 %v11977_v17  ;;  %v4606_v3 = vld [vmem:[%s15789_s3 + $0x24a0] sm:$0xff] }
 0x429   :  { %5543 = vmatpush.msrb.mxu3 %v4678_v26  ;;  %5515 = vmatpush.msra.mxu1 %v4414_v45  ;;  %v3575_v26 = vld [vmem:[%s15789_s3 + $0x468] sm:$0xff]  ;;  %v3689_v45 = vld [vmem:[%s15789_s3 + $0x7f8] sm:$0xff] }
 0x42a   :  { %5532 = vmatpush.msra.mxu0 %v4528_v58  ;;  %5585 = vmatpush.msra.mxu2 %v3515_v27  ;;  %v3443_v58 = vld [vmem:[%s15789_s3 + $0x48] sm:$0xff]  ;;  %v4600_v27 = vld [vmem:[%s15789_s3 + $0x2470] sm:$0xff] }
 0x42b   :  { %5544 = vmatpush.msrb.mxu3 %v4672_v48  ;;  %5516 = vmatpush.msra.mxu1 %v4408_v42  ;;  %v3569_v48 = vld [vmem:[%s15789_s3 + $0x438] sm:$0xff]  ;;  %v3683_v42 = vld [vmem:[%s15789_s3 + $0x7c8] sm:$0xff] }
 0x42c   :  { %5533 = vmatpush.msra.mxu0 %v4522_v8  ;;  %5586 = vmatpush.msra.mxu2 %v3509_v37  ;;  %v3437_v8 = vld [vmem:[%s15789_s3 + $0x18] sm:$0xff]  ;;  %v4594_v37 = vld [vmem:[%s15789_s3 + $0x2440] sm:$0xff] }
 0x42d   :  { %5545 = vmatpush.msrb.mxu3 %v4666_v31  ;;  %5517 = vmatpush.msra.mxu1 %v4402_v23  ;;  %v3563_v31 = vld [vmem:[%s15789_s3 + $0x408] sm:$0xff]  ;;  %v3677_v23 = vld [vmem:[%s15789_s3 + $0x798] sm:$0xff] }
 0x42e   :  { %5534 = vmatpush.msra.mxu0 %v4516_v30  ;;  %5587 = vmatpush.msra.mxu2 %v3503_v22  ;;  %v3911_v30 = vld [vmem:[%s15789_s3 + $0xee8] sm:$0xff]  ;;  %v4588_v22 = vld [vmem:[%s15789_s3 + $0x2410] sm:$0xff] }
 0x42f   :  { %5546 = vmatpush.msrb.mxu3 %v4660_v40  ;;  %5518 = vmatpush.msra.mxu1 %v4396_v13  ;;  %v3557_v40 = vld [vmem:[%s15789_s3 + $0x3d8] sm:$0xff]  ;;  %v3671_v13 = vld [vmem:[%s15789_s3 + $0x768] sm:$0xff] }
 0x430   :  { %5535 = vmatpush.msra.mxu0 %v4510_v33  ;;  %5588 = vmatpush.msra.mxu2 %v3497_v55  ;;  %v3905_v33 = vld [vmem:[%s15789_s3 + $0xeb8] sm:$0xff]  ;;  %v3815_v55 = vld [vmem:[%s15789_s3 + $0xbe8] sm:$0xff] }
 0x431   :  { %5519 = vmatmul.f32.vlgmr.msra.gmra.mxu1 %v12021_v43  ;;  %5547 = vmatpush.msrb.mxu3 %v4654_v39  ;;  %v3551_v39 = vld [vmem:[%s15789_s3 + $0x3a8] sm:$0xff] }
 0x432   :  { %5603 = vmatpush.msrb.mxu1 %v3623_v38  ;;  %5536 = vmatpush.msra.mxu0 %v4504_v2  ;;  %v3665_v38 = vld [vmem:[%s15789_s3 + $0x738] sm:$0xff]  ;;  %v3899_v2 = vld [vmem:[%s15789_s3 + $0xe88] sm:$0xff] }
 0x433   :  { %5589 = vmatpush.msra.mxu2 %v3491_v10  ;;  %5548 = vmatpush.msrb.mxu3 %v4648_v54  ;;  %v3809_v10 = vld [vmem:[%s15789_s3 + $0xbb8] sm:$0xff] }
 0x434   :  { %5604 = vmatpush.msrb.mxu1 %v3617_v56  ;;  %5537 = vmatpush.msra.mxu0 %v4498_v15  ;;  %v3545_v54 = vld [vmem:[%s15789_s3 + $0x378] sm:$0xff]  ;;  %v3659_v56 = vld [vmem:[%s15789_s3 + $0x708] sm:$0xff] }
 0x435   :  { %5590 = vmatpush.msra.mxu2 %v3485_v61  ;;  %5549 = vmatpush.msrb.mxu3 %v4642_v53  ;;  %v3893_v15 = vld [vmem:[%s15789_s3 + $0xe58] sm:$0xff]  ;;  %v3803_v61 = vld [vmem:[%s15789_s3 + $0xb88] sm:$0xff] }
 0x436   :  { %5605 = vmatpush.msrb.mxu1 %v3611_v0  ;;  %5538 = vmatpush.msra.mxu0 %v4492_v32  ;;  %v3539_v53 = vld [vmem:[%s15789_s3 + $0x348] sm:$0xff]  ;;  %v3653_v0 = vld [vmem:[%s15789_s3 + $0x6d8] sm:$0xff] }
 0x437   :  { %5591 = vmatpush.msra.mxu2 %v3479_v41  ;;  %5539 = vmatmul.f32.vlgmr.msra.gmra.mxu0 %v12026_v16  ;;  %v3887_v32 = vld [vmem:[%s15789_s3 + $0xe28] sm:$0xff]  ;;  %v3797_v41 = vld [vmem:[%s15789_s3 + $0xb58] sm:$0xff] }
 0x438   :  { %5550 = vmatpush.msrb.mxu3 %v4636_v63  ;;  %5606 = vmatpush.msrb.mxu1 %v3605_v52  ;;  %v3533_v63 = vld [vmem:[%s15789_s3 + $0x318] sm:$0xff]  ;;  %v3647_v52 = vld [vmem:[%s15789_s3 + $0x6a8] sm:$0xff] }
 0x439   :  { %5623 = vmatpush.msrb.mxu0 %v3719_v51  ;;  %5592 = vmatpush.msra.mxu2 %v3473_v34  ;;  %v3881_v51 = vld [vmem:[%s15789_s3 + $0xdf8] sm:$0xff]  ;;  %v3791_v34 = vld [vmem:[%s15789_s3 + $0xb28] sm:$0xff] }
 0x43a   :  { %5551 = vmatpush.msrb.mxu3 %v4630_v20  ;;  %5607 = vmatpush.msrb.mxu1 %v3599_v5  ;;  %v4007_v20 = vld [vmem:[%s15789_s3 + $0x11e8] sm:$0xff]  ;;  %v3641_v5 = vld [vmem:[%s15789_s3 + $0x678] sm:$0xff] }
 0x43b   :  { %5624 = vmatpush.msrb.mxu0 %v3713_v19  ;;  %5593 = vmatpush.msra.mxu2 %v3467_v1  ;;  %v3875_v19 = vld [vmem:[%s15789_s3 + $0xdc8] sm:$0xff]  ;;  %v3785_v1 = vld [vmem:[%s15789_s3 + $0xaf8] sm:$0xff] }
 0x43c   :  { %5552 = vmatpush.msrb.mxu3 %v4624_v46  ;;  %5608 = vmatpush.msrb.mxu1 %v3593_v36  ;;  %v4001_v46 = vld [vmem:[%s15789_s3 + $0x11b8] sm:$0xff]  ;;  %v3635_v36 = vld [vmem:[%s15789_s3 + $0x648] sm:$0xff] }
 0x43d   :  { %5625 = vmatpush.msrb.mxu0 %v3707_v50  ;;  %5594 = vmatpush.msra.mxu2 %v3461_v9  ;;  %v3869_v50 = vld [vmem:[%s15789_s3 + $0xd98] sm:$0xff]  ;;  %v3779_v9 = vld [vmem:[%s15789_s3 + $0xac8] sm:$0xff] }
 0x43e   :  { %5553 = vmatpush.msrb.mxu3 %v4618_v35  ;;  %5609 = vmatpush.msrb.mxu1 %v3587_v47  ;;  %v3995_v35 = vld [vmem:[%s15789_s3 + $0x1188] sm:$0xff]  ;;  %v3629_v47 = vld [vmem:[%s15789_s3 + $0x618] sm:$0xff] }
 0x43f   :  { %5626 = vmatpush.msrb.mxu0 %v3701_v60  ;;  %5595 = vmatpush.msra.mxu2 %v3455_v25  ;;  %v3863_v60 = vld [vmem:[%s15789_s3 + $0xd68] sm:$0xff]  ;;  %v3773_v25 = vld [vmem:[%s15789_s3 + $0xa98] sm:$0xff] }
 0x440   :  { %5554 = vmatpush.msrb.mxu3 %v4612_v21  ;;  %5610 = vmatpush.msrb.mxu1 %v3581_v6  ;;  %v3989_v21 = vld [vmem:[%s15789_s3 + $0x1158] sm:$0xff]  ;;  %v4103_v6 = vld [vmem:[%s15789_s3 + $0x14e8] sm:$0xff] }
 0x441   :  { %5627 = vmatpush.msrb.mxu0 %v3695_v14  ;;  %5596 = vmatpush.msra.mxu2 %v3449_v24  ;;  %v3857_v14 = vld [vmem:[%s15789_s3 + $0xd38] sm:$0xff]  ;;  %v3767_v24 = vld [vmem:[%s15789_s3 + $0xa68] sm:$0xff] }
 0x442   :  { %5555 = vmatpush.msrb.mxu3 %v4606_v3  ;;  %5611 = vmatpush.msrb.mxu1 %v3575_v26  ;;  %v3983_v3 = vld [vmem:[%s15789_s3 + $0x1128] sm:$0xff]  ;;  %v4097_v26 = vld [vmem:[%s15789_s3 + $0x14b8] sm:$0xff] }
 0x443   :  { %5628 = vmatpush.msrb.mxu0 %v3689_v45  ;;  %5597 = vmatpush.msra.mxu2 %v3443_v58  ;;  %v3851_v45 = vld [vmem:[%s15789_s3 + $0xd08] sm:$0xff]  ;;  %v3761_v58 = vld [vmem:[%s15789_s3 + $0xa38] sm:$0xff] }
 0x444   :  { %5556 = vmatpush.msrb.mxu3 %v4600_v27  ;;  %5612 = vmatpush.msrb.mxu1 %v3569_v48  ;;  %v3977_v27 = vld [vmem:[%s15789_s3 + $0x10f8] sm:$0xff]  ;;  %v4091_v48 = vld [vmem:[%s15789_s3 + $0x1488] sm:$0xff] }
 0x445   :  { %5629 = vmatpush.msrb.mxu0 %v3683_v42  ;;  %5598 = vmatpush.msra.mxu2 %v3437_v8  ;;  %v3845_v42 = vld [vmem:[%s15789_s3 + $0xcd8] sm:$0xff]  ;;  %v3755_v8 = vld [vmem:[%s15789_s3 + $0xa08] sm:$0xff] }
 0x446   :  { %5557 = vmatpush.msrb.mxu3 %v4594_v37  ;;  %5599 = vmatmul.f32.vlgmr.msra.gmra.mxu2 %v11461_v4  ;;  %v3971_v37 = vld [vmem:[%s15789_s3 + $0x10c8] sm:$0xff] }
 0x447   :  { %5613 = vmatpush.msrb.mxu1 %v3563_v31  ;;  %5630 = vmatpush.msrb.mxu0 %v3677_v23  ;;  %v4085_v31 = vld [vmem:[%s15789_s3 + $0x1458] sm:$0xff]  ;;  %v3839_v23 = vld [vmem:[%s15789_s3 + $0xca8] sm:$0xff] }
 0x448   :  { %5663 = vmatpush.msrb.mxu2 %v3911_v30  ;;  %5558 = vmatpush.msrb.mxu3 %v4588_v22  ;;  %v3749_v30 = vld [vmem:[%s15789_s3 + $0x9d8] sm:$0xff] }
 0x449   :  { %5614 = vmatpush.msrb.mxu1 %v3557_v40  ;;  %5631 = vmatpush.msrb.mxu0 %v3671_v13  ;;  %v3965_v22 = vld [vmem:[%s15789_s3 + $0x1098] sm:$0xff]  ;;  %v4079_v40 = vld [vmem:[%s15789_s3 + $0x1428] sm:$0xff] }
 0x44a   :  { %5664 = vmatpush.msrb.mxu2 %v3905_v33  ;;  %5559 = vmatmul.f32.vlgmr.msrb.gmra.mxu3 %v12186_v18  ;;  %v3833_v13 = vld [vmem:[%s15789_s3 + $0xc78] sm:$0xff]  ;;  %v3743_v33 = vld [vmem:[%s15789_s3 + $0x9a8] sm:$0xff] }
 0x44b   :  { %5643 = vmatpush.msra.mxu3 %v3815_v55  ;;  %5615 = vmatpush.msrb.mxu1 %v3551_v39  ;;  %v3959_v55 = vld [vmem:[%s15789_s3 + $0x1068] sm:$0xff]  ;;  %v4073_v39 = vld [vmem:[%s15789_s3 + $0x13f8] sm:$0xff] }
 0x44c   :  { %5632 = vmatpush.msrb.mxu0 %v3665_v38  ;;  %5665 = vmatpush.msrb.mxu2 %v3899_v2  ;;  %v3827_v38 = vld [vmem:[%s15789_s3 + $0xc48] sm:$0xff]  ;;  %v3737_v2 = vld [vmem:[%s15789_s3 + $0x978] sm:$0xff] }
 0x44d   :  { %5644 = vmatpush.msra.mxu3 %v3809_v10  ;;  %5616 = vmatpush.msrb.mxu1 %v3545_v54  ;;  %v3953_v10 = vld [vmem:[%s15789_s3 + $0x1038] sm:$0xff]  ;;  %v4067_v54 = vld [vmem:[%s15789_s3 + $0x13c8] sm:$0xff] }
 0x44e   :  { %5633 = vmatpush.msrb.mxu0 %v3659_v56  ;;  %5666 = vmatpush.msrb.mxu2 %v3893_v15  ;;  %v3821_v56 = vld [vmem:[%s15789_s3 + $0xc18] sm:$0xff]  ;;  %v3731_v15 = vld [vmem:[%s15789_s3 + $0x948] sm:$0xff] }
 0x44f   :  { %5645 = vmatpush.msra.mxu3 %v3803_v61  ;;  %5617 = vmatpush.msrb.mxu1 %v3539_v53  ;;  %v3947_v61 = vld [vmem:[%s15789_s3 + $0x1008] sm:$0xff]  ;;  %v4061_v53 = vld [vmem:[%s15789_s3 + $0x1398] sm:$0xff] }
 0x450   :  { %5634 = vmatpush.msrb.mxu0 %v3653_v0  ;;  %5667 = vmatpush.msrb.mxu2 %v3887_v32  ;;  %v4295_v0 = vld [vmem:[%s15789_s3 + $0x1ae8] sm:$0xff]  ;;  %v3725_v32 = vld [vmem:[%s15789_s3 + $0x918] sm:$0xff] }
 0x451   :  { %5646 = vmatpush.msra.mxu3 %v3797_v41  ;;  %5618 = vmatpush.msrb.mxu1 %v3533_v63  ;;  %v3941_v41 = vld [vmem:[%s15789_s3 + $0xfd8] sm:$0xff]  ;;  %v4055_v63 = vld [vmem:[%s15789_s3 + $0x1368] sm:$0xff] }
 0x452   :  { %5635 = vmatpush.msrb.mxu0 %v3647_v52  ;;  %5668 = vmatpush.msrb.mxu2 %v3881_v51  ;;  %v4289_v52 = vld [vmem:[%s15789_s3 + $0x1ab8] sm:$0xff]  ;;  %v4199_v51 = vld [vmem:[%s15789_s3 + $0x17e8] sm:$0xff] }
 0x453   :  { %5619 = vmatmul.f32.vlgmr.msrb.gmra.mxu1 %v11509_v49  ;;  %5647 = vmatpush.msra.mxu3 %v3791_v34  ;;  %v3935_v34 = vld [vmem:[%s15789_s3 + $0xfa8] sm:$0xff] }
 0x454   :  { %5683 = vmatpush.msra.mxu1 %v4007_v20  ;;  %5636 = vmatpush.msrb.mxu0 %v3641_v5  ;;  %v4049_v20 = vld [vmem:[%s15789_s3 + $0x1338] sm:$0xff]  ;;  %v4283_v5 = vld [vmem:[%s15789_s3 + $0x1a88] sm:$0xff] }
 0x455   :  { %5669 = vmatpush.msrb.mxu2 %v3875_v19  ;;  %5648 = vmatpush.msra.mxu3 %v3785_v1  ;;  %v4193_v19 = vld [vmem:[%s15789_s3 + $0x17b8] sm:$0xff] }
 0x456   :  { %5684 = vmatpush.msra.mxu1 %v4001_v46  ;;  %5637 = vmatpush.msrb.mxu0 %v3635_v36  ;;  %v3929_v1 = vld [vmem:[%s15789_s3 + $0xf78] sm:$0xff]  ;;  %v4043_v46 = vld [vmem:[%s15789_s3 + $0x1308] sm:$0xff] }
 0x457   :  { %5670 = vmatpush.msrb.mxu2 %v3869_v50  ;;  %5649 = vmatpush.msra.mxu3 %v3779_v9  ;;  %v4277_v36 = vld [vmem:[%s15789_s3 + $0x1a58] sm:$0xff]  ;;  %v4187_v50 = vld [vmem:[%s15789_s3 + $0x1788] sm:$0xff] }
 0x458   :  { %5685 = vmatpush.msra.mxu1 %v3995_v35  ;;  %5638 = vmatpush.msrb.mxu0 %v3629_v47  ;;  %v3923_v9 = vld [vmem:[%s15789_s3 + $0xf48] sm:$0xff]  ;;  %v4037_v35 = vld [vmem:[%s15789_s3 + $0x12d8] sm:$0xff] }
 0x459   :  { %5671 = vmatpush.msrb.mxu2 %v3863_v60  ;;  %5639 = vmatmul.f32.vlgmr.msrb.gmra.mxu0 %v11511_v12  ;;  %v4271_v47 = vld [vmem:[%s15789_s3 + $0x1a28] sm:$0xff]  ;;  %v4181_v60 = vld [vmem:[%s15789_s3 + $0x1758] sm:$0xff] }
 0x45a   :  { %5650 = vmatpush.msra.mxu3 %v3773_v25  ;;  %5686 = vmatpush.msra.mxu1 %v3989_v21  ;;  %v3917_v25 = vld [vmem:[%s15789_s3 + $0xf18] sm:$0xff]  ;;  %v4031_v21 = vld [vmem:[%s15789_s3 + $0x12a8] sm:$0xff] }
 0x45b   :  { %5703 = vmatpush.msra.mxu0 %v4103_v6  ;;  %5672 = vmatpush.msrb.mxu2 %v3857_v14  ;;  %v4265_v6 = vld [vmem:[%s15789_s3 + $0x19f8] sm:$0xff]  ;;  %v4175_v14 = vld [vmem:[%s15789_s3 + $0x1728] sm:$0xff] }
 0x45c   :  { %5651 = vmatpush.msra.mxu3 %v3767_v24  ;;  %5687 = vmatpush.msra.mxu1 %v3983_v3  ;;  %v4391_v24 = vld [vmem:[%s15789_s3 + $0x1de8] sm:$0xff]  ;;  %v4025_v3 = vld [vmem:[%s15789_s3 + $0x1278] sm:$0xff] }
 0x45d   :  { %5704 = vmatpush.msra.mxu0 %v4097_v26  ;;  %5673 = vmatpush.msrb.mxu2 %v3851_v45  ;;  %v4259_v26 = vld [vmem:[%s15789_s3 + $0x19c8] sm:$0xff]  ;;  %v4169_v45 = vld [vmem:[%s15789_s3 + $0x16f8] sm:$0xff] }
 0x45e   :  { %5652 = vmatpush.msra.mxu3 %v3761_v58  ;;  %5688 = vmatpush.msra.mxu1 %v3977_v27  ;;  %v4385_v58 = vld [vmem:[%s15789_s3 + $0x1db8] sm:$0xff]  ;;  %v4019_v27 = vld [vmem:[%s15789_s3 + $0x1248] sm:$0xff] }
 0x45f   :  { %5705 = vmatpush.msra.mxu0 %v4091_v48  ;;  %5674 = vmatpush.msrb.mxu2 %v3845_v42  ;;  %v4253_v48 = vld [vmem:[%s15789_s3 + $0x1998] sm:$0xff]  ;;  %v4163_v42 = vld [vmem:[%s15789_s3 + $0x16c8] sm:$0xff] }
 0x460   :  { %5653 = vmatpush.msra.mxu3 %v3755_v8  ;;  %5689 = vmatpush.msra.mxu1 %v3971_v37  ;;  %v4379_v8 = vld [vmem:[%s15789_s3 + $0x1d88] sm:$0xff]  ;;  %v4013_v37 = vld [vmem:[%s15789_s3 + $0x1218] sm:$0xff] }
 0x461   :  { %5706 = vmatpush.msra.mxu0 %v4085_v31  ;;  %5675 = vmatpush.msrb.mxu2 %v3839_v23  ;;  %v4247_v31 = vld [vmem:[%s15789_s3 + $0x1968] sm:$0xff]  ;;  %v4157_v23 = vld [vmem:[%s15789_s3 + $0x1698] sm:$0xff] }
 0x462   :  { %5654 = vmatpush.msra.mxu3 %v3749_v30  ;;  %5690 = vmatpush.msra.mxu1 %v3965_v22  ;;  %v4373_v30 = vld [vmem:[%s15789_s3 + $0x1d58] sm:$0xff]  ;;  %v4487_v22 = vld [vmem:[%s15789_s3 + $0x20e8] sm:$0xff] }
 0x463   :  { %5707 = vmatpush.msra.mxu0 %v4079_v40  ;;  %5676 = vmatpush.msrb.mxu2 %v3833_v13  ;;  %v4241_v40 = vld [vmem:[%s15789_s3 + $0x1938] sm:$0xff]  ;;  %v4151_v13 = vld [vmem:[%s15789_s3 + $0x1668] sm:$0xff] }
 0x464   :  { %5655 = vmatpush.msra.mxu3 %v3743_v33  ;;  %5691 = vmatpush.msra.mxu1 %v3959_v55  ;;  %v4367_v33 = vld [vmem:[%s15789_s3 + $0x1d28] sm:$0xff]  ;;  %v4481_v55 = vld [vmem:[%s15789_s3 + $0x20b8] sm:$0xff] }
 0x465   :  { %5708 = vmatpush.msra.mxu0 %v4073_v39  ;;  %5677 = vmatpush.msrb.mxu2 %v3827_v38  ;;  %v4235_v39 = vld [vmem:[%s15789_s3 + $0x1908] sm:$0xff]  ;;  %v4145_v38 = vld [vmem:[%s15789_s3 + $0x1638] sm:$0xff] }
 0x466   :  { %5656 = vmatpush.msra.mxu3 %v3737_v2  ;;  %5692 = vmatpush.msra.mxu1 %v3953_v10  ;;  %v4361_v2 = vld [vmem:[%s15789_s3 + $0x1cf8] sm:$0xff]  ;;  %v4475_v10 = vld [vmem:[%s15789_s3 + $0x2088] sm:$0xff] }
 0x467   :  { %5709 = vmatpush.msra.mxu0 %v4067_v54  ;;  %5678 = vmatpush.msrb.mxu2 %v3821_v56  ;;  %v4229_v54 = vld [vmem:[%s15789_s3 + $0x18d8] sm:$0xff]  ;;  %v4139_v56 = vld [vmem:[%s15789_s3 + $0x1608] sm:$0xff] }
 0x468   :  { %5657 = vmatpush.msra.mxu3 %v3731_v15  ;;  %5679 = vmatmul.f32.vlgmr.msrb.gmra.mxu2 %v11729_v57  ;;  %v4355_v15 = vld [vmem:[%s15789_s3 + $0x1cc8] sm:$0xff] }
 0x469   :  { %5693 = vmatpush.msra.mxu1 %v3947_v61  ;;  %5710 = vmatpush.msra.mxu0 %v4061_v53  ;;  %v4469_v61 = vld [vmem:[%s15789_s3 + $0x2058] sm:$0xff]  ;;  %v4223_v53 = vld [vmem:[%s15789_s3 + $0x18a8] sm:$0xff] }
 0x46a   :  { %5743 = vmatpush.msra.mxu2 %v4295_v0  ;;  %5658 = vmatpush.msra.mxu3 %v3725_v32  ;;  %v4133_v0 = vld [vmem:[%s15789_s3 + $0x15d8] sm:$0xff] }
 0x46b   :  { %5694 = vmatpush.msra.mxu1 %v3941_v41  ;;  %5711 = vmatpush.msra.mxu0 %v4055_v63  ;;  %v4349_v32 = vld [vmem:[%s15789_s3 + $0x1c98] sm:$0xff]  ;;  %v4463_v41 = vld [vmem:[%s15789_s3 + $0x2028] sm:$0xff] }
 0x46c   :  { %5744 = vmatpush.msra.mxu2 %v4289_v52  ;;  %5659 = vmatmul.f32.vlgmr.msra.gmra.mxu3 %v11520_v11  ;;  %v4217_v63 = vld [vmem:[%s15789_s3 + $0x1878] sm:$0xff]  ;;  %v4127_v52 = vld [vmem:[%s15789_s3 + $0x15a8] sm:$0xff] }
 0x46d   :  { %5723 = vmatpush.msrb.mxu3 %v4199_v51  ;;  %5695 = vmatpush.msra.mxu1 %v3935_v34  ;;  %v4343_v51 = vld [vmem:[%s15789_s3 + $0x1c68] sm:$0xff]  ;;  %v4457_v34 = vld [vmem:[%s15789_s3 + $0x1ff8] sm:$0xff] }
 0x46e   :  { %5712 = vmatpush.msra.mxu0 %v4049_v20  ;;  %5745 = vmatpush.msra.mxu2 %v4283_v5  ;;  %v4211_v20 = vld [vmem:[%s15789_s3 + $0x1848] sm:$0xff]  ;;  %v4121_v5 = vld [vmem:[%s15789_s3 + $0x1578] sm:$0xff] }
 0x46f   :  { %5724 = vmatpush.msrb.mxu3 %v4193_v19  ;;  %5696 = vmatpush.msra.mxu1 %v3929_v1  ;;  %v4337_v19 = vld [vmem:[%s15789_s3 + $0x1c38] sm:$0xff]  ;;  %v4451_v1 = vld [vmem:[%s15789_s3 + $0x1fc8] sm:$0xff] }
 0x470   :  { %5713 = vmatpush.msra.mxu0 %v4043_v46  ;;  %5746 = vmatpush.msra.mxu2 %v4277_v36  ;;  %v4205_v46 = vld [vmem:[%s15789_s3 + $0x1818] sm:$0xff]  ;;  %v4115_v36 = vld [vmem:[%s15789_s3 + $0x1548] sm:$0xff] }
 0x471   :  { %5725 = vmatpush.msrb.mxu3 %v4187_v50  ;;  %5697 = vmatpush.msra.mxu1 %v3923_v9  ;;  %v4331_v50 = vld [vmem:[%s15789_s3 + $0x1c08] sm:$0xff]  ;;  %v4445_v9 = vld [vmem:[%s15789_s3 + $0x1f98] sm:$0xff] }
 0x472   :  { %5714 = vmatpush.msra.mxu0 %v4037_v35  ;;  %5747 = vmatpush.msra.mxu2 %v4271_v47  ;;  %v4679_v35 = vld [vmem:[%s15789_s3 + $0x26e8] sm:$0xff]  ;;  %v4109_v47 = vld [vmem:[%s15789_s3 + $0x1518] sm:$0xff] }
 0x473   :  { %5726 = vmatpush.msrb.mxu3 %v4181_v60  ;;  %5698 = vmatpush.msra.mxu1 %v3917_v25  ;;  %v4325_v60 = vld [vmem:[%s15789_s3 + $0x1bd8] sm:$0xff]  ;;  %v4439_v25 = vld [vmem:[%s15789_s3 + $0x1f68] sm:$0xff] }
 0x474   :  { %5715 = vmatpush.msra.mxu0 %v4031_v21  ;;  %5748 = vmatpush.msra.mxu2 %v4265_v6  ;;  %v4673_v21 = vld [vmem:[%s15789_s3 + $0x26b8] sm:$0xff]  ;;  %v4583_v6 = vld [vmem:[%s15789_s3 + $0x23e8] sm:$0xff] }
 0x475   :  { %5699 = vmatmul.f32.vlgmr.msra.gmra.mxu1 %v11782_v28  ;;  %5727 = vmatpush.msrb.mxu3 %v4175_v14  ;;  %v4319_v14 = vld [vmem:[%s15789_s3 + $0x1ba8] sm:$0xff] }
 0x476   :  { %5763 = vmatpush.msrb.mxu1 %v4391_v24  ;;  %5716 = vmatpush.msra.mxu0 %v4025_v3  ;;  %v4433_v24 = vld [vmem:[%s15789_s3 + $0x1f38] sm:$0xff]  ;;  %v4667_v3 = vld [vmem:[%s15789_s3 + $0x2688] sm:$0xff] }
 0x477   :  { %5749 = vmatpush.msra.mxu2 %v4259_v26  ;;  %5728 = vmatpush.msrb.mxu3 %v4169_v45  ;;  %v4577_v26 = vld [vmem:[%s15789_s3 + $0x23b8] sm:$0xff] }
 0x478   :  { %5764 = vmatpush.msrb.mxu1 %v4385_v58  ;;  %5717 = vmatpush.msra.mxu0 %v4019_v27  ;;  %v4313_v45 = vld [vmem:[%s15789_s3 + $0x1b78] sm:$0xff]  ;;  %v4427_v58 = vld [vmem:[%s15789_s3 + $0x1f08] sm:$0xff] }
 0x479   :  { %5750 = vmatpush.msra.mxu2 %v4253_v48  ;;  %5729 = vmatpush.msrb.mxu3 %v4163_v42  ;;  %v4661_v27 = vld [vmem:[%s15789_s3 + $0x2658] sm:$0xff]  ;;  %v4571_v48 = vld [vmem:[%s15789_s3 + $0x2388] sm:$0xff] }
 0x47a   :  { %5765 = vmatpush.msrb.mxu1 %v4379_v8  ;;  %5718 = vmatpush.msra.mxu0 %v4013_v37  ;;  %v4307_v42 = vld [vmem:[%s15789_s3 + $0x1b48] sm:$0xff]  ;;  %v4421_v8 = vld [vmem:[%s15789_s3 + $0x1ed8] sm:$0xff] }
 0x47b   :  { %5751 = vmatpush.msra.mxu2 %v4247_v31  ;;  %5719 = vmatmul.f32.vlgmr.msra.gmra.mxu0 %v11784_v29  ;;  %v4655_v37 = vld [vmem:[%s15789_s3 + $0x2628] sm:$0xff]  ;;  %v4565_v31 = vld [vmem:[%s15789_s3 + $0x2358] sm:$0xff] }
 0x47c   :  { %5730 = vmatpush.msrb.mxu3 %v4157_v23  ;;  %5766 = vmatpush.msrb.mxu1 %v4373_v30  ;;  %v4301_v23 = vld [vmem:[%s15789_s3 + $0x1b18] sm:$0xff]  ;;  %v4415_v30 = vld [vmem:[%s15789_s3 + $0x1ea8] sm:$0xff] }
 0x47d   :  { %5783 = vmatpush.msrb.mxu0 %v4487_v22  ;;  %5752 = vmatpush.msra.mxu2 %v4241_v40  ;;  %v4649_v22 = vld [vmem:[%s15789_s3 + $0x25f8] sm:$0xff]  ;;  %v4559_v40 = vld [vmem:[%s15789_s3 + $0x2328] sm:$0xff] }
 0x47e   :  { %5731 = vmatpush.msrb.mxu3 %v4151_v13  ;;  %5767 = vmatpush.msrb.mxu1 %v4367_v33  ;;  %v4703_v13 = vld [vmem:[%s15789_s3 + $0x27a8] sm:$0x3]  ;;  %v4409_v33 = vld [vmem:[%s15789_s3 + $0x1e78] sm:$0xff] }
 0x47f   :  { %5784 = vmatpush.msrb.mxu0 %v4481_v55  ;;  %5753 = vmatpush.msra.mxu2 %v4235_v39  ;;  %v4643_v55 = vld [vmem:[%s15789_s3 + $0x25c8] sm:$0xff]  ;;  %v4553_v39 = vld [vmem:[%s15789_s3 + $0x22f8] sm:$0xff] }
 0x480   :  { %5732 = vmatpush.msrb.mxu3 %v4145_v38  ;;  %5768 = vmatpush.msrb.mxu1 %v4361_v2  ;;  %v4697_v38 = vld [vmem:[%s15789_s3 + $0x2778] sm:$0xff]  ;;  %v4403_v2 = vld [vmem:[%s15789_s3 + $0x1e48] sm:$0xff] }
 0x481   :  { %5785 = vmatpush.msrb.mxu0 %v4475_v10  ;;  %5754 = vmatpush.msra.mxu2 %v4229_v54  ;;  %v4637_v10 = vld [vmem:[%s15789_s3 + $0x2598] sm:$0xff]  ;;  %v4547_v54 = vld [vmem:[%s15789_s3 + $0x22c8] sm:$0xff] }
 0x482   :  { %5733 = vmatpush.msrb.mxu3 %v4139_v56  ;;  %5769 = vmatpush.msrb.mxu1 %v4355_v15  ;;  %v4691_v56 = vld [vmem:[%s15789_s3 + $0x2748] sm:$0xff]  ;;  %v4397_v15 = vld [vmem:[%s15789_s3 + $0x1e18] sm:$0xff] }
 0x483   :  { %5786 = vmatpush.msrb.mxu0 %v4469_v61  ;;  %5755 = vmatpush.msra.mxu2 %v4223_v53  ;;  %v4631_v61 = vld [vmem:[%s15789_s3 + $0x2568] sm:$0xff]  ;;  %v4541_v53 = vld [vmem:[%s15789_s3 + $0x2298] sm:$0xff] }
 0x484   :  { %5734 = vmatpush.msrb.mxu3 %v4133_v0  ;;  %5770 = vmatpush.msrb.mxu1 %v4349_v32  ;;  %v4685_v0 = vld [vmem:[%s15789_s3 + $0x2718] sm:$0xff]  ;;  %v3528_v32 = vld [vmem:[%s15789_s3 + $0x2f0] sm:$0xff] }
 0x485   :  { %5787 = vmatpush.msrb.mxu0 %v4463_v41  ;;  %5756 = vmatpush.msra.mxu2 %v4217_v63  ;;  %v4625_v41 = vld [vmem:[%s15789_s3 + $0x2538] sm:$0xff]  ;;  %v3624_v63 = vld [vmem:[%s15789_s3 + $0x5f0] sm:$0xff] }
 0x486   :  { %5735 = vmatpush.msrb.mxu3 %v4127_v52  ;;  %5771 = vmatpush.msrb.mxu1 %v4343_v51  ;;  %v4535_v52 = vld [vmem:[%s15789_s3 + $0x2268] sm:$0xff]  ;;  %v3522_v51 = vld [vmem:[%s15789_s3 + $0x2c0] sm:$0xff] }
 0x487   :  { %5788 = vmatpush.msrb.mxu0 %v4457_v34  ;;  %5757 = vmatpush.msra.mxu2 %v4211_v20  ;;  %v4619_v34 = vld [vmem:[%s15789_s3 + $0x2508] sm:$0xff]  ;;  %v3618_v20 = vld [vmem:[%s15789_s3 + $0x5c0] sm:$0xff] }
 0x488   :  { %5736 = vmatpush.msrb.mxu3 %v4121_v5  ;;  %5772 = vmatpush.msrb.mxu1 %v4337_v19  ;;  %v4529_v5 = vld [vmem:[%s15789_s3 + $0x2238] sm:$0xff]  ;;  %v3516_v19 = vld [vmem:[%s15789_s3 + $0x290] sm:$0xff] }
 0x489   :  { %5789 = vmatpush.msrb.mxu0 %v4451_v1  ;;  %5758 = vmatpush.msra.mxu2 %v4205_v46  ;;  %v4613_v1 = vld [vmem:[%s15789_s3 + $0x24d8] sm:$0xff]  ;;  %v3612_v46 = vld [vmem:[%s15789_s3 + $0x590] sm:$0xff] }
 0x48a   :  { %5737 = vmatpush.msrb.mxu3 %v4115_v36  ;;  %5759 = vmatmul.f32.vlgmr.msra.gmra.mxu2 %v11977_v17  ;;  %v4523_v36 = vld [vmem:[%s15789_s3 + $0x2208] sm:$0xff] }
 0x48b   :  { %5773 = vmatpush.msrb.mxu1 %v4331_v50  ;;  %5790 = vmatpush.msrb.mxu0 %v4445_v9  ;;  %v3510_v50 = vld [vmem:[%s15789_s3 + $0x260] sm:$0xff]  ;;  %v4607_v9 = vld [vmem:[%s15789_s3 + $0x24a8] sm:$0xff] }
 0x48c   :  { %5823 = vmatpush.msrb.mxu2 %v4679_v35  ;;  %5738 = vmatpush.msrb.mxu3 %v4109_v47  ;;  %v3606_v35 = vld [vmem:[%s15789_s3 + $0x560] sm:$0xff]  ;;  %v4517_v47 = vld [vmem:[%s15789_s3 + $0x21d8] sm:$0xff] }
 0x48d   :  { %5774 = vmatpush.msrb.mxu1 %v4325_v60  ;;  %5791 = vmatpush.msrb.mxu0 %v4439_v25  ;;  %v3504_v60 = vld [vmem:[%s15789_s3 + $0x230] sm:$0xff]  ;;  %v4601_v25 = vld [vmem:[%s15789_s3 + $0x2478] sm:$0xff] }
 0x48e   :  { %5824 = vmatpush.msrb.mxu2 %v4673_v21  ;;  %5739 = vmatmul.f32.vlgmr.msrb.gmra.mxu3 %v11793_v62  ;;  %v3600_v21 = vld [vmem:[%s15789_s3 + $0x530] sm:$0xff] }
 0x48f   :  { %5803 = vmatpush.msra.mxu3 %v4583_v6  ;;  %5775 = vmatpush.msrb.mxu1 %v4319_v14  ;;  %v4511_v6 = vld [vmem:[%s15789_s3 + $0x21a8] sm:$0xff]  ;;  %v3498_v14 = vld [vmem:[%s15789_s3 + $0x200] sm:$0xff] }
 0x490   :  { %5792 = vmatpush.msrb.mxu0 %v4433_v24  ;;  %5825 = vmatpush.msrb.mxu2 %v4667_v3  ;;  %v4595_v24 = vld [vmem:[%s15789_s3 + $0x2448] sm:$0xff]  ;;  %v3594_v3 = vld [vmem:[%s15789_s3 + $0x500] sm:$0xff] }
 0x491   :  { %5804 = vmatpush.msra.mxu3 %v4577_v26  ;;  %5776 = vmatpush.msrb.mxu1 %v4313_v45  ;;  %v4505_v26 = vld [vmem:[%s15789_s3 + $0x2178] sm:$0xff]  ;;  %v3492_v45 = vld [vmem:[%s15789_s3 + $0x1d0] sm:$0xff] }
 0x492   :  { %5793 = vmatpush.msrb.mxu0 %v4427_v58  ;;  %5826 = vmatpush.msrb.mxu2 %v4661_v27  ;;  %v4589_v58 = vld [vmem:[%s15789_s3 + $0x2418] sm:$0xff]  ;;  %v3588_v27 = vld [vmem:[%s15789_s3 + $0x4d0] sm:$0xff] }
 0x493   :  { %5805 = vmatpush.msra.mxu3 %v4571_v48  ;;  %5777 = vmatpush.msrb.mxu1 %v4307_v42  ;;  %v4499_v48 = vld [vmem:[%s15789_s3 + $0x2148] sm:$0xff]  ;;  %v3486_v42 = vld [vmem:[%s15789_s3 + $0x1a0] sm:$0xff] }
 0x494   :  { %5794 = vmatpush.msrb.mxu0 %v4421_v8  ;;  %5827 = vmatpush.msrb.mxu2 %v4655_v37  ;;  %v3816_v8 = vld [vmem:[%s15789_s3 + $0xbf0] sm:$0xff]  ;;  %v3582_v37 = vld [vmem:[%s15789_s3 + $0x4a0] sm:$0xff] }
 0x495   :  { %5806 = vmatpush.msra.mxu3 %v4565_v31  ;;  %5778 = vmatpush.msrb.mxu1 %v4301_v23  ;;  %v4493_v31 = vld [vmem:[%s15789_s3 + $0x2118] sm:$0xff]  ;;  %v3480_v23 = vld [vmem:[%s15789_s3 + $0x170] sm:$0xff] }
 0x496   :  { %5795 = vmatpush.msrb.mxu0 %v4415_v30  ;;  %5828 = vmatpush.msrb.mxu2 %v4649_v22  ;;  %v3810_v30 = vld [vmem:[%s15789_s3 + $0xbc0] sm:$0xff]  ;;  %v3576_v22 = vld [vmem:[%s15789_s3 + $0x470] sm:$0xff] }
 0x497   :  { %5779 = vmatmul.f32.vlgmr.msrb.gmra.mxu1 %v12019_v59  ;;  %5807 = vmatpush.msra.mxu3 %v4559_v40  ;;  %v3720_v40 = vld [vmem:[%s15789_s3 + $0x8f0] sm:$0xff] }
 0x498   :  { %6757 = vmatpush.msk.msra.mxu1 %vm4724_vm1, %v4703_v13  ;;  %5796 = vmatpush.msrb.mxu0 %v4409_v33  ;;  %v3474_v13 = vld [vmem:[%s15789_s3 + $0x140] sm:$0xff]  ;;  %v3804_v33 = vld [vmem:[%s15789_s3 + $0xb90] sm:$0xff] }
 0x499   :  { %5829 = vmatpush.msrb.mxu2 %v4643_v55  ;;  %5808 = vmatpush.msra.mxu3 %v4553_v39  ;;  %v3570_v55 = vld [vmem:[%s15789_s3 + $0x440] sm:$0xff] }
 0x49a   :  { %5856 = vmatpush.msra.mxu1 %v4697_v38  ;;  %5797 = vmatpush.msrb.mxu0 %v4403_v2  ;;  %v3714_v39 = vld [vmem:[%s15789_s3 + $0x8c0] sm:$0xff]  ;;  %v3468_v38 = vld [vmem:[%s15789_s3 + $0x110] sm:$0xff] }
 0x49b   :  { %5830 = vmatpush.msrb.mxu2 %v4637_v10  ;;  %5809 = vmatpush.msra.mxu3 %v4547_v54  ;;  %v3798_v2 = vld [vmem:[%s15789_s3 + $0xb60] sm:$0xff]  ;;  %v3564_v10 = vld [vmem:[%s15789_s3 + $0x410] sm:$0xff] }
 0x49c   :  { %5857 = vmatpush.msra.mxu1 %v4691_v56  ;;  %5798 = vmatpush.msrb.mxu0 %v4397_v15  ;;  %v3708_v54 = vld [vmem:[%s15789_s3 + $0x890] sm:$0xff]  ;;  %v3462_v56 = vld [vmem:[%s15789_s3 + $0xe0] sm:$0xff] }
 0x49d   :  { %5831 = vmatpush.msrb.mxu2 %v4631_v61  ;;  %5799 = vmatmul.f32.vlgmr.msrb.gmra.mxu0 %v12021_v43  ;;  %v3792_v15 = vld [vmem:[%s15789_s3 + $0xb30] sm:$0xff]  ;;  %v3558_v61 = vld [vmem:[%s15789_s3 + $0x3e0] sm:$0xff] }
 0x49e   :  { %5810 = vmatpush.msra.mxu3 %v4541_v53  ;;  %5858 = vmatpush.msra.mxu1 %v4685_v0  ;;  %v3702_v53 = vld [vmem:[%s15789_s3 + $0x860] sm:$0xff]  ;;  %v3456_v0 = vld [vmem:[%s15789_s3 + $0xb0] sm:$0xff] }
 0x49f   :  { %5863 = vmatpush.msra.mxu0 %v3528_v32  ;;  %5832 = vmatpush.msrb.mxu2 %v4625_v41  ;;  %v3786_v32 = vld [vmem:[%s15789_s3 + $0xb00] sm:$0xff]  ;;  %v3552_v41 = vld [vmem:[%s15789_s3 + $0x3b0] sm:$0xff] }
 0x4a0   :  { %5883 = vmatpush.msrb.mxu1 %v3624_v63  ;;  %5811 = vmatpush.msra.mxu3 %v4535_v52  ;;  %v3696_v63 = vld [vmem:[%s15789_s3 + $0x830] sm:$0xff]  ;;  %v3450_v52 = vld [vmem:[%s15789_s3 + $0x80] sm:$0xff] }
 0x4a1   :  { %6758 = vmatmul.msk.f32.vlgmr.msra.gmra.mxu1 %vm4720_vm2, %v12293_v7  ;;  %5864 = vmatpush.msra.mxu0 %v3522_v51  ;;  %v3780_v51 = vld [vmem:[%s15789_s3 + $0xad0] sm:$0xff] }
 0x4a2   :  { %5833 = vmatpush.msrb.mxu2 %v4619_v34  ;;  %5884 = vmatpush.msrb.mxu1 %v3618_v20  ;;  %v3546_v34 = vld [vmem:[%s15789_s3 + $0x380] sm:$0xff] }
 0x4a3   :  { %5812 = vmatpush.msra.mxu3 %v4529_v5  ;;  %5865 = vmatpush.msra.mxu0 %v3516_v19  ;;  %v3690_v20 = vld [vmem:[%s15789_s3 + $0x800] sm:$0xff]  ;;  %v3444_v5 = vld [vmem:[%s15789_s3 + $0x50] sm:$0xff] }
 0x4a4   :  { %5834 = vmatpush.msrb.mxu2 %v4613_v1  ;;  %5885 = vmatpush.msrb.mxu1 %v3612_v46  ;;  %v3774_v19 = vld [vmem:[%s15789_s3 + $0xaa0] sm:$0xff]  ;;  %v3540_v1 = vld [vmem:[%s15789_s3 + $0x350] sm:$0xff] }
 0x4a5   :  { %5813 = vmatpush.msra.mxu3 %v4523_v36  ;;  %5866 = vmatpush.msra.mxu0 %v3510_v50  ;;  %v3684_v46 = vld [vmem:[%s15789_s3 + $0x7d0] sm:$0xff]  ;;  %v3438_v36 = vld [vmem:[%s15789_s3 + $0x20] sm:$0xff] }
 0x4a6   :  { %5835 = vmatpush.msrb.mxu2 %v4607_v9  ;;  %5886 = vmatpush.msrb.mxu1 %v3606_v35  ;;  %v3768_v50 = vld [vmem:[%s15789_s3 + $0xa70] sm:$0xff]  ;;  %v3534_v9 = vld [vmem:[%s15789_s3 + $0x320] sm:$0xff] }
 0x4a7   :  { %5814 = vmatpush.msra.mxu3 %v4517_v47  ;;  %5867 = vmatpush.msra.mxu0 %v3504_v60  ;;  %v3678_v35 = vld [vmem:[%s15789_s3 + $0x7a0] sm:$0xff]  ;;  %v3912_v47 = vld [vmem:[%s15789_s3 + $0xef0] sm:$0xff] }
 0x4a8   :  { %5836 = vmatpush.msrb.mxu2 %v4601_v25  ;;  %5887 = vmatpush.msrb.mxu1 %v3600_v21  ;;  %v3762_v60 = vld [vmem:[%s15789_s3 + $0xa40] sm:$0xff]  ;;  %v4008_v25 = vld [vmem:[%s15789_s3 + $0x11f0] sm:$0xff] }
 0x4a9   :  { %5815 = vmatpush.msra.mxu3 %v4511_v6  ;;  %5868 = vmatpush.msra.mxu0 %v3498_v14  ;;  %v3672_v21 = vld [vmem:[%s15789_s3 + $0x770] sm:$0xff]  ;;  %v3906_v6 = vld [vmem:[%s15789_s3 + $0xec0] sm:$0xff] }
 0x4aa   :  { %5837 = vmatpush.msrb.mxu2 %v4595_v24  ;;  %5888 = vmatpush.msrb.mxu1 %v3594_v3  ;;  %v3756_v14 = vld [vmem:[%s15789_s3 + $0xa10] sm:$0xff]  ;;  %v4002_v24 = vld [vmem:[%s15789_s3 + $0x11c0] sm:$0xff] }
 0x4ab   :  { %5816 = vmatpush.msra.mxu3 %v4505_v26  ;;  %5869 = vmatpush.msra.mxu0 %v3492_v45  ;;  %v3666_v3 = vld [vmem:[%s15789_s3 + $0x740] sm:$0xff]  ;;  %v3900_v26 = vld [vmem:[%s15789_s3 + $0xe90] sm:$0xff] }
 0x4ac   :  { %5838 = vmatpush.msrb.mxu2 %v4589_v58  ;;  %5889 = vmatpush.msrb.mxu1 %v3588_v27  ;;  %v3750_v45 = vld [vmem:[%s15789_s3 + $0x9e0] sm:$0xff]  ;;  %v3996_v58 = vld [vmem:[%s15789_s3 + $0x1190] sm:$0xff] }
 0x4ad   :  { %5817 = vmatpush.msra.mxu3 %v4499_v48  ;;  %5839 = vmatmul.f32.vlgmr.msrb.gmra.mxu2 %v12186_v18  ;;  %v3660_v27 = vld [vmem:[%s15789_s3 + $0x710] sm:$0xff]  ;;  %v3894_v48 = vld [vmem:[%s15789_s3 + $0xe60] sm:$0xff] }
 0x4ae   :  { %5870 = vmatpush.msra.mxu0 %v3486_v42  ;;  %5923 = vmatpush.msra.mxu2 %v3816_v8  ;;  %v3744_v42 = vld [vmem:[%s15789_s3 + $0x9b0] sm:$0xff]  ;;  %v3990_v8 = vld [vmem:[%s15789_s3 + $0x1160] sm:$0xff] }
 0x4af   :  { %5890 = vmatpush.msrb.mxu1 %v3582_v37  ;;  %5818 = vmatpush.msra.mxu3 %v4493_v31  ;;  %v3654_v37 = vld [vmem:[%s15789_s3 + $0x6e0] sm:$0xff]  ;;  %v3888_v31 = vld [vmem:[%s15789_s3 + $0xe30] sm:$0xff] }
 0x4b0   :  { %5871 = vmatpush.msra.mxu0 %v3480_v23  ;;  %5924 = vmatpush.msra.mxu2 %v3810_v30  ;;  %v3738_v23 = vld [vmem:[%s15789_s3 + $0x980] sm:$0xff]  ;;  %v3984_v30 = vld [vmem:[%s15789_s3 + $0x1130] sm:$0xff] }
 0x4b1   :  { %5819 = vmatmul.f32.vlgmr.msra.gmra.mxu3 %v12026_v16  ;;  %5891 = vmatpush.msrb.mxu1 %v3576_v22  ;;  %v3648_v22 = vld [vmem:[%s15789_s3 + $0x6b0] sm:$0xff] }
 0x4b2   :  { %5903 = vmatpush.msrb.mxu3 %v3720_v40  ;;  %5872 = vmatpush.msra.mxu0 %v3474_v13  ;;  %v3882_v40 = vld [vmem:[%s15789_s3 + $0xe00] sm:$0xff]  ;;  %v3732_v13 = vld [vmem:[%s15789_s3 + $0x950] sm:$0xff] }
 0x4b3   :  { %5925 = vmatpush.msra.mxu2 %v3804_v33  ;;  %5892 = vmatpush.msrb.mxu1 %v3570_v55  ;;  %v3978_v33 = vld [vmem:[%s15789_s3 + $0x1100] sm:$0xff] }
 0x4b4   :  { %5904 = vmatpush.msrb.mxu3 %v3714_v39  ;;  %5873 = vmatpush.msra.mxu0 %v3468_v38  ;;  %v3642_v55 = vld [vmem:[%s15789_s3 + $0x680] sm:$0xff]  ;;  %v3876_v39 = vld [vmem:[%s15789_s3 + $0xdd0] sm:$0xff] }
 0x4b5   :  { %5926 = vmatpush.msra.mxu2 %v3798_v2  ;;  %5893 = vmatpush.msrb.mxu1 %v3564_v10  ;;  %v3726_v38 = vld [vmem:[%s15789_s3 + $0x920] sm:$0xff]  ;;  %v3972_v2 = vld [vmem:[%s15789_s3 + $0x10d0] sm:$0xff] }
 0x4b6   :  { %5905 = vmatpush.msrb.mxu3 %v3708_v54  ;;  %5874 = vmatpush.msra.mxu0 %v3462_v56  ;;  %v3636_v10 = vld [vmem:[%s15789_s3 + $0x650] sm:$0xff]  ;;  %v3870_v54 = vld [vmem:[%s15789_s3 + $0xda0] sm:$0xff] }
 0x4b7   :  { %5927 = vmatpush.msra.mxu2 %v3792_v15  ;;  %5894 = vmatpush.msrb.mxu1 %v3558_v61  ;;  %v4200_v56 = vld [vmem:[%s15789_s3 + $0x17f0] sm:$0xff]  ;;  %v3966_v15 = vld [vmem:[%s15789_s3 + $0x10a0] sm:$0xff] }
 0x4b8   :  { %5906 = vmatpush.msrb.mxu3 %v3702_v53  ;;  %5875 = vmatpush.msra.mxu0 %v3456_v0  ;;  %v3630_v61 = vld [vmem:[%s15789_s3 + $0x620] sm:$0xff]  ;;  %v3864_v53 = vld [vmem:[%s15789_s3 + $0xd70] sm:$0xff] }
 0x4b9   :  { %5928 = vmatpush.msra.mxu2 %v3786_v32  ;;  %5895 = vmatpush.msrb.mxu1 %v3552_v41  ;;  %v4194_v0 = vld [vmem:[%s15789_s3 + $0x17c0] sm:$0xff]  ;;  %v3960_v32 = vld [vmem:[%s15789_s3 + $0x1070] sm:$0xff] }
 0x4ba   :  { %5907 = vmatpush.msrb.mxu3 %v3696_v63  ;;  %5876 = vmatpush.msra.mxu0 %v3450_v52  ;;  %v4104_v41 = vld [vmem:[%s15789_s3 + $0x14f0] sm:$0xff]  ;;  %v3858_v63 = vld [vmem:[%s15789_s3 + $0xd40] sm:$0xff] }
 0x4bb   :  { %5929 = vmatpush.msra.mxu2 %v3780_v51  ;;  %5896 = vmatpush.msrb.mxu1 %v3546_v34  ;;  %v4188_v52 = vld [vmem:[%s15789_s3 + $0x1790] sm:$0xff]  ;;  %v3954_v51 = vld [vmem:[%s15789_s3 + $0x1040] sm:$0xff] }
 0x4bc   :  { %5908 = vmatpush.msrb.mxu3 %v3690_v20  ;;  %5877 = vmatpush.msra.mxu0 %v3444_v5  ;;  %v4098_v34 = vld [vmem:[%s15789_s3 + $0x14c0] sm:$0xff]  ;;  %v3852_v20 = vld [vmem:[%s15789_s3 + $0xd10] sm:$0xff] }
 0x4bd   :  { %5930 = vmatpush.msra.mxu2 %v3774_v19  ;;  %5897 = vmatpush.msrb.mxu1 %v3540_v1  ;;  %v4182_v5 = vld [vmem:[%s15789_s3 + $0x1760] sm:$0xff]  ;;  %v3948_v19 = vld [vmem:[%s15789_s3 + $0x1010] sm:$0xff] }
 0x4be   :  { %5909 = vmatpush.msrb.mxu3 %v3684_v46  ;;  %5878 = vmatpush.msra.mxu0 %v3438_v36  ;;  %v4092_v1 = vld [vmem:[%s15789_s3 + $0x1490] sm:$0xff]  ;;  %v3846_v46 = vld [vmem:[%s15789_s3 + $0xce0] sm:$0xff] }
 0x4bf   :  { %5931 = vmatpush.msra.mxu2 %v3768_v50  ;;  %5879 = vmatmul.f32.vlgmr.msra.gmra.mxu0 %v11461_v4  ;;  %v4176_v36 = vld [vmem:[%s15789_s3 + $0x1730] sm:$0xff]  ;;  %v3942_v50 = vld [vmem:[%s15789_s3 + $0xfe0] sm:$0xff] }
 0x4c0   :  { %5898 = vmatpush.msrb.mxu1 %v3534_v9  ;;  %5910 = vmatpush.msrb.mxu3 %v3678_v35  ;;  %v4086_v9 = vld [vmem:[%s15789_s3 + $0x1460] sm:$0xff]  ;;  %v3840_v35 = vld [vmem:[%s15789_s3 + $0xcb0] sm:$0xff] }
 0x4c1   :  { %5943 = vmatpush.msrb.mxu0 %v3912_v47  ;;  %5899 = vmatmul.f32.vlgmr.msrb.gmra.mxu1 %v11509_v49  ;;  %v4170_v47 = vld [vmem:[%s15789_s3 + $0x1700] sm:$0xff] }
 0x4c2   :  { %5932 = vmatpush.msra.mxu2 %v3762_v60  ;;  %5963 = vmatpush.msra.mxu1 %v4008_v25  ;;  %v3936_v60 = vld [vmem:[%s15789_s3 + $0xfb0] sm:$0xff] }
 0x4c3   :  { %5911 = vmatpush.msrb.mxu3 %v3672_v21  ;;  %5944 = vmatpush.msrb.mxu0 %v3906_v6  ;;  %v4080_v25 = vld [vmem:[%s15789_s3 + $0x1430] sm:$0xff]  ;;  %v3834_v21 = vld [vmem:[%s15789_s3 + $0xc80] sm:$0xff] }
 0x4c4   :  { %5933 = vmatpush.msra.mxu2 %v3756_v14  ;;  %5964 = vmatpush.msra.mxu1 %v4002_v24  ;;  %v4164_v6 = vld [vmem:[%s15789_s3 + $0x16d0] sm:$0xff]  ;;  %v3930_v14 = vld [vmem:[%s15789_s3 + $0xf80] sm:$0xff] }
 0x4c5   :  { %5912 = vmatpush.msrb.mxu3 %v3666_v3  ;;  %5945 = vmatpush.msrb.mxu0 %v3900_v26  ;;  %v4074_v24 = vld [vmem:[%s15789_s3 + $0x1400] sm:$0xff]  ;;  %v3828_v3 = vld [vmem:[%s15789_s3 + $0xc50] sm:$0xff] }
 0x4c6   :  { %5934 = vmatpush.msra.mxu2 %v3750_v45  ;;  %5965 = vmatpush.msra.mxu1 %v3996_v58  ;;  %v4158_v26 = vld [vmem:[%s15789_s3 + $0x16a0] sm:$0xff]  ;;  %v3924_v45 = vld [vmem:[%s15789_s3 + $0xf50] sm:$0xff] }
 0x4c7   :  { %5913 = vmatpush.msrb.mxu3 %v3660_v27  ;;  %5946 = vmatpush.msrb.mxu0 %v3894_v48  ;;  %v4068_v58 = vld [vmem:[%s15789_s3 + $0x13d0] sm:$0xff]  ;;  %v3822_v27 = vld [vmem:[%s15789_s3 + $0xc20] sm:$0xff] }
 0x4c8   :  { %5935 = vmatpush.msra.mxu2 %v3744_v42  ;;  %5966 = vmatpush.msra.mxu1 %v3990_v8  ;;  %v4152_v48 = vld [vmem:[%s15789_s3 + $0x1670] sm:$0xff]  ;;  %v3918_v42 = vld [vmem:[%s15789_s3 + $0xf20] sm:$0xff] }
 0x4c9   :  { %5914 = vmatpush.msrb.mxu3 %v3654_v37  ;;  %5947 = vmatpush.msrb.mxu0 %v3888_v31  ;;  %v4062_v8 = vld [vmem:[%s15789_s3 + $0x13a0] sm:$0xff]  ;;  %v4296_v37 = vld [vmem:[%s15789_s3 + $0x1af0] sm:$0xff] }
 0x4ca   :  { %5936 = vmatpush.msra.mxu2 %v3738_v23  ;;  %5967 = vmatpush.msra.mxu1 %v3984_v30  ;;  %v4146_v31 = vld [vmem:[%s15789_s3 + $0x1640] sm:$0xff]  ;;  %v4392_v23 = vld [vmem:[%s15789_s3 + $0x1df0] sm:$0xff] }
 0x4cb   :  { %5915 = vmatpush.msrb.mxu3 %v3648_v22  ;;  %5948 = vmatpush.msrb.mxu0 %v3882_v40  ;;  %v4056_v30 = vld [vmem:[%s15789_s3 + $0x1370] sm:$0xff]  ;;  %v4290_v22 = vld [vmem:[%s15789_s3 + $0x1ac0] sm:$0xff] }
 0x4cc   :  { %5937 = vmatpush.msra.mxu2 %v3732_v13  ;;  %5968 = vmatpush.msra.mxu1 %v3978_v33  ;;  %v4140_v40 = vld [vmem:[%s15789_s3 + $0x1610] sm:$0xff]  ;;  %v4386_v13 = vld [vmem:[%s15789_s3 + $0x1dc0] sm:$0xff] }
 0x4cd   :  { %5916 = vmatpush.msrb.mxu3 %v3642_v55  ;;  %5949 = vmatpush.msrb.mxu0 %v3876_v39  ;;  %v4050_v33 = vld [vmem:[%s15789_s3 + $0x1340] sm:$0xff]  ;;  %v4284_v55 = vld [vmem:[%s15789_s3 + $0x1a90] sm:$0xff] }
 0x4ce   :  { %5938 = vmatpush.msra.mxu2 %v3726_v38  ;;  %5969 = vmatpush.msra.mxu1 %v3972_v2  ;;  %v4134_v39 = vld [vmem:[%s15789_s3 + $0x15e0] sm:$0xff]  ;;  %v4380_v38 = vld [vmem:[%s15789_s3 + $0x1d90] sm:$0xff] }
 0x4cf   :  { %5917 = vmatpush.msrb.mxu3 %v3636_v10  ;;  %5939 = vmatmul.f32.vlgmr.msra.gmra.mxu2 %v11520_v11  ;;  %v4044_v2 = vld [vmem:[%s15789_s3 + $0x1310] sm:$0xff]  ;;  %v4278_v10 = vld [vmem:[%s15789_s3 + $0x1a60] sm:$0xff] }
 0x4d0   :  { %5950 = vmatpush.msrb.mxu0 %v3870_v54  ;;  %6003 = vmatpush.msrb.mxu2 %v4200_v56  ;;  %v4128_v54 = vld [vmem:[%s15789_s3 + $0x15b0] sm:$0xff]  ;;  %v4374_v56 = vld [vmem:[%s15789_s3 + $0x1d60] sm:$0xff] }
 0x4d1   :  { %5970 = vmatpush.msra.mxu1 %v3966_v15  ;;  %5918 = vmatpush.msrb.mxu3 %v3630_v61  ;;  %v4038_v15 = vld [vmem:[%s15789_s3 + $0x12e0] sm:$0xff]  ;;  %v4272_v61 = vld [vmem:[%s15789_s3 + $0x1a30] sm:$0xff] }
 0x4d2   :  { %5951 = vmatpush.msrb.mxu0 %v3864_v53  ;;  %6004 = vmatpush.msrb.mxu2 %v4194_v0  ;;  %v4122_v53 = vld [vmem:[%s15789_s3 + $0x1580] sm:$0xff]  ;;  %v4368_v0 = vld [vmem:[%s15789_s3 + $0x1d30] sm:$0xff] }
 0x4d3   :  { %5919 = vmatmul.f32.vlgmr.msrb.gmra.mxu3 %v11511_v12  ;;  %5971 = vmatpush.msra.mxu1 %v3960_v32  ;;  %v4032_v32 = vld [vmem:[%s15789_s3 + $0x12b0] sm:$0xff] }
 0x4d4   :  { %5983 = vmatpush.msra.mxu3 %v4104_v41  ;;  %5952 = vmatpush.msrb.mxu0 %v3858_v63  ;;  %v4266_v41 = vld [vmem:[%s15789_s3 + $0x1a00] sm:$0xff]  ;;  %v4116_v63 = vld [vmem:[%s15789_s3 + $0x1550] sm:$0xff] }
 0x4d5   :  { %6005 = vmatpush.msrb.mxu2 %v4188_v52  ;;  %5972 = vmatpush.msra.mxu1 %v3954_v51  ;;  %v4362_v52 = vld [vmem:[%s15789_s3 + $0x1d00] sm:$0xff] }
 0x4d6   :  { %5984 = vmatpush.msra.mxu3 %v4098_v34  ;;  %5953 = vmatpush.msrb.mxu0 %v3852_v20  ;;  %v4026_v51 = vld [vmem:[%s15789_s3 + $0x1280] sm:$0xff]  ;;  %v4260_v34 = vld [vmem:[%s15789_s3 + $0x19d0] sm:$0xff] }
 0x4d7   :  { %6006 = vmatpush.msrb.mxu2 %v4182_v5  ;;  %5973 = vmatpush.msra.mxu1 %v3948_v19  ;;  %v4110_v20 = vld [vmem:[%s15789_s3 + $0x1520] sm:$0xff]  ;;  %v4356_v5 = vld [vmem:[%s15789_s3 + $0x1cd0] sm:$0xff] }
 0x4d8   :  { %5985 = vmatpush.msra.mxu3 %v4092_v1  ;;  %5954 = vmatpush.msrb.mxu0 %v3846_v46  ;;  %v4020_v19 = vld [vmem:[%s15789_s3 + $0x1250] sm:$0xff]  ;;  %v4254_v1 = vld [vmem:[%s15789_s3 + $0x19a0] sm:$0xff] }
 0x4d9   :  { %6007 = vmatpush.msrb.mxu2 %v4176_v36  ;;  %5974 = vmatpush.msra.mxu1 %v3942_v50  ;;  %v4584_v46 = vld [vmem:[%s15789_s3 + $0x23f0] sm:$0xff]  ;;  %v4350_v36 = vld [vmem:[%s15789_s3 + $0x1ca0] sm:$0xff] }
 0x4da   :  { %5986 = vmatpush.msra.mxu3 %v4086_v9  ;;  %5955 = vmatpush.msrb.mxu0 %v3840_v35  ;;  %v4014_v50 = vld [vmem:[%s15789_s3 + $0x1220] sm:$0xff]  ;;  %v4248_v9 = vld [vmem:[%s15789_s3 + $0x1970] sm:$0xff] }
 0x4db   :  { %6008 = vmatpush.msrb.mxu2 %v4170_v47  ;;  %5975 = vmatpush.msra.mxu1 %v3936_v60  ;;  %v4578_v35 = vld [vmem:[%s15789_s3 + $0x23c0] sm:$0xff]  ;;  %v4344_v47 = vld [vmem:[%s15789_s3 + $0x1c70] sm:$0xff] }
 0x4dc   :  { %5987 = vmatpush.msra.mxu3 %v4080_v25  ;;  %5956 = vmatpush.msrb.mxu0 %v3834_v21  ;;  %v4488_v60 = vld [vmem:[%s15789_s3 + $0x20f0] sm:$0xff]  ;;  %v4242_v25 = vld [vmem:[%s15789_s3 + $0x1940] sm:$0xff] }
 0x4dd   :  { %6009 = vmatpush.msrb.mxu2 %v4164_v6  ;;  %5976 = vmatpush.msra.mxu1 %v3930_v14  ;;  %v4572_v21 = vld [vmem:[%s15789_s3 + $0x2390] sm:$0xff]  ;;  %v4338_v6 = vld [vmem:[%s15789_s3 + $0x1c40] sm:$0xff] }
 0x4de   :  { %5988 = vmatpush.msra.mxu3 %v4074_v24  ;;  %5957 = vmatpush.msrb.mxu0 %v3828_v3  ;;  %v4482_v14 = vld [vmem:[%s15789_s3 + $0x20c0] sm:$0xff]  ;;  %v4236_v24 = vld [vmem:[%s15789_s3 + $0x1910] sm:$0xff] }
 0x4df   :  { %6010 = vmatpush.msrb.mxu2 %v4158_v26  ;;  %5977 = vmatpush.msra.mxu1 %v3924_v45  ;;  %v4566_v3 = vld [vmem:[%s15789_s3 + $0x2360] sm:$0xff]  ;;  %v4332_v26 = vld [vmem:[%s15789_s3 + $0x1c10] sm:$0xff] }
 0x4e0   :  { %5989 = vmatpush.msra.mxu3 %v4068_v58  ;;  %5958 = vmatpush.msrb.mxu0 %v3822_v27  ;;  %v4476_v45 = vld [vmem:[%s15789_s3 + $0x2090] sm:$0xff]  ;;  %v4230_v58 = vld [vmem:[%s15789_s3 + $0x18e0] sm:$0xff] }
 0x4e1   :  { %6011 = vmatpush.msrb.mxu2 %v4152_v48  ;;  %5959 = vmatmul.f32.vlgmr.msrb.gmra.mxu0 %v11729_v57  ;;  %v4560_v27 = vld [vmem:[%s15789_s3 + $0x2330] sm:$0xff]  ;;  %v4326_v48 = vld [vmem:[%s15789_s3 + $0x1be0] sm:$0xff] }
 0x4e2   :  { %5978 = vmatpush.msra.mxu1 %v3918_v42  ;;  %5990 = vmatpush.msra.mxu3 %v4062_v8  ;;  %v4470_v42 = vld [vmem:[%s15789_s3 + $0x2060] sm:$0xff]  ;;  %v4224_v8 = vld [vmem:[%s15789_s3 + $0x18b0] sm:$0xff] }
 0x4e3   :  { %6023 = vmatpush.msra.mxu0 %v4296_v37  ;;  %5979 = vmatmul.f32.vlgmr.msra.gmra.mxu1 %v11782_v28  ;;  %v4554_v37 = vld [vmem:[%s15789_s3 + $0x2300] sm:$0xff] }
 0x4e4   :  { %6012 = vmatpush.msrb.mxu2 %v4146_v31  ;;  %6043 = vmatpush.msrb.mxu1 %v4392_v23  ;;  %v4320_v31 = vld [vmem:[%s15789_s3 + $0x1bb0] sm:$0xff] }
 0x4e5   :  { %5991 = vmatpush.msra.mxu3 %v4056_v30  ;;  %6024 = vmatpush.msra.mxu0 %v4290_v22  ;;  %v4464_v23 = vld [vmem:[%s15789_s3 + $0x2030] sm:$0xff]  ;;  %v4218_v30 = vld [vmem:[%s15789_s3 + $0x1880] sm:$0xff] }
 0x4e6   :  { %6013 = vmatpush.msrb.mxu2 %v4140_v40  ;;  %6044 = vmatpush.msrb.mxu1 %v4386_v13  ;;  %v4548_v22 = vld [vmem:[%s15789_s3 + $0x22d0] sm:$0xff]  ;;  %v4314_v40 = vld [vmem:[%s15789_s3 + $0x1b80] sm:$0xff] }
 0x4e7   :  { %5992 = vmatpush.msra.mxu3 %v4050_v33  ;;  %6025 = vmatpush.msra.mxu0 %v4284_v55  ;;  %v4458_v13 = vld [vmem:[%s15789_s3 + $0x2000] sm:$0xff]  ;;  %v4212_v33 = vld [vmem:[%s15789_s3 + $0x1850] sm:$0xff] }
 0x4e8   :  { %6014 = vmatpush.msrb.mxu2 %v4134_v39  ;;  %6045 = vmatpush.msrb.mxu1 %v4380_v38  ;;  %v4542_v55 = vld [vmem:[%s15789_s3 + $0x22a0] sm:$0xff]  ;;  %v4308_v39 = vld [vmem:[%s15789_s3 + $0x1b50] sm:$0xff] }
 0x4e9   :  { %5993 = vmatpush.msra.mxu3 %v4044_v2  ;;  %6026 = vmatpush.msra.mxu0 %v4278_v10  ;;  %v4452_v38 = vld [vmem:[%s15789_s3 + $0x1fd0] sm:$0xff]  ;;  %v4206_v2 = vld [vmem:[%s15789_s3 + $0x1820] sm:$0xff] }
 0x4ea   :  { %6015 = vmatpush.msrb.mxu2 %v4128_v54  ;;  %6046 = vmatpush.msrb.mxu1 %v4374_v56  ;;  %v4536_v10 = vld [vmem:[%s15789_s3 + $0x2270] sm:$0xff]  ;;  %v4302_v54 = vld [vmem:[%s15789_s3 + $0x1b20] sm:$0xff] }
 0x4eb   :  { %5994 = vmatpush.msra.mxu3 %v4038_v15  ;;  %6027 = vmatpush.msra.mxu0 %v4272_v61  ;;  %v4446_v56 = vld [vmem:[%s15789_s3 + $0x1fa0] sm:$0xff]  ;;  %v4680_v15 = vld [vmem:[%s15789_s3 + $0x26f0] sm:$0xff] }
 0x4ec   :  { %6016 = vmatpush.msrb.mxu2 %v4122_v53  ;;  %6047 = vmatpush.msrb.mxu1 %v4368_v0  ;;  %v4530_v61 = vld [vmem:[%s15789_s3 + $0x2240] sm:$0xff]  ;;  %v4704_v53 = vld [vmem:[%s15789_s3 + $0x27b0] sm:$0x3] }
 0x4ed   :  { %5995 = vmatpush.msra.mxu3 %v4032_v32  ;;  %6028 = vmatpush.msra.mxu0 %v4266_v41  ;;  %v4440_v0 = vld [vmem:[%s15789_s3 + $0x1f70] sm:$0xff]  ;;  %v4674_v32 = vld [vmem:[%s15789_s3 + $0x26c0] sm:$0xff] }
 0x4ee   :  { %6017 = vmatpush.msrb.mxu2 %v4116_v63  ;;  %6048 = vmatpush.msrb.mxu1 %v4362_v52  ;;  %v4524_v41 = vld [vmem:[%s15789_s3 + $0x2210] sm:$0xff]  ;;  %v4698_v63 = vld [vmem:[%s15789_s3 + $0x2780] sm:$0xff] }
 0x4ef   :  { %5996 = vmatpush.msra.mxu3 %v4026_v51  ;;  %6029 = vmatpush.msra.mxu0 %v4260_v34  ;;  %v4434_v52 = vld [vmem:[%s15789_s3 + $0x1f40] sm:$0xff]  ;;  %v4668_v51 = vld [vmem:[%s15789_s3 + $0x2690] sm:$0xff] }
 0x4f0   :  { %6018 = vmatpush.msrb.mxu2 %v4110_v20  ;;  %6049 = vmatpush.msrb.mxu1 %v4356_v5  ;;  %v4518_v34 = vld [vmem:[%s15789_s3 + $0x21e0] sm:$0xff]  ;;  %v4692_v20 = vld [vmem:[%s15789_s3 + $0x2750] sm:$0xff] }
 0x4f1   :  { %5997 = vmatpush.msra.mxu3 %v4020_v19  ;;  %6019 = vmatmul.f32.vlgmr.msrb.gmra.mxu2 %v11793_v62  ;;  %v4428_v5 = vld [vmem:[%s15789_s3 + $0x1f10] sm:$0xff]  ;;  %v4662_v19 = vld [vmem:[%s15789_s3 + $0x2660] sm:$0xff] }
 0x4f2   :  { %6030 = vmatpush.msra.mxu0 %v4254_v1  ;;  %6083 = vmatpush.msra.mxu2 %v4584_v46  ;;  %v4512_v1 = vld [vmem:[%s15789_s3 + $0x21b0] sm:$0xff]  ;;  %v4686_v46 = vld [vmem:[%s15789_s3 + $0x2720] sm:$0xff] }
 0x4f3   :  { %6050 = vmatpush.msrb.mxu1 %v4350_v36  ;;  %5998 = vmatpush.msra.mxu3 %v4014_v50  ;;  %v4422_v36 = vld [vmem:[%s15789_s3 + $0x1ee0] sm:$0xff]  ;;  %v4656_v50 = vld [vmem:[%s15789_s3 + $0x2630] sm:$0xff] }
 0x4f4   :  { %6031 = vmatpush.msra.mxu0 %v4248_v9  ;;  %6084 = vmatpush.msra.mxu2 %v4578_v35  ;;  %v3625_v9 = vld [vmem:[%s15789_s3 + $0x5f8] sm:$0xff]  ;;  %v4506_v35 = vld [vmem:[%s15789_s3 + $0x2180] sm:$0xff] }
 0x4f5   :  { %5999 = vmatmul.f32.vlgmr.msra.gmra.mxu3 %v11784_v29  ;;  %6051 = vmatpush.msrb.mxu1 %v4344_v47  ;;  %v4416_v47 = vld [vmem:[%s15789_s3 + $0x1eb0] sm:$0xff] }
 0x4f6   :  { %6063 = vmatpush.msrb.mxu3 %v4488_v60  ;;  %6032 = vmatpush.msra.mxu0 %v4242_v25  ;;  %v4650_v60 = vld [vmem:[%s15789_s3 + $0x2600] sm:$0xff]  ;;  %v3619_v25 = vld [vmem:[%s15789_s3 + $0x5c8] sm:$0xff] }
 0x4f7   :  { %6085 = vmatpush.msra.mxu2 %v4572_v21  ;;  %6052 = vmatpush.msrb.mxu1 %v4338_v6  ;;  %v4500_v21 = vld [vmem:[%s15789_s3 + $0x2150] sm:$0xff]  ;;  %v4410_v6 = vld [vmem:[%s15789_s3 + $0x1e80] sm:$0xff] }
 0x4f8   :  { %6064 = vmatpush.msrb.mxu3 %v4482_v14  ;;  %6033 = vmatpush.msra.mxu0 %v4236_v24  ;;  %v4644_v14 = vld [vmem:[%s15789_s3 + $0x25d0] sm:$0xff]  ;;  %v3613_v24 = vld [vmem:[%s15789_s3 + $0x598] sm:$0xff] }
 0x4f9   :  { %6086 = vmatpush.msra.mxu2 %v4566_v3  ;;  %6053 = vmatpush.msrb.mxu1 %v4332_v26  ;;  %v4494_v3 = vld [vmem:[%s15789_s3 + $0x2120] sm:$0xff]  ;;  %v4404_v26 = vld [vmem:[%s15789_s3 + $0x1e50] sm:$0xff] }
 0x4fa   :  { %6065 = vmatpush.msrb.mxu3 %v4476_v45  ;;  %6034 = vmatpush.msra.mxu0 %v4230_v58  ;;  %v4638_v45 = vld [vmem:[%s15789_s3 + $0x25a0] sm:$0xff]  ;;  %v3607_v58 = vld [vmem:[%s15789_s3 + $0x568] sm:$0xff] }
 0x4fb   :  { %6087 = vmatpush.msra.mxu2 %v4560_v27  ;;  %6054 = vmatpush.msrb.mxu1 %v4326_v48  ;;  %v3721_v27 = vld [vmem:[%s15789_s3 + $0x8f8] sm:$0xff]  ;;  %v4398_v48 = vld [vmem:[%s15789_s3 + $0x1e20] sm:$0xff] }
 0x4fc   :  { %6066 = vmatpush.msrb.mxu3 %v4470_v42  ;;  %6035 = vmatpush.msra.mxu0 %v4224_v8  ;;  %v4632_v42 = vld [vmem:[%s15789_s3 + $0x2570] sm:$0xff]  ;;  %v3601_v8 = vld [vmem:[%s15789_s3 + $0x538] sm:$0xff] }
 0x4fd   :  { %6088 = vmatpush.msra.mxu2 %v4554_v37  ;;  %6055 = vmatpush.msrb.mxu1 %v4320_v31  ;;  %v3715_v37 = vld [vmem:[%s15789_s3 + $0x8c8] sm:$0xff]  ;;  %v4626_v31 = vld [vmem:[%s15789_s3 + $0x2540] sm:$0xff] }
 0x4fe   :  { %6067 = vmatpush.msrb.mxu3 %v4464_v23  ;;  %6036 = vmatpush.msra.mxu0 %v4218_v30  ;;  %v3529_v23 = vld [vmem:[%s15789_s3 + $0x2f8] sm:$0xff]  ;;  %v3595_v30 = vld [vmem:[%s15789_s3 + $0x508] sm:$0xff] }
 0x4ff   :  { %6089 = vmatpush.msra.mxu2 %v4548_v22  ;;  %6056 = vmatpush.msrb.mxu1 %v4314_v40  ;;  %v3709_v22 = vld [vmem:[%s15789_s3 + $0x898] sm:$0xff]  ;;  %v4620_v40 = vld [vmem:[%s15789_s3 + $0x2510] sm:$0xff] }
 0x500   :  { %6068 = vmatpush.msrb.mxu3 %v4458_v13  ;;  %6037 = vmatpush.msra.mxu0 %v4212_v33  ;;  %v3523_v13 = vld [vmem:[%s15789_s3 + $0x2c8] sm:$0xff]  ;;  %v3589_v33 = vld [vmem:[%s15789_s3 + $0x4d8] sm:$0xff] }
 0x501   :  { %6090 = vmatpush.msra.mxu2 %v4542_v55  ;;  %6057 = vmatpush.msrb.mxu1 %v4308_v39  ;;  %v3703_v55 = vld [vmem:[%s15789_s3 + $0x868] sm:$0xff]  ;;  %v4614_v39 = vld [vmem:[%s15789_s3 + $0x24e0] sm:$0xff] }
 0x502   :  { %6069 = vmatpush.msrb.mxu3 %v4452_v38  ;;  %6038 = vmatpush.msra.mxu0 %v4206_v2  ;;  %v3517_v38 = vld [vmem:[%s15789_s3 + $0x298] sm:$0xff]  ;;  %v3583_v2 = vld [vmem:[%s15789_s3 + $0x4a8] sm:$0xff] }
 0x503   :  { %6091 = vmatpush.msra.mxu2 %v4536_v10  ;;  %6039 = vmatmul.f32.vlgmr.msra.gmra.mxu0 %v11977_v17  ;;  %v3697_v10 = vld [vmem:[%s15789_s3 + $0x838] sm:$0xff] }
 0x504   :  { %6058 = vmatpush.msrb.mxu1 %v4302_v54  ;;  %6070 = vmatpush.msrb.mxu3 %v4446_v56  ;;  %v4608_v54 = vld [vmem:[%s15789_s3 + $0x24b0] sm:$0xff]  ;;  %v3511_v56 = vld [vmem:[%s15789_s3 + $0x268] sm:$0xff] }
 0x505   :  { %6103 = vmatpush.msrb.mxu0 %v4680_v15  ;;  %6059 = vmatmul.f32.vlgmr.msrb.gmra.mxu1 %v12019_v59  ;;  %v3577_v15 = vld [vmem:[%s15789_s3 + $0x478] sm:$0xff] }
 0x506   :  { %6092 = vmatpush.msra.mxu2 %v4530_v61  ;;  %6759 = vmatpush.msk.msra.mxu1 %vm4724_vm1, %v4704_v53  ;;  %v3691_v61 = vld [vmem:[%s15789_s3 + $0x808] sm:$0xff]  ;;  %v4602_v53 = vld [vmem:[%s15789_s3 + $0x2480] sm:$0xff] }
 0x507   :  { %6071 = vmatpush.msrb.mxu3 %v4440_v0  ;;  %6104 = vmatpush.msrb.mxu0 %v4674_v32  ;;  %v3505_v0 = vld [vmem:[%s15789_s3 + $0x238] sm:$0xff]  ;;  %v3571_v32 = vld [vmem:[%s15789_s3 + $0x448] sm:$0xff] }
 0x508   :  { %6093 = vmatpush.msra.mxu2 %v4524_v41  ;;  %6136 = vmatpush.msra.mxu1 %v4698_v63  ;;  %v3685_v41 = vld [vmem:[%s15789_s3 + $0x7d8] sm:$0xff]  ;;  %v4596_v63 = vld [vmem:[%s15789_s3 + $0x2450] sm:$0xff] }
 0x509   :  { %6072 = vmatpush.msrb.mxu3 %v4434_v52  ;;  %6105 = vmatpush.msrb.mxu0 %v4668_v51  ;;  %v3499_v52 = vld [vmem:[%s15789_s3 + $0x208] sm:$0xff]  ;;  %v3565_v51 = vld [vmem:[%s15789_s3 + $0x418] sm:$0xff] }
 0x50a   :  { %6094 = vmatpush.msra.mxu2 %v4518_v34  ;;  %6137 = vmatpush.msra.mxu1 %v4692_v20  ;;  %v3679_v34 = vld [vmem:[%s15789_s3 + $0x7a8] sm:$0xff]  ;;  %v4590_v20 = vld [vmem:[%s15789_s3 + $0x2420] sm:$0xff] }
 0x50b   :  { %6073 = vmatpush.msrb.mxu3 %v4428_v5  ;;  %6106 = vmatpush.msrb.mxu0 %v4662_v19  ;;  %v3493_v5 = vld [vmem:[%s15789_s3 + $0x1d8] sm:$0xff]  ;;  %v3559_v19 = vld [vmem:[%s15789_s3 + $0x3e8] sm:$0xff] }
 0x50c   :  { %6095 = vmatpush.msra.mxu2 %v4512_v1  ;;  %6138 = vmatpush.msra.mxu1 %v4686_v46  ;;  %v3673_v1 = vld [vmem:[%s15789_s3 + $0x778] sm:$0xff]  ;;  %v3487_v46 = vld [vmem:[%s15789_s3 + $0x1a8] sm:$0xff] }
 0x50d   :  { %6074 = vmatpush.msrb.mxu3 %v4422_v36  ;;  %6107 = vmatpush.msrb.mxu0 %v4656_v50  ;;  %v3817_v36 = vld [vmem:[%s15789_s3 + $0xbf8] sm:$0xff] }
 0x50e   :  { %6163 = vmatpush.msrb.mxu1 %v3625_v9  ;;  %6096 = vmatpush.msra.mxu2 %v4506_v35  ;;  %v3553_v50 = vld [vmem:[%s15789_s3 + $0x3b8] sm:$0xff]  ;;  %v3667_v9 = vld [vmem:[%s15789_s3 + $0x748] sm:$0xff] }
 0x50f   :  { %6760 = vmatmul.msk.f32.vlgmr.msra.gmra.mxu1 %vm4720_vm2, %v12293_v7  ;;  %6075 = vmatpush.msrb.mxu3 %v4416_v47  ;;  %v3481_v35 = vld [vmem:[%s15789_s3 + $0x178] sm:$0xff]  ;;  %v3811_v47 = vld [vmem:[%s15789_s3 + $0xbc8] sm:$0xff] }
 0x510   :  { %6108 = vmatpush.msrb.mxu0 %v4650_v60  ;;  %6164 = vmatpush.msrb.mxu1 %v3619_v25  ;;  %v3547_v60 = vld [vmem:[%s15789_s3 + $0x388] sm:$0xff]  ;;  %v3661_v25 = vld [vmem:[%s15789_s3 + $0x718] sm:$0xff] }
 0x511   :  { %6097 = vmatpush.msra.mxu2 %v4500_v21  ;;  %6076 = vmatpush.msrb.mxu3 %v4410_v6  ;;  %v3475_v21 = vld [vmem:[%s15789_s3 + $0x148] sm:$0xff]  ;;  %v3805_v6 = vld [vmem:[%s15789_s3 + $0xb98] sm:$0xff] }
 0x512   :  { %6109 = vmatpush.msrb.mxu0 %v4644_v14  ;;  %6165 = vmatpush.msrb.mxu1 %v3613_v24  ;;  %v3541_v14 = vld [vmem:[%s15789_s3 + $0x358] sm:$0xff]  ;;  %v3655_v24 = vld [vmem:[%s15789_s3 + $0x6e8] sm:$0xff] }
 0x513   :  { %6098 = vmatpush.msra.mxu2 %v4494_v3  ;;  %6077 = vmatpush.msrb.mxu3 %v4404_v26  ;;  %v3469_v3 = vld [vmem:[%s15789_s3 + $0x118] sm:$0xff]  ;;  %v3799_v26 = vld [vmem:[%s15789_s3 + $0xb68] sm:$0xff] }
 0x514   :  { %6099 = vmatmul.f32.vlgmr.msra.gmra.mxu2 %v12026_v16  ;;  %6110 = vmatpush.msrb.mxu0 %v4638_v45  ;;  %v3535_v45 = vld [vmem:[%s15789_s3 + $0x328] sm:$0xff] }
 0x515   :  { %6166 = vmatpush.msrb.mxu1 %v3607_v58  ;;  %6183 = vmatpush.msrb.mxu2 %v3721_v27  ;;  %v3649_v58 = vld [vmem:[%s15789_s3 + $0x6b8] sm:$0xff]  ;;  %v3463_v27 = vld [vmem:[%s15789_s3 + $0xe8] sm:$0xff] }
 0x516   :  { %6078 = vmatpush.msrb.mxu3 %v4398_v48  ;;  %6111 = vmatpush.msrb.mxu0 %v4632_v42  ;;  %v3793_v48 = vld [vmem:[%s15789_s3 + $0xb38] sm:$0xff] }
 0x517   :  { %6167 = vmatpush.msrb.mxu1 %v3601_v8  ;;  %6184 = vmatpush.msrb.mxu2 %v3715_v37  ;;  %v4009_v42 = vld [vmem:[%s15789_s3 + $0x11f8] sm:$0xff]  ;;  %v3643_v8 = vld [vmem:[%s15789_s3 + $0x688] sm:$0xff] }
 0x518   :  { %6079 = vmatmul.f32.vlgmr.msrb.gmra.mxu3 %v12021_v43  ;;  %6112 = vmatpush.msrb.mxu0 %v4626_v31  ;;  %v3457_v37 = vld [vmem:[%s15789_s3 + $0xb8] sm:$0xff]  ;;  %v3787_v31 = vld [vmem:[%s15789_s3 + $0xb08] sm:$0xff] }
 0x519   :  { %6143 = vmatpush.msra.mxu3 %v3529_v23  ;;  %6168 = vmatpush.msrb.mxu1 %v3595_v30  ;;  %v4003_v23 = vld [vmem:[%s15789_s3 + $0x11c8] sm:$0xff]  ;;  %v3637_v30 = vld [vmem:[%s15789_s3 + $0x658] sm:$0xff] }
 0x51a   :  { %6185 = vmatpush.msrb.mxu2 %v3709_v22  ;;  %6113 = vmatpush.msrb.mxu0 %v4620_v40  ;;  %v3451_v22 = vld [vmem:[%s15789_s3 + $0x88] sm:$0xff]  ;;  %v3997_v40 = vld [vmem:[%s15789_s3 + $0x1198] sm:$0xff] }
 0x51b   :  { %6144 = vmatpush.msra.mxu3 %v3523_v13  ;;  %6169 = vmatpush.msrb.mxu1 %v3589_v33  ;;  %v3631_v13 = vld [vmem:[%s15789_s3 + $0x628] sm:$0xff]  ;;  %v3445_v33 = vld [vmem:[%s15789_s3 + $0x58] sm:$0xff] }
 0x51c   :  { %6186 = vmatpush.msrb.mxu2 %v3703_v55  ;;  %6114 = vmatpush.msrb.mxu0 %v4614_v39  ;;  %v3775_v55 = vld [vmem:[%s15789_s3 + $0xaa8] sm:$0xff] }
 0x51d   :  { %6145 = vmatpush.msra.mxu3 %v3517_v38  ;;  %6170 = vmatpush.msrb.mxu1 %v3583_v2  ;;  %v3991_v39 = vld [vmem:[%s15789_s3 + $0x1168] sm:$0xff]  ;;  %v4105_v38 = vld [vmem:[%s15789_s3 + $0x14f8] sm:$0xff]  ;;  %v14894_v2 = vpop.f32.mrf.mxu2 }
 0x51e   :  { %6187 = vmatpush.msrb.mxu2 %v3697_v10  ;;  %6115 = vmatpush.msrb.mxu0 %v4608_v54  ;;  %v3439_v10 = vld [vmem:[%s15789_s3 + $0x28] sm:$0xff]  ;;  %v3769_v54 = vld [vmem:[%s15789_s3 + $0xa78] sm:$0xff] }
 0x51f   :  { %6146 = vmatpush.msra.mxu3 %v3511_v56  ;;  %6171 = vmatpush.msrb.mxu1 %v3577_v15  ;;  %v3985_v56 = vld [vmem:[%s15789_s3 + $0x1138] sm:$0xff]  ;;  %v4099_v15 = vld [vmem:[%s15789_s3 + $0x14c8] sm:$0xff] }
 0x520   :  { %6188 = vmatpush.msrb.mxu2 %v3691_v61  ;;  %6116 = vmatpush.msrb.mxu0 %v4602_v53  ;;  %v3763_v61 = vld [vmem:[%s15789_s3 + $0xa48] sm:$0xff] }
 0x521   :  { %6147 = vmatpush.msra.mxu3 %v3505_v0  ;;  %6172 = vmatpush.msrb.mxu1 %v3571_v32  ;;  %v3979_v53 = vld [vmem:[%s15789_s3 + $0x1108] sm:$0xff]  ;;  %v4093_v0 = vld [vmem:[%s15789_s3 + $0x1498] sm:$0xff] }
 0x522   :  { %6189 = vmatpush.msrb.mxu2 %v3685_v41  ;;  %6117 = vmatpush.msrb.mxu0 %v4596_v63  ;;  %v3757_v32 = vld [vmem:[%s15789_s3 + $0xa18] sm:$0xff]  ;;  %v3907_v41 = vld [vmem:[%s15789_s3 + $0xec8] sm:$0xff] }
 0x523   :  { %6148 = vmatpush.msra.mxu3 %v3499_v52  ;;  %6173 = vmatpush.msrb.mxu1 %v3565_v51  ;;  %v3973_v63 = vld [vmem:[%s15789_s3 + $0x10d8] sm:$0xff]  ;;  %v4087_v52 = vld [vmem:[%s15789_s3 + $0x1468] sm:$0xff] }
 0x524   :  { %6190 = vmatpush.msrb.mxu2 %v3679_v34  ;;  %6118 = vmatpush.msrb.mxu0 %v4590_v20  ;;  %v3751_v51 = vld [vmem:[%s15789_s3 + $0x9e8] sm:$0xff]  ;;  %v14943_v20 = vpop.f32.mrf.mxu0 }
 0x525   :  { %6149 = vmatpush.msra.mxu3 %v3493_v5  ;;  %6174 = vmatpush.msrb.mxu1 %v3559_v19  ;;  %v3967_v34 = vld [vmem:[%s15789_s3 + $0x10a8] sm:$0xff]  ;;  %v14945_v5 = vpop.f32.mrf.mxu2  ;;  %v4081_v19 = vld [vmem:[%s15789_s3 + $0x1438] sm:$0xff] }
 0x526   :  { %6191 = vmatpush.msrb.mxu2 %v3673_v1  ;;  %6119 = vmatmul.f32.vlgmr.msrb.gmra.mxu0 %v12186_v18  ;;  %v3745_v1 = vld [vmem:[%s15789_s3 + $0x9b8] sm:$0xff] }
 0x527   :  { %6150 = vmatpush.msra.mxu3 %v3487_v46  ;;  %6203 = vmatpush.msra.mxu0 %v3817_v36  ;;  %v3895_v46 = vld [vmem:[%s15789_s3 + $0xe68] sm:$0xff]  ;;  %v3961_v36 = vld [vmem:[%s15789_s3 + $0x1078] sm:$0xff] }
 0x528   :  { %6175 = vmatpush.msrb.mxu1 %v3553_v50  ;;  %6192 = vmatpush.msrb.mxu2 %v3667_v9  ;;  %v14959_v50 = vpop.f32.mrf.mxu1  ;;  %v4075_v9 = vld [vmem:[%s15789_s3 + $0x1408] sm:$0xff] }
 0x529   :  { %6151 = vmatpush.msra.mxu3 %v3481_v35  ;;  %6204 = vmatpush.msra.mxu0 %v3811_v47  ;;  %v3739_v35 = vld [vmem:[%s15789_s3 + $0x988] sm:$0xff]  ;;  %v3889_v47 = vld [vmem:[%s15789_s3 + $0xe38] sm:$0xff] }
 0x52a   :  { %6176 = vmatpush.msrb.mxu1 %v3547_v60  ;;  %6193 = vmatpush.msrb.mxu2 %v3661_v25  ;;  %v3955_v60 = vld [vmem:[%s15789_s3 + $0x1048] sm:$0xff]  ;;  %v4069_v25 = vld [vmem:[%s15789_s3 + $0x13d8] sm:$0xff] }
 0x52b   :  { %6152 = vmatpush.msra.mxu3 %v3475_v21  ;;  %6205 = vmatpush.msra.mxu0 %v3805_v6  ;;  %v3733_v21 = vld [vmem:[%s15789_s3 + $0x958] sm:$0xff]  ;;  %v3883_v6 = vld [vmem:[%s15789_s3 + $0xe08] sm:$0xff] }
 0x52c   :  { %6177 = vmatpush.msrb.mxu1 %v3541_v14  ;;  %6194 = vmatpush.msrb.mxu2 %v3655_v24  ;;  %v3949_v14 = vld [vmem:[%s15789_s3 + $0x1018] sm:$0xff]  ;;  %v14985_v24 = vpop.f32.mrf.mxu3 }
 0x52d   :  { %6153 = vmatpush.msra.mxu3 %v3469_v3  ;;  %6206 = vmatpush.msra.mxu0 %v3799_v26  ;;  %v4063_v3 = vld [vmem:[%s15789_s3 + $0x13a8] sm:$0xff] }
 0x52e   :  { %6178 = vmatpush.msrb.mxu1 %v3535_v45  ;;  %6195 = vmatpush.msrb.mxu2 %v3649_v58  ;;  %v3727_v26 = vld [vmem:[%s15789_s3 + $0x928] sm:$0xff]  ;;  %v3877_v45 = vld [vmem:[%s15789_s3 + $0xdd8] sm:$0xff] }
 0x52f   :  { %6154 = vmatpush.msra.mxu3 %v3463_v27  ;;  %6179 = vmatmul.f32.vlgmr.msrb.gmra.mxu1 %v11509_v49  ;;  %v3781_v49 = vld [vmem:[%s15789_s3 + $0xad8] sm:$0xff]  ;;  %v3943_v58 = vld [vmem:[%s15789_s3 + $0xfe8] sm:$0xff]  ;;  %v14999_v27 = vpop.f32.mrf.mxu0 }
 0x530   :  { %6207 = vmatpush.msra.mxu0 %v3793_v48  ;;  %6243 = vmatpush.msra.mxu1 %v4009_v42  ;;  %v15001_v48 = vpop.f32.mrf.mxu2  ;;  %v4057_v42 = vld [vmem:[%s15789_s3 + $0x1378] sm:$0xff] }
 0x531   :  { %6196 = vmatpush.msrb.mxu2 %v3643_v8  ;;  %6155 = vmatpush.msra.mxu3 %v3457_v37  ;;  %v3871_v8 = vld [vmem:[%s15789_s3 + $0xda8] sm:$0xff]  ;;  %v4201_v37 = vld [vmem:[%s15789_s3 + $0x17f8] sm:$0xff] }
 0x532   :  { %6208 = vmatpush.msra.mxu0 %v3787_v31  ;;  %6244 = vmatpush.msra.mxu1 %v4003_v23  ;;  %v15012_v31 = vpop.f32.mrf.mxu1  ;;  %v3937_v23 = vld [vmem:[%s15789_s3 + $0xfb8] sm:$0xff] }
 0x533   :  { %6197 = vmatpush.msrb.mxu2 %v3637_v30  ;;  %6156 = vmatpush.msra.mxu3 %v3451_v22  ;;  %v4051_v30 = vld [vmem:[%s15789_s3 + $0x1348] sm:$0xff]  ;;  %v3865_v22 = vld [vmem:[%s15789_s3 + $0xd78] sm:$0xff] }
 0x534   :  { %6209 = vmatpush.msra.mxu0 %v3781_v49  ;;  %6245 = vmatpush.msra.mxu1 %v3997_v40  ;;  %v4195_v49 = vld [vmem:[%s15789_s3 + $0x17c8] sm:$0xff] }
 0x535   :  { %6198 = vmatpush.msrb.mxu2 %v3631_v13  ;;  %6157 = vmatpush.msra.mxu3 %v3445_v33  ;;  %v3931_v40 = vld [vmem:[%s15789_s3 + $0xf88] sm:$0xff]  ;;  %v4045_v13 = vld [vmem:[%s15789_s3 + $0x1318] sm:$0xff] }
 0x536   :  { %6199 = vmatmul.f32.vlgmr.msrb.gmra.mxu2 %v11511_v12  ;;  %6210 = vmatpush.msra.mxu0 %v3775_v55  ;;  %v3913_v12 = vld [vmem:[%s15789_s3 + $0xef8] sm:$0xff]  ;;  %v15039_v55 = vpop.f32.mrf.mxu3 }
 0x537   :  { %6246 = vmatpush.msra.mxu1 %v3991_v39  ;;  %6263 = vmatpush.msra.mxu2 %v4105_v38  ;;  %v4189_v33 = vld [vmem:[%s15789_s3 + $0x1798] sm:$0xff]  ;;  %v4039_v38 = vld [vmem:[%s15789_s3 + $0x12e8] sm:$0xff] }
 0x538   :  { %6158 = vmatpush.msra.mxu3 %v3439_v10  ;;  %6211 = vmatpush.msra.mxu0 %v3769_v54  ;;  %v3925_v39 = vld [vmem:[%s15789_s3 + $0xf58] sm:$0xff]  ;;  %v4183_v54 = vld [vmem:[%s15789_s3 + $0x1768] sm:$0xff] }
 0x539   :  { %6247 = vmatpush.msra.mxu1 %v3985_v56  ;;  %6264 = vmatpush.msra.mxu2 %v4099_v15  ;;  %v3853_v10 = vld [vmem:[%s15789_s3 + $0xd18] sm:$0xff]  ;;  %v15053_v56 = vpop.f32.mrf.mxu0  ;;  %v3919_v15 = vld [vmem:[%s15789_s3 + $0xf28] sm:$0xff] }
 0x53a   :  { %6159 = vmatmul.f32.vlgmr.msra.gmra.mxu3 %v11461_v4  ;;  %6212 = vmatpush.msra.mxu0 %v3763_v61  ;;  %v3901_v4 = vld [vmem:[%s15789_s3 + $0xe98] sm:$0xff] }
 0x53b   :  { %6223 = vmatpush.msrb.mxu3 %v3913_v12  ;;  %6248 = vmatpush.msra.mxu1 %v3979_v53  ;;  %v4033_v61 = vld [vmem:[%s15789_s3 + $0x12b8] sm:$0xff]  ;;  %v3847_v12 = vld [vmem:[%s15789_s3 + $0xce8] sm:$0xff]  ;;  %v15064_v53 = vpop.f32.mrf.mxu2 }
 0x53c   :  { %6265 = vmatpush.msra.mxu2 %v4093_v0  ;;  %6213 = vmatpush.msra.mxu0 %v3757_v32  ;;  %v15066_v0 = vpop.f32.mrf.mxu1  ;;  %v4177_v32 = vld [vmem:[%s15789_s3 + $0x1738] sm:$0xff] }
 0x53d   :  { %6224 = vmatpush.msrb.mxu3 %v3907_v41  ;;  %6249 = vmatpush.msra.mxu1 %v3973_v63  ;;  %v4393_v41 = vld [vmem:[%s15789_s3 + $0x1df8] sm:$0xff]  ;;  %v4027_v63 = vld [vmem:[%s15789_s3 + $0x1288] sm:$0xff] }
 0x53e   :  { %6266 = vmatpush.msra.mxu2 %v4087_v52  ;;  %6214 = vmatpush.msra.mxu0 %v3751_v51  ;;  %v3841_v52 = vld [vmem:[%s15789_s3 + $0xcb8] sm:$0xff]  ;;  %v4171_v51 = vld [vmem:[%s15789_s3 + $0x1708] sm:$0xff] }
 0x53f   :  { %6225 = vmatpush.msrb.mxu3 %v3901_v4  ;;  %6250 = vmatpush.msra.mxu1 %v3967_v34  ;;  %v4387_v4 = vld [vmem:[%s15789_s3 + $0x1dc8] sm:$0xff]  ;;  %v4021_v34 = vld [vmem:[%s15789_s3 + $0x1258] sm:$0xff] }
 0x540   :  { %6267 = vmatpush.msra.mxu2 %v4081_v19  ;;  %6215 = vmatpush.msra.mxu0 %v3745_v1  ;;  %v3835_v19 = vld [vmem:[%s15789_s3 + $0xc88] sm:$0xff]  ;;  %v15093_v1 = vpop.f32.mrf.mxu3 }
 0x541   :  { %6226 = vmatpush.msrb.mxu3 %v3895_v46  ;;  %6251 = vmatpush.msra.mxu1 %v3961_v36  ;;  %v4381_v46 = vld [vmem:[%s15789_s3 + $0x1d98] sm:$0xff]  ;;  %v4015_v36 = vld [vmem:[%s15789_s3 + $0x1228] sm:$0xff] }
 0x542   :  { %6268 = vmatpush.msra.mxu2 %v4075_v9  ;;  %6216 = vmatpush.msra.mxu0 %v3739_v35  ;;  %v3829_v9 = vld [vmem:[%s15789_s3 + $0xc58] sm:$0xff]  ;;  %v15107_v35 = vpop.f32.mrf.mxu0 }
 0x543   :  { %6227 = vmatpush.msrb.mxu3 %v3889_v47  ;;  %6252 = vmatpush.msra.mxu1 %v3955_v60  ;;  %v4159_v47 = vld [vmem:[%s15789_s3 + $0x16a8] sm:$0xff] }
 0x544   :  { %6269 = vmatpush.msra.mxu2 %v4069_v25  ;;  %6217 = vmatpush.msra.mxu0 %v3733_v21  ;;  %v4375_v60 = vld [vmem:[%s15789_s3 + $0x1d68] sm:$0xff]  ;;  %v4489_v25 = vld [vmem:[%s15789_s3 + $0x20f8] sm:$0xff]  ;;  %v15118_v21 = vpop.f32.mrf.mxu2 }
 0x545   :  { %6228 = vmatpush.msrb.mxu3 %v3883_v6  ;;  %6253 = vmatpush.msra.mxu1 %v3949_v14  ;;  %v15120_v6 = vpop.f32.mrf.mxu1  ;;  %v3823_v14 = vld [vmem:[%s15789_s3 + $0xc28] sm:$0xff] }
 0x546   :  { %6270 = vmatpush.msra.mxu2 %v4063_v3  ;;  %6218 = vmatpush.msra.mxu0 %v3727_v26  ;;  %v4153_v3 = vld [vmem:[%s15789_s3 + $0x1678] sm:$0xff] }
 0x547   :  { %6229 = vmatpush.msrb.mxu3 %v3877_v45  ;;  %6254 = vmatpush.msra.mxu1 %v3943_v58  ;;  %v4369_v26 = vld [vmem:[%s15789_s3 + $0x1d38] sm:$0xff]  ;;  %v4483_v45 = vld [vmem:[%s15789_s3 + $0x20c8] sm:$0xff] }
 0x548   :  { %6271 = vmatpush.msra.mxu2 %v4057_v42  ;;  %6219 = vmatmul.f32.vlgmr.msra.gmra.mxu0 %v11520_v11  ;;  %v3859_v11 = vld [vmem:[%s15789_s3 + $0xd48] sm:$0xff] }
 0x549   :  { %6230 = vmatpush.msrb.mxu3 %v3871_v8  ;;  %6283 = vmatpush.msrb.mxu0 %v4201_v37  ;;  %v4147_v58 = vld [vmem:[%s15789_s3 + $0x1648] sm:$0xff]  ;;  %v15144_v8 = vpop.f32.mrf.mxu3  ;;  %v4477_v37 = vld [vmem:[%s15789_s3 + $0x2098] sm:$0xff] }
 0x54a   :  { %6255 = vmatpush.msra.mxu1 %v3937_v23  ;;  %6272 = vmatpush.msra.mxu2 %v4051_v30  ;;  %v4363_v42 = vld [vmem:[%s15789_s3 + $0x1d08] sm:$0xff]  ;;  %v4141_v23 = vld [vmem:[%s15789_s3 + $0x1618] sm:$0xff] }
 0x54b   :  { %6231 = vmatpush.msrb.mxu3 %v3865_v22  ;;  %6284 = vmatpush.msrb.mxu0 %v4195_v49  ;;  %v4291_v30 = vld [vmem:[%s15789_s3 + $0x1ac8] sm:$0xff]  ;;  %v4357_v22 = vld [vmem:[%s15789_s3 + $0x1cd8] sm:$0xff]  ;;  %v15159_v49 = vpop.f32.mrf.mxu0 }
 0x54c   :  { %6256 = vmatpush.msra.mxu1 %v3931_v40  ;;  %6273 = vmatpush.msra.mxu2 %v4045_v13  ;;  %v4471_v40 = vld [vmem:[%s15789_s3 + $0x2068] sm:$0xff]  ;;  %v4285_v13 = vld [vmem:[%s15789_s3 + $0x1a98] sm:$0xff] }
 0x54d   :  { %6232 = vmatpush.msrb.mxu3 %v3859_v11  ;;  %6285 = vmatpush.msrb.mxu0 %v4189_v33  ;;  %v4351_v11 = vld [vmem:[%s15789_s3 + $0x1ca8] sm:$0xff]  ;;  %v15173_v33 = vpop.f32.mrf.mxu2 }
 0x54e   :  { %6257 = vmatpush.msra.mxu1 %v3925_v39  ;;  %6274 = vmatpush.msra.mxu2 %v4039_v38  ;;  %v15175_v39 = vpop.f32.mrf.mxu1  ;;  %v4465_v38 = vld [vmem:[%s15789_s3 + $0x2038] sm:$0xff] }
 0x54f   :  { %6233 = vmatpush.msrb.mxu3 %v3853_v10  ;;  %6286 = vmatpush.msrb.mxu0 %v4183_v54  ;;  %v4129_v10 = vld [vmem:[%s15789_s3 + $0x15b8] sm:$0xff]  ;;  %v4279_v54 = vld [vmem:[%s15789_s3 + $0x1a68] sm:$0xff] }
 0x550   :  { %6258 = vmatpush.msra.mxu1 %v3919_v15  ;;  %6275 = vmatpush.msra.mxu2 %v4033_v61  ;;  %v4345_v15 = vld [vmem:[%s15789_s3 + $0x1c78] sm:$0xff]  ;;  %v4459_v61 = vld [vmem:[%s15789_s3 + $0x2008] sm:$0xff] }
 0x551   :  { %6234 = vmatpush.msrb.mxu3 %v3847_v12  ;;  %6259 = vmatmul.f32.vlgmr.msra.gmra.mxu1 %v11782_v28  ;;  %v4165_v28 = vld [vmem:[%s15789_s3 + $0x16d8] sm:$0xff]  ;;  %v4123_v12 = vld [vmem:[%s15789_s3 + $0x1588] sm:$0xff] }
 0x552   :  { %6287 = vmatpush.msrb.mxu0 %v4177_v32  ;;  %6323 = vmatpush.msrb.mxu1 %v4393_v41  ;;  %v4273_v32 = vld [vmem:[%s15789_s3 + $0x1a38] sm:$0xff]  ;;  %v4339_v41 = vld [vmem:[%s15789_s3 + $0x1c48] sm:$0xff] }
 0x553   :  { %6276 = vmatpush.msra.mxu2 %v4027_v63  ;;  %6235 = vmatpush.msrb.mxu3 %v3841_v52  ;;  %v15201_v63 = vpop.f32.mrf.mxu3  ;;  %v4453_v52 = vld [vmem:[%s15789_s3 + $0x1fd8] sm:$0xff] }
 0x554   :  { %6288 = vmatpush.msrb.mxu0 %v4171_v51  ;;  %6324 = vmatpush.msrb.mxu1 %v4387_v4  ;;  %v4117_v51 = vld [vmem:[%s15789_s3 + $0x1558] sm:$0xff]  ;;  %v4267_v4 = vld [vmem:[%s15789_s3 + $0x1a08] sm:$0xff] }
 0x555   :  { %6277 = vmatpush.msra.mxu2 %v4021_v34  ;;  %6236 = vmatpush.msrb.mxu3 %v3835_v19  ;;  %v4333_v34 = vld [vmem:[%s15789_s3 + $0x1c18] sm:$0xff]  ;;  %v15215_v19 = vpop.f32.mrf.mxu0 }
 0x556   :  { %6289 = vmatpush.msrb.mxu0 %v4165_v28  ;;  %6325 = vmatpush.msrb.mxu1 %v4381_v46  ;;  %v4447_v28 = vld [vmem:[%s15789_s3 + $0x1fa8] sm:$0xff] }
 0x557   :  { %6278 = vmatpush.msra.mxu2 %v4015_v36  ;;  %6237 = vmatpush.msrb.mxu3 %v3829_v9  ;;  %v4111_v46 = vld [vmem:[%s15789_s3 + $0x1528] sm:$0xff]  ;;  %v4261_v36 = vld [vmem:[%s15789_s3 + $0x19d8] sm:$0xff] }
 0x558   :  { %6279 = vmatmul.f32.vlgmr.msra.gmra.mxu2 %v11784_v29  ;;  %6290 = vmatpush.msrb.mxu0 %v4159_v47  ;;  %v4297_v29 = vld [vmem:[%s15789_s3 + $0x1af8] sm:$0xff]  ;;  %v4327_v9 = vld [vmem:[%s15789_s3 + $0x1be8] sm:$0xff]  ;;  %v15229_v47 = vpop.f32.mrf.mxu2 }
 0x559   :  { %6326 = vmatpush.msrb.mxu1 %v4375_v60  ;;  %6343 = vmatpush.msrb.mxu2 %v4489_v25  ;;  %v15231_v60 = vpop.f32.mrf.mxu1  ;;  %v4441_v25 = vld [vmem:[%s15789_s3 + $0x1f78] sm:$0xff] }
 0x55a   :  { %6238 = vmatpush.msrb.mxu3 %v3823_v14  ;;  %6291 = vmatpush.msrb.mxu0 %v4153_v3  ;;  %v4255_v14 = vld [vmem:[%s15789_s3 + $0x19a8] sm:$0xff]  ;;  %v4585_v3 = vld [vmem:[%s15789_s3 + $0x23f8] sm:$0xff] }
 0x55b   :  { %6327 = vmatpush.msrb.mxu1 %v4369_v26  ;;  %6344 = vmatpush.msrb.mxu2 %v4483_v45  ;;  %v4321_v26 = vld [vmem:[%s15789_s3 + $0x1bb8] sm:$0xff]  ;;  %v4435_v45 = vld [vmem:[%s15789_s3 + $0x1f48] sm:$0xff] }
 0x55c   :  { %6239 = vmatmul.f32.vlgmr.msrb.gmra.mxu3 %v11729_v57  ;;  %6292 = vmatpush.msrb.mxu0 %v4147_v58  ;;  %v4135_v57 = vld [vmem:[%s15789_s3 + $0x15e8] sm:$0xff]  ;;  %v4249_v58 = vld [vmem:[%s15789_s3 + $0x1978] sm:$0xff] }
 0x55d   :  { %6303 = vmatpush.msra.mxu3 %v4297_v29  ;;  %6328 = vmatpush.msrb.mxu1 %v4363_v42  ;;  %v4579_v29 = vld [vmem:[%s15789_s3 + $0x23c8] sm:$0xff]  ;;  %v15255_v42 = vpop.f32.mrf.mxu3 }
 0x55e   :  { %6345 = vmatpush.msrb.mxu2 %v4477_v37  ;;  %6293 = vmatpush.msrb.mxu0 %v4141_v23  ;;  %v4315_v37 = vld [vmem:[%s15789_s3 + $0x1b88] sm:$0xff]  ;;  %v15266_v23 = vld [vmem:[%s15790_s4] sm:$0x3f]  ;;  %s6712_s4 = sshll.u32 %s15795_s9, 4  ;;  %s6713_s4 = int_to_ptr.hbm [resolvable:$true] %s6712_s4 }
 0x55f   :  { %6304 = vmatpush.msra.mxu3 %v4291_v30  ;;  %6329 = vmatpush.msrb.mxu1 %v4357_v22  ;;  %v4709_v30 = vperm.slane %v15266_v23, 1  ;;  %v4243_v22 = vld [vmem:[%s15789_s3 + $0x1948] sm:$0xff] }
 0x560   :  { %6346 = vmatpush.msrb.mxu2 %v4471_v40  ;;  %6294 = vmatpush.msrb.mxu0 %v4135_v57  ;;  %v4573_v40 = vld [vmem:[%s15789_s3 + $0x2398] sm:$0xff]  ;;  %v15275_v57 = vpop.f32.mrf.mxu0 }
 0x561   :  { %6305 = vmatpush.msra.mxu3 %v4285_v13  ;;  %6330 = vmatpush.msrb.mxu1 %v4351_v11  ;;  %v4309_v13 = vld [vmem:[%s15789_s3 + $0x1b58] sm:$0xff]  ;;  %v4423_v11 = vld [vmem:[%s15789_s3 + $0x1ee8] sm:$0xff] }
 0x562   :  { %6347 = vmatpush.msrb.mxu2 %v4465_v38  ;;  %6295 = vmatpush.msrb.mxu0 %v4129_v10  ;;  %v4237_v38 = vld [vmem:[%s15789_s3 + $0x1918] sm:$0xff]  ;;  %v4567_v10 = vld [vmem:[%s15789_s3 + $0x2368] sm:$0xff] }
 0x563   :  { %6306 = vmatpush.msra.mxu3 %v4279_v54  ;;  %6331 = vmatpush.msrb.mxu1 %v4345_v15  ;;  %v15289_v54 = vpop.f32.mrf.mxu1  ;;  %v4303_v15 = vld [vmem:[%s15789_s3 + $0x1b28] sm:$0xff] }
 0x564   :  { %6348 = vmatpush.msrb.mxu2 %v4459_v61  ;;  %6296 = vmatpush.msrb.mxu0 %v4123_v12  ;;  %v4417_v61 = vld [vmem:[%s15789_s3 + $0x1eb8] sm:$0xff]  ;;  %v5041_v12 = vadd.f32 %v14943_v20, %v4709_v30 }
 0x565   :  { %6307 = vmatpush.msra.mxu3 %v4273_v32  ;;  %6332 = vmatpush.msrb.mxu1 %v4339_v41  ;;  %v4231_v32 = vld [vmem:[%s15789_s3 + $0x18e8] sm:$0xff]  ;;  %v15301_v41 = vpop.f32.mrf.mxu2 }
 0x566   :  { %6349 = vmatpush.msrb.mxu2 %v4453_v52  ;;  %6297 = vmatpush.msrb.mxu0 %v4117_v51  ;;  %v4561_v52 = vld [vmem:[%s15789_s3 + $0x2338] sm:$0xff]  ;;  %v5061_v20 = vadd.f32 %v14894_v2, %v5041_v12  ;;  %v4699_v2 = vld [vmem:[%s15789_s3 + $0x2788] sm:$0xff] }
 0x567   :  { %6308 = vmatpush.msra.mxu3 %v4267_v4  ;;  %6333 = vmatpush.msrb.mxu1 %v4333_v34  ;;  %v4705_v51 = vld [vmem:[%s15789_s3 + $0x27b8] sm:$0x3]  ;;  %v4411_v4 = vld [vmem:[%s15789_s3 + $0x1e88] sm:$0xff] }
 0x568   :  { %6350 = vmatpush.msrb.mxu2 %v4447_v28  ;;  %6298 = vmatpush.msrb.mxu0 %v4111_v46  ;;  %v4225_v34 = vld [vmem:[%s15789_s3 + $0x18b8] sm:$0xff]  ;;  %v15316_v28 = vpop.f32.mrf.mxu3  ;;  %v4555_v46 = vld [vmem:[%s15789_s3 + $0x2308] sm:$0xff] }
 0x569   :  { %6309 = vmatpush.msra.mxu3 %v4261_v36  ;;  %6334 = vmatpush.msrb.mxu1 %v4327_v9  ;;  %v5081_v36 = vadd.f32 %v14985_v24, %v5061_v20  ;;  %v4405_v9 = vld [vmem:[%s15789_s3 + $0x1e58] sm:$0xff]  ;;  %v6458_v12 = vld [vmem:[%s15791_s5 + $0xe8] sm:$0xff] }
 0x56a   :  { %6351 = vmatpush.msrb.mxu2 %v4441_v25  ;;  %6299 = vmatmul.f32.vlgmr.msrb.gmra.mxu0 %v11793_v62  ;;  %v4429_v62 = vld [vmem:[%s15789_s3 + $0x1f18] sm:$0xff]  ;;  %v15333_v25 = vpop.f32.mrf.mxu0 }
 0x56b   :  { %6310 = vmatpush.msra.mxu3 %v4255_v14  ;;  %6363 = vmatpush.msra.mxu0 %v4585_v3  ;;  %v4549_v14 = vld [vmem:[%s15789_s3 + $0x22d8] sm:$0xff]  ;;  %v4399_v3 = vld [vmem:[%s15789_s3 + $0x1e28] sm:$0xff] }
 0x56c   :  { %6335 = vmatpush.msrb.mxu1 %v4321_v26  ;;  %6352 = vmatpush.msrb.mxu2 %v4435_v45  ;;  %v4693_v24 = vld [vmem:[%s15789_s3 + $0x2758] sm:$0xff]  ;;  %v15347_v45 = vpop.f32.mrf.mxu1 }
 0x56d   :  { %6311 = vmatpush.msra.mxu3 %v4249_v58  ;;  %6364 = vmatpush.msra.mxu0 %v4579_v29  ;;  %v4213_v26 = vld [vmem:[%s15789_s3 + $0x1858] sm:$0xff]  ;;  %v4543_v58 = vld [vmem:[%s15789_s3 + $0x22a8] sm:$0xff]  ;;  %v5101_v29 = vadd.f32 %v14959_v50, %v5081_v36  ;;  %v15359_v30 = vpop.f32.mrf.mxu2 }
 0x56e   :  { %6336 = vmatpush.msrb.mxu1 %v4315_v37  ;;  %6353 = vmatpush.msrb.mxu2 %v4429_v62  ;;  %v4687_v37 = vld [vmem:[%s15789_s3 + $0x2728] sm:$0xff]  ;;  %v6460_v62 = vld [vmem:[%s15791_s5 + $0xf8] sm:$0xff] }
 0x56f   :  { %6312 = vmatpush.msra.mxu3 %v4243_v22  ;;  %6365 = vmatpush.msra.mxu0 %v4573_v40  ;;  %v6444_v22 = vld [vmem:[%s15791_s5 + $0x78] sm:$0xff]  ;;  %v4207_v50 = vld [vmem:[%s15789_s3 + $0x1828] sm:$0xff] }
 0x570   :  { %6337 = vmatpush.msrb.mxu1 %v4309_v13  ;;  %6354 = vmatpush.msrb.mxu2 %v4423_v11  ;;  %v4537_v40 = vld [vmem:[%s15789_s3 + $0x2278] sm:$0xff]  ;;  %v15371_v13 = vpop.f32.mrf.mxu3  ;;  %v6459_v11 = vld [vmem:[%s15791_s5 + $0xf0] sm:$0xff] }
 0x571   :  { %6313 = vmatpush.msra.mxu3 %v4237_v38  ;;  %6366 = vmatpush.msra.mxu0 %v4567_v10  ;;  %v5121_v38 = vadd.f32 %v14999_v27, %v5101_v29  ;;  %v4710_v10 = vperm.slane %v15266_v23, 2  ;;  %v4531_v27 = vld [vmem:[%s15789_s3 + $0x2248] sm:$0xff] }
 0x572   :  { %6338 = vmatpush.msrb.mxu1 %v4303_v15  ;;  %6355 = vmatpush.msrb.mxu2 %v4417_v61  ;;  %v6443_v15 = vld [vmem:[%s15791_s5 + $0x70] sm:$0xff]  ;;  %v15384_v61 = vpop.f32.mrf.mxu0 }
 0x573   :  { %6314 = vmatpush.msra.mxu3 %v4231_v32  ;;  %6339 = vmatmul.f32.vlgmr.msrb.gmra.mxu1 %v12019_v59  ;;  %v4219_v59 = vld [vmem:[%s15789_s3 + $0x1888] sm:$0xff]  ;;  %v5141_v20 = vadd.f32 %v14945_v5, %v5121_v38 }
 0x574   :  { %6367 = vmatpush.msra.mxu0 %v4561_v52  ;;  %6761 = vmatpush.msk.msra.mxu1 %vm4724_vm1, %v4705_v51  ;;  %v4675_v32 = vld [vmem:[%s15789_s3 + $0x26c8] sm:$0xff]  ;;  %v4525_v51 = vld [vmem:[%s15789_s3 + $0x2218] sm:$0xff] }
 0x575   :  { %6356 = vmatpush.msrb.mxu2 %v4411_v4  ;;  %6315 = vmatpush.msra.mxu3 %v4225_v34  ;;  %v6442_v52 = vld [vmem:[%s15791_s5 + $0x68] sm:$0xff]  ;;  %v5321_v4 = vadd.f32 %v15144_v8, %v4710_v10  ;;  %v4669_v34 = vld [vmem:[%s15789_s3 + $0x2698] sm:$0xff]  ;;  %v5161_v36 = vadd.f32 %v15039_v55, %v5141_v20  ;;  %v6455_v55 = vld [vmem:[%s15791_s5 + $0xd0] sm:$0xff] }
 0x576   :  { %6368 = vmatpush.msra.mxu0 %v4555_v46  ;;  %6416 = vmatpush.msra.mxu1 %v4699_v2  ;;  %v6441_v46 = vld [vmem:[%s15791_s5 + $0x60] sm:$0xff]  ;;  %v15417_v2 = vpop.f32.mrf.mxu2  ;;  %v4519_v5 = vld [vmem:[%s15789_s3 + $0x21e8] sm:$0xff]  ;;  %v6456_v8 = vld [vmem:[%s15791_s5 + $0xd8] sm:$0xff] }
 0x577   :  { %6357 = vmatpush.msrb.mxu2 %v4405_v9  ;;  %6316 = vmatpush.msra.mxu3 %v4219_v59  ;;  %v4663_v9 = vld [vmem:[%s15789_s3 + $0x2668] sm:$0xff]  ;;  %v6440_v59 = vld [vmem:[%s15791_s5 + $0x58] sm:$0xff] }
 0x578   :  { %6369 = vmatpush.msra.mxu0 %v4549_v14  ;;  %6417 = vmatpush.msra.mxu1 %v4693_v24  ;;  %v15432_v14 = vpop.f32.mrf.mxu3  ;;  %v4513_v24 = vld [vmem:[%s15789_s3 + $0x21b8] sm:$0xff] }
 0x579   :  { %6358 = vmatpush.msrb.mxu2 %v4399_v3  ;;  %6317 = vmatpush.msra.mxu3 %v4213_v26  ;;  %v5341_v3 = vadd.f32 %v15118_v21, %v5321_v4  ;;  %v4657_v26 = vld [vmem:[%s15789_s3 + $0x2638] sm:$0xff]  ;;  %v6454_v21 = vld [vmem:[%s15791_s5 + $0xc8] sm:$0xff]  ;;  %v4712_v4 = vperm.slane %v15266_v23, 4 }
 0x57a   :  { %6359 = vmatmul.f32.vlgmr.msrb.gmra.mxu2 %v12021_v43  ;;  %6370 = vmatpush.msra.mxu0 %v4543_v58  ;;  %v4681_v43 = vld [vmem:[%s15789_s3 + $0x26f8] sm:$0xff]  ;;  %v6439_v58 = vld [vmem:[%s15791_s5 + $0x50] sm:$0xff]  ;;  %v15447_v29 = vpop.f32.mrf.mxu0 }
 0x57b   :  { %6418 = vmatpush.msra.mxu1 %v4687_v37  ;;  %6547 = vmatpush.msra.mxu2 %v6460_v62  ;;  %v4507_v37 = vld [vmem:[%s15789_s3 + $0x2188] sm:$0xff]  ;;  %v5181_v62 = vadd.f32 %v15012_v31, %v5161_v36  ;;  %v6453_v31 = vld [vmem:[%s15791_s5 + $0xc0] sm:$0xff]  ;;  %v5361_v38 = vadd.f32 %v15120_v6, %v5341_v3  ;;  %v4645_v10 = vld [vmem:[%s15789_s3 + $0x25d8] sm:$0xff] }
 0x57c   :  { %6318 = vmatpush.msra.mxu3 %v4207_v50  ;;  %6371 = vmatpush.msra.mxu0 %v4537_v40  ;;  %v6438_v50 = vld [vmem:[%s15791_s5 + $0x48] sm:$0xff]  ;;  %v4501_v40 = vld [vmem:[%s15789_s3 + $0x2158] sm:$0xff] }
 0x57d   :  { %6527 = vmatpush.msrb.mxu1 %v6444_v22  ;;  %6548 = vmatpush.msra.mxu2 %v6459_v11  ;;  %v4651_v22 = vld [vmem:[%s15789_s3 + $0x2608] sm:$0xff]  ;;  %v5201_v11 = vadd.f32 %v15053_v56, %v5181_v62  ;;  %v6452_v6 = vld [vmem:[%s15791_s5 + $0xb8] sm:$0xff] }
 0x57e   :  { %6762 = vmatmul.msk.f32.vlgmr.msra.gmra.mxu1 %vm4720_vm2, %v12293_v7  ;;  %6319 = vmatmul.f32.vlgmr.msra.gmra.mxu3 %v11977_v17  ;;  %v15401_v7 = vpop.f32.mrf.mxu1  ;;  %v6457_v17 = vld [vmem:[%s15791_s5 + $0xe0] sm:$0xff]  ;;  %v4495_v56 = vld [vmem:[%s15789_s3 + $0x2128] sm:$0xff] }
 0x57f   :  { %6383 = vmatpush.msrb.mxu3 %v4681_v43  ;;  %6528 = vmatpush.msrb.mxu1 %v6443_v15  ;;  %v6437_v43 = vld [vmem:[%s15791_s5 + $0x40] sm:$0xff]  ;;  %v15476_v15 = vpop.f32.mrf.mxu2  ;;  %v4627_v36 = vld [vmem:[%s15789_s3 + $0x2548] sm:$0xff] }
 0x580   :  { %6372 = vmatpush.msra.mxu0 %v4531_v27  ;;  %6549 = vmatpush.msra.mxu2 %v6458_v12  ;;  %v5221_v12 = vadd.f32 %v15001_v48, %v5201_v11  ;;  %v6476_v48 = vld [vmem:[%s15791_s5 + $0x178] sm:$0xff] }
 0x581   :  { %6384 = vmatpush.msrb.mxu3 %v4675_v32  ;;  %6529 = vmatpush.msrb.mxu1 %v6442_v52  ;;  %v5381_v32 = vadd.f32 %v15159_v49, %v5361_v38  ;;  %v4639_v52 = vld [vmem:[%s15789_s3 + $0x25a8] sm:$0xff]  ;;  %v6432_v11 = vld [vmem:[%s15791_s5 + $0x18] sm:$0xff] }
 0x582   :  { %6373 = vmatpush.msra.mxu0 %v4525_v51  ;;  %6550 = vmatpush.msra.mxu2 %v6457_v17  ;;  %v15491_v51 = vpop.f32.mrf.mxu3  ;;  %v6436_v17 = vld [vmem:[%s15791_s5 + $0x38] sm:$0xff]  ;;  %v5241_v49 = vadd.f32 %v15093_v1, %v5221_v12  ;;  %v6435_v1 = vld [vmem:[%s15791_s5 + $0x30] sm:$0xff] }
 0x583   :  { %6385 = vmatpush.msrb.mxu3 %v4669_v34  ;;  %6530 = vmatpush.msrb.mxu1 %v6441_v46  ;;  %v5401_v20 = vadd.f32 %v15201_v63, %v5381_v32  ;;  %v6451_v34 = vld [vmem:[%s15791_s5 + $0xb0] sm:$0xff]  ;;  %v4633_v46 = vld [vmem:[%s15789_s3 + $0x2578] sm:$0xff] }
 0x584   :  { %6374 = vmatpush.msra.mxu0 %v4519_v5  ;;  %6551 = vmatpush.msra.mxu2 %v6456_v8  ;;  %v5880_v5 = vpop.f32.mrf.mxu0  ;;  %v6475_v63 = vld [vmem:[%s15791_s5 + $0x170] sm:$0xff]  ;;  %v6450_v8 = vld [vmem:[%s15791_s5 + $0xa8] sm:$0xff] }
 0x585   :  { %6386 = vmatpush.msrb.mxu3 %v4663_v9  ;;  %6531 = vmatpush.msrb.mxu1 %v6440_v59  ;;  %v6434_v9 = vld [vmem:[%s15791_s5 + $0x28] sm:$0xff]  ;;  %v5881_v3 = vadd.f32 %v5880_v5, %v4712_v4 }
 0x586   :  { %6375 = vmatpush.msra.mxu0 %v4513_v24  ;;  %6552 = vmatpush.msra.mxu2 %v6455_v55  ;;  %v15478_v27 = vpop.f32.mrf.mxu1  ;;  %v6474_v59 = vld [vmem:[%s15791_s5 + $0x168] sm:$0xff]  ;;  %v5261_v24 = vadd.f32 %v15066_v0, %v5241_v49  ;;  %v5421_v55 = vadd.f32 %v15173_v33, %v5401_v20  ;;  %v6433_v0 = vld [vmem:[%s15791_s5 + $0x20] sm:$0xff] }
 0x587   :  { %6387 = vmatpush.msrb.mxu3 %v4657_v26  ;;  %6532 = vmatpush.msrb.mxu1 %v6439_v58  ;;  %v6449_v26 = vld [vmem:[%s15791_s5 + $0xa0] sm:$0xff]  ;;  %v4621_v58 = vld [vmem:[%s15789_s3 + $0x2518] sm:$0xff] }
 0x588   :  { %6376 = vmatpush.msra.mxu0 %v4507_v37  ;;  %6553 = vmatpush.msra.mxu2 %v6454_v21  ;;  %v15536_v37 = vpop.f32.mrf.mxu2  ;;  %v6473_v33 = vld [vmem:[%s15791_s5 + $0x160] sm:$0xff]  ;;  %v5281_v62 = vadd.f32 %v15107_v35, %v5261_v24  ;;  %v6472_v35 = vld [vmem:[%s15791_s5 + $0x158] sm:$0xff]  ;;  %v5441_v38 = vadd.f32 %v15175_v39, %v5421_v55  ;;  %v6471_v39 = vld [vmem:[%s15791_s5 + $0x150] sm:$0xff] }
 0x589   :  { %6388 = vmatpush.msrb.mxu3 %v4651_v22  ;;  %6533 = vmatpush.msrb.mxu1 %v6438_v50  ;;  %v6448_v22 = vld [vmem:[%s15791_s5 + $0x98] sm:$0xff]  ;;  %v4615_v50 = vld [vmem:[%s15789_s3 + $0x24e8] sm:$0xff]  ;;  %v6445_v20 = vld [vmem:[%s15791_s5 + $0x80] sm:$0xff] }
 0x58a   :  { %6377 = vmatpush.msra.mxu0 %v4501_v40  ;;  %6554 = vmatpush.msra.mxu2 %v6453_v31  ;;  %v5920_v31 = vpop.f32.mrf.mxu3  ;;  %v5301_v12 = vadd.f32 %v15064_v53, %v5281_v62  ;;  %v5461_v32 = vadd.f32 %v15215_v19, %v5441_v38  ;;  %v6430_v53 = vld [vmem:[%s15791_s5 + $0x8] sm:$0xff]  ;;  %v6492_v55 = vld [vmem:[%s15791_s5 + $0x1f8] sm:$0xff] }
 0x58b   :  { %6389 = vmatpush.msrb.mxu3 %v4645_v10  ;;  %6534 = vmatpush.msrb.mxu1 %v6437_v43  ;;  %v4609_v43 = vld [vmem:[%s15789_s3 + $0x24b8] sm:$0xff]  ;;  %v6470_v19 = vld [vmem:[%s15791_s5 + $0x148] sm:$0xff] }
 0x58c   :  { %6378 = vmatpush.msra.mxu0 %v4495_v56  ;;  %6555 = vmatpush.msra.mxu2 %v6452_v6  ;;  %v6431_v6 = vld [vmem:[%s15791_s5 + $0x10] sm:$0xff]  ;;  %v5481_v49 = vadd.f32 %v15255_v42, %v5461_v32  ;;  %v6429_v42 = vld [vmem:[%s15791_s5] sm:$0xff]  ;;  %v6424_v5 = vmax.f32 %v5301_v12, 0.0  ;;  %v6462_v32 = vld [vmem:[%s15791_s5 + $0x108] sm:$0xff] }
 0x58d   :  { %6379 = vmatmul.f32.vlgmr.msra.gmra.mxu0 %v12026_v16  ;;  %6390 = vmatpush.msrb.mxu3 %v4639_v52  ;;  %v4711_v16 = vperm.slane %v15266_v23, 3 }
 0x58e   :  { %6535 = vmatpush.msrb.mxu1 %v6436_v17  ;;  %6567 = vmatpush.msrb.mxu0 %v6476_v48  ;;  %v5900_v21 = vpop.f32.mrf.mxu1  ;;  %v4603_v17 = vld [vmem:[%s15789_s3 + $0x2488] sm:$0xff] }
 0x58f   :  { %6556 = vmatpush.msra.mxu2 %v6451_v34  ;;  %6391 = vmatpush.msrb.mxu3 %v4633_v46  ;;  %v5601_v40 = vadd.f32 %v15359_v30, %v4711_v16  ;;  %v5901_v10 = vadd.f32 %v5900_v21, %v5881_v3  ;;  %v6447_v30 = vld [vmem:[%s15791_s5 + $0x90] sm:$0xff]  ;;  %v5960_v46 = vpop.f32.mrf.mxu0  ;;  %v5501_v16 = vadd.f32 %v15229_v47, %v5481_v49 }
 0x590   :  { %6536 = vmatpush.msrb.mxu1 %v6435_v1  ;;  %6568 = vmatpush.msrb.mxu0 %v6475_v63  ;;  %v5940_v34 = vpop.f32.mrf.mxu2  ;;  %v6469_v63 = vld [vmem:[%s15791_s5 + $0x140] sm:$0xff]  ;;  %v6507_v47 = vld [vmem:[%s15791_s5 + $0x270] sm:$0xff] }
 0x591   :  { %6557 = vmatpush.msra.mxu2 %v6450_v8  ;;  %6392 = vmatpush.msrb.mxu3 %v4627_v36  ;;  %v5621_v56 = vadd.f32 %v15289_v54, %v5601_v40  ;;  %v5921_v52 = vadd.f32 %v5920_v31, %v5901_v10  ;;  %v6446_v54 = vld [vmem:[%s15791_s5 + $0x88] sm:$0xff]  ;;  %v6423_v8 = vmax.f32 %v13093_v44, 0.0  ;;  %v6467_v3 = vld [vmem:[%s15791_s5 + $0x130] sm:$0xff]  ;;  %v5521_v21 = vadd.f32 %v15231_v60, %v5501_v16  ;;  %v6465_v40 = vld [vmem:[%s15791_s5 + $0x120] sm:$0xff] }
 0x592   :  { %6537 = vmatpush.msrb.mxu1 %v6434_v9  ;;  %6569 = vmatpush.msrb.mxu0 %v6474_v59  ;;  %v4591_v36 = vld [vmem:[%s15789_s3 + $0x2428] sm:$0xff]  ;;  %v6468_v59 = vld [vmem:[%s15791_s5 + $0x138] sm:$0xff]  ;;  %v6489_v31 = vld [vmem:[%s15791_s5 + $0x1e0] sm:$0xff] }
 0x593   :  { %6558 = vmatpush.msra.mxu2 %v6449_v26  ;;  %6393 = vmatpush.msrb.mxu3 %v4621_v58  ;;  %v5641_v48 = vadd.f32 %v15333_v25, %v5621_v56  ;;  %v4597_v25 = vld [vmem:[%s15789_s3 + $0x2458] sm:$0xff]  ;;  %v5941_v1 = vadd.f32 %v5940_v34, %v5921_v52  ;;  %v6000_v26 = vpop.f32.mrf.mxu3  ;;  %v6506_v58 = vld [vmem:[%s15791_s5 + $0x268] sm:$0xff]  ;;  %v5541_v60 = vadd.f32 %v15275_v57, %v5521_v21  ;;  %v6463_v56 = vld [vmem:[%s15791_s5 + $0x110] sm:$0xff] }
 0x594   :  { %6538 = vmatpush.msrb.mxu1 %v6433_v0  ;;  %6570 = vmatpush.msrb.mxu0 %v6473_v33  ;;  %v6466_v33 = vld [vmem:[%s15791_s5 + $0x128] sm:$0xff]  ;;  %v6481_v16 = vld [vmem:[%s15791_s5 + $0x1a0] sm:$0xff] }
 0x595   :  { %6559 = vmatpush.msra.mxu2 %v6448_v22  ;;  %6394 = vmatpush.msrb.mxu3 %v4615_v50  ;;  %v5661_v4 = vadd.f32 %v15371_v13, %v5641_v48  ;;  %v6508_v13 = vld [vmem:[%s15791_s5 + $0x278] sm:$0xff]  ;;  %v5961_v9 = vadd.f32 %v5960_v46, %v5941_v1  ;;  %v6505_v22 = vld [vmem:[%s15791_s5 + $0x260] sm:$0xff]  ;;  %v5561_v57 = vadd.f32 %v15316_v28, %v5541_v60  ;;  %v6499_v46 = vld [vmem:[%s15791_s5 + $0x230] sm:$0xff] }
 0x596   :  { %6539 = vmatpush.msrb.mxu1 %v6432_v11  ;;  %6571 = vmatpush.msrb.mxu0 %v6472_v35  ;;  %v5980_v24 = vpop.f32.mrf.mxu1  ;;  %v6504_v11 = vld [vmem:[%s15791_s5 + $0x258] sm:$0xff]  ;;  %v6501_v48 = vld [vmem:[%s15791_s5 + $0x240] sm:$0xff]  ;;  %v6515_v60 = vld [vmem:[%s15791_s5 + $0x2b0] sm:$0xff] }
 0x597   :  { %6560 = vmatpush.msra.mxu2 %v6447_v30  ;;  %6395 = vmatpush.msrb.mxu3 %v4609_v43  ;;  %v5681_v44 = vadd.f32 %v15417_v2, %v5661_v4  ;;  %v6491_v2 = vld [vmem:[%s15791_s5 + $0x1f0] sm:$0xff]  ;;  %v5981_v0 = vadd.f32 %v5980_v24, %v5961_v9  ;;  %v6464_v35 = vld [vmem:[%s15791_s5 + $0x118] sm:$0xff]  ;;  %v6040_v10 = vpop.f32.mrf.mxu0  ;;  %v6477_v21 = vld [vmem:[%s15791_s5 + $0x180] sm:$0xff] }
 0x598   :  { %6540 = vmatpush.msrb.mxu1 %v6431_v6  ;;  %6572 = vmatpush.msrb.mxu0 %v6471_v39  ;;  %v6488_v30 = vld [vmem:[%s15791_s5 + $0x1d8] sm:$0xff]  ;;  %v6503_v43 = vld [vmem:[%s15791_s5 + $0x250] sm:$0xff]  ;;  %v6502_v6 = vld [vmem:[%s15791_s5 + $0x248] sm:$0xff]  ;;  %v5581_v39 = vadd.f32 %v15301_v41, %v5561_v57 }
 0x599   :  { %6561 = vmatpush.msra.mxu2 %v6446_v54  ;;  %6396 = vmatpush.msrb.mxu3 %v4603_v17  ;;  %v5701_v62 = vadd.f32 %v15347_v45, %v5681_v44  ;;  %v6001_v50 = vadd.f32 %v6000_v26, %v5981_v0  ;;  %v6486_v17 = vld [vmem:[%s15791_s5 + $0x1c8] sm:$0xff]  ;;  %v6461_v41 = vld [vmem:[%s15791_s5 + $0x100] sm:$0xff]  ;;  %v6484_v4 = vld [vmem:[%s15791_s5 + $0x1b8] sm:$0xff] }
 0x59a   :  { %6541 = vmatpush.msrb.mxu1 %v6430_v53  ;;  %6573 = vmatpush.msrb.mxu0 %v6470_v19  ;;  %v6425_v19 = vmax.f32 %v5581_v39, 0.0  ;;  %v6480_v44 = vld [vmem:[%s15791_s5 + $0x198] sm:$0xff]  ;;  %v6495_v24 = vld [vmem:[%s15791_s5 + $0x210] sm:$0xff] }
 0x59b   :  { %6562 = vmatpush.msra.mxu2 %v6445_v20  ;;  %6397 = vmatpush.msrb.mxu3 %v4597_v25  ;;  %v5721_v45 = vadd.f32 %v15384_v61, %v5701_v62  ;;  %v6020_v61 = vpop.f32.mrf.mxu2  ;;  %v6080_v53 = vpop.f32.mrf.mxu3  ;;  %v6500_v20 = vld [vmem:[%s15791_s5 + $0x238] sm:$0xff]  ;;  %v6517_v62 = vld [vmem:[%s15791_s5 + $0x2c0] sm:$0xff] }
 0x59c   :  { %6542 = vmatpush.msrb.mxu1 %v6429_v42  ;;  %6563 = vmatmul.f32.vlgmr.msra.gmra.mxu2 %v6424_v5  ;;  %v6021_v28 = vadd.f32 %v6020_v61, %v6001_v50  ;;  %v6483_v5 = vld [vmem:[%s15791_s5 + $0x1b0] sm:$0xff]  ;;  %v6512_v57 = vld [vmem:[%s15791_s5 + $0x298] sm:$0xff] }
 0x59d   :  { %6574 = vmatpush.msrb.mxu0 %v6469_v63  ;;  %6543 = vmatmul.f32.vlgmr.msrb.gmra.mxu1 %v6423_v8  ;;  %v5741_v38 = vadd.f32 %v15432_v14, %v5721_v45  ;;  %v6487_v14 = vld [vmem:[%s15791_s5 + $0x1d0] sm:$0xff] }
 0x59e   :  { %6607 = vmatpush.msra.mxu1 %v6508_v13  ;;  %6398 = vmatpush.msrb.mxu3 %v4591_v36  ;;  %v6041_v12 = vadd.f32 %v6040_v10, %v6021_v28  ;;  %v6060_v54 = vpop.f32.mrf.mxu1  ;;  %v6482_v13 = vld [vmem:[%s15791_s5 + $0x1a8] sm:$0xff]  ;;  %v6497_v36 = vld [vmem:[%s15791_s5 + $0x220] sm:$0xff] }
 0x59f   :  { %6575 = vmatpush.msrb.mxu0 %v6468_v59  ;;  %6399 = vmatmul.f32.vlgmr.msrb.gmra.mxu3 %v12186_v18  ;;  %v6490_v18 = vld [vmem:[%s15791_s5 + $0x1e8] sm:$0xff]  ;;  %v5761_v52 = vadd.f32 %v15476_v15, %v5741_v38  ;;  %v6485_v15 = vld [vmem:[%s15791_s5 + $0x1c0] sm:$0xff] }
 0x5a0   :  { %6587 = vmatpush.msra.mxu3 %v6492_v55  ;;  %6608 = vmatpush.msra.mxu1 %v6507_v47  ;;  %v6061_v49 = vadd.f32 %v6060_v54, %v6041_v12  ;;  %v6479_v47 = vld [vmem:[%s15791_s5 + $0x190] sm:$0xff] }
 0x5a1   :  { %6576 = vmatpush.msrb.mxu0 %v6467_v3  ;;  %v5781_v25 = vadd.f32 %v15401_v7, %v5761_v52  ;;  %v6498_v7 = vld [vmem:[%s15791_s5 + $0x228] sm:$0xff] }
 0x5a2   :  { %6588 = vmatpush.msra.mxu3 %v6491_v2  ;;  %6609 = vmatpush.msra.mxu1 %v6506_v58  ;;  %v6081_v34 = vadd.f32 %v6080_v53, %v6061_v49  ;;  %v6478_v2 = vld [vmem:[%s15791_s5 + $0x188] sm:$0xff]  ;;  %v6493_v58 = vld [vmem:[%s15791_s5 + $0x200] sm:$0xff] }
 0x5a3   :  { %6577 = vmatpush.msrb.mxu0 %v6466_v33  ;;  %v5801_v42 = vadd.f32 %v15447_v29, %v5781_v25  ;;  %v6100_v63 = vpop.f32.mrf.mxu2  ;;  %v6120_v8 = vpop.f32.mrf.mxu0 }
 0x5a4   :  { %6589 = vmatpush.msra.mxu3 %v6490_v18  ;;  %6610 = vmatpush.msra.mxu1 %v6505_v22  ;;  %v6101_v29 = vadd.f32 %v6100_v63, %v6081_v34  ;;  %v4713_v18 = vperm.slane %v15266_v23, 5  ;;  %v6516_v22 = vld [vmem:[%s15791_s5 + $0x2b8] sm:$0xff]  ;;  %v6513_v23 = vld [vmem:[%s15791_s5 + $0x2a0] sm:$0xff] }
 0x5a5   :  { %6578 = vmatpush.msrb.mxu0 %v6465_v40  ;;  %v5821_v1 = vadd.f32 %v15491_v51, %v5801_v42  ;;  %v6496_v51 = vld [vmem:[%s15791_s5 + $0x218] sm:$0xff]  ;;  %v6514_v40 = vld [vmem:[%s15791_s5 + $0x2a8] sm:$0xff] }
 0x5a6   :  { %6590 = vmatpush.msra.mxu3 %v6489_v31  ;;  %6611 = vmatpush.msra.mxu1 %v6504_v11  ;;  %v6121_v9 = vadd.f32 %v6120_v8, %v6101_v29  ;;  %v6140_v55 = vpop.f32.mrf.mxu1 }
 0x5a7   :  { %6579 = vmatpush.msrb.mxu0 %v6464_v35  ;;  %v5841_v59 = vadd.f32 %v15536_v37, %v5821_v1  ;;  %v6494_v37 = vld [vmem:[%s15791_s5 + $0x208] sm:$0xff]  ;;  %v6511_v35 = vld [vmem:[%s15791_s5 + $0x290] sm:$0xff]  ;;  %v6771_v1 = vld [vmem:[%s15792_s6] ss:$0 sm:$0xff]  ;;  %s6830_s6 = smov [#allocation5]  }
 0x5a8   :  { %6591 = vmatpush.msra.mxu3 %v6488_v30  ;;  %6612 = vmatpush.msra.mxu1 %v6503_v43  ;;  %v6141_v3 = vadd.f32 %v6140_v55, %v6121_v9  ;;  %v6510_v30 = vld [vmem:[%s15791_s5 + $0x288] sm:$0xff]  ;;  %v6509_v43 = vld [vmem:[%s15791_s5 + $0x280] sm:$0xff]  ;;  %s6721_s29 = sshll.u32 %s6830_s6, 4  ;;  %s6722_s29 = int_to_ptr.vmem [resolvable:$true] %s6721_s29 }
 0x5a9   :  { %6580 = vmatpush.msrb.mxu0 %v6463_v56  ;;  %v5861_v26 = vadd.f32 %v15478_v27, %v5841_v59  ;;  %v6518_v27 = vld [vmem:[%s15791_s5 + $0x2c8] sm:$0xff] }
 0x5aa   :  { %6592 = vmatpush.msra.mxu3 %v6487_v14  ;;  %6613 = vmatpush.msra.mxu1 %v6502_v6  ;;  %v6427_v0 = vmax.f32 %v6141_v3, 0.0  ;;  %v6648_v3 = vld [vmem:[%s15793_s7] sm:$0x1]  ;;  %s6831_s7 = smov [#allocation3]  }
 0x5ab   :  { %6581 = vmatpush.msrb.mxu0 %v6462_v32  ;;  %v6426_v33 = vmax.f32 %v5861_v26, 0.0  ;;  %6633 = vmatpush.msrb.mxu2 %v6518_v27  ;;  %s6710_s10 = sshll.u32 %s6831_s7, 4  ;;  %s6711_s10 = int_to_ptr.vmem [resolvable:$true] %s6710_s10 }
 0x5ac   :  { %6593 = vmatpush.msra.mxu3 %v6486_v17  ;;  %6614 = vmatpush.msra.mxu1 %v6501_v48 }
 0x5ad   :  { %6582 = vmatpush.msrb.mxu0 %v6461_v41  ;;  %6634 = vmatpush.msrb.mxu2 %v6517_v62 }
 0x5ae   :  { %6583 = vmatmul.f32.vlgmr.msrb.gmra.mxu0 %v6425_v19  ;;  %6594 = vmatpush.msra.mxu3 %v6485_v15  ;;  %v6180_v31 = vpop.f32.mrf.mxu1 }
 0x5af   :  { %6615 = vmatpush.msra.mxu1 %v6500_v20  ;;  %6635 = vmatpush.msrb.mxu2 %v6516_v22 }
 0x5b0   :  { %6595 = vmatpush.msra.mxu3 %v6484_v4 }
 0x5b1   :  { %6616 = vmatpush.msra.mxu1 %v6499_v46  ;;  %6636 = vmatpush.msrb.mxu2 %v6515_v60 }
 0x5b2   :  { %6596 = vmatpush.msra.mxu3 %v6483_v5  ;;  %v6649_v5 = vld [vmem:[#allocation2] sm:$0x1] }
 0x5b3   :  { %6617 = vmatpush.msra.mxu1 %v6498_v7  ;;  %6637 = vmatpush.msrb.mxu2 %v6514_v40  ;;  %v6829_v7 = vmov 0  }
 0x5b4   :  { %6597 = vmatpush.msra.mxu3 %v6482_v13  ;;  %6770 = vset.pattern.permute.xlu0 %v6829_v7 }
 0x5b5   :  { %6618 = vmatpush.msra.mxu1 %v6497_v36  ;;  %6638 = vmatpush.msrb.mxu2 %v6513_v23 }
 0x5b6   :  { %6598 = vmatpush.msra.mxu3 %v6481_v16  ;;  %6652 = vperm.xlu0 %6770, %v6649_v5  }
 0x5b7   :  { %6619 = vmatpush.msra.mxu1 %v6496_v51  ;;  %6639 = vmatpush.msrb.mxu2 %v6512_v57 }
 0x5b8   :  { %6599 = vmatpush.msra.mxu3 %v6480_v44 }
 0x5b9   :  { %6620 = vmatpush.msra.mxu1 %v6495_v24  ;;  %v6200_v38 = vpop.f32.mrf.mxu2  ;;  %6640 = vmatpush.msrb.mxu2 %v6511_v35 }
 0x5ba   :  { %6600 = vmatpush.msra.mxu3 %v6479_v47 }
 0x5bb   :  { %6621 = vmatpush.msra.mxu1 %v6494_v37  ;;  %6641 = vmatpush.msrb.mxu2 %v6510_v30 }
 0x5bc   :  { %6601 = vmatpush.msra.mxu3 %v6478_v2 }
 0x5bd   :  { %6622 = vmatpush.msra.mxu1 %v6493_v58  ;;  %v6160_v50 = vpop.f32.mrf.mxu3  ;;  %6642 = vmatpush.msrb.mxu2 %v6509_v43 }
 0x5be   :  { %6623 = vmatmul.f32.vlgmr.msra.gmra.mxu1 %v6427_v0  ;;  %6602 = vmatpush.msra.mxu3 %v6477_v21  ;;  %v6161_v45 = vadd.f32 %v6160_v50, %v4713_v18 }
 0x5bf   :  { %6603 = vmatmul.f32.vlgmr.msra.gmra.mxu3 %v6426_v33 }
 0x5c0   :  { %v6181_v11 = vadd.f32 %v6180_v31, %v6161_v45 }
 0x5c2   :  { %v6201_v10 = vadd.f32 %v6200_v38, %v6181_v11 }
 0x5c5   :  { %v6220_v61 = vpop.f32.mrf.mxu0 }
 0x5c6   :  { %v6221_v56 = vadd.f32 %v6220_v61, %v6201_v10 }
 0x5ce   :  { %v6260_v6 = vpop.f32.mrf.mxu1 }
 0x5db   :  { %v6280_v12 = vpop.f32.mrf.mxu2 }
 0x5df   :  { %v6240_v28 = vpop.f32.mrf.mxu3 }
 0x5e0   :  { %v6241_v14 = vadd.f32 %v6240_v28, %v6221_v56 }
 0x5e2   :  { %v6261_v39 = vadd.f32 %v6260_v6, %v6241_v14 }
 0x5e4   :  { %v6281_v52 = vadd.f32 %v6280_v12, %v6261_v39 }
 0x5e7   :  { %v6300_v32 = vpop.f32.mrf.mxu0 }
 0x5e8   :  { %v6301_v17 = vadd.f32 %v6300_v32, %v6281_v52 }
 0x5f0   :  { %v6340_v41 = vpop.f32.mrf.mxu1 }
 0x5fb   :  { %v6420_v34 = vpop.f32.mrf.mxu1 }
 0x5fd   :  { %v6360_v15 = vpop.f32.mrf.mxu2 }
 0x601   :  { %v6320_v54 = vpop.f32.mrf.mxu3 }
 0x602   :  { %v6321_v48 = vadd.f32 %v6320_v54, %v6301_v17 }
 0x604   :  { %v6341_v53 = vadd.f32 %v6340_v41, %v6321_v48 }
 0x606   :  { %v6361_v49 = vadd.f32 %v6360_v15, %v6341_v53 }
 0x60a   :  { %v6380_v19 = vpop.f32.mrf.mxu0 }
 0x60b   :  { %v6381_v20 = vadd.f32 %v6380_v19, %v6361_v49 }
 0x61a   :  { %v6544_v63 = vpop.f32.mrf.mxu1 }
 0x61b   :  { %v6545_v13 = vadd.f32 %v6771_v1, %v6544_v63 }
 0x61f   :  { %v6564_v8 = vpop.f32.mrf.mxu2 }
 0x620   :  { %v6565_v36 = vadd.f32 %v6564_v8, %v6545_v13 }
 0x622   :  { %v6400_v25 = vpop.f32.mrf.mxu3 }
 0x623   :  { %v6401_v4 = vadd.f32 %v6400_v25, %v6381_v20 }
 0x625   :  { %v6421_v46 = vadd.f32 %v6420_v34, %v6401_v4 }
 0x627   :  { %v6428_v42 = vmax.f32 %v6421_v46, 0.0 }
 0x628   :  { %v6653_v37 = vpop.permute.xlu0 %6652 }
 0x629   :  { %6763 = vmatmul.msk.f32.vlgmr.msrb.gmra.mxu2 %vm6523_vm3, %v6428_v42  ;;  %v6655_v26 = vperm.slane %v6653_v37, 0 }
 0x62b   :  { %v6584_v29 = vpop.f32.mrf.mxu0 }
 0x62c   :  { %v6585_v9 = vadd.f32 %v6584_v29, %v6565_v36 }
 0x63b   :  { %v6624_v59 = vpop.f32.mrf.mxu1 }
 0x642   :  { %v6604_v16 = vpop.f32.mrf.mxu3 }
 0x643   :  { %v6605_v51 = vadd.f32 %v6604_v16, %v6585_v9 }
 0x645   :  { %v6625_v44 = vadd.f32 %v6624_v59, %v6605_v51 }
 0x6ac   :  { %v6644_v24 = vpop.f32.mrf.mxu2 }
 0x6ad   :  { %v6645_v55 = vadd.f32 %v6644_v24, %v6625_v44 }
 0x6af   :  { %v6647_v47 = vmax.f32 %v6645_v55, 0.0 }
 0x6b1   :  { %6764 = vmatpush.xpose.msk.msra.mxu0 %vm6656_vm4, %v6647_v47 }
 0x6b4   :  { %6765 = vmatmul.msk.f32.vlgmr.msra.gmra.mxu0 %vm6656_vm4, %v6648_v3 }
 0x731   :  { %v6680_v2 = vpop.f32.mrf.mxu0 }
 0x732   :  { %v6681_v58 = vadd.f32 %v6680_v2, %v6655_v26 }
 0x734   :  { %v6766_v21 = vmul.f32 -1.442695, %v6681_v58  ;;  %6704 = vst.msk [vmem:[#allocation5] sm:$0x1] %vm6702_vm5, %v6681_v58 }
 0x735   :  { %6726 = dma.vmem_to_hbm [thread:$0]  %s6722_s29, 16, %s6724_s12, [#allocation6]  }
 0x736   :  { %6772 = vpow2.f32 %v6766_v21 }
 0x73c   :  { %v6773_v0 = vpop.eup %6772 }
 0x73d   :  { %v6686_v33 = vadd.f32 1.0, %v6773_v0 }
 0x73f   :  { %6774 = vrcp.f32 %v6686_v33  ;;  %v6698_v22 = vand.u32 2147483648, %v6686_v33  ;;  %v6696_v50 = vand.u32 2147483647, %v6686_v33  ;;  %vm6692_vm7 = vweird.f32 %v6686_v33 }
 0x741   :  { %v6699_v45 = vor.u32 1.1754944e-38, %v6698_v22  ;;  %vm6697_vm9 = vcmp.eq.f32.partialorder %v6696_v50, 8.507059e+37 }
 0x745   :  { %v6775_v27 = vpop.eup %6774 }
 0x746   :  { %v6688_v62 = vmul.f32 %v6775_v27, %v6686_v33  ;;  %vm6693_vm6 = vweird.f32 %v6775_v27 }
 0x747   :  { %vm6694_vm8 = vmor %vm6692_vm7, %vm6693_vm6 }
 0x748   :  { %v6689_v18 = vsub.f32 1.0, %v6688_v62 }
 0x74a   :  { %v6690_v60 = vmul.f32 %v6775_v27, %v6689_v18 }
 0x74c   :  { %v6691_v40 = vadd.f32 %v6775_v27, %v6690_v60 }
 0x74e   :  { %v6695_v23 = vsel %vm6694_vm8, %v6775_v27, %v6691_v40 }
 0x74f   :  { %v6700_v31 = vsel %vm6697_vm9, %v6699_v45, %v6695_v23 }
 0x750   :  { %6703 = vst.msk [vmem:[#allocation3] sm:$0x1] %vm6702_vm5, %v6700_v31 }
 0x751   :  { %6715 = dma.vmem_to_hbm [thread:$0]  %s6711_s10, 16, %s6713_s4, [#allocation4]  }
 0x752   :  { %6825 = dma.done.wait [#allocation4], 16  }
 0x753   :  { %6826 = vsyncadd [#allocation4], 4294967280 }
 0x754   :  { %6827 = dma.done.wait [#allocation6], 16  }
 0x755   :  { %6828 = vsyncadd [#allocation6], 4294967280 }
 0x756   :  { %6735 = vsyncpa [#allocation4], 1 }
 0x757   :  { %6736 = vsyncpa [#allocation6], 1 }

</bundles_post_ra>
